<compile_context>
chip_gen: v7x
topology: tpu7x:2x2x1
jax: 0.10.0
libtpu: 0.0.40
codegen_flags: <defaults>
</compile_context>

<pallas_src>
import jax
import jax.numpy as jnp
from jax.experimental import pallas as pl
from jax.experimental.pallas import tpu as pltpu


# Stand-in for the original [1199882, 10000, 1000, 256, 128, 64] widths.
ENC_DIMS = [1024, 512, 256, 128, 64, 32]
BATCH = 256          # >= 128/256 rows keeps the MXU busy (perf review)
TILE_M = 128         # rows per grid step; "parallel" axis -> 2 TCs on v7x
LANE = 128


def layer_dims():
    enc = list(zip(ENC_DIMS[:-1], ENC_DIMS[1:]))          # encoder: 5 layers
    dec = [(o, i) for (i, o) in reversed(enc)]            # decoder: mirror
    return enc + dec                                      # 10 (d_in, d_out)


def _pad(d):
    return max(LANE, ((d + LANE - 1) // LANE) * LANE)


LAYERS = layer_dims()                                     # logical dims
PADDED = [(_pad(i), _pad(o)) for (i, o) in LAYERS]        # MXU-friendly dims
TOTAL_N_PAD = sum(n for (_, n) in PADDED)                 # packed bias width

# Group layers into weight slabs by padded output width (zero-waste packing).
SLAB_WIDTHS = sorted({n for (_, n) in PADDED})            # e.g. [128,256,512,1024]


def _build_plan():
    heights = {w: 0 for w in SLAB_WIDTHS}
    plan = []
    for (kp, np_) in PADDED:
        s = SLAB_WIDTHS.index(np_)
        plan.append((s, heights[np_]))                    # (slab idx, row offset)
        heights[np_] += kp
    shapes = [(heights[w], w) for w in SLAB_WIDTHS]
    return plan, shapes


PLAN, SLAB_SHAPES = _build_plan()
N_SLABS = len(SLAB_SHAPES)


# ---------------------------------------------------------------------------
# Fused 10-layer MLP kernel.  All weights/biases VMEM-resident; activations
# carried in bf16; bias + ReLU / final sigmoid fused in f32 after each dot.
# refs = (x_ref, wslab_0 .. wslab_{N_SLABS-1}, b_ref, o_ref)
# ---------------------------------------------------------------------------
def _fused_mlp_kernel(*refs):
    x_ref = refs[0]
    slab_refs = refs[1:1 + N_SLABS]
    b_ref = refs[1 + N_SLABS]
    o_ref = refs[-1]

    n_layers = len(LAYERS)
    h = x_ref[...]                                        # (tm, D0) bf16
    col = 0
    for i in range(n_layers):                             # unrolled at trace time
        kp, np_ = PADDED[i]
        s, row = PLAN[i]
        w = slab_refs[s][row:row + kp, :]                 # (kp, np_) bf16, aligned
        b = b_ref[:, col:col + np_]                       # (1, np_) f32, aligned
        # bf16 x bf16 MXU matmul with f32 accumulation; f32 epilogue.
        y = jnp.dot(h, w, preferred_element_type=jnp.float32) + b
        if i == n_layers - 1:
            o_ref[...] = jax.nn.sigmoid(y).astype(o_ref.dtype)
        else:
            h = jnp.maximum(y, 0.0).astype(jnp.bfloat16)  # bf16 between layers
        col += np_


# ---------------------------------------------------------------------------
# Parameter packing: coalesce 20 tensors into 4 weight slabs + 1 bias row.
# ---------------------------------------------------------------------------
def pack_params(params):
    slabs = [jnp.zeros(shape, jnp.bfloat16) for shape in SLAB_SHAPES]
    bias = jnp.zeros((1, TOTAL_N_PAD), jnp.float32)
    col = 0
    for i, (w, b) in enumerate(params):
        d_in, d_out = w.shape
        kp, np_ = PADDED[i]
        s, row = PLAN[i]
        slabs[s] = slabs[s].at[row:row + d_in, :d_out].set(w.astype(jnp.bfloat16))
        bias = bias.at[:, col:col + d_out].set(b.astype(jnp.float32))
        col += np_
    return slabs, bias


def denoising_model_forward(x, packed, *, tm=TILE_M):
    """Full forward pass (encoder + decoder) in a single fused Pallas kernel."""
    slabs, bias = packed
    M, D = x.shape
    assert M % tm == 0, "batch must be a multiple of the M tile"
    x_bf16 = x.astype(jnp.bfloat16)

    x_spec = pl.BlockSpec((tm, D), lambda i: (i, 0))
    w_specs = [pl.BlockSpec(shape, lambda i: (0, 0)) for shape in SLAB_SHAPES]
    b_spec = pl.BlockSpec((1, TOTAL_N_PAD), lambda i: (0, 0))
    o_spec = pl.BlockSpec((tm, D), lambda i: (i, 0))

    return pl.pallas_call(
        _fused_mlp_kernel,
        out_shape=jax.ShapeDtypeStruct((M, D), jnp.float32),
        grid_spec=pltpu.PrefetchScalarGridSpec(
            num_scalar_prefetch=0,
            grid=(M // tm,),
            in_specs=[x_spec] + w_specs + [b_spec],
            out_specs=o_spec,
        ),
        compiler_params=pltpu.CompilerParams(
            dimension_semantics=("parallel",),
            vmem_limit_bytes=32 * 1024 * 1024,
        ),
    )(x_bf16, *slabs, bias)


# ---------------------------------------------------------------------------
# Parameter init (torch.nn.Linear-style U[-1/sqrt(fan_in), +]) and reference.
# ---------------------------------------------------------------------------
def init_params(key):
    params = []
    for (d_in, d_out) in LAYERS:
        key, kw, kb = jax.random.split(key, 3)
        bound = 1.0 / jnp.sqrt(jnp.float32(d_in))
        w = jax.random.uniform(kw, (d_in, d_out), jnp.float32, -bound, bound)
        w = w.astype(jnp.bfloat16)             # halve weight bytes (HBM + VMEM)
        b = jax.random.uniform(kb, (1, d_out), jnp.float32, -bound, bound)
        params.append((w, b))
    return params


def reference_forward(x, params):
    """Plain-JAX reference with the same numerics (bf16 dots/acts, f32 accum)."""
    h = x.astype(jnp.bfloat16)
    n_layers = len(params)
    for i, (w, b) in enumerate(params):
        y = jnp.dot(h, w, preferred_element_type=jnp.float32) + b
        if i == n_layers - 1:
            h = jax.nn.sigmoid(y)
        else:
            h = jnp.maximum(y, 0.0).astype(jnp.bfloat16)
    return h


if __name__ == "__main__":
    key = jax.random.PRNGKey(0)
    k_in, k_params = jax.random.split(key)

    x = jax.random.uniform(k_in, (BATCH, ENC_DIMS[0]), jnp.float32)
    params = init_params(k_params)
    packed = pack_params(params)               # pack once; reused across calls

    out = denoising_model_forward(x, packed)
    out = jax.block_until_ready(out)

    ref = reference_forward(x, params)
    assert out.shape == (BATCH, ENC_DIMS[0])
    assert jnp.allclose(out, ref, rtol=5e-3, atol=5e-3)

    print("KERNEL_OK")
</pallas_src>

<mosaic_0001>
module attributes {stable_mosaic.version = 11 : i64} {
  func.func @_fused_mlp_kernel(%arg0: i32, %arg1: memref<128x1024xbf16, #tpu.memory_space<vmem>>, %arg2: memref<768x128xbf16, #tpu.memory_space<vmem>>, %arg3: memref<640x256xbf16, #tpu.memory_space<vmem>>, %arg4: memref<1280x512xbf16, #tpu.memory_space<vmem>>, %arg5: memref<512x1024xbf16, #tpu.memory_space<vmem>>, %arg6: memref<1x3200xf32, #tpu.memory_space<vmem>>, %arg7: memref<128x1024xf32, #tpu.memory_space<vmem>>) attributes {dimension_semantics = [#tpu.dimension_semantics<parallel>], iteration_bounds = array<i64: 2>, scalar_prefetch = 0 : i64, scratch_operands = 0 : i64, tpu.core_type = #tpu.core_type<tc>, window_params = [{transform_indices = @transform_0, window_bounds = array<i64: 128, 1024>}, {pipeline_mode = #tpu.pipeline_mode<synchronous>, transform_indices = @transform_1, window_bounds = array<i64: 768, 128>}, {pipeline_mode = #tpu.pipeline_mode<synchronous>, transform_indices = @transform_2, window_bounds = array<i64: 640, 256>}, {pipeline_mode = #tpu.pipeline_mode<synchronous>, transform_indices = @transform_3, window_bounds = array<i64: 1280, 512>}, {pipeline_mode = #tpu.pipeline_mode<synchronous>, transform_indices = @transform_4, window_bounds = array<i64: 512, 1024>}, {pipeline_mode = #tpu.pipeline_mode<synchronous>, transform_indices = @transform_5, window_bounds = array<i64: 1, 3200>}, {transform_indices = @transform_6, window_bounds = array<i64: 128, 1024>}]} {
    %c0 = arith.constant 0 : index
    %c0_0 = arith.constant 0 : index
    %0 = vector.load %arg1[%c0, %c0_0] : memref<128x1024xbf16, #tpu.memory_space<vmem>>, vector<128x1024xbf16>
    %c0_1 = arith.constant 0 : index
    %c0_2 = arith.constant 0 : index
    %1 = vector.load %arg4[%c0_1, %c0_2] : memref<1280x512xbf16, #tpu.memory_space<vmem>>, vector<1024x512xbf16>
    %c0_3 = arith.constant 0 : index
    %c0_4 = arith.constant 0 : index
    %2 = vector.load %arg6[%c0_3, %c0_4] : memref<1x3200xf32, #tpu.memory_space<vmem>>, vector<1x512xf32>
    %cst = arith.constant dense<0.000000e+00> : vector<128x512xf32>
    %3 = tpu.matmul %0, %1, %cst {dimension_numbers = #tpu.dot_dimension_numbers<[1], [0], [0], [1], [0, 0, 1, 1], [], []>} : vector<128x1024xbf16>, vector<1024x512xbf16>, vector<128x512xf32> -> vector<128x512xf32>
    %4 = vector.broadcast %2 : vector<1x512xf32> to vector<128x512xf32>
    %5 = arith.addf %3, %4 : vector<128x512xf32>
    %cst_5 = arith.constant 0.000000e+00 : f32
    %6 = vector.broadcast %cst_5 : f32 to vector<128x512xf32>
    %7 = arith.maximumf %5, %6 : vector<128x512xf32>
    %8 = arith.truncf %7 : vector<128x512xf32> to vector<128x512xbf16>
    %c0_6 = arith.constant 0 : index
    %c0_7 = arith.constant 0 : index
    %9 = vector.load %arg3[%c0_6, %c0_7] : memref<640x256xbf16, #tpu.memory_space<vmem>>, vector<512x256xbf16>
    %c0_8 = arith.constant 0 : index
    %c512 = arith.constant 512 : index
    %10 = vector.load %arg6[%c0_8, %c512] : memref<1x3200xf32, #tpu.memory_space<vmem>>, vector<1x256xf32>
    %cst_9 = arith.constant dense<0.000000e+00> : vector<128x256xf32>
    %11 = tpu.matmul %8, %9, %cst_9 {dimension_numbers = #tpu.dot_dimension_numbers<[1], [0], [0], [1], [0, 0, 1, 1], [], []>} : vector<128x512xbf16>, vector<512x256xbf16>, vector<128x256xf32> -> vector<128x256xf32>
    %12 = vector.broadcast %10 : vector<1x256xf32> to vector<128x256xf32>
    %13 = arith.addf %11, %12 : vector<128x256xf32>
    %cst_10 = arith.constant 0.000000e+00 : f32
    %14 = vector.broadcast %cst_10 : f32 to vector<128x256xf32>
    %15 = arith.maximumf %13, %14 : vector<128x256xf32>
    %16 = arith.truncf %15 : vector<128x256xf32> to vector<128x256xbf16>
    %c0_11 = arith.constant 0 : index
    %c0_12 = arith.constant 0 : index
    %17 = vector.load %arg2[%c0_11, %c0_12] : memref<768x128xbf16, #tpu.memory_space<vmem>>, vector<256x128xbf16>
    %c0_13 = arith.constant 0 : index
    %c768 = arith.constant 768 : index
    %18 = vector.load %arg6[%c0_13, %c768] : memref<1x3200xf32, #tpu.memory_space<vmem>>, vector<1x128xf32>
    %cst_14 = arith.constant dense<0.000000e+00> : vector<128x128xf32>
    %19 = tpu.matmul %16, %17, %cst_14 {dimension_numbers = #tpu.dot_dimension_numbers<[1], [0], [0], [1], [0, 0, 1, 1], [], []>} : vector<128x256xbf16>, vector<256x128xbf16>, vector<128x128xf32> -> vector<128x128xf32>
    %20 = vector.broadcast %18 : vector<1x128xf32> to vector<128x128xf32>
    %21 = arith.addf %19, %20 : vector<128x128xf32>
    %cst_15 = arith.constant 0.000000e+00 : f32
    %22 = vector.broadcast %cst_15 : f32 to vector<128x128xf32>
    %23 = arith.maximumf %21, %22 : vector<128x128xf32>
    %24 = arith.truncf %23 : vector<128x128xf32> to vector<128x128xbf16>
    %c256 = arith.constant 256 : index
    %c0_16 = arith.constant 0 : index
    %25 = vector.load %arg2[%c256, %c0_16] : memref<768x128xbf16, #tpu.memory_space<vmem>>, vector<128x128xbf16>
    %c0_17 = arith.constant 0 : index
    %c896 = arith.constant 896 : index
    %26 = vector.load %arg6[%c0_17, %c896] : memref<1x3200xf32, #tpu.memory_space<vmem>>, vector<1x128xf32>
    %cst_18 = arith.constant dense<0.000000e+00> : vector<128x128xf32>
    %27 = tpu.matmul %24, %25, %cst_18 {dimension_numbers = #tpu.dot_dimension_numbers<[1], [0], [0], [1], [0, 0, 1, 1], [], []>} : vector<128x128xbf16>, vector<128x128xbf16>, vector<128x128xf32> -> vector<128x128xf32>
    %28 = vector.broadcast %26 : vector<1x128xf32> to vector<128x128xf32>
    %29 = arith.addf %27, %28 : vector<128x128xf32>
    %cst_19 = arith.constant 0.000000e+00 : f32
    %30 = vector.broadcast %cst_19 : f32 to vector<128x128xf32>
    %31 = arith.maximumf %29, %30 : vector<128x128xf32>
    %32 = arith.truncf %31 : vector<128x128xf32> to vector<128x128xbf16>
    %c384 = arith.constant 384 : index
    %c0_20 = arith.constant 0 : index
    %33 = vector.load %arg2[%c384, %c0_20] : memref<768x128xbf16, #tpu.memory_space<vmem>>, vector<128x128xbf16>
    %c0_21 = arith.constant 0 : index
    %c1024 = arith.constant 1024 : index
    %34 = vector.load %arg6[%c0_21, %c1024] : memref<1x3200xf32, #tpu.memory_space<vmem>>, vector<1x128xf32>
    %cst_22 = arith.constant dense<0.000000e+00> : vector<128x128xf32>
    %35 = tpu.matmul %32, %33, %cst_22 {dimension_numbers = #tpu.dot_dimension_numbers<[1], [0], [0], [1], [0, 0, 1, 1], [], []>} : vector<128x128xbf16>, vector<128x128xbf16>, vector<128x128xf32> -> vector<128x128xf32>
    %36 = vector.broadcast %34 : vector<1x128xf32> to vector<128x128xf32>
    %37 = arith.addf %35, %36 : vector<128x128xf32>
    %cst_23 = arith.constant 0.000000e+00 : f32
    %38 = vector.broadcast %cst_23 : f32 to vector<128x128xf32>
    %39 = arith.maximumf %37, %38 : vector<128x128xf32>
    %40 = arith.truncf %39 : vector<128x128xf32> to vector<128x128xbf16>
    %c512_24 = arith.constant 512 : index
    %c0_25 = arith.constant 0 : index
    %41 = vector.load %arg2[%c512_24, %c0_25] : memref<768x128xbf16, #tpu.memory_space<vmem>>, vector<128x128xbf16>
    %c0_26 = arith.constant 0 : index
    %c1152 = arith.constant 1152 : index
    %42 = vector.load %arg6[%c0_26, %c1152] : memref<1x3200xf32, #tpu.memory_space<vmem>>, vector<1x128xf32>
    %cst_27 = arith.constant dense<0.000000e+00> : vector<128x128xf32>
    %43 = tpu.matmul %40, %41, %cst_27 {dimension_numbers = #tpu.dot_dimension_numbers<[1], [0], [0], [1], [0, 0, 1, 1], [], []>} : vector<128x128xbf16>, vector<128x128xbf16>, vector<128x128xf32> -> vector<128x128xf32>
    %44 = vector.broadcast %42 : vector<1x128xf32> to vector<128x128xf32>
    %45 = arith.addf %43, %44 : vector<128x128xf32>
    %cst_28 = arith.constant 0.000000e+00 : f32
    %46 = vector.broadcast %cst_28 : f32 to vector<128x128xf32>
    %47 = arith.maximumf %45, %46 : vector<128x128xf32>
    %48 = arith.truncf %47 : vector<128x128xf32> to vector<128x128xbf16>
    %c640 = arith.constant 640 : index
    %c0_29 = arith.constant 0 : index
    %49 = vector.load %arg2[%c640, %c0_29] : memref<768x128xbf16, #tpu.memory_space<vmem>>, vector<128x128xbf16>
    %c0_30 = arith.constant 0 : index
    %c1280 = arith.constant 1280 : index
    %50 = vector.load %arg6[%c0_30, %c1280] : memref<1x3200xf32, #tpu.memory_space<vmem>>, vector<1x128xf32>
    %cst_31 = arith.constant dense<0.000000e+00> : vector<128x128xf32>
    %51 = tpu.matmul %48, %49, %cst_31 {dimension_numbers = #tpu.dot_dimension_numbers<[1], [0], [0], [1], [0, 0, 1, 1], [], []>} : vector<128x128xbf16>, vector<128x128xbf16>, vector<128x128xf32> -> vector<128x128xf32>
    %52 = vector.broadcast %50 : vector<1x128xf32> to vector<128x128xf32>
    %53 = arith.addf %51, %52 : vector<128x128xf32>
    %cst_32 = arith.constant 0.000000e+00 : f32
    %54 = vector.broadcast %cst_32 : f32 to vector<128x128xf32>
    %55 = arith.maximumf %53, %54 : vector<128x128xf32>
    %56 = arith.truncf %55 : vector<128x128xf32> to vector<128x128xbf16>
    %c512_33 = arith.constant 512 : index
    %c0_34 = arith.constant 0 : index
    %57 = vector.load %arg3[%c512_33, %c0_34] : memref<640x256xbf16, #tpu.memory_space<vmem>>, vector<128x256xbf16>
    %c0_35 = arith.constant 0 : index
    %c1408 = arith.constant 1408 : index
    %58 = vector.load %arg6[%c0_35, %c1408] : memref<1x3200xf32, #tpu.memory_space<vmem>>, vector<1x256xf32>
    %cst_36 = arith.constant dense<0.000000e+00> : vector<128x256xf32>
    %59 = tpu.matmul %56, %57, %cst_36 {dimension_numbers = #tpu.dot_dimension_numbers<[1], [0], [0], [1], [0, 0, 1, 1], [], []>} : vector<128x128xbf16>, vector<128x256xbf16>, vector<128x256xf32> -> vector<128x256xf32>
    %60 = vector.broadcast %58 : vector<1x256xf32> to vector<128x256xf32>
    %61 = arith.addf %59, %60 : vector<128x256xf32>
    %cst_37 = arith.constant 0.000000e+00 : f32
    %62 = vector.broadcast %cst_37 : f32 to vector<128x256xf32>
    %63 = arith.maximumf %61, %62 : vector<128x256xf32>
    %64 = arith.truncf %63 : vector<128x256xf32> to vector<128x256xbf16>
    %c1024_38 = arith.constant 1024 : index
    %c0_39 = arith.constant 0 : index
    %65 = vector.load %arg4[%c1024_38, %c0_39] : memref<1280x512xbf16, #tpu.memory_space<vmem>>, vector<256x512xbf16>
    %c0_40 = arith.constant 0 : index
    %c1664 = arith.constant 1664 : index
    %66 = vector.load %arg6[%c0_40, %c1664] : memref<1x3200xf32, #tpu.memory_space<vmem>>, vector<1x512xf32>
    %cst_41 = arith.constant dense<0.000000e+00> : vector<128x512xf32>
    %67 = tpu.matmul %64, %65, %cst_41 {dimension_numbers = #tpu.dot_dimension_numbers<[1], [0], [0], [1], [0, 0, 1, 1], [], []>} : vector<128x256xbf16>, vector<256x512xbf16>, vector<128x512xf32> -> vector<128x512xf32>
    %68 = vector.broadcast %66 : vector<1x512xf32> to vector<128x512xf32>
    %69 = arith.addf %67, %68 : vector<128x512xf32>
    %cst_42 = arith.constant 0.000000e+00 : f32
    %70 = vector.broadcast %cst_42 : f32 to vector<128x512xf32>
    %71 = arith.maximumf %69, %70 : vector<128x512xf32>
    %72 = arith.truncf %71 : vector<128x512xf32> to vector<128x512xbf16>
    %c0_43 = arith.constant 0 : index
    %c0_44 = arith.constant 0 : index
    %73 = vector.load %arg5[%c0_43, %c0_44] : memref<512x1024xbf16, #tpu.memory_space<vmem>>, vector<512x1024xbf16>
    %c0_45 = arith.constant 0 : index
    %c2176 = arith.constant 2176 : index
    %74 = vector.load %arg6[%c0_45, %c2176] : memref<1x3200xf32, #tpu.memory_space<vmem>>, vector<1x1024xf32>
    %cst_46 = arith.constant dense<0.000000e+00> : vector<128x1024xf32>
    %75 = tpu.matmul %72, %73, %cst_46 {dimension_numbers = #tpu.dot_dimension_numbers<[1], [0], [0], [1], [0, 0, 1, 1], [], []>} : vector<128x512xbf16>, vector<512x1024xbf16>, vector<128x1024xf32> -> vector<128x1024xf32>
    %76 = vector.broadcast %74 : vector<1x1024xf32> to vector<128x1024xf32>
    %77 = arith.addf %75, %76 : vector<128x1024xf32>
    %78 = arith.negf %77 : vector<128x1024xf32>
    %79 = math.exp %78 : vector<128x1024xf32>
    %cst_47 = arith.constant 1.000000e+00 : f32
    %80 = vector.broadcast %cst_47 : f32 to vector<128x1024xf32>
    %81 = arith.addf %80, %79 : vector<128x1024xf32>
    %82 = arith.divf %80, %81 : vector<128x1024xf32>
    %c0_48 = arith.constant 0 : index
    %c0_49 = arith.constant 0 : index
    %83 = vector.load %arg7[%c0_48, %c0_49] : memref<128x1024xf32, #tpu.memory_space<vmem>>, vector<128x1024xf32>
    tpu.vector_store %arg7[%c0_48, %c0_49], %82 {strides = array<i32>} : memref<128x1024xf32, #tpu.memory_space<vmem>>, vector<128x1024xf32>,
    return
  }
  func.func @transform_0(%arg0: i32) -> (i32, i32) {
    %c0_i32 = arith.constant 0 : i32
    %c0_i32_0 = arith.constant 0 : i32
    return %arg0, %c0_i32 : i32, i32
  }
  func.func @transform_1(%arg0: i32) -> (i32, i32) {
    %c0_i32 = arith.constant 0 : i32
    %c0_i32_0 = arith.constant 0 : i32
    %c0_i32_1 = arith.constant 0 : i32
    return %c0_i32, %c0_i32_0 : i32, i32
  }
  func.func @transform_2(%arg0: i32) -> (i32, i32) {
    %c0_i32 = arith.constant 0 : i32
    %c0_i32_0 = arith.constant 0 : i32
    %c0_i32_1 = arith.constant 0 : i32
    return %c0_i32, %c0_i32_0 : i32, i32
  }
  func.func @transform_3(%arg0: i32) -> (i32, i32) {
    %c0_i32 = arith.constant 0 : i32
    %c0_i32_0 = arith.constant 0 : i32
    %c0_i32_1 = arith.constant 0 : i32
    return %c0_i32, %c0_i32_0 : i32, i32
  }
  func.func @transform_4(%arg0: i32) -> (i32, i32) {
    %c0_i32 = arith.constant 0 : i32
    %c0_i32_0 = arith.constant 0 : i32
    %c0_i32_1 = arith.constant 0 : i32
    return %c0_i32, %c0_i32_0 : i32, i32
  }
  func.func @transform_5(%arg0: i32) -> (i32, i32) {
    %c0_i32 = arith.constant 0 : i32
    %c0_i32_0 = arith.constant 0 : i32
    %c0_i32_1 = arith.constant 0 : i32
    return %c0_i32, %c0_i32_0 : i32, i32
  }
  func.func @transform_6(%arg0: i32) -> (i32, i32) {
    %c0_i32 = arith.constant 0 : i32
    %c0_i32_0 = arith.constant 0 : i32
    return %arg0, %c0_i32 : i32, i32
  }
}

</mosaic_0001>

<bundles_post_ra>
// kernel: tpu_custom_call.1
= control target key start
LH: loop header
LB: loop body
LE: loop exit
PB: predicated region body
PF: predicated region fallthrough
CT: control target
= control target key end

     0   :  { %11 = vsyncpa [#allocation3], 0  ;;  %s14723_s0 = inlined_call_operand.hbm [shape: bf16[256,1024], index: 0, kind: input, shape index: {}]   ;;  %s14724_s1 = inlined_call_operand.hbm [shape: bf16[768,128], index: 1, kind: input, shape index: {}]   ;;  %s14725_s2 = inlined_call_operand.hbm [shape: bf16[640,256], index: 2, kind: input, shape index: {}]   ;;  %s14726_s3 = inlined_call_operand.hbm [shape: bf16[1280,512], index: 3, kind: input, shape index: {}]   ;;  %s14727_s4 = inlined_call_operand.hbm [shape: bf16[512,1024], index: 4, kind: input, shape index: {}]   ;;  %s14728_s5 = inlined_call_operand.hbm [shape: f32[1,3200], index: 5, kind: input, shape index: {}]   ;;  %s14729_s6 = inlined_call_operand.hbm [shape: f32[256,1024], index: 6, kind: output, shape index: {}]  }
   0x1   :  { %13 = vsyncpa [#allocation3 + $0x1], 0 }
   0x2   :  { %14 = vsyncpa [#allocation6], 0 }
   0x3   :  { %15 = vsyncpa [#allocation9], 0 }
   0x4   :  { %16 = vsyncpa [#allocation12], 0 }
   0x5   :  { %17 = vsyncpa [#allocation4], 0 }
   0x6   :  { %19 = vsyncpa [#allocation4 + $0x1], 0  ;;  %s12859_s21 = smov 0   ;;  %s12861_s22 = smov 0  }
   0x7   :  { %s12863_s23 = smov 0   ;;  %s12865_s24 = smov 0  }
   0x8 LB: > { %s12806_s25 = smov [#allocation5]   ;;  %s12880_s27 = sadd.s32 4294967295, %s12804_s24   ;;  %s12804_s24 = sphi %s12865_s24, %s14770_s24   ;;  %s12800_s23 = sphi %s12863_s23, %s14769_s23   ;;  %s12796_s22 = sphi %s12861_s22, %s14768_s22   ;;  %s12792_s21 = sphi %s12859_s21, %s14767_s21  }
   0x9   : > { %s199_s26 = sshll.u32 %s12806_s25, 4  ;;  %p9493_p0 = scmp.ge.s32.totalorder %s12804_s24, 1  ;;  %s12885_s26 = int_to_ptr.vmem [resolvable:$true] %s199_s26 }
   0xa   : > { %p14730_p1 = scmp.eq.s32.totalorder %s12880_s27, 0  ;;  %p187_p2 = scmp.lt.s32.totalorder %s12804_s24, 3 }
   0xb   : > { %s12807_s29 = smov [#allocation8]   ;;  %s12808_s8 = smov [#allocation7]  }
   0xc   : > { %p12887_p3 = pnand %p9493_p0, %p187_p2  ;;  %s225_s30 = sshll.u32 %s12807_s29, 4  ;;  %s12900_s30 = int_to_ptr.vmem [resolvable:$true] %s225_s30 }
   0xd   : > { %s12902_s9 = sshll.u32 %s12808_s8, 4  ;;  %s12556_s12 = scalar_lea.hbm %s14724_s1, 6144  ;;  %s213_s9 = int_to_ptr.vmem [resolvable:$true] %s12902_s9 }
   0xe   : > { %s14739_s28 = scalar_select %p12887_p3, 1, 0 }
   0xf   : > { %p11311_p5 = pneg %p12887_p3  ;;  %p12557_p7 = scmp.ne.s32.totalorder %s14724_s1, %s12556_s12 }
  0x10   : > { %p12563_p11 = scmp.lt.u32.totalorder %s12556_s12, %s14724_s1 }
  0x11   : > { %p12896_p6 = pnand %p11311_p5, %p14730_p1 }
  0x13   : > { %p12912_p8 = pneg %p12896_p6 }
  0x15   : > { %p12559_p9 = pnand %p12912_p8, %p12557_p7 }
  0x17   : > { %p12560_p10 = pneg %p12559_p9 }
  0x19   : > { %p12565_p12 = pnand %p12563_p11, %p12560_p10 }
  0x1b   : > { %12568 = shalt.err (!%p12565_p12)
}
  0x1c   : > { %s12569_s18 = scalar_lea.vmem %s12885_s26, 6144  ;;  %p12577_p5 = scmp.lt.s32.totalorder %s12885_s26, %s12885_s26 }
  0x1d   : > { %p12570_p13 = scmp.ne.s32.totalorder %s12885_s26, %s12569_s18  ;;  %p12578_p4 = scmp.lt.s32.totalorder %s12569_s18, %s12569_s18 }
  0x1f   : > { %p12572_p0 = pnand %p12570_p13, %p12912_p8  ;;  %p12579_p7 = por %p12578_p4, %p12577_p5 }
  0x21   : > { %p12573_p2 = pneg %p12572_p0 }
  0x23   : > { %p12580_p9 = pnand %p12579_p7, %p12573_p2 }
  0x25   : > { %12583 = shalt.err (!%p12580_p9)
}
  0x26   : > { %s12809_s19 = smov 64   ;;  %s12810_s20 = smov 4  }
  0x27   : > { %11314 = dma.hbm_to_vmem [thread:$0]  (!%p12896_p6), %s14724_s1, 6144, %s12885_s26, [#allocation6], %s12809_s19, %s12809_s19, %s12810_s20  }
  0x28   : > { %s12584_s11 = scalar_lea.hbm %s14726_s3, 40960 }
  0x29   : > { %p12585_p4 = scmp.ne.s32.totalorder %s14726_s3, %s12584_s11  ;;  %p12591_p12 = scmp.lt.u32.totalorder %s12584_s11, %s14726_s3 }
  0x2b   : > { %p12587_p10 = pnand %p12585_p4, %p12912_p8 }
  0x2d   : > { %p12588_p11 = pneg %p12587_p10 }
  0x2f   : > { %p12593_p13 = pnand %p12591_p12, %p12588_p11 }
  0x31   : > { %12596 = shalt.err (!%p12593_p13)
}
  0x32   : > { %s12597_s26 = scalar_lea.vmem %s12900_s30, 40960  ;;  %p12605_p7 = scmp.lt.s32.totalorder %s12900_s30, %s12900_s30 }
  0x33   : > { %p12598_p0 = scmp.ne.s32.totalorder %s12900_s30, %s12597_s26  ;;  %p12606_p9 = scmp.lt.s32.totalorder %s12597_s26, %s12597_s26 }
  0x35   : > { %p12600_p2 = pnand %p12598_p0, %p12912_p8  ;;  %p12607_p4 = por %p12606_p9, %p12605_p7 }
  0x37   : > { %p12601_p5 = pneg %p12600_p2 }
  0x39   : > { %p12608_p10 = pnand %p12607_p4, %p12601_p5 }
  0x3b   : > { %12611 = shalt.err (!%p12608_p10)
}
  0x3c   : > { %s12811_s17 = smov 256   ;;  %s12812_s18 = smov 16  }
  0x3d   : > { %11320 = dma.hbm_to_vmem [thread:$0]  (!%p12896_p6), %s14726_s3, 40960, %s12900_s30, [#allocation9], %s12811_s17, %s12811_s17, %s12812_s18  }
  0x3e   : > { %s12612_s8 = scalar_lea.hbm %s14725_s2, 10240 }
  0x3f   : > { %p12613_p11 = scmp.ne.s32.totalorder %s14725_s2, %s12612_s8  ;;  %p12619_p0 = scmp.lt.u32.totalorder %s12612_s8, %s14725_s2 }
  0x41   : > { %p12615_p12 = pnand %p12613_p11, %p12912_p8 }
  0x43   : > { %p12616_p13 = pneg %p12615_p12 }
  0x45   : > { %p12621_p2 = pnand %p12619_p0, %p12616_p13 }
  0x47   : > { %12624 = shalt.err (!%p12621_p2)
}
  0x48   : > { %s12625_s14 = scalar_lea.vmem %s213_s9, 10240  ;;  %p12633_p4 = scmp.lt.s32.totalorder %s213_s9, %s213_s9 }
  0x49   : > { %p12626_p5 = scmp.ne.s32.totalorder %s213_s9, %s12625_s14  ;;  %p12634_p10 = scmp.lt.s32.totalorder %s12625_s14, %s12625_s14 }
  0x4b   : > { %p12628_p7 = pnand %p12626_p5, %p12912_p8  ;;  %p12635_p1 = por %p12634_p10, %p12633_p4 }
  0x4d   : > { %p12629_p9 = pneg %p12628_p7 }
  0x4f   : > { %p12636_p3 = pnand %p12635_p1, %p12629_p9 }
  0x51   : > { %12639 = shalt.err (!%p12636_p3)
}
  0x52   : > { %s12813_s30 = smov 128   ;;  %s12814_s16 = smov 8  }
  0x53   : > { %11317 = dma.hbm_to_vmem [thread:$0]  (!%p12896_p6), %s14725_s2, 10240, %s213_s9, [#allocation6], %s12813_s30, %s12813_s30, %s12814_s16  }
  0x54   : > { %s12815_s18 = smov [#allocation10]   ;;  %s12640_s29 = scalar_lea.hbm %s14727_s4, 32768 }
  0x55   : > { %s238_s19 = sshll.u32 %s12815_s18, 4  ;;  %p12641_p1 = scmp.ne.s32.totalorder %s14727_s4, %s12640_s29  ;;  %s239_s19 = int_to_ptr.vmem [resolvable:$true] %s238_s19 }
  0x56   : > { %p12647_p12 = scmp.lt.u32.totalorder %s12640_s29, %s14727_s4 }
  0x57   : > { %p12643_p3 = pnand %p12641_p1, %p12912_p8 }
  0x59   : > { %p12644_p11 = pneg %p12643_p3 }
  0x5b   : > { %p12649_p13 = pnand %p12647_p12, %p12644_p11 }
  0x5d   : > { %12652 = shalt.err (!%p12649_p13)
}
  0x5e   : > { %s12653_s9 = scalar_lea.vmem %s239_s19, 32768  ;;  %p12661_p7 = scmp.lt.s32.totalorder %s239_s19, %s239_s19 }
  0x5f   : > { %p12654_p0 = scmp.ne.s32.totalorder %s239_s19, %s12653_s9  ;;  %p12662_p9 = scmp.lt.s32.totalorder %s12653_s9, %s12653_s9 }
  0x61   : > { %p12656_p2 = pnand %p12654_p0, %p12912_p8  ;;  %p12663_p4 = por %p12662_p9, %p12661_p7 }
  0x63   : > { %p12657_p5 = pneg %p12656_p2 }
  0x65   : > { %p12664_p10 = pnand %p12663_p4, %p12657_p5 }
  0x67   : > { %12667 = shalt.err (!%p12664_p10)
}
  0x68   : > { %s12816_s13 = smov 512   ;;  %s12817_s14 = smov 32  }
  0x69   : > { %11323 = dma.hbm_to_vmem [thread:$0]  (!%p12896_p6), %s14727_s4, 32768, %s239_s19, [#allocation9], %s12816_s13, %s12816_s13, %s12817_s14  }
  0x6a   : > { %s12818_s26 = smov [#allocation11]   ;;  %s12668_s25 = scalar_lea.hbm %s14728_s5, 400 }
  0x6b   : > { %s252_s17 = sshll.u32 %s12818_s26, 4  ;;  %p12669_p1 = scmp.ne.s32.totalorder %s14728_s5, %s12668_s25  ;;  %s253_s17 = int_to_ptr.vmem [resolvable:$true] %s252_s17 }
  0x6c   : > { %p12675_p12 = scmp.lt.u32.totalorder %s12668_s25, %s14728_s5 }
  0x6d   : > { %p12671_p3 = pnand %p12669_p1, %p12912_p8 }
  0x6f   : > { %p12672_p11 = pneg %p12671_p3 }
  0x71   : > { %p12677_p13 = pnand %p12675_p12, %p12672_p11 }
  0x73   : > { %12680 = shalt.err (!%p12677_p13)
}
  0x74   : > { %s12681_s19 = scalar_lea.vmem %s253_s17, 400  ;;  %s12688_s12 = scalar_lea.vmem %s253_s17, 416 }
  0x75   : > { %p12682_p0 = scmp.ne.s32.totalorder %s253_s17, %s12681_s19  ;;  %p12689_p7 = scmp.lt.s32.totalorder %s253_s17, %s253_s17 }
  0x76   : > { %p12690_p9 = scmp.lt.s32.totalorder %s12688_s12, %s12681_s19 }
  0x77   : > { %p12684_p2 = pnand %p12682_p0, %p12912_p8 }
  0x78   : > { %p12691_p4 = por %p12690_p9, %p12689_p7 }
  0x79   : > { %p12685_p5 = pneg %p12684_p2 }
  0x7b   : > { %p12692_p10 = pnand %p12691_p4, %p12685_p5 }
  0x7d   : > { %12695 = shalt.err (!%p12692_p10)
}
  0x7e   : > { %11326 = dma.hbm_to_vmem [thread:$0]  (!%p12896_p6), %s14728_s5, 400, %s253_s17, [#allocation12]  }
  0x7f   : > { %s9492_s15 = sadd.s32 4294967294, %s12804_s24   ;;  %s13016_s7 = sadd.s32 1, %s12804_s24  }
  0x80   : > { %s32_s16 = sadd.s32 1, %s12800_s23  ;;  %s29_s26 = ssub.s32 %s12804_s24, %s13016_s7 }
  0x81   : > { %p39_p8 = scmp.ne.s32.totalorder %s12800_s23, %s12796_s22  ;;  %p30_p1 = scmp.eq.s32.totalorder %s29_s26, 0 }
  0x82   : > { %p40_p3 = scmp.eq.s32.totalorder %s12804_s24, 0  ;;  %p45_p11 = scmp.ne.s32.totalorder %s12796_s22, %s12792_s21 }
  0x83   : > { %p174_p12 = scmp.eq.s32.totalorder %s12880_s27, 1  ;;  %p14742_p0 = scmp.eq.s32.totalorder %s12880_s27, 0 }
  0x84   : > { %s13028_s18 = scalar_select %p30_p1, %s12800_s23, %s32_s16  }
  0x85   : > { %p41_p13 = por %p40_p3, %p39_p8  ;;  %p13032_p2 = por %p14742_p0, %p45_p11 }
  0x86   : > { %p13036_p6 = por %p174_p12, %p39_p8  ;;  %p180_p5 = scmp.eq.s32.totalorder %s9492_s15, 1 }
  0x87   : > { %p11340_p7 = scmp.lt.s32.totalorder %s12804_s24, 2  ;;  %s263_s25 = sand.u32 1, %s12800_s23  }
  0x88   : > { %s14744_s17 = scalar_select %p13036_p6, 1, 0 }
  0x89   : > { %p13042_p9 = por %p180_p5, %p45_p11  ;;  %s9500_s8 = sshll.u32 %s263_s25, 9 }
  0x8a   : > { %s10420_s10 = sshll.u32 %s12804_s24, 13  ;;  %s267_s9 = scalar_lea.vmem [#allocation2], %s9500_s8 }
  0x8b   : > { %s14745_s29 = scalar_select %p13042_p9, 1, 0 }
  0x8c   : > { %s13050_s12 = scalar_lea.hbm %s14723_s0, %s10420_s10  ;;  %s275_s30 = sshll.u32 %s267_s9, 4  ;;  %s13056_s30 = int_to_ptr.vmem [resolvable:$true] %s275_s30 }
  0x8d   : > { %p13052_p4 = pnand %p11340_p7, %p41_p13  ;;  %s13058_s16 = scalar_lea.sflag [#allocation3], %s263_s25 }
  0x8e   : > { %s12696_s26 = scalar_lea.hbm %s13050_s12, 8192  ;;  %s12701_s11 = scalar_lea.hbm %s14723_s0, 16384 }
  0x8f   : > { %p12697_p10 = scmp.ne.s32.totalorder %s13050_s12, %s12696_s26  ;;  %p12698_p8 = pneg %p13052_p4 }
  0x90   : > { %p12702_p11 = scmp.lt.u32.totalorder %s13050_s12, %s14723_s0  ;;  %p12703_p12 = scmp.lt.u32.totalorder %s12701_s11, %s12696_s26 }
  0x91   : > { %p12699_p1 = pnand %p12698_p8, %p12697_p10  ;;  %p12705_p0 = scmp.lt.u32.totalorder %s12696_s26, %s13050_s12 }
  0x92   : > { %p12704_p13 = por %p12703_p12, %p12702_p11 }
  0x93   : > { %p12700_p3 = pneg %p12699_p1 }
  0x94   : > { %p12706_p5 = por %p12705_p0, %p12704_p13 }
  0x96   : > { %p12707_p7 = pnand %p12706_p5, %p12700_p3 }
  0x98   : > { %12710 = shalt.err (!%p12707_p7)
}
  0x99   : > { %s12711_s25 = scalar_lea.vmem %s13056_s30, 8192  ;;  %s12819_s8 = smov [#allocation2]  }
  0x9a   : > { %p12712_p10 = scmp.ne.s32.totalorder %s13056_s30, %s12711_s25  ;;  %s12716_s10 = sshll.u32 %s12819_s8, 4  ;;  %s12717_s10 = int_to_ptr.vmem [resolvable:$false] %s12716_s10 }
  0x9b   : > { %s12718_s19 = scalar_lea.vmem %s12717_s10, 16384  ;;  %p12719_p6 = scmp.lt.s32.totalorder %s13056_s30, %s12717_s10 }
  0x9c   : > { %p12714_p1 = pnand %p12712_p10, %p12698_p8  ;;  %p12720_p11 = scmp.lt.s32.totalorder %s12718_s19, %s12711_s25 }
  0x9e   : > { %p12715_p9 = pneg %p12714_p1  ;;  %p12721_p12 = por %p12720_p11, %p12719_p6 }
  0xa0   : > { %p12722_p13 = pnand %p12721_p12, %p12715_p9 }
  0xa2   : > { %12725 = shalt.err (!%p12722_p13)
}
  0xa3   : > { %11330 = dma.hbm_to_vmem [thread:$0]  (!%p13052_p4), %s13050_s12, 8192, %s13056_s30, %s13058_s16, %s12816_s13, %s12816_s13, %s12817_s14  }
  0xa4   : > { %p14747_p8 = scmp.ne.s32.totalorder %s14739_s28, 0 }
  0xa6   : > { %287 = sbr.rel (%p14747_p8) target bundleno = 3080 (0xc08), region = 44 }
  0xad   : > { %s13092_s26 = sand.u32 1, %s12796_s22  }
  0xae   : > { %s9505_s11 = sshll.u32 %s13092_s26, 9  ;;  %s290_s9 = scalar_lea.sflag [#allocation3], %s13092_s26 }
  0xaf   : > { %s13096_s25 = scalar_lea.vmem [#allocation2], %s9505_s11 }
  0xb0   : > { %12771 = dma.done.wait (%p13032_p2), %s290_s9, 8192  }
  0xb1   : > { %12773 = vsyncadd (%p13032_p2), %s290_s9, 4294959104  ;;  %p14748_p6 = scmp.eq.s32.totalorder %s12880_s27, 0 }
  0xb3   : > { %12775 = dma.done.wait (%p14748_p6), [#allocation6], 16384   ;;  %p14749_p9 = pmov %p14748_p6 }
  0xb4   : > { %p14750_p4 = pmov %p14748_p6 }
  0xb5   : > { %12777 = vsyncadd (%p14749_p9), [#allocation6], 4294950912 }
  0xb6   : > { %12779 = dma.done.wait (%p14750_p4), [#allocation9], 73728   ;;  %p14751_p3 = pmov %p14750_p4 }
  0xb8   : > { %12781 = vsyncadd (%p14751_p3), [#allocation9], 4294893568  ;;  %p14752_p0 = pmov %p14751_p3 }
  0xba   : > { %12783 = dma.done.wait (%p14752_p0), [#allocation12], 400   ;;  %p14753_p5 = pmov %p14752_p0 }
  0xbb   : > { %v11395_v0 = vld [vmem:[#allocation8 + $0x4] ss:$16 sps:$4 sm:$0xff]   ;;  %v11397_v1 = vld [vmem:[#allocation8 + $0xc] ss:$16 sps:$4 sm:$0xff]   ;;  %v11399_v2 = vld [vmem:[#allocation8] ss:$16 sps:$4 sm:$0xff]  }
  0xbc   : > { %12785 = vsyncadd (%p14753_p5), [#allocation12], 4294966896  ;;  %2287 = vmatprep.subr.bf16.mxu0 %v11395_v0  ;;  %v11400_v3 = vld [vmem:[#allocation8 + $0x8] ss:$16 sps:$4 sm:$0xff]   ;;  %2739 = vmatprep.subr.bf16.mxu1 %v11397_v1  ;;  %v11401_v4 = vld [vmem:[#allocation8 + $0x24] ss:$16 sps:$4 sm:$0xff]  }
  0xbd   : > { %2288 = vmatpush1.bf16.msra.mxu0 %v11399_v2  ;;  %2740 = vmatpush1.bf16.msra.mxu1 %v11400_v3  ;;  %v11403_v5 = vld [vmem:[#allocation8 + $0x2c] ss:$16 sps:$4 sm:$0xff]   ;;  %v11405_v6 = vld [vmem:[#allocation8 + $0x20] ss:$16 sps:$4 sm:$0xff]   ;;  %v11406_v7 = vld [vmem:[#allocation8 + $0x28] ss:$16 sps:$4 sm:$0xff]  }
  0xbe   : > { %2289 = vmatprep.subr.bf16.mxu0 %v11401_v4  ;;  %2741 = vmatprep.subr.bf16.mxu1 %v11403_v5  ;;  %v11407_v8 = vld [vmem:[#allocation8 + $0x44] ss:$16 sps:$4 sm:$0xff]   ;;  %v11409_v9 = vld [vmem:[#allocation8 + $0x4c] ss:$16 sps:$4 sm:$0xff]   ;;  %v11411_v10 = vld [vmem:[#allocation8 + $0x40] ss:$16 sps:$4 sm:$0xff]  }
  0xbf   : > { %v11412_v11 = vld [vmem:[#allocation8 + $0x48] ss:$16 sps:$4 sm:$0xff]   ;;  %v11413_v12 = vld [vmem:[#allocation8 + $0x64] ss:$16 sps:$4 sm:$0xff]   ;;  %v11415_v13 = vld [vmem:[#allocation8 + $0x6c] ss:$16 sps:$4 sm:$0xff]  }
  0xc0   : > { %v11417_v14 = vld [vmem:[#allocation8 + $0x60] ss:$16 sps:$4 sm:$0xff]   ;;  %v11418_v15 = vld [vmem:[#allocation8 + $0x68] ss:$16 sps:$4 sm:$0xff]   ;;  %v11419_v16 = vld [vmem:[#allocation8 + $0x84] ss:$16 sps:$4 sm:$0xff]  }
  0xc1   : > { %2290 = vmatpush1.bf16.msra.mxu0 %v11405_v6  ;;  %2742 = vmatpush1.bf16.msra.mxu1 %v11406_v7  ;;  %v11421_v17 = vld [vmem:[#allocation8 + $0x8c] ss:$16 sps:$4 sm:$0xff]   ;;  %v11423_v18 = vld [vmem:[#allocation8 + $0x80] ss:$16 sps:$4 sm:$0xff]   ;;  %v11424_v19 = vld [vmem:[#allocation8 + $0x88] ss:$16 sps:$4 sm:$0xff]  }
  0xc2   : > { %2291 = vmatprep.subr.bf16.mxu0 %v11407_v8  ;;  %2743 = vmatprep.subr.bf16.mxu1 %v11409_v9  ;;  %v11425_v20 = vld [vmem:[#allocation8 + $0xa4] ss:$16 sps:$4 sm:$0xff]   ;;  %v11427_v21 = vld [vmem:[#allocation8 + $0xac] ss:$16 sps:$4 sm:$0xff]   ;;  %v11429_v22 = vld [vmem:[#allocation8 + $0xa0] ss:$16 sps:$4 sm:$0xff]  }
  0xc3   : > { %v11430_v23 = vld [vmem:[#allocation8 + $0xa8] ss:$16 sps:$4 sm:$0xff]   ;;  %v11431_v24 = vld [vmem:[#allocation8 + $0xc4] ss:$16 sps:$4 sm:$0xff]   ;;  %v11433_v25 = vld [vmem:[#allocation8 + $0xcc] ss:$16 sps:$4 sm:$0xff]  }
  0xc4   : > { %v11435_v26 = vld [vmem:[#allocation8 + $0xc0] ss:$16 sps:$4 sm:$0xff]   ;;  %v11436_v27 = vld [vmem:[#allocation8 + $0xc8] ss:$16 sps:$4 sm:$0xff]   ;;  %v11437_v28 = vld [vmem:[#allocation8 + $0xe4] ss:$16 sps:$4 sm:$0xff]  }
  0xc5   : > { %2292 = vmatpush1.bf16.msra.mxu0 %v11411_v10  ;;  %2744 = vmatpush1.bf16.msra.mxu1 %v11412_v11  ;;  %v11439_v29 = vld [vmem:[#allocation8 + $0xec] ss:$16 sps:$4 sm:$0xff]   ;;  %v11441_v30 = vld [vmem:[#allocation8 + $0xe0] ss:$16 sps:$4 sm:$0xff]   ;;  %v11442_v31 = vld [vmem:[#allocation8 + $0xe8] ss:$16 sps:$4 sm:$0xff]  }
  0xc6   : > { %2293 = vmatprep.subr.bf16.mxu0 %v11413_v12  ;;  %2745 = vmatprep.subr.bf16.mxu1 %v11415_v13  ;;  %v11443_v32 = vld [vmem:[#allocation8 + $0x104] ss:$16 sps:$4 sm:$0xff]   ;;  %v11445_v33 = vld [vmem:[#allocation8 + $0x10c] ss:$16 sps:$4 sm:$0xff]   ;;  %v11447_v34 = vld [vmem:[#allocation8 + $0x100] ss:$16 sps:$4 sm:$0xff]  }
  0xc7   : > { %v11448_v35 = vld [vmem:[#allocation8 + $0x108] ss:$16 sps:$4 sm:$0xff]   ;;  %v11449_v36 = vld [vmem:[#allocation8 + $0x124] ss:$16 sps:$4 sm:$0xff]   ;;  %v11451_v37 = vld [vmem:[#allocation8 + $0x12c] ss:$16 sps:$4 sm:$0xff]  }
  0xc8   : > { %v11453_v38 = vld [vmem:[#allocation8 + $0x120] ss:$16 sps:$4 sm:$0xff]   ;;  %v11454_v39 = vld [vmem:[#allocation8 + $0x128] ss:$16 sps:$4 sm:$0xff]   ;;  %v11455_v40 = vld [vmem:[#allocation8 + $0x144] ss:$16 sps:$4 sm:$0xff]  }
  0xc9   : > { %2294 = vmatpush1.bf16.msra.mxu0 %v11417_v14  ;;  %2746 = vmatpush1.bf16.msra.mxu1 %v11418_v15  ;;  %v11457_v41 = vld [vmem:[#allocation8 + $0x14c] ss:$16 sps:$4 sm:$0xff]   ;;  %v11459_v42 = vld [vmem:[#allocation8 + $0x140] ss:$16 sps:$4 sm:$0xff]   ;;  %v11460_v43 = vld [vmem:[#allocation8 + $0x148] ss:$16 sps:$4 sm:$0xff]  }
  0xca   : > { %2295 = vmatprep.subr.bf16.mxu0 %v11419_v16  ;;  %2747 = vmatprep.subr.bf16.mxu1 %v11421_v17  ;;  %v11461_v44 = vld [vmem:[#allocation8 + $0x164] ss:$16 sps:$4 sm:$0xff]   ;;  %v11463_v45 = vld [vmem:[#allocation8 + $0x16c] ss:$16 sps:$4 sm:$0xff]   ;;  %v11465_v48 = vld [vmem:[#allocation8 + $0x160] ss:$16 sps:$4 sm:$0xff]  }
  0xcb   : > { %v345_v46 = vld [vmem:[%s13096_s25] sm:$0xff]  ;;  %v11466_v49 = vld [vmem:[#allocation8 + $0x168] ss:$16 sps:$4 sm:$0xff]   ;;  %v11469_v52 = vld [vmem:[#allocation8 + $0x18c] ss:$16 sps:$4 sm:$0xff]   ;;  %s9511_s28 = sshll.u32 %s13092_s26, 10 }
  0xcc   : > { %v349_v47 = vld [vmem:[%s13096_s25 + $0x20] sm:$0xff]  ;;  %v11472_v54 = vld [vmem:[#allocation8 + $0x188] ss:$16 sps:$4 sm:$0xff]   ;;  %v11475_v56 = vld [vmem:[#allocation8 + $0x1ac] ss:$16 sps:$4 sm:$0xff]   ;;  %s14171_s13 = scalar_lea.vmem [#allocation13], %s9511_s28 }
  0xcd   : > { %2296 = vmatpush1.bf16.msra.mxu0 %v11423_v18  ;;  %2748 = vmatpush1.bf16.msra.mxu1 %v11424_v19  ;;  %v9513_v50 = vcombine.high %v345_v46, %v349_v47  ;;  %v11467_v51 = vld [vmem:[#allocation8 + $0x184] ss:$16 sps:$4 sm:$0xff]   ;;  %v11471_v53 = vld [vmem:[#allocation8 + $0x180] ss:$16 sps:$4 sm:$0xff]   ;;  %v11478_v58 = vld [vmem:[#allocation8 + $0x1a8] ss:$16 sps:$4 sm:$0xff]   ;;  %v9512_v7 = vcombine.low %v345_v46, %v349_v47 }
  0xce   : > { %2297 = vmatprep.subr.bf16.mxu0 %v11425_v20  ;;  %2749 = vmatprep.subr.bf16.mxu1 %v11427_v21  ;;  %v11473_v55 = vld [vmem:[#allocation8 + $0x1a4] ss:$16 sps:$4 sm:$0xff]   ;;  %v11477_v57 = vld [vmem:[#allocation8 + $0x1a0] ss:$16 sps:$4 sm:$0xff]   ;;  %v11481_v60 = vld [vmem:[#allocation8 + $0x1cc] ss:$16 sps:$4 sm:$0xff]  }
  0xcf   : > { %2319 = vmatprep.mubr.bf16.mxu0 %v9513_v50  ;;  %2771 = vmatprep.mubr.bf16.mxu1 %v9513_v50  ;;  %v11479_v59 = vld [vmem:[#allocation8 + $0x1c4] ss:$16 sps:$4 sm:$0xff]   ;;  %v11483_v61 = vld [vmem:[#allocation8 + $0x1c0] ss:$16 sps:$4 sm:$0xff]   ;;  %v11484_v62 = vld [vmem:[#allocation8 + $0x1c8] ss:$16 sps:$4 sm:$0xff]  }
  0xd0   : > { %v11485_v63 = vld [vmem:[#allocation8 + $0x1e4] ss:$16 sps:$4 sm:$0xff]   ;;  %v11487_v0 = vld [vmem:[#allocation8 + $0x1ec] ss:$16 sps:$4 sm:$0xff]   ;;  %v11489_v1 = vld [vmem:[#allocation8 + $0x1e0] ss:$16 sps:$4 sm:$0xff]  }
  0xd1   : > { %2298 = vmatpush1.bf16.msra.mxu0 %v11429_v22  ;;  %2750 = vmatpush1.bf16.msra.mxu1 %v11430_v23  ;;  %v11490_v2 = vld [vmem:[#allocation8 + $0x1e8] ss:$16 sps:$4 sm:$0xff]   ;;  %v11493_v3 = vld [vmem:[#allocation8 + $0x204] ss:$16 sps:$4 sm:$0xff]   ;;  %v11496_v4 = vld [vmem:[#allocation8 + $0x20c] ss:$16 sps:$4 sm:$0xff]  }
  0xd2   : > { %2299 = vmatprep.subr.bf16.mxu0 %v11431_v24  ;;  %2751 = vmatprep.subr.bf16.mxu1 %v11433_v25  ;;  %v11491_v5 = vld [vmem:[#allocation8 + $0x200] ss:$16 sps:$4 sm:$0xff]   ;;  %v11494_v6 = vld [vmem:[#allocation8 + $0x208] ss:$16 sps:$4 sm:$0xff]   ;;  %v11499_v10 = vld [vmem:[#allocation8 + $0x224] ss:$16 sps:$4 sm:$0xff]  }
  0xd3   : > { %v353_v8 = vld [vmem:[%s13096_s25 + $0x40] sm:$0xff]  ;;  %v11502_v11 = vld [vmem:[#allocation8 + $0x22c] ss:$16 sps:$4 sm:$0xff]   ;;  %v11500_v14 = vld [vmem:[#allocation8 + $0x228] ss:$16 sps:$4 sm:$0xff]   ;;  %s10422_s14 = sshll.u32 %s12880_s27, 14 }
  0xd4   : > { %v357_v9 = vld [vmem:[%s13096_s25 + $0x60] sm:$0xff]  ;;  %v11508_v16 = vld [vmem:[#allocation8 + $0x24c] ss:$16 sps:$4 sm:$0xff]   ;;  %v11506_v21 = vld [vmem:[#allocation8 + $0x248] ss:$16 sps:$4 sm:$0xff]   ;;  %s9371_s20 = sshll.u32 %s14171_s13, 4  ;;  %s14674_s15 = scalar_lea.hbm %s14729_s6, %s10422_s14  ;;  %s14676_s20 = int_to_ptr.vmem [resolvable:$true] %s9371_s20 }
  0xd5   : > { %2300 = vmatpush1.bf16.msra.mxu0 %v11435_v26  ;;  %2752 = vmatpush1.bf16.msra.mxu1 %v11436_v27  ;;  %v9521_v12 = vcombine.high %v353_v8, %v357_v9  ;;  %v11497_v13 = vld [vmem:[#allocation8 + $0x220] ss:$16 sps:$4 sm:$0xff]   ;;  %v11505_v15 = vld [vmem:[#allocation8 + $0x244] ss:$16 sps:$4 sm:$0xff]   ;;  %v9520_v18 = vcombine.low %v353_v8, %v357_v9  ;;  %v11514_v23 = vld [vmem:[#allocation8 + $0x26c] ss:$16 sps:$4 sm:$0xff]  }
  0xd6   : > { %2301 = vmatprep.subr.bf16.mxu0 %v11437_v28  ;;  %2753 = vmatprep.subr.bf16.mxu1 %v11439_v29  ;;  %v361_v17 = vld [vmem:[%s13096_s25 + $0x80] sm:$0xff]  ;;  %v11512_v26 = vld [vmem:[#allocation8 + $0x268] ss:$16 sps:$4 sm:$0xff]   ;;  %v11520_v28 = vld [vmem:[#allocation8 + $0x28c] ss:$16 sps:$4 sm:$0xff]   ;;  %s9357_s27 = scalar_lea.sflag [#allocation4], %s13092_s26 }
  0xd7   : > { %v365_v19 = vld [vmem:[%s13096_s25 + $0xa0] sm:$0xff]  ;;  %v11538_v47 = vld [vmem:[#allocation8 + $0x2ec] ss:$16 sps:$4 sm:$0xff]   ;;  %v11536_v50 = vld [vmem:[#allocation8 + $0x2e8] ss:$16 sps:$4 sm:$0xff]   ;;  %s12726_s16 = scalar_lea.vmem %s14676_s20, 16384 }
  0xd8   : > { %v11503_v20 = vld [vmem:[#allocation8 + $0x240] ss:$16 sps:$4 sm:$0xff]   ;;  %v11511_v22 = vld [vmem:[#allocation8 + $0x264] ss:$16 sps:$4 sm:$0xff]   ;;  %v9529_v24 = vcombine.high %v361_v17, %v365_v19  ;;  %p12727_p2 = scmp.ne.s32.totalorder %s14676_s20, %s12726_s16  ;;  %p14764_p7 = scmp.ne.s32.totalorder %s14744_s17, 0 }
  0xd9   : > { %2302 = vmatpush1.bf16.msra.mxu0 %v11441_v30  ;;  %2754 = vmatpush1.bf16.msra.mxu1 %v11442_v31  ;;  %v11509_v25 = vld [vmem:[#allocation8 + $0x260] ss:$16 sps:$4 sm:$0xff]   ;;  %v11517_v27 = vld [vmem:[#allocation8 + $0x284] ss:$16 sps:$4 sm:$0xff]   ;;  %v9528_v30 = vcombine.low %v361_v17, %v365_v19  ;;  %v11574_v19 = vld [vmem:[#allocation8 + $0x3ac] ss:$16 sps:$4 sm:$0xff]  }
  0xda   : > { %2303 = vmatprep.subr.bf16.mxu0 %v11443_v32  ;;  %2755 = vmatprep.subr.bf16.mxu1 %v11445_v33  ;;  %v369_v29 = vld [vmem:[%s13096_s25 + $0xc0] sm:$0xff]  ;;  %v11518_v33 = vld [vmem:[#allocation8 + $0x288] ss:$16 sps:$4 sm:$0xff]   ;;  %p12728_p10 = pnand %p12727_p2, %p14764_p7  ;;  %s12821_s8 = smov [#allocation13]  }
  0xdb   : > { %v373_v31 = vld [vmem:[%s13096_s25 + $0xe0] sm:$0xff]  ;;  %s12730_s10 = sshll.u32 %s12821_s8, 4  ;;  %s12731_s10 = int_to_ptr.vmem [resolvable:$false] %s12730_s10 }
  0xdc   : > { %v11515_v32 = vld [vmem:[#allocation8 + $0x280] ss:$16 sps:$4 sm:$0xff]   ;;  %v11535_v46 = vld [vmem:[#allocation8 + $0x2e4] ss:$16 sps:$4 sm:$0xff]   ;;  %p12729_p1 = pneg %p12728_p10  ;;  %s12732_s19 = scalar_lea.vmem %s12731_s10, 32768 }
  0xdd   : > { %2304 = vmatpush1.bf16.msra.mxu0 %v11447_v34  ;;  %2756 = vmatpush1.bf16.msra.mxu1 %v11448_v35  ;;  %v11523_v34 = vld [vmem:[#allocation8 + $0x2a4] ss:$16 sps:$4 sm:$0xff]   ;;  %v11526_v35 = vld [vmem:[#allocation8 + $0x2ac] ss:$16 sps:$4 sm:$0xff]   ;;  %v11557_v9 = vld [vmem:[#allocation8 + $0x360] ss:$16 sps:$4 sm:$0xff]   ;;  %p12733_p11 = scmp.lt.s32.totalorder %s14676_s20, %s12731_s10  ;;  %p12734_p12 = scmp.lt.s32.totalorder %s12732_s19, %s12726_s16 }
  0xde   : > { %2305 = vmatprep.subr.bf16.mxu0 %v11449_v36  ;;  %2757 = vmatprep.subr.bf16.mxu1 %v11451_v37  ;;  %v9537_v36 = vcombine.high %v369_v29, %v373_v31  ;;  %v11521_v37 = vld [vmem:[#allocation8 + $0x2a0] ss:$16 sps:$4 sm:$0xff]  }
  0xdf   : > { %v405_v17 = vld [vmem:[%s13096_s25 + $0x1e0] sm:$0xff]  ;;  %p12735_p13 = por %p12734_p12, %p12733_p11 }
  0xe1   : > { %2306 = vmatpush1.bf16.msra.mxu0 %v11453_v38  ;;  %2758 = vmatpush1.bf16.msra.mxu1 %v11454_v39  ;;  %v11524_v38 = vld [vmem:[#allocation8 + $0x2a8] ss:$16 sps:$4 sm:$0xff]   ;;  %v11529_v39 = vld [vmem:[#allocation8 + $0x2c4] ss:$16 sps:$4 sm:$0xff]   ;;  %p12736_p8 = pnand %p12735_p13, %p12729_p1 }
  0xe2   : > { %2307 = vmatprep.subr.bf16.mxu0 %v11455_v40  ;;  %2759 = vmatprep.subr.bf16.mxu1 %v11457_v41  ;;  %v11532_v40 = vld [vmem:[#allocation8 + $0x2cc] ss:$16 sps:$4 sm:$0xff]   ;;  %v11527_v41 = vld [vmem:[#allocation8 + $0x2c0] ss:$16 sps:$4 sm:$0xff]  }
  0xe5   : > { %2308 = vmatpush1.bf16.msra.mxu0 %v11459_v42  ;;  %2760 = vmatpush1.bf16.msra.mxu1 %v11460_v43  ;;  %v11530_v42 = vld [vmem:[#allocation8 + $0x2c8] ss:$16 sps:$4 sm:$0xff]   ;;  %v9536_v43 = vcombine.low %v369_v29, %v373_v31  ;;  %v11586_v31 = vld [vmem:[#allocation8 + $0x3ec] ss:$16 sps:$4 sm:$0xff]  }
  0xe6   : > { %2309 = vmatprep.subr.bf16.mxu0 %v11461_v44  ;;  %2761 = vmatprep.subr.bf16.mxu1 %v11463_v45  ;;  %v377_v44 = vld [vmem:[%s13096_s25 + $0x100] sm:$0xff]  ;;  %v11578_v29 = vld [vmem:[#allocation8 + $0x3c8] ss:$16 sps:$4 sm:$0xff]  }
  0xe7   : > { %v381_v45 = vld [vmem:[%s13096_s25 + $0x120] sm:$0xff] }
  0xe9   : > { %2310 = vmatpush1.bf16.msra.mxu0 %v11465_v48  ;;  %2762 = vmatpush1.bf16.msra.mxu1 %v11466_v49  ;;  %v9545_v48 = vcombine.high %v377_v44, %v381_v45  ;;  %v11533_v49 = vld [vmem:[#allocation8 + $0x2e0] ss:$16 sps:$4 sm:$0xff]  }
  0xea   : > { %2311 = vmatprep.subr.bf16.mxu0 %v11467_v51  ;;  %2763 = vmatprep.subr.bf16.mxu1 %v11469_v52  ;;  %v11541_v51 = vld [vmem:[#allocation8 + $0x304] ss:$16 sps:$4 sm:$0xff]   ;;  %v11544_v52 = vld [vmem:[#allocation8 + $0x30c] ss:$16 sps:$4 sm:$0xff]  }
  0xed   : > { %2312 = vmatpush1.bf16.msra.mxu0 %v11471_v53  ;;  %2764 = vmatpush1.bf16.msra.mxu1 %v11472_v54  ;;  %v385_v53 = vld [vmem:[%s13096_s25 + $0x140] sm:$0xff]  ;;  %v9544_v54 = vcombine.low %v377_v44, %v381_v45 }
  0xee   : > { %2313 = vmatprep.subr.bf16.mxu0 %v11473_v55  ;;  %2765 = vmatprep.subr.bf16.mxu1 %v11475_v56  ;;  %v389_v55 = vld [vmem:[%s13096_s25 + $0x160] sm:$0xff] }
  0xef   : > { %v11539_v56 = vld [vmem:[#allocation8 + $0x300] ss:$16 sps:$4 sm:$0xff]  }
  0xf0   : > { %v11593_v45 = vld [vmem:[#allocation8 + $0x420] ss:$16 sps:$4 sm:$0xff]  }
  0xf1   : > { %2314 = vmatpush1.bf16.msra.mxu0 %v11477_v57  ;;  %2766 = vmatpush1.bf16.msra.mxu1 %v11478_v58  ;;  %v11542_v57 = vld [vmem:[#allocation8 + $0x308] ss:$16 sps:$4 sm:$0xff]   ;;  %v11547_v58 = vld [vmem:[#allocation8 + $0x324] ss:$16 sps:$4 sm:$0xff]  }
  0xf2   : > { %2315 = vmatprep.subr.bf16.mxu0 %v11479_v59  ;;  %2767 = vmatprep.subr.bf16.mxu1 %v11481_v60  ;;  %v11550_v59 = vld [vmem:[#allocation8 + $0x32c] ss:$16 sps:$4 sm:$0xff]   ;;  %v9553_v60 = vcombine.high %v385_v53, %v389_v55 }
  0xf5   : > { %2316 = vmatpush1.bf16.msra.mxu0 %v11483_v61  ;;  %2768 = vmatpush1.bf16.msra.mxu1 %v11484_v62  ;;  %v11545_v61 = vld [vmem:[#allocation8 + $0x320] ss:$16 sps:$4 sm:$0xff]   ;;  %v11548_v62 = vld [vmem:[#allocation8 + $0x328] ss:$16 sps:$4 sm:$0xff]  }
  0xf6   : > { %2317 = vmatprep.subr.bf16.mxu0 %v11485_v63  ;;  %2769 = vmatprep.subr.bf16.mxu1 %v11487_v0  ;;  %v11553_v63 = vld [vmem:[#allocation8 + $0x344] ss:$16 sps:$4 sm:$0xff]   ;;  %v11556_v0 = vld [vmem:[#allocation8 + $0x34c] ss:$16 sps:$4 sm:$0xff]  }
  0xf9   : > { %2318 = vmatpush1.bf16.msra.mxu0 %v11489_v1  ;;  %2770 = vmatpush1.bf16.msra.mxu1 %v11490_v2  ;;  %v393_v1 = vld [vmem:[%s13096_s25 + $0x180] sm:$0xff]  ;;  %v9552_v2 = vcombine.low %v385_v53, %v389_v55  ;;  %v366_v53 = vld [vmem:[%s13096_s25 + $0xa8] sm:$0xff] }
  0xfa   : > { %2400 = vmatprep.subr.bf16.mxu0 %v11493_v3  ;;  %2852 = vmatprep.subr.bf16.mxu1 %v11496_v4  ;;  %v397_v3 = vld [vmem:[%s13096_s25 + $0x1a0] sm:$0xff]  ;;  %v11610_v55 = vld [vmem:[#allocation8 + $0x46c] ss:$16 sps:$4 sm:$0xff]  }
  0xfb   : > { %v11551_v4 = vld [vmem:[#allocation8 + $0x340] ss:$16 sps:$4 sm:$0xff]   ;;  %v9561_v8 = vcombine.high %v393_v1, %v397_v3 }
  0xfc   : > { %2320 = vmatmul.mubr.bf16.vlgmr.msra.gmra.mrb[0].mxu0 %v9512_v7  ;;  %2772 = vmatmul.mubr.bf16.vlgmr.msra.gmra.mrb[0].mxu1 %v9512_v7  ;;  %v11562_v7 = vld [vmem:[#allocation8 + $0x36c] ss:$16 sps:$4 sm:$0xff]  }
  0xfd   : > { %2401 = vmatpush1.bf16.msra.mxu0 %v11491_v5  ;;  %2853 = vmatpush1.bf16.msra.mxu1 %v11494_v6  ;;  %v11554_v5 = vld [vmem:[#allocation8 + $0x348] ss:$16 sps:$4 sm:$0xff]   ;;  %v11559_v6 = vld [vmem:[#allocation8 + $0x364] ss:$16 sps:$4 sm:$0xff]  }
  0xfe   : > { %2402 = vmatprep.subr.bf16.mxu0 %v11499_v10  ;;  %2854 = vmatprep.subr.bf16.mxu1 %v11502_v11  ;;  %v11560_v10 = vld [vmem:[#allocation8 + $0x368] ss:$16 sps:$4 sm:$0xff]   ;;  %v11565_v11 = vld [vmem:[#allocation8 + $0x384] ss:$16 sps:$4 sm:$0xff]  }
  0xff   : > { %2329 = vmatprep.mubr.bf16.mxu0 %v9521_v12  ;;  %2781 = vmatprep.mubr.bf16.mxu1 %v9521_v12  ;;  %v11568_v12 = vld [vmem:[#allocation8 + $0x38c] ss:$16 sps:$4 sm:$0xff]  }
 0x101   : > { %2403 = vmatpush1.bf16.msra.mxu0 %v11497_v13  ;;  %2855 = vmatpush1.bf16.msra.mxu1 %v11500_v14  ;;  %v11563_v13 = vld [vmem:[#allocation8 + $0x380] ss:$16 sps:$4 sm:$0xff]   ;;  %v11566_v14 = vld [vmem:[#allocation8 + $0x388] ss:$16 sps:$4 sm:$0xff]  }
 0x102   : > { %2404 = vmatprep.subr.bf16.mxu0 %v11505_v15  ;;  %2856 = vmatprep.subr.bf16.mxu1 %v11508_v16  ;;  %v9560_v15 = vcombine.low %v393_v1, %v397_v3  ;;  %v401_v16 = vld [vmem:[%s13096_s25 + $0x1c0] sm:$0xff]  ;;  %v11614_v1 = vld [vmem:[#allocation8 + $0x488] ss:$16 sps:$4 sm:$0xff]   ;;  %v11622_v3 = vld [vmem:[#allocation8 + $0x4ac] ss:$16 sps:$4 sm:$0xff]  }
 0x104   : > { %2330 = vmatmul.mubr.bf16.gmra.mrb[4].mxu0 %v9520_v18  ;;  %2782 = vmatmul.mubr.bf16.gmra.mrb[4].mxu1 %v9520_v18  ;;  %v11571_v18 = vld [vmem:[#allocation8 + $0x3a4] ss:$16 sps:$4 sm:$0xff]  }
 0x105   : > { %2405 = vmatpush1.bf16.msra.mxu0 %v11503_v20  ;;  %2857 = vmatpush1.bf16.msra.mxu1 %v11506_v21  ;;  %v9569_v20 = vcombine.high %v401_v16, %v405_v17  ;;  %v11569_v21 = vld [vmem:[#allocation8 + $0x3a0] ss:$16 sps:$4 sm:$0xff]  }
 0x106   : > { %2406 = vmatprep.subr.bf16.mxu0 %v11511_v22  ;;  %2858 = vmatprep.subr.bf16.mxu1 %v11514_v23  ;;  %v11572_v22 = vld [vmem:[#allocation8 + $0x3a8] ss:$16 sps:$4 sm:$0xff]   ;;  %v11577_v23 = vld [vmem:[#allocation8 + $0x3c4] ss:$16 sps:$4 sm:$0xff]  }
 0x107   : > { %2339 = vmatprep.mubr.bf16.mxu0 %v9529_v24  ;;  %2791 = vmatprep.mubr.bf16.mxu1 %v9529_v24  ;;  %v11580_v24 = vld [vmem:[#allocation8 + $0x3cc] ss:$16 sps:$4 sm:$0xff]  }
 0x109   : > { %2407 = vmatpush1.bf16.msra.mxu0 %v11509_v25  ;;  %2859 = vmatpush1.bf16.msra.mxu1 %v11512_v26  ;;  %v346_v25 = vld [vmem:[%s13096_s25 + $0x8] sm:$0xff]  ;;  %v9568_v26 = vcombine.low %v401_v16, %v405_v17  ;;  %v11629_v17 = vld [vmem:[#allocation8 + $0x4e0] ss:$16 sps:$4 sm:$0xff]  }
 0x10a   : > { %2408 = vmatprep.subr.bf16.mxu0 %v11517_v27  ;;  %2860 = vmatprep.subr.bf16.mxu1 %v11520_v28  ;;  %v350_v27 = vld [vmem:[%s13096_s25 + $0x28] sm:$0xff]  ;;  %v11575_v28 = vld [vmem:[#allocation8 + $0x3c0] ss:$16 sps:$4 sm:$0xff]  }
 0x10c   : > { %2340 = vmatmul.mubr.bf16.gmra.mrb[8].mxu0 %v9528_v30  ;;  %2792 = vmatmul.mubr.bf16.gmra.mrb[8].mxu1 %v9528_v30  ;;  %v11583_v30 = vld [vmem:[#allocation8 + $0x3e4] ss:$16 sps:$4 sm:$0xff]  }
 0x10d   : > { %2409 = vmatpush1.bf16.msra.mxu0 %v11515_v32  ;;  %2861 = vmatpush1.bf16.msra.mxu1 %v11518_v33  ;;  %v9515_v32 = vcombine.high %v346_v25, %v350_v27  ;;  %v11581_v33 = vld [vmem:[#allocation8 + $0x3e0] ss:$16 sps:$4 sm:$0xff]  }
 0x10e   : > { %2410 = vmatprep.subr.bf16.mxu0 %v11523_v34  ;;  %2862 = vmatprep.subr.bf16.mxu1 %v11526_v35  ;;  %v11584_v34 = vld [vmem:[#allocation8 + $0x3e8] ss:$16 sps:$4 sm:$0xff]   ;;  %v11589_v35 = vld [vmem:[#allocation8 + $0x404] ss:$16 sps:$4 sm:$0xff]  }
 0x10f   : > { %2349 = vmatprep.mubr.bf16.mxu0 %v9537_v36  ;;  %2801 = vmatprep.mubr.bf16.mxu1 %v9537_v36  ;;  %v11592_v36 = vld [vmem:[#allocation8 + $0x40c] ss:$16 sps:$4 sm:$0xff]  }
 0x111   : > { %2411 = vmatpush1.bf16.msra.mxu0 %v11521_v37  ;;  %2863 = vmatpush1.bf16.msra.mxu1 %v11524_v38  ;;  %v354_v37 = vld [vmem:[%s13096_s25 + $0x48] sm:$0xff]  ;;  %v9514_v38 = vcombine.low %v346_v25, %v350_v27 }
 0x112   : > { %2412 = vmatprep.subr.bf16.mxu0 %v11529_v39  ;;  %2864 = vmatprep.subr.bf16.mxu1 %v11532_v40  ;;  %v358_v39 = vld [vmem:[%s13096_s25 + $0x68] sm:$0xff]  ;;  %v11587_v40 = vld [vmem:[#allocation8 + $0x400] ss:$16 sps:$4 sm:$0xff]  }
 0x113   : > { %v9523_v44 = vcombine.high %v354_v37, %v358_v39  ;;  %v390_v25 = vld [vmem:[%s13096_s25 + $0x168] sm:$0xff] }
 0x114   : > { %2350 = vmatmul.mubr.bf16.gmra.mrb[12].mxu0 %v9536_v43  ;;  %2802 = vmatmul.mubr.bf16.gmra.mrb[12].mxu1 %v9536_v43  ;;  %v11598_v43 = vld [vmem:[#allocation8 + $0x42c] ss:$16 sps:$4 sm:$0xff]  }
 0x115   : > { %2413 = vmatpush1.bf16.msra.mxu0 %v11527_v41  ;;  %2865 = vmatpush1.bf16.msra.mxu1 %v11530_v42  ;;  %v11590_v41 = vld [vmem:[#allocation8 + $0x408] ss:$16 sps:$4 sm:$0xff]   ;;  %v11595_v42 = vld [vmem:[#allocation8 + $0x424] ss:$16 sps:$4 sm:$0xff]   ;;  %v11646_v27 = vld [vmem:[#allocation8 + $0x52c] ss:$16 sps:$4 sm:$0xff]  }
 0x116   : > { %2414 = vmatprep.subr.bf16.mxu0 %v11535_v46  ;;  %2866 = vmatprep.subr.bf16.mxu1 %v11538_v47  ;;  %v11596_v46 = vld [vmem:[#allocation8 + $0x428] ss:$16 sps:$4 sm:$0xff]   ;;  %v11601_v47 = vld [vmem:[#allocation8 + $0x444] ss:$16 sps:$4 sm:$0xff]  }
 0x117   : > { %2359 = vmatprep.mubr.bf16.mxu0 %v9545_v48  ;;  %2811 = vmatprep.mubr.bf16.mxu1 %v9545_v48  ;;  %v11604_v48 = vld [vmem:[#allocation8 + $0x44c] ss:$16 sps:$4 sm:$0xff]  }
 0x119   : > { %2415 = vmatpush1.bf16.msra.mxu0 %v11533_v49  ;;  %2867 = vmatpush1.bf16.msra.mxu1 %v11536_v50  ;;  %v11599_v49 = vld [vmem:[#allocation8 + $0x440] ss:$16 sps:$4 sm:$0xff]   ;;  %v11602_v50 = vld [vmem:[#allocation8 + $0x448] ss:$16 sps:$4 sm:$0xff]  }
 0x11a   : > { %2416 = vmatprep.subr.bf16.mxu0 %v11541_v51  ;;  %2868 = vmatprep.subr.bf16.mxu1 %v11544_v52  ;;  %v9522_v51 = vcombine.low %v354_v37, %v358_v39  ;;  %v362_v52 = vld [vmem:[%s13096_s25 + $0x88] sm:$0xff] }
 0x11b   : > { %v11650_v37 = vld [vmem:[#allocation8 + $0x548] ss:$16 sps:$4 sm:$0xff]   ;;  %v11658_v39 = vld [vmem:[#allocation8 + $0x56c] ss:$16 sps:$4 sm:$0xff]  }
 0x11c   : > { %2360 = vmatmul.mubr.bf16.gmra.mrb[16].mxu0 %v9544_v54  ;;  %2812 = vmatmul.mubr.bf16.gmra.mrb[16].mxu1 %v9544_v54  ;;  %v11607_v54 = vld [vmem:[#allocation8 + $0x464] ss:$16 sps:$4 sm:$0xff]  }
 0x11d   : > { %2417 = vmatpush1.bf16.msra.mxu0 %v11539_v56  ;;  %2869 = vmatpush1.bf16.msra.mxu1 %v11542_v57  ;;  %v9531_v56 = vcombine.high %v362_v52, %v366_v53  ;;  %v11605_v57 = vld [vmem:[#allocation8 + $0x460] ss:$16 sps:$4 sm:$0xff]  }
 0x11e   : > { %2418 = vmatprep.subr.bf16.mxu0 %v11547_v58  ;;  %2870 = vmatprep.subr.bf16.mxu1 %v11550_v59  ;;  %v11608_v58 = vld [vmem:[#allocation8 + $0x468] ss:$16 sps:$4 sm:$0xff]   ;;  %v11613_v59 = vld [vmem:[#allocation8 + $0x484] ss:$16 sps:$4 sm:$0xff]  }
 0x11f   : > { %2369 = vmatprep.mubr.bf16.mxu0 %v9553_v60  ;;  %2821 = vmatprep.mubr.bf16.mxu1 %v9553_v60  ;;  %v11616_v60 = vld [vmem:[#allocation8 + $0x48c] ss:$16 sps:$4 sm:$0xff]  }
 0x121   : > { %2419 = vmatpush1.bf16.msra.mxu0 %v11545_v61  ;;  %2871 = vmatpush1.bf16.msra.mxu1 %v11548_v62  ;;  %v370_v61 = vld [vmem:[%s13096_s25 + $0xc8] sm:$0xff]  ;;  %v9530_v62 = vcombine.low %v362_v52, %v366_v53  ;;  %v11665_v53 = vld [vmem:[#allocation8 + $0x5a0] ss:$16 sps:$4 sm:$0xff]  }
 0x122   : > { %2420 = vmatprep.subr.bf16.mxu0 %v11553_v63  ;;  %2872 = vmatprep.subr.bf16.mxu1 %v11556_v0  ;;  %v374_v63 = vld [vmem:[%s13096_s25 + $0xe8] sm:$0xff]  ;;  %v11611_v0 = vld [vmem:[#allocation8 + $0x480] ss:$16 sps:$4 sm:$0xff]  }
 0x124   : > { %2370 = vmatmul.mubr.bf16.gmra.mrb[20].mxu0 %v9552_v2  ;;  %2822 = vmatmul.mubr.bf16.gmra.mrb[20].mxu1 %v9552_v2  ;;  %v11619_v2 = vld [vmem:[#allocation8 + $0x4a4] ss:$16 sps:$4 sm:$0xff]  }
 0x125   : > { %2421 = vmatpush1.bf16.msra.mxu0 %v11551_v4  ;;  %2873 = vmatpush1.bf16.msra.mxu1 %v11554_v5  ;;  %v9539_v4 = vcombine.high %v370_v61, %v374_v63  ;;  %v11617_v5 = vld [vmem:[#allocation8 + $0x4a0] ss:$16 sps:$4 sm:$0xff]  }
 0x126   : > { %2422 = vmatprep.subr.bf16.mxu0 %v11559_v6  ;;  %2874 = vmatprep.subr.bf16.mxu1 %v11562_v7  ;;  %v11620_v6 = vld [vmem:[#allocation8 + $0x4a8] ss:$16 sps:$4 sm:$0xff]   ;;  %v11625_v7 = vld [vmem:[#allocation8 + $0x4c4] ss:$16 sps:$4 sm:$0xff]  }
 0x127   : > { %2379 = vmatprep.mubr.bf16.mxu0 %v9561_v8  ;;  %2831 = vmatprep.mubr.bf16.mxu1 %v9561_v8  ;;  %v11628_v8 = vld [vmem:[#allocation8 + $0x4cc] ss:$16 sps:$4 sm:$0xff]  }
 0x129   : > { %2423 = vmatpush1.bf16.msra.mxu0 %v11557_v9  ;;  %2875 = vmatpush1.bf16.msra.mxu1 %v11560_v10  ;;  %v378_v9 = vld [vmem:[%s13096_s25 + $0x108] sm:$0xff]  ;;  %v9538_v10 = vcombine.low %v370_v61, %v374_v63  ;;  %v351_v61 = vld [vmem:[%s13096_s25 + $0x30] sm:$0xff] }
 0x12a   : > { %2424 = vmatprep.subr.bf16.mxu0 %v11565_v11  ;;  %2876 = vmatprep.subr.bf16.mxu1 %v11568_v12  ;;  %v382_v11 = vld [vmem:[%s13096_s25 + $0x128] sm:$0xff]  ;;  %v11623_v12 = vld [vmem:[#allocation8 + $0x4c0] ss:$16 sps:$4 sm:$0xff]  }
 0x12b   : > { %v9547_v16 = vcombine.high %v378_v9, %v382_v11  ;;  %v11682_v63 = vld [vmem:[#allocation8 + $0x5ec] ss:$16 sps:$4 sm:$0xff]  }
 0x12c   : > { %2380 = vmatmul.mubr.bf16.gmra.mrb[24].mxu0 %v9560_v15  ;;  %2832 = vmatmul.mubr.bf16.gmra.mrb[24].mxu1 %v9560_v15  ;;  %v11634_v15 = vld [vmem:[#allocation8 + $0x4ec] ss:$16 sps:$4 sm:$0xff]  }
 0x12d   : > { %2425 = vmatpush1.bf16.msra.mxu0 %v11563_v13  ;;  %2877 = vmatpush1.bf16.msra.mxu1 %v11566_v14  ;;  %v11626_v13 = vld [vmem:[#allocation8 + $0x4c8] ss:$16 sps:$4 sm:$0xff]   ;;  %v11631_v14 = vld [vmem:[#allocation8 + $0x4e4] ss:$16 sps:$4 sm:$0xff]  }
 0x12e   : > { %2426 = vmatprep.subr.bf16.mxu0 %v11571_v18  ;;  %2878 = vmatprep.subr.bf16.mxu1 %v11574_v19  ;;  %v11632_v18 = vld [vmem:[#allocation8 + $0x4e8] ss:$16 sps:$4 sm:$0xff]   ;;  %v11637_v19 = vld [vmem:[#allocation8 + $0x504] ss:$16 sps:$4 sm:$0xff]  }
 0x12f   : > { %2389 = vmatprep.mubr.bf16.mxu0 %v9569_v20  ;;  %2841 = vmatprep.mubr.bf16.mxu1 %v9569_v20  ;;  %v11640_v20 = vld [vmem:[#allocation8 + $0x50c] ss:$16 sps:$4 sm:$0xff]  }
 0x131   : > { %2427 = vmatpush1.bf16.msra.mxu0 %v11569_v21  ;;  %2879 = vmatpush1.bf16.msra.mxu1 %v11572_v22  ;;  %v11635_v21 = vld [vmem:[#allocation8 + $0x500] ss:$16 sps:$4 sm:$0xff]   ;;  %v11638_v22 = vld [vmem:[#allocation8 + $0x508] ss:$16 sps:$4 sm:$0xff]  }
 0x132   : > { %2428 = vmatprep.subr.bf16.mxu0 %v11577_v23  ;;  %2880 = vmatprep.subr.bf16.mxu1 %v11580_v24  ;;  %v9546_v23 = vcombine.low %v378_v9, %v382_v11  ;;  %v386_v24 = vld [vmem:[%s13096_s25 + $0x148] sm:$0xff]  ;;  %v359_v9 = vld [vmem:[%s13096_s25 + $0x70] sm:$0xff] }
 0x133   : > { %v11694_v11 = vld [vmem:[#allocation8 + $0x62c] ss:$16 sps:$4 sm:$0xff]  }
 0x134   : > { %2390 = vmatmul.mubr.bf16.gmra.mrb[28].mxu0 %v9568_v26  ;;  %2842 = vmatmul.mubr.bf16.gmra.mrb[28].mxu1 %v9568_v26  ;;  %v11643_v26 = vld [vmem:[#allocation8 + $0x524] ss:$16 sps:$4 sm:$0xff]  }
 0x135   : > { %2429 = vmatpush1.bf16.msra.mxu0 %v11575_v28  ;;  %2881 = vmatpush1.bf16.msra.mxu1 %v11578_v29  ;;  %v9555_v28 = vcombine.high %v386_v24, %v390_v25  ;;  %v11641_v29 = vld [vmem:[#allocation8 + $0x520] ss:$16 sps:$4 sm:$0xff]  }
 0x136   : > { %2430 = vmatprep.subr.bf16.mxu0 %v11583_v30  ;;  %2882 = vmatprep.subr.bf16.mxu1 %v11586_v31  ;;  %v11644_v30 = vld [vmem:[#allocation8 + $0x528] ss:$16 sps:$4 sm:$0xff]   ;;  %v11649_v31 = vld [vmem:[#allocation8 + $0x544] ss:$16 sps:$4 sm:$0xff]  }
 0x137   : > { %2432 = vmatprep.mubr.bf16.mxu0 %v9515_v32  ;;  %2884 = vmatprep.mubr.bf16.mxu1 %v9515_v32  ;;  %v11652_v32 = vld [vmem:[#allocation8 + $0x54c] ss:$16 sps:$4 sm:$0xff]  }
 0x139   : > { %2431 = vmatpush1.bf16.msra.mxu0 %v11581_v33  ;;  %2883 = vmatpush1.bf16.msra.mxu1 %v11584_v34  ;;  %v394_v33 = vld [vmem:[%s13096_s25 + $0x188] sm:$0xff]  ;;  %v9554_v34 = vcombine.low %v386_v24, %v390_v25  ;;  %v11701_v25 = vld [vmem:[#allocation8 + $0x660] ss:$16 sps:$4 sm:$0xff]  }
 0x13a   : > { %2513 = vmatprep.subr.bf16.mxu0 %v11589_v35  ;;  %2965 = vmatprep.subr.bf16.mxu1 %v11592_v36  ;;  %v398_v35 = vld [vmem:[%s13096_s25 + $0x1a8] sm:$0xff]  ;;  %v11647_v36 = vld [vmem:[#allocation8 + $0x540] ss:$16 sps:$4 sm:$0xff]  }
 0x13c   : > { %2433 = vmatmul.mubr.bf16.vlgmr.msra.gmra.mrb[0].mxu0 %v9514_v38  ;;  %2885 = vmatmul.mubr.bf16.vlgmr.msra.gmra.mrb[0].mxu1 %v9514_v38  ;;  %v11655_v38 = vld [vmem:[#allocation8 + $0x564] ss:$16 sps:$4 sm:$0xff]  }
 0x13d   : > { %2514 = vmatpush1.bf16.msra.mxu0 %v11587_v40  ;;  %2966 = vmatpush1.bf16.msra.mxu1 %v11590_v41  ;;  %v9563_v40 = vcombine.high %v394_v33, %v398_v35  ;;  %v11653_v41 = vld [vmem:[#allocation8 + $0x560] ss:$16 sps:$4 sm:$0xff]  }
 0x13e   : > { %2515 = vmatprep.subr.bf16.mxu0 %v11595_v42  ;;  %2967 = vmatprep.subr.bf16.mxu1 %v11598_v43  ;;  %v11656_v42 = vld [vmem:[#allocation8 + $0x568] ss:$16 sps:$4 sm:$0xff]   ;;  %v11661_v43 = vld [vmem:[#allocation8 + $0x584] ss:$16 sps:$4 sm:$0xff]  }
 0x13f   : > { %2442 = vmatprep.mubr.bf16.mxu0 %v9523_v44  ;;  %2894 = vmatprep.mubr.bf16.mxu1 %v9523_v44  ;;  %v11664_v44 = vld [vmem:[#allocation8 + $0x58c] ss:$16 sps:$4 sm:$0xff]  }
 0x141   : > { %2516 = vmatpush1.bf16.msra.mxu0 %v11593_v45  ;;  %2968 = vmatpush1.bf16.msra.mxu1 %v11596_v46  ;;  %v402_v45 = vld [vmem:[%s13096_s25 + $0x1c8] sm:$0xff]  ;;  %v9562_v46 = vcombine.low %v394_v33, %v398_v35  ;;  %v375_v33 = vld [vmem:[%s13096_s25 + $0xf0] sm:$0xff] }
 0x142   : > { %2517 = vmatprep.subr.bf16.mxu0 %v11601_v47  ;;  %2969 = vmatprep.subr.bf16.mxu1 %v11604_v48  ;;  %v406_v47 = vld [vmem:[%s13096_s25 + $0x1e8] sm:$0xff]  ;;  %v11659_v48 = vld [vmem:[#allocation8 + $0x580] ss:$16 sps:$4 sm:$0xff]  }
 0x143   : > { %v9571_v52 = vcombine.high %v402_v45, %v406_v47  ;;  %v11718_v35 = vld [vmem:[#allocation8 + $0x6ac] ss:$16 sps:$4 sm:$0xff]  }
 0x144   : > { %2443 = vmatmul.mubr.bf16.gmra.mrb[4].mxu0 %v9522_v51  ;;  %2895 = vmatmul.mubr.bf16.gmra.mrb[4].mxu1 %v9522_v51  ;;  %v11670_v51 = vld [vmem:[#allocation8 + $0x5ac] ss:$16 sps:$4 sm:$0xff]  }
 0x145   : > { %2518 = vmatpush1.bf16.msra.mxu0 %v11599_v49  ;;  %2970 = vmatpush1.bf16.msra.mxu1 %v11602_v50  ;;  %v11662_v49 = vld [vmem:[#allocation8 + $0x588] ss:$16 sps:$4 sm:$0xff]   ;;  %v11667_v50 = vld [vmem:[#allocation8 + $0x5a4] ss:$16 sps:$4 sm:$0xff]  }
 0x146   : > { %2519 = vmatprep.subr.bf16.mxu0 %v11607_v54  ;;  %2971 = vmatprep.subr.bf16.mxu1 %v11610_v55  ;;  %v11668_v54 = vld [vmem:[#allocation8 + $0x5a8] ss:$16 sps:$4 sm:$0xff]   ;;  %v11673_v55 = vld [vmem:[#allocation8 + $0x5c4] ss:$16 sps:$4 sm:$0xff]  }
 0x147   : > { %2452 = vmatprep.mubr.bf16.mxu0 %v9531_v56  ;;  %2904 = vmatprep.mubr.bf16.mxu1 %v9531_v56  ;;  %v11676_v56 = vld [vmem:[#allocation8 + $0x5cc] ss:$16 sps:$4 sm:$0xff]  }
 0x149   : > { %2520 = vmatpush1.bf16.msra.mxu0 %v11605_v57  ;;  %2972 = vmatpush1.bf16.msra.mxu1 %v11608_v58  ;;  %v11671_v57 = vld [vmem:[#allocation8 + $0x5c0] ss:$16 sps:$4 sm:$0xff]   ;;  %v11674_v58 = vld [vmem:[#allocation8 + $0x5c8] ss:$16 sps:$4 sm:$0xff]  }
 0x14a   : > { %2521 = vmatprep.subr.bf16.mxu0 %v11613_v59  ;;  %2973 = vmatprep.subr.bf16.mxu1 %v11616_v60  ;;  %v9570_v59 = vcombine.low %v402_v45, %v406_v47  ;;  %v347_v60 = vld [vmem:[%s13096_s25 + $0x10] sm:$0xff]  ;;  %v11730_v47 = vld [vmem:[#allocation8 + $0x6ec] ss:$16 sps:$4 sm:$0xff]  }
 0x14c   : > { %2453 = vmatmul.mubr.bf16.gmra.mrb[8].mxu0 %v9530_v62  ;;  %2905 = vmatmul.mubr.bf16.gmra.mrb[8].mxu1 %v9530_v62  ;;  %v11679_v62 = vld [vmem:[#allocation8 + $0x5e4] ss:$16 sps:$4 sm:$0xff]  }
 0x14d   : > { %2522 = vmatpush1.bf16.msra.mxu0 %v11611_v0  ;;  %2974 = vmatpush1.bf16.msra.mxu1 %v11614_v1  ;;  %v9517_v0 = vcombine.high %v347_v60, %v351_v61  ;;  %v11677_v1 = vld [vmem:[#allocation8 + $0x5e0] ss:$16 sps:$4 sm:$0xff]  }
 0x14e   : > { %2523 = vmatprep.subr.bf16.mxu0 %v11619_v2  ;;  %2975 = vmatprep.subr.bf16.mxu1 %v11622_v3  ;;  %v11680_v2 = vld [vmem:[#allocation8 + $0x5e8] ss:$16 sps:$4 sm:$0xff]   ;;  %v11685_v3 = vld [vmem:[#allocation8 + $0x604] ss:$16 sps:$4 sm:$0xff]  }
 0x14f   : > { %2462 = vmatprep.mubr.bf16.mxu0 %v9539_v4  ;;  %2914 = vmatprep.mubr.bf16.mxu1 %v9539_v4  ;;  %v11688_v4 = vld [vmem:[#allocation8 + $0x60c] ss:$16 sps:$4 sm:$0xff]  }
 0x151   : > { %2524 = vmatpush1.bf16.msra.mxu0 %v11617_v5  ;;  %2976 = vmatpush1.bf16.msra.mxu1 %v11620_v6  ;;  %v11683_v5 = vld [vmem:[#allocation8 + $0x600] ss:$16 sps:$4 sm:$0xff]   ;;  %v9516_v6 = vcombine.low %v347_v60, %v351_v61  ;;  %v11740_v61 = vld [vmem:[#allocation8 + $0x728] ss:$16 sps:$4 sm:$0xff]  }
 0x152   : > { %2525 = vmatprep.subr.bf16.mxu0 %v11625_v7  ;;  %2977 = vmatprep.subr.bf16.mxu1 %v11628_v8  ;;  %v11686_v7 = vld [vmem:[#allocation8 + $0x608] ss:$16 sps:$4 sm:$0xff]   ;;  %v355_v8 = vld [vmem:[%s13096_s25 + $0x50] sm:$0xff] }
 0x153   : > { %v11737_v60 = vld [vmem:[#allocation8 + $0x720] ss:$16 sps:$4 sm:$0xff]  }
 0x154   : > { %2463 = vmatmul.mubr.bf16.gmra.mrb[12].mxu0 %v9538_v10  ;;  %2915 = vmatmul.mubr.bf16.gmra.mrb[12].mxu1 %v9538_v10  ;;  %v11691_v10 = vld [vmem:[#allocation8 + $0x624] ss:$16 sps:$4 sm:$0xff]  }
 0x155   : > { %2526 = vmatpush1.bf16.msra.mxu0 %v11623_v12  ;;  %2978 = vmatpush1.bf16.msra.mxu1 %v11626_v13  ;;  %v9525_v12 = vcombine.high %v355_v8, %v359_v9  ;;  %v11689_v13 = vld [vmem:[#allocation8 + $0x620] ss:$16 sps:$4 sm:$0xff]  }
 0x156   : > { %2527 = vmatprep.subr.bf16.mxu0 %v11631_v14  ;;  %2979 = vmatprep.subr.bf16.mxu1 %v11634_v15  ;;  %v11692_v14 = vld [vmem:[#allocation8 + $0x628] ss:$16 sps:$4 sm:$0xff]   ;;  %v11697_v15 = vld [vmem:[#allocation8 + $0x644] ss:$16 sps:$4 sm:$0xff]  }
 0x157   : > { %2472 = vmatprep.mubr.bf16.mxu0 %v9547_v16  ;;  %2924 = vmatprep.mubr.bf16.mxu1 %v9547_v16  ;;  %v11700_v16 = vld [vmem:[#allocation8 + $0x64c] ss:$16 sps:$4 sm:$0xff]  }
 0x159   : > { %2528 = vmatpush1.bf16.msra.mxu0 %v11629_v17  ;;  %2980 = vmatpush1.bf16.msra.mxu1 %v11632_v18  ;;  %v11695_v17 = vld [vmem:[#allocation8 + $0x640] ss:$16 sps:$4 sm:$0xff]   ;;  %v11698_v18 = vld [vmem:[#allocation8 + $0x648] ss:$16 sps:$4 sm:$0xff]  }
 0x15a   : > { %2529 = vmatprep.subr.bf16.mxu0 %v11637_v19  ;;  %2981 = vmatprep.subr.bf16.mxu1 %v11640_v20  ;;  %v9524_v19 = vcombine.low %v355_v8, %v359_v9  ;;  %v363_v20 = vld [vmem:[%s13096_s25 + $0x90] sm:$0xff]  ;;  %v11752_v9 = vld [vmem:[#allocation8 + $0x768] ss:$16 sps:$4 sm:$0xff]  }
 0x15b   : > { %v11749_v8 = vld [vmem:[#allocation8 + $0x760] ss:$16 sps:$4 sm:$0xff]  }
 0x15c   : > { %2473 = vmatmul.mubr.bf16.gmra.mrb[16].mxu0 %v9546_v23  ;;  %2925 = vmatmul.mubr.bf16.gmra.mrb[16].mxu1 %v9546_v23  ;;  %v11706_v23 = vld [vmem:[#allocation8 + $0x66c] ss:$16 sps:$4 sm:$0xff]  }
 0x15d   : > { %2530 = vmatpush1.bf16.msra.mxu0 %v11635_v21  ;;  %2982 = vmatpush1.bf16.msra.mxu1 %v11638_v22  ;;  %v367_v21 = vld [vmem:[%s13096_s25 + $0xb0] sm:$0xff] }
 0x15e   : > { %2531 = vmatprep.subr.bf16.mxu0 %v11643_v26  ;;  %2983 = vmatprep.subr.bf16.mxu1 %v11646_v27  ;;  %v11703_v22 = vld [vmem:[#allocation8 + $0x664] ss:$16 sps:$4 sm:$0xff]   ;;  %v9533_v24 = vcombine.high %v363_v20, %v367_v21  ;;  %v11704_v26 = vld [vmem:[#allocation8 + $0x668] ss:$16 sps:$4 sm:$0xff]  }
 0x15f   : > { %2482 = vmatprep.mubr.bf16.mxu0 %v9555_v28  ;;  %2934 = vmatprep.mubr.bf16.mxu1 %v9555_v28  ;;  %v11709_v27 = vld [vmem:[#allocation8 + $0x684] ss:$16 sps:$4 sm:$0xff]   ;;  %v11712_v28 = vld [vmem:[#allocation8 + $0x68c] ss:$16 sps:$4 sm:$0xff]  }
 0x161   : > { %2532 = vmatpush1.bf16.msra.mxu0 %v11641_v29  ;;  %2984 = vmatpush1.bf16.msra.mxu1 %v11644_v30  ;;  %v11707_v29 = vld [vmem:[#allocation8 + $0x680] ss:$16 sps:$4 sm:$0xff]   ;;  %v11710_v30 = vld [vmem:[#allocation8 + $0x688] ss:$16 sps:$4 sm:$0xff]  }
 0x162   : > { %2533 = vmatprep.subr.bf16.mxu0 %v11649_v31  ;;  %2985 = vmatprep.subr.bf16.mxu1 %v11652_v32  ;;  %v9532_v31 = vcombine.low %v363_v20, %v367_v21  ;;  %v371_v32 = vld [vmem:[%s13096_s25 + $0xd0] sm:$0xff]  ;;  %v11764_v21 = vld [vmem:[#allocation8 + $0x7a8] ss:$16 sps:$4 sm:$0xff]  }
 0x163   : > { %v9540_v45 = vcombine.low %v371_v32, %v375_v33  ;;  %v11761_v20 = vld [vmem:[#allocation8 + $0x7a0] ss:$16 sps:$4 sm:$0xff]  }
 0x164   : > { %2483 = vmatmul.mubr.bf16.gmra.mrb[20].mxu0 %v9554_v34  ;;  %2935 = vmatmul.mubr.bf16.gmra.mrb[20].mxu1 %v9554_v34  ;;  %v11715_v34 = vld [vmem:[#allocation8 + $0x6a4] ss:$16 sps:$4 sm:$0xff]  }
 0x165   : > { %2534 = vmatpush1.bf16.msra.mxu0 %v11647_v36  ;;  %2986 = vmatpush1.bf16.msra.mxu1 %v11650_v37  ;;  %v11713_v36 = vld [vmem:[#allocation8 + $0x6a0] ss:$16 sps:$4 sm:$0xff]   ;;  %v11716_v37 = vld [vmem:[#allocation8 + $0x6a8] ss:$16 sps:$4 sm:$0xff]  }
 0x166   : > { %2535 = vmatprep.subr.bf16.mxu0 %v11655_v38  ;;  %2987 = vmatprep.subr.bf16.mxu1 %v11658_v39  ;;  %v9541_v38 = vcombine.high %v371_v32, %v375_v33  ;;  %v11721_v39 = vld [vmem:[#allocation8 + $0x6c4] ss:$16 sps:$4 sm:$0xff]   ;;  %v11773_v32 = vld [vmem:[#allocation8 + $0x7e0] ss:$16 sps:$4 sm:$0xff]   ;;  %v11776_v33 = vld [vmem:[#allocation8 + $0x7e8] ss:$16 sps:$4 sm:$0xff]  }
 0x167   : > { %2492 = vmatprep.mubr.bf16.mxu0 %v9563_v40  ;;  %2944 = vmatprep.mubr.bf16.mxu1 %v9563_v40  ;;  %v11724_v40 = vld [vmem:[#allocation8 + $0x6cc] ss:$16 sps:$4 sm:$0xff]  }
 0x169   : > { %2536 = vmatpush1.bf16.msra.mxu0 %v11653_v41  ;;  %2988 = vmatpush1.bf16.msra.mxu1 %v11656_v42  ;;  %v379_v41 = vld [vmem:[%s13096_s25 + $0x110] sm:$0xff] }
 0x16a   : > { %2537 = vmatprep.subr.bf16.mxu0 %v11661_v43  ;;  %2989 = vmatprep.subr.bf16.mxu1 %v11664_v44  ;;  %v383_v42 = vld [vmem:[%s13096_s25 + $0x130] sm:$0xff]  ;;  %v11722_v44 = vld [vmem:[#allocation8 + $0x6c8] ss:$16 sps:$4 sm:$0xff]  }
 0x16b   : > { %v11719_v43 = vld [vmem:[#allocation8 + $0x6c0] ss:$16 sps:$4 sm:$0xff]  }
 0x16c   : > { %2493 = vmatmul.mubr.bf16.gmra.mrb[24].mxu0 %v9562_v46  ;;  %2945 = vmatmul.mubr.bf16.gmra.mrb[24].mxu1 %v9562_v46  ;;  %v11727_v46 = vld [vmem:[#allocation8 + $0x6e4] ss:$16 sps:$4 sm:$0xff]  }
 0x16d   : > { %2538 = vmatpush1.bf16.msra.mxu0 %v11659_v48  ;;  %2990 = vmatpush1.bf16.msra.mxu1 %v11662_v49  ;;  %v11725_v48 = vld [vmem:[#allocation8 + $0x6e0] ss:$16 sps:$4 sm:$0xff]   ;;  %v11728_v49 = vld [vmem:[#allocation8 + $0x6e8] ss:$16 sps:$4 sm:$0xff]  }
 0x16e   : > { %2539 = vmatprep.subr.bf16.mxu0 %v11667_v50  ;;  %2991 = vmatprep.subr.bf16.mxu1 %v11670_v51  ;;  %v9549_v50 = vcombine.high %v379_v41, %v383_v42  ;;  %v11733_v51 = vld [vmem:[#allocation8 + $0x704] ss:$16 sps:$4 sm:$0xff]  }
 0x16f   : > { %2502 = vmatprep.mubr.bf16.mxu0 %v9571_v52  ;;  %2954 = vmatprep.mubr.bf16.mxu1 %v9571_v52  ;;  %v11736_v52 = vld [vmem:[#allocation8 + $0x70c] ss:$16 sps:$4 sm:$0xff]  }
 0x171   : > { %2540 = vmatpush1.bf16.msra.mxu0 %v11665_v53  ;;  %2992 = vmatpush1.bf16.msra.mxu1 %v11668_v54  ;;  %v387_v53 = vld [vmem:[%s13096_s25 + $0x150] sm:$0xff] }
 0x172   : > { %2541 = vmatprep.subr.bf16.mxu0 %v11673_v55  ;;  %2993 = vmatprep.subr.bf16.mxu1 %v11676_v56  ;;  %v391_v54 = vld [vmem:[%s13096_s25 + $0x170] sm:$0xff]  ;;  %v11734_v56 = vld [vmem:[#allocation8 + $0x708] ss:$16 sps:$4 sm:$0xff]  }
 0x173   : > { %v11731_v55 = vld [vmem:[#allocation8 + $0x700] ss:$16 sps:$4 sm:$0xff]  }
 0x174   : > { %2503 = vmatmul.mubr.bf16.gmra.mrb[28].mxu0 %v9570_v59  ;;  %2955 = vmatmul.mubr.bf16.gmra.mrb[28].mxu1 %v9570_v59  ;;  %v11742_v59 = vld [vmem:[#allocation8 + $0x72c] ss:$16 sps:$4 sm:$0xff]  }
 0x175   : > { %2542 = vmatpush1.bf16.msra.mxu0 %v11671_v57  ;;  %2994 = vmatpush1.bf16.msra.mxu1 %v11674_v58  ;;  %v9548_v57 = vcombine.low %v379_v41, %v383_v42  ;;  %v11739_v58 = vld [vmem:[#allocation8 + $0x724] ss:$16 sps:$4 sm:$0xff]   ;;  %v364_v42 = vld [vmem:[%s13096_s25 + $0x98] sm:$0xff] }
 0x176   : > { %2543 = vmatprep.subr.bf16.mxu0 %v11679_v62  ;;  %2995 = vmatprep.subr.bf16.mxu1 %v11682_v63  ;;  %v9557_v62 = vcombine.high %v387_v53, %v391_v54  ;;  %v11745_v63 = vld [vmem:[#allocation8 + $0x744] ss:$16 sps:$4 sm:$0xff]  }
 0x177   : > { %2545 = vmatprep.mubr.bf16.mxu0 %v9517_v0  ;;  %2997 = vmatprep.mubr.bf16.mxu1 %v9517_v0  ;;  %v11748_v0 = vld [vmem:[#allocation8 + $0x74c] ss:$16 sps:$4 sm:$0xff]  }
 0x178   : > { %v11784_v41 = vld [vmem:[#allocation7 + $0x14] ss:$8 sps:$4 sm:$0xff]  }
 0x179   : > { %2544 = vmatpush1.bf16.msra.mxu0 %v11677_v1  ;;  %2996 = vmatpush1.bf16.msra.mxu1 %v11680_v2  ;;  %v395_v1 = vld [vmem:[%s13096_s25 + $0x190] sm:$0xff] }
 0x17a   : > { %2626 = vmatprep.subr.bf16.mxu0 %v11685_v3  ;;  %3078 = vmatprep.subr.bf16.mxu1 %v11688_v4  ;;  %v399_v2 = vld [vmem:[%s13096_s25 + $0x1b0] sm:$0xff]  ;;  %v11746_v4 = vld [vmem:[#allocation8 + $0x748] ss:$16 sps:$4 sm:$0xff]  }
 0x17b   : > { %v11743_v3 = vld [vmem:[#allocation8 + $0x740] ss:$16 sps:$4 sm:$0xff]  }
 0x17c   : > { %2546 = vmatmul.mubr.bf16.vlgmr.msra.gmra.mrb[0].mxu0 %v9516_v6  ;;  %2998 = vmatmul.mubr.bf16.vlgmr.msra.gmra.mrb[0].mxu1 %v9516_v6  ;;  %v11751_v6 = vld [vmem:[#allocation8 + $0x764] ss:$16 sps:$4 sm:$0xff]  }
 0x17d   : > { %2627 = vmatpush1.bf16.msra.mxu0 %v11683_v5  ;;  %3079 = vmatpush1.bf16.msra.mxu1 %v11686_v7  ;;  %v9556_v5 = vcombine.low %v387_v53, %v391_v54  ;;  %v11754_v7 = vld [vmem:[#allocation8 + $0x76c] ss:$16 sps:$4 sm:$0xff]  }
 0x17e   : > { %2628 = vmatprep.subr.bf16.mxu0 %v11691_v10  ;;  %3080 = vmatprep.subr.bf16.mxu1 %v11694_v11  ;;  %v9565_v10 = vcombine.high %v395_v1, %v399_v2  ;;  %v11757_v11 = vld [vmem:[#allocation8 + $0x784] ss:$16 sps:$4 sm:$0xff]  }
 0x17f   : > { %2555 = vmatprep.mubr.bf16.mxu0 %v9525_v12  ;;  %3007 = vmatprep.mubr.bf16.mxu1 %v9525_v12  ;;  %v11760_v12 = vld [vmem:[#allocation8 + $0x78c] ss:$16 sps:$4 sm:$0xff]  }
 0x180   : > { %v11793_v53 = vld [vmem:[#allocation7 + $0x44] ss:$8 sps:$4 sm:$0xff]  }
 0x181   : > { %2629 = vmatpush1.bf16.msra.mxu0 %v11689_v13  ;;  %3081 = vmatpush1.bf16.msra.mxu1 %v11692_v14  ;;  %v403_v13 = vld [vmem:[%s13096_s25 + $0x1d0] sm:$0xff] }
 0x182   : > { %2630 = vmatprep.subr.bf16.mxu0 %v11697_v15  ;;  %3082 = vmatprep.subr.bf16.mxu1 %v11700_v16  ;;  %v407_v14 = vld [vmem:[%s13096_s25 + $0x1f0] sm:$0xff]  ;;  %v11758_v16 = vld [vmem:[#allocation8 + $0x788] ss:$16 sps:$4 sm:$0xff]  }
 0x183   : > { %v11755_v15 = vld [vmem:[#allocation8 + $0x780] ss:$16 sps:$4 sm:$0xff]  }
 0x184   : > { %2556 = vmatmul.mubr.bf16.gmra.mrb[4].mxu0 %v9524_v19  ;;  %3008 = vmatmul.mubr.bf16.gmra.mrb[4].mxu1 %v9524_v19  ;;  %v11766_v19 = vld [vmem:[#allocation8 + $0x7ac] ss:$16 sps:$4 sm:$0xff]  }
 0x185   : > { %2631 = vmatpush1.bf16.msra.mxu0 %v11695_v17  ;;  %3083 = vmatpush1.bf16.msra.mxu1 %v11698_v18  ;;  %v9564_v17 = vcombine.low %v395_v1, %v399_v2  ;;  %v11763_v18 = vld [vmem:[#allocation8 + $0x7a4] ss:$16 sps:$4 sm:$0xff]   ;;  %v388_v2 = vld [vmem:[%s13096_s25 + $0x158] sm:$0xff] }
 0x186   : > { %2632 = vmatprep.subr.bf16.mxu0 %v11703_v22  ;;  %3084 = vmatprep.subr.bf16.mxu1 %v11706_v23  ;;  %v9573_v22 = vcombine.high %v403_v13, %v407_v14  ;;  %v11769_v23 = vld [vmem:[#allocation8 + $0x7c4] ss:$16 sps:$4 sm:$0xff]  }
 0x187   : > { %2565 = vmatprep.mubr.bf16.mxu0 %v9533_v24  ;;  %3017 = vmatprep.mubr.bf16.mxu1 %v9533_v24  ;;  %v11772_v24 = vld [vmem:[#allocation8 + $0x7cc] ss:$16 sps:$4 sm:$0xff]  }
 0x188   : > { %v11802_v1 = vld [vmem:[#allocation7 + $0x74] ss:$8 sps:$4 sm:$0xff]  }
 0x189   : > { %2633 = vmatpush1.bf16.msra.mxu0 %v11701_v25  ;;  %3085 = vmatpush1.bf16.msra.mxu1 %v11704_v26  ;;  %v348_v25 = vld [vmem:[%s13096_s25 + $0x18] sm:$0xff] }
 0x18a   : > { %2634 = vmatprep.subr.bf16.mxu0 %v11709_v27  ;;  %3086 = vmatprep.subr.bf16.mxu1 %v11712_v28  ;;  %v352_v26 = vld [vmem:[%s13096_s25 + $0x38] sm:$0xff]  ;;  %v11767_v27 = vld [vmem:[#allocation8 + $0x7c0] ss:$16 sps:$4 sm:$0xff]  }
 0x18b   : > { %v11770_v28 = vld [vmem:[#allocation8 + $0x7c8] ss:$16 sps:$4 sm:$0xff]  }
 0x18c   : > { %2566 = vmatmul.mubr.bf16.gmra.mrb[8].mxu0 %v9532_v31  ;;  %3018 = vmatmul.mubr.bf16.gmra.mrb[8].mxu1 %v9532_v31  ;;  %v11778_v31 = vld [vmem:[#allocation8 + $0x7ec] ss:$16 sps:$4 sm:$0xff]  }
 0x18d   : > { %2635 = vmatpush1.bf16.msra.mxu0 %v11707_v29  ;;  %3087 = vmatpush1.bf16.msra.mxu1 %v11710_v30  ;;  %v9572_v29 = vcombine.low %v403_v13, %v407_v14  ;;  %v11775_v30 = vld [vmem:[#allocation8 + $0x7e4] ss:$16 sps:$4 sm:$0xff]  }
 0x18e   : > { %2636 = vmatprep.subr.bf16.mxu0 %v11715_v34  ;;  %3088 = vmatprep.subr.bf16.mxu1 %v11718_v35  ;;  %v9519_v34 = vcombine.high %v348_v25, %v352_v26  ;;  %v356_v35 = vld [vmem:[%s13096_s25 + $0x58] sm:$0xff]  ;;  %v11811_v13 = vld [vmem:[#allocation7 + $0xa4] ss:$8 sps:$4 sm:$0xff]  }
 0x18f   : > { %2575 = vmatprep.mubr.bf16.mxu0 %v9541_v38  ;;  %3027 = vmatprep.mubr.bf16.mxu1 %v9541_v38  ;;  %v9518_v38 = vcombine.low %v348_v25, %v352_v26  ;;  %v11820_v25 = vld [vmem:[#allocation7 + $0xd4] ss:$8 sps:$4 sm:$0xff]   ;;  %v11818_v26 = vld [vmem:[#allocation7 + $0xd0] ss:$8 sps:$4 sm:$0xff]  }
 0x191   : > { %2637 = vmatpush1.bf16.msra.mxu0 %v11713_v36  ;;  %3089 = vmatpush1.bf16.msra.mxu1 %v11716_v37  ;;  %v360_v36 = vld [vmem:[%s13096_s25 + $0x78] sm:$0xff]  ;;  %v11781_v37 = vld [vmem:[#allocation7 + $0x4] ss:$8 sps:$4 sm:$0xff]  }
 0x192   : > { %2638 = vmatprep.subr.bf16.mxu0 %v11721_v39  ;;  %3090 = vmatprep.subr.bf16.mxu1 %v11724_v40  ;;  %v11779_v39 = vld [vmem:[#allocation7] ss:$8 sps:$4 sm:$0xff]   ;;  %v9527_v40 = vcombine.high %v356_v35, %v360_v36 }
 0x194   : > { %2576 = vmatmul.mubr.bf16.gmra.mrb[12].mxu0 %v9540_v45  ;;  %3028 = vmatmul.mubr.bf16.gmra.mrb[12].mxu1 %v9540_v45  ;;  %v11787_v45 = vld [vmem:[#allocation7 + $0x24] ss:$8 sps:$4 sm:$0xff]  }
 0x195   : > { %2639 = vmatpush1.bf16.msra.mxu0 %v11719_v43  ;;  %3091 = vmatpush1.bf16.msra.mxu1 %v11722_v44  ;;  %v368_v43 = vld [vmem:[%s13096_s25 + $0xb8] sm:$0xff] }
 0x196   : > { %2640 = vmatprep.subr.bf16.mxu0 %v11727_v46  ;;  %3092 = vmatprep.subr.bf16.mxu1 %v11730_v47  ;;  %v11782_v44 = vld [vmem:[#allocation7 + $0x10] ss:$8 sps:$4 sm:$0xff]   ;;  %v9526_v46 = vcombine.low %v356_v35, %v360_v36  ;;  %v11785_v47 = vld [vmem:[#allocation7 + $0x20] ss:$8 sps:$4 sm:$0xff]   ;;  %v9534_v54 = vcombine.low %v364_v42, %v368_v43 }
 0x197   : > { %2585 = vmatprep.mubr.bf16.mxu0 %v9549_v50  ;;  %3037 = vmatprep.mubr.bf16.mxu1 %v9549_v50  ;;  %v372_v50 = vld [vmem:[%s13096_s25 + $0xd8] sm:$0xff] }
 0x199   : > { %2641 = vmatpush1.bf16.msra.mxu0 %v11725_v48  ;;  %3093 = vmatpush1.bf16.msra.mxu1 %v11728_v49  ;;  %v9535_v48 = vcombine.high %v364_v42, %v368_v43  ;;  %v11790_v49 = vld [vmem:[#allocation7 + $0x34] ss:$8 sps:$4 sm:$0xff]  }
 0x19a   : > { %2642 = vmatprep.subr.bf16.mxu0 %v11733_v51  ;;  %3094 = vmatprep.subr.bf16.mxu1 %v11736_v52  ;;  %v376_v51 = vld [vmem:[%s13096_s25 + $0xf8] sm:$0xff] }
 0x19b   : > { %v11788_v52 = vld [vmem:[#allocation7 + $0x30] ss:$8 sps:$4 sm:$0xff]  }
 0x19c   : > { %2586 = vmatmul.mubr.bf16.gmra.mrb[16].mxu0 %v9548_v57  ;;  %3038 = vmatmul.mubr.bf16.gmra.mrb[16].mxu1 %v9548_v57  ;;  %v11796_v57 = vld [vmem:[#allocation7 + $0x54] ss:$8 sps:$4 sm:$0xff]  }
 0x19d   : > { %2643 = vmatpush1.bf16.msra.mxu0 %v11731_v55  ;;  %3095 = vmatpush1.bf16.msra.mxu1 %v11734_v56  ;;  %v11791_v55 = vld [vmem:[#allocation7 + $0x40] ss:$8 sps:$4 sm:$0xff]   ;;  %v9543_v56 = vcombine.high %v372_v50, %v376_v51 }
 0x19e   : > { %2644 = vmatprep.subr.bf16.mxu0 %v11739_v58  ;;  %3096 = vmatprep.subr.bf16.mxu1 %v11742_v59  ;;  %v380_v58 = vld [vmem:[%s13096_s25 + $0x118] sm:$0xff] }
 0x19f   : > { %2595 = vmatprep.mubr.bf16.mxu0 %v9557_v62  ;;  %3047 = vmatprep.mubr.bf16.mxu1 %v9557_v62  ;;  %v384_v59 = vld [vmem:[%s13096_s25 + $0x138] sm:$0xff]  ;;  %v9542_v62 = vcombine.low %v372_v50, %v376_v51 }
 0x1a1   : > { %2645 = vmatpush1.bf16.msra.mxu0 %v11737_v60  ;;  %3097 = vmatpush1.bf16.msra.mxu1 %v11740_v61  ;;  %v11794_v60 = vld [vmem:[#allocation7 + $0x50] ss:$8 sps:$4 sm:$0xff]   ;;  %v11799_v61 = vld [vmem:[#allocation7 + $0x64] ss:$8 sps:$4 sm:$0xff]  }
 0x1a2   : > { %2646 = vmatprep.subr.bf16.mxu0 %v11745_v63  ;;  %3098 = vmatprep.subr.bf16.mxu1 %v11748_v0  ;;  %v9551_v63 = vcombine.high %v380_v58, %v384_v59  ;;  %v11797_v0 = vld [vmem:[#allocation7 + $0x60] ss:$8 sps:$4 sm:$0xff]  }
 0x1a4   : > { %2596 = vmatmul.mubr.bf16.gmra.mrb[20].mxu0 %v9556_v5  ;;  %3048 = vmatmul.mubr.bf16.gmra.mrb[20].mxu1 %v9556_v5  ;;  %v11805_v5 = vld [vmem:[#allocation7 + $0x84] ss:$8 sps:$4 sm:$0xff]  }
 0x1a5   : > { %2647 = vmatpush1.bf16.msra.mxu0 %v11743_v3  ;;  %3099 = vmatpush1.bf16.msra.mxu1 %v11746_v4  ;;  %v392_v3 = vld [vmem:[%s13096_s25 + $0x178] sm:$0xff] }
 0x1a6   : > { %2648 = vmatprep.subr.bf16.mxu0 %v11751_v6  ;;  %3100 = vmatprep.subr.bf16.mxu1 %v11754_v7  ;;  %v11800_v4 = vld [vmem:[#allocation7 + $0x70] ss:$8 sps:$4 sm:$0xff]   ;;  %v9550_v6 = vcombine.low %v380_v58, %v384_v59  ;;  %v9559_v7 = vcombine.high %v388_v2, %v392_v3  ;;  %v9558_v14 = vcombine.low %v388_v2, %v392_v3  ;;  %v11875_v58 = vld [vmem:[#allocation5 + $0x40] sm:$0xff]  }
 0x1a7   : > { %2605 = vmatprep.mubr.bf16.mxu0 %v9565_v10  ;;  %3057 = vmatprep.mubr.bf16.mxu1 %v9565_v10  ;;  %v396_v10 = vld [vmem:[%s13096_s25 + $0x198] sm:$0xff]  ;;  %v11876_v59 = vld [vmem:[#allocation5] sm:$0xff]  }
 0x1a9   : > { %2649 = vmatpush1.bf16.msra.mxu0 %v11749_v8  ;;  %3101 = vmatpush1.bf16.msra.mxu1 %v11752_v9  ;;  %v11803_v8 = vld [vmem:[#allocation7 + $0x80] ss:$8 sps:$4 sm:$0xff]   ;;  %v11808_v9 = vld [vmem:[#allocation7 + $0x94] ss:$8 sps:$4 sm:$0xff]  }
 0x1aa   : > { %2650 = vmatprep.subr.bf16.mxu0 %v11757_v11  ;;  %3102 = vmatprep.subr.bf16.mxu1 %v11760_v12  ;;  %v400_v11 = vld [vmem:[%s13096_s25 + $0x1b8] sm:$0xff] }
 0x1ab   : > { %v11806_v12 = vld [vmem:[#allocation7 + $0x90] ss:$8 sps:$4 sm:$0xff]  }
 0x1ac   : > { %2606 = vmatmul.mubr.bf16.gmra.mrb[24].mxu0 %v9564_v17  ;;  %3058 = vmatmul.mubr.bf16.gmra.mrb[24].mxu1 %v9564_v17  ;;  %v11814_v17 = vld [vmem:[#allocation7 + $0xb4] ss:$8 sps:$4 sm:$0xff]  }
 0x1ad   : > { %2651 = vmatpush1.bf16.msra.mxu0 %v11755_v15  ;;  %3103 = vmatpush1.bf16.msra.mxu1 %v11758_v16  ;;  %v9567_v15 = vcombine.high %v396_v10, %v400_v11  ;;  %v11809_v16 = vld [vmem:[#allocation7 + $0xa0] ss:$8 sps:$4 sm:$0xff]  }
 0x1ae   : > { %2652 = vmatprep.subr.bf16.mxu0 %v11763_v18  ;;  %3104 = vmatprep.subr.bf16.mxu1 %v11766_v19  ;;  %v404_v18 = vld [vmem:[%s13096_s25 + $0x1d8] sm:$0xff] }
 0x1af   : > { %2615 = vmatprep.mubr.bf16.mxu0 %v9573_v22  ;;  %3067 = vmatprep.mubr.bf16.mxu1 %v9573_v22  ;;  %v408_v19 = vld [vmem:[%s13096_s25 + $0x1f8] sm:$0xff]  ;;  %v9566_v22 = vcombine.low %v396_v10, %v400_v11  ;;  %v11879_v10 = vld [vmem:[#allocation5 + $0x50] sm:$0xff]  }
 0x1b1   : > { %2653 = vmatpush1.bf16.msra.mxu0 %v11761_v20  ;;  %3105 = vmatpush1.bf16.msra.mxu1 %v11764_v21  ;;  %v11812_v20 = vld [vmem:[#allocation7 + $0xb0] ss:$8 sps:$4 sm:$0xff]   ;;  %v11817_v21 = vld [vmem:[#allocation7 + $0xc4] ss:$8 sps:$4 sm:$0xff]  }
 0x1b2   : > { %2654 = vmatprep.subr.bf16.mxu0 %v11769_v23  ;;  %3106 = vmatprep.subr.bf16.mxu1 %v11772_v24  ;;  %v9575_v23 = vcombine.high %v404_v18, %v408_v19  ;;  %v11815_v24 = vld [vmem:[#allocation7 + $0xc0] ss:$8 sps:$4 sm:$0xff]  }
 0x1b4   : > { %2616 = vmatmul.mubr.bf16.gmra.mrb[28].mxu0 %v9572_v29  ;;  %3068 = vmatmul.mubr.bf16.gmra.mrb[28].mxu1 %v9572_v29  ;;  %v11821_v29 = vld [vmem:[#allocation7 + $0xe0] ss:$8 sps:$4 sm:$0xff]  }
 0x1b5   : > { %2655 = vmatpush1.bf16.msra.mxu0 %v11767_v27  ;;  %3107 = vmatpush1.bf16.msra.mxu1 %v11770_v28  ;;  %v9574_v27 = vcombine.low %v404_v18, %v408_v19  ;;  %v11823_v28 = vld [vmem:[#allocation7 + $0xe4] ss:$8 sps:$4 sm:$0xff]  }
 0x1b6   : > { %2656 = vmatprep.subr.bf16.mxu0 %v11775_v30  ;;  %3108 = vmatprep.subr.bf16.mxu1 %v11778_v31  ;;  %v11826_v30 = vld [vmem:[#allocation7 + $0xf4] ss:$8 sps:$4 sm:$0xff]   ;;  %v11824_v31 = vld [vmem:[#allocation7 + $0xf0] ss:$8 sps:$4 sm:$0xff]  }
 0x1b7   : > { %2658 = vmatprep.mubr.bf16.mxu0 %v9519_v34  ;;  %3110 = vmatprep.mubr.bf16.mxu1 %v9519_v34 }
 0x1b9   : > { %2657 = vmatpush1.bf16.msra.mxu0 %v11773_v32  ;;  %3109 = vmatpush1.bf16.msra.mxu1 %v11776_v33  ;;  %v11829_v32 = vld [vmem:[#allocation7 + $0x104] ss:$8 sps:$4 sm:$0xff]   ;;  %v667_v33 = vlaneseq }
 0x1ba   : > { %3683 = vmatprep.subr.bf16.mxu0 %v11781_v37  ;;  %v665_v37 = vld [vmem:[#allocation11] sm:$0xf]  ;;  %10423 = vmatprep.subr.bf16.mxu1 %v11875_v58 }
 0x1bb   : > { %v13178_v34 = vshrl.u32 %v667_v33, 7  ;;  %v11830_v33 = vld [vmem:[#allocation7 + $0x110] ss:$8 sps:$4 sm:$0xff]  }
 0x1bc   : > { %2659 = vmatmul.mubr.bf16.vlgmr.msra.gmra.mrb[0].mxu0 %v9518_v38  ;;  %3111 = vmatmul.mubr.bf16.vlgmr.msra.gmra.mrb[0].mxu1 %v9518_v38 }
 0x1bd   : > { %2668 = vmatprep.mubr.bf16.mxu0 %v9527_v40  ;;  %3120 = vmatprep.mubr.bf16.mxu1 %v9527_v40  ;;  %14754 = vst [vmem:[#allocation19_spill] sm:$0xff] %v13178_v34  ;;  %v13181_v35 = vsub.s32 0, %v13178_v34  ;;  %v13184_v36 = vsub.s32 2, %v13178_v34  ;;  %v13187_v38 = vsub.s32 1, %v13178_v34 }
 0x1be   : > { %3684 = vmatpush1.bf16.msra.mxu0 %v11779_v39  ;;  %v13190_v39 = vsub.s32 3, %v13178_v34  ;;  %10424 = vmatpush3.bf16.msra.mxu1 %v11876_v59 }
 0x1bf   : > { %3685 = vmatprep.subr.bf16.mxu0 %v11784_v41  ;;  %14755 = vst [vmem:[#allocation20_spill] sm:$0xff] %v13181_v35  ;;  %14756 = vst [vmem:[#allocation21_spill] sm:$0xff] %v13184_v36  ;;  %v13193_v40 = vrot.slane %v665_v37, %v13181_v35  ;;  %v13196_v41 = vrot.slane %v665_v37, %v13184_v36  ;;  %v13199_v42 = vrot.slane %v665_v37, %v13187_v38 }
 0x1c0   : > { %14757 = vst [vmem:[#allocation22_spill] sm:$0xff] %v13187_v38  ;;  %14758 = vst [vmem:[#allocation23_spill] sm:$0xff] %v13190_v39  ;;  %v13202_v43 = vrot.slane %v665_v37, %v13190_v39 }
 0x1c2   : > { %3686 = vmatpush1.bf16.msra.mxu0 %v11782_v44 }
 0x1c3   : > { %3687 = vmatprep.subr.bf16.mxu0 %v11787_v45 }
 0x1c4   : > { %2669 = vmatmul.mubr.bf16.gmra.mrb[4].mxu0 %v9526_v46  ;;  %3121 = vmatmul.mubr.bf16.gmra.mrb[4].mxu1 %v9526_v46 }
 0x1c5   : > { %2678 = vmatprep.mubr.bf16.mxu0 %v9535_v48  ;;  %3130 = vmatprep.mubr.bf16.mxu1 %v9535_v48 }
 0x1c6   : > { %3688 = vmatpush1.bf16.msra.mxu0 %v11785_v47 }
 0x1c7   : > { %3689 = vmatprep.subr.bf16.mxu0 %v11790_v49 }
 0x1ca   : > { %3690 = vmatpush1.bf16.msra.mxu0 %v11788_v52 }
 0x1cb   : > { %3691 = vmatprep.subr.bf16.mxu0 %v11793_v53 }
 0x1cc   : > { %2679 = vmatmul.mubr.bf16.gmra.mrb[8].mxu0 %v9534_v54  ;;  %3131 = vmatmul.mubr.bf16.gmra.mrb[8].mxu1 %v9534_v54 }
 0x1cd   : > { %2688 = vmatprep.mubr.bf16.mxu0 %v9543_v56  ;;  %3140 = vmatprep.mubr.bf16.mxu1 %v9543_v56 }
 0x1ce   : > { %3692 = vmatpush1.bf16.msra.mxu0 %v11791_v55 }
 0x1cf   : > { %3693 = vmatprep.subr.bf16.mxu0 %v11796_v57 }
 0x1d2   : > { %3694 = vmatpush1.bf16.msra.mxu0 %v11794_v60 }
 0x1d3   : > { %3695 = vmatprep.subr.bf16.mxu0 %v11799_v61 }
 0x1d4   : > { %2689 = vmatmul.mubr.bf16.gmra.mrb[12].mxu0 %v9542_v62  ;;  %3141 = vmatmul.mubr.bf16.gmra.mrb[12].mxu1 %v9542_v62  ;;  %v11877_v62 = vld [vmem:[#allocation5 + $0x48] sm:$0xff]  }
 0x1d5   : > { %2698 = vmatprep.mubr.bf16.mxu0 %v9551_v63  ;;  %3150 = vmatprep.mubr.bf16.mxu1 %v9551_v63 }
 0x1d6   : > { %3696 = vmatpush1.bf16.msra.mxu0 %v11797_v0  ;;  %10425 = vmatprep.subr.bf16.mxu1 %v11877_v62 }
 0x1d7   : > { %3697 = vmatprep.subr.bf16.mxu0 %v11802_v1 }
 0x1da   : > { %3698 = vmatpush1.bf16.msra.mxu0 %v11800_v4 }
 0x1db   : > { %3699 = vmatprep.subr.bf16.mxu0 %v11805_v5 }
 0x1dc   : > { %2699 = vmatmul.mubr.bf16.gmra.mrb[16].mxu0 %v9550_v6  ;;  %3151 = vmatmul.mubr.bf16.gmra.mrb[16].mxu1 %v9550_v6 }
 0x1dd   : > { %2708 = vmatprep.mubr.bf16.mxu0 %v9559_v7  ;;  %3160 = vmatprep.mubr.bf16.mxu1 %v9559_v7  ;;  %v11878_v7 = vld [vmem:[#allocation5 + $0x8] sm:$0xff]  }
 0x1de   : > { %3700 = vmatpush1.bf16.msra.mxu0 %v11803_v8  ;;  %10426 = vmatpush3.bf16.msra.mxu1 %v11878_v7 }
 0x1df   : > { %3701 = vmatprep.subr.bf16.mxu0 %v11808_v9  ;;  %10427 = vmatprep.subr.bf16.mxu1 %v11879_v10 }
 0x1e2   : > { %3702 = vmatpush1.bf16.msra.mxu0 %v11806_v12 }
 0x1e3   : > { %3703 = vmatprep.subr.bf16.mxu0 %v11811_v13 }
 0x1e4   : > { %2709 = vmatmul.mubr.bf16.gmra.mrb[20].mxu0 %v9558_v14  ;;  %3161 = vmatmul.mubr.bf16.gmra.mrb[20].mxu1 %v9558_v14 }
 0x1e5   : > { %2718 = vmatprep.mubr.bf16.mxu0 %v9567_v15  ;;  %3170 = vmatprep.mubr.bf16.mxu1 %v9567_v15  ;;  %v11827_v15 = vld [vmem:[#allocation7 + $0x100] ss:$8 sps:$4 sm:$0xff]  }
 0x1e6   : > { %3704 = vmatpush1.bf16.msra.mxu0 %v11809_v16 }
 0x1e7   : > { %3705 = vmatprep.subr.bf16.mxu0 %v11814_v17 }
 0x1ea   : > { %3706 = vmatpush1.bf16.msra.mxu0 %v11812_v20  ;;  %v11832_v20 = vld [vmem:[#allocation7 + $0x114] ss:$8 sps:$4 sm:$0xff]  }
 0x1eb   : > { %3707 = vmatprep.subr.bf16.mxu0 %v11817_v21 }
 0x1ec   : > { %2719 = vmatmul.mubr.bf16.gmra.mrb[24].mxu0 %v9566_v22  ;;  %3171 = vmatmul.mubr.bf16.gmra.mrb[24].mxu1 %v9566_v22 }
 0x1ed   : > { %2728 = vmatprep.mubr.bf16.mxu0 %v9575_v23  ;;  %3180 = vmatprep.mubr.bf16.mxu1 %v9575_v23 }
 0x1ee   : > { %3708 = vmatpush1.bf16.msra.mxu0 %v11815_v24 }
 0x1ef   : > { %3709 = vmatprep.subr.bf16.mxu0 %v11820_v25  ;;  %v11880_v25 = vld [vmem:[#allocation5 + $0x10] sm:$0xff]  }
 0x1f0   : > { %10428 = vmatpush3.bf16.msra.mxu1 %v11880_v25 }
 0x1f2   : > { %3710 = vmatpush1.bf16.msra.mxu0 %v11818_v26 }
 0x1f3   : > { %3711 = vmatprep.subr.bf16.mxu0 %v11823_v28 }
 0x1f4   : > { %2729 = vmatmul.mubr.bf16.gmra.mrb[28].mxu0 %v9574_v27  ;;  %3181 = vmatmul.mubr.bf16.gmra.mrb[28].mxu1 %v9574_v27 }
 0x1f6   : > { %3712 = vmatpush1.bf16.msra.mxu0 %v11821_v29 }
 0x1f7   : > { %3713 = vmatprep.subr.bf16.mxu0 %v11826_v30  ;;  %v11881_v30 = vld [vmem:[#allocation5 + $0x58] sm:$0xff]  }
 0x1f8   : > { %10429 = vmatprep.subr.bf16.mxu1 %v11881_v30 }
 0x1fa   : > { %3714 = vmatpush1.bf16.msra.mxu0 %v11824_v31 }
 0x1fb   : > { %3796 = vmatprep.subr.bf16.mxu0 %v11829_v32 }
 0x28f   : > { %v2660_v44 = vpop.f32.mrb[0].mxu0  ;;  %v3112_v45 = vpop.f32.mrb[0].mxu1 }
 0x290   : > { %v10711_v46 = vadd.f32 %v2660_v44, %v13193_v40  ;;  %v10743_v47 = vadd.f32 %v3112_v45, %v13196_v41  ;;  %v2662_v48 = vpop.f32.mrb[1].mxu0  ;;  %v3114_v49 = vpop.f32.mrb[1].mxu1 }
 0x291   : > { %v10712_v50 = vadd.f32 %v2662_v48, %v13199_v42  ;;  %v10744_v51 = vadd.f32 %v3114_v49, %v13202_v43  ;;  %v2664_v52 = vpop.f32.mrb[2].mxu0  ;;  %v3116_v53 = vpop.f32.mrb[2].mxu1 }
 0x292   : > { %v10713_v54 = vadd.f32 %v2664_v52, %v13193_v40  ;;  %v10745_v55 = vadd.f32 %v3116_v53, %v13196_v41  ;;  %v2666_v56 = vpop.f32.mrb[3].mxu0  ;;  %v3118_v57 = vpop.f32.mrb[3].mxu1  ;;  %v3191_v63 = vmax.f32 %v10711_v46, 0.0  ;;  %v3193_v0 = vmax.f32 %v10743_v47, 0.0  ;;  %v11835_v47 = vld [vmem:[#allocation7 + $0x124] ss:$8 sps:$4 sm:$0xff]  }
 0x293   : > { %v10714_v60 = vadd.f32 %v2666_v56, %v13199_v42  ;;  %v10746_v61 = vadd.f32 %v3118_v57, %v13202_v43  ;;  %v3192_v3 = vmax.f32 %v10712_v50, 0.0  ;;  %v3194_v4 = vmax.f32 %v10744_v51, 0.0  ;;  %v11882_v52 = vld [vmem:[#allocation5 + $0x18] sm:$0xff]  }
 0x294   : > { %v3195_v1 = vmax.f32 %v10713_v54, 0.0  ;;  %v3197_v2 = vmax.f32 %v10745_v55, 0.0  ;;  %v11883_v55 = vld [vmem:[#allocation5 + $0x60] sm:$0xff]   ;;  %10430 = vmatpush3.bf16.msra.mxu1 %v11882_v52 }
 0x295   : > { %v3196_v5 = vmax.f32 %v10714_v60, 0.0  ;;  %v3198_v6 = vmax.f32 %v10746_v61, 0.0  ;;  %v11833_v60 = vld [vmem:[#allocation7 + $0x120] ss:$8 sps:$4 sm:$0xff]   ;;  %10431 = vmatprep.subr.bf16.mxu1 %v11883_v55 }
 0x296   : > { %v3255_v8 = vpack.c.bf16 %v3195_v1, %v3191_v63  ;;  %v13212_v9 = vpack.c.bf16 %v3197_v2, %v3193_v0  ;;  %v11838_v1 = vld [vmem:[#allocation7 + $0x134] ss:$8 sps:$4 sm:$0xff]  }
 0x297   : > { %v3256_v11 = vpack.c.bf16 %v3196_v5, %v3192_v3  ;;  %v13214_v12 = vpack.c.bf16 %v3198_v6, %v3194_v4  ;;  %v2670_v13 = vpop.f32.mrb[4].mxu0  ;;  %v3122_v14 = vpop.f32.mrb[4].mxu1  ;;  %v11884_v6 = vld [vmem:[#allocation5 + $0x20] sm:$0xff]  }
 0x298   : > { %v10715_v16 = vadd.f32 %v2670_v13, %v13193_v40  ;;  %v10747_v17 = vadd.f32 %v3122_v14, %v13196_v41  ;;  %v2672_v18 = vpop.f32.mrb[5].mxu0  ;;  %v3124_v19 = vpop.f32.mrb[5].mxu1  ;;  %v11885_v13 = vld [vmem:[#allocation5 + $0x68] sm:$0xff]   ;;  %10432 = vmatpush3.bf16.msra.mxu1 %v11884_v6 }
 0x299   : > { %v10716_v21 = vadd.f32 %v2672_v18, %v13199_v42  ;;  %v10748_v22 = vadd.f32 %v3124_v19, %v13202_v43  ;;  %v2674_v23 = vpop.f32.mrb[6].mxu0  ;;  %v3126_v24 = vpop.f32.mrb[6].mxu1  ;;  %3715 = vmatprep.mubr.bf16.mxu0 %v3256_v11  ;;  %10433 = vmatprep.subr.bf16.mxu1 %v11885_v13 }
 0x29a   : > { %v10717_v26 = vadd.f32 %v2674_v23, %v13193_v40  ;;  %v10749_v27 = vadd.f32 %v3126_v24, %v13196_v41  ;;  %v2676_v28 = vpop.f32.mrb[7].mxu0  ;;  %v3128_v29 = vpop.f32.mrb[7].mxu1  ;;  %3716 = vmatmul.mubr.bf16.vlgmr.msra.gmra.mrb[32].mxu0 %v3255_v8  ;;  %v3199_v37 = vmax.f32 %v10715_v16, 0.0  ;;  %v3201_v44 = vmax.f32 %v10747_v17, 0.0  ;;  %v11836_v16 = vld [vmem:[#allocation7 + $0x130] ss:$8 sps:$4 sm:$0xff]  }
 0x29b   : > { %v10718_v31 = vadd.f32 %v2676_v28, %v13199_v42  ;;  %v10750_v32 = vadd.f32 %v3128_v29, %v13202_v43  ;;  %3797 = vmatpush1.bf16.msra.mxu0 %v11827_v15  ;;  %v3200_v48 = vmax.f32 %v10716_v21, 0.0  ;;  %v3202_v49 = vmax.f32 %v10748_v22, 0.0  ;;  %v11841_v21 = vld [vmem:[#allocation7 + $0x144] ss:$8 sps:$4 sm:$0xff]   ;;  %v11887_v29 = vld [vmem:[#allocation5 + $0x70] sm:$0xff]  }
 0x29c   : > { %v3203_v45 = vmax.f32 %v10717_v26, 0.0  ;;  %v3205_v46 = vmax.f32 %v10749_v27, 0.0  ;;  %3798 = vmatprep.subr.bf16.mxu0 %v11832_v20  ;;  %v11886_v26 = vld [vmem:[#allocation5 + $0x28] sm:$0xff]  }
 0x29d   : > { %v3204_v50 = vmax.f32 %v10718_v31, 0.0  ;;  %v3206_v51 = vmax.f32 %v10750_v32, 0.0  ;;  %10434 = vmatpush3.bf16.msra.mxu1 %v11886_v26 }
 0x29e   : > { %v3259_v53 = vpack.c.bf16 %v3203_v45, %v3199_v37  ;;  %v13224_v54 = vpack.c.bf16 %v3205_v46, %v3201_v44  ;;  %v11839_v37 = vld [vmem:[#allocation7 + $0x140] ss:$8 sps:$4 sm:$0xff]   ;;  %10435 = vmatprep.subr.bf16.mxu1 %v11887_v29 }
 0x29f   : > { %v3260_v56 = vpack.c.bf16 %v3204_v50, %v3200_v48  ;;  %v13226_v57 = vpack.c.bf16 %v3206_v51, %v3202_v49  ;;  %v2680_v58 = vpop.f32.mrb[8].mxu0  ;;  %v3132_v59 = vpop.f32.mrb[8].mxu1  ;;  %3799 = vmatpush1.bf16.msra.mxu0 %v11830_v33  ;;  %v11844_v48 = vld [vmem:[#allocation7 + $0x154] ss:$8 sps:$4 sm:$0xff]  }
 0x2a0   : > { %v10719_v61 = vadd.f32 %v2680_v58, %v13193_v40  ;;  %v10751_v62 = vadd.f32 %v3132_v59, %v13196_v41  ;;  %v2682_v63 = vpop.f32.mrb[9].mxu0  ;;  %v3134_v0 = vpop.f32.mrb[9].mxu1  ;;  %3800 = vmatprep.subr.bf16.mxu0 %v11835_v47 }
 0x2a1   : > { %v10720_v2 = vadd.f32 %v2682_v63, %v13199_v42  ;;  %v10752_v3 = vadd.f32 %v3134_v0, %v13202_v43  ;;  %v2684_v4 = vpop.f32.mrb[10].mxu0  ;;  %v3136_v5 = vpop.f32.mrb[10].mxu1  ;;  %3725 = vmatprep.mubr.bf16.mxu0 %v3260_v56 }
 0x2a2   : > { %v10721_v7 = vadd.f32 %v2684_v4, %v13193_v40  ;;  %v10753_v8 = vadd.f32 %v3136_v5, %v13196_v41  ;;  %v2686_v10 = vpop.f32.mrb[11].mxu0  ;;  %v3138_v11 = vpop.f32.mrb[11].mxu1  ;;  %3726 = vmatmul.mubr.bf16.gmra.mrb[36].mxu0 %v3259_v53  ;;  %v3207_v17 = vmax.f32 %v10719_v61, 0.0  ;;  %v3209_v18 = vmax.f32 %v10751_v62, 0.0  ;;  %v11888_v53 = vld [vmem:[#allocation5 + $0x30] sm:$0xff]  }
 0x2a3   : > { %v10722_v14 = vadd.f32 %v2686_v10, %v13199_v42  ;;  %v10754_v15 = vadd.f32 %v3138_v11, %v13202_v43  ;;  %3801 = vmatpush1.bf16.msra.mxu0 %v11833_v60  ;;  %v3208_v22 = vmax.f32 %v10720_v2, 0.0  ;;  %v3210_v23 = vmax.f32 %v10752_v3, 0.0  ;;  %v11842_v62 = vld [vmem:[#allocation7 + $0x150] ss:$8 sps:$4 sm:$0xff]   ;;  %v11847_v3 = vld [vmem:[#allocation7 + $0x164] ss:$8 sps:$4 sm:$0xff]   ;;  %10436 = vmatpush3.bf16.msra.mxu1 %v11888_v53 }
 0x2a4   : > { %v3211_v19 = vmax.f32 %v10721_v7, 0.0  ;;  %v3213_v20 = vmax.f32 %v10753_v8, 0.0  ;;  %3802 = vmatprep.subr.bf16.mxu0 %v11838_v1 }
 0x2a5   : > { %v3212_v24 = vmax.f32 %v10722_v14, 0.0  ;;  %v3214_v25 = vmax.f32 %v10754_v15, 0.0 }
 0x2a6   : > { %v3263_v27 = vpack.c.bf16 %v3211_v19, %v3207_v17  ;;  %v13236_v28 = vpack.c.bf16 %v3213_v20, %v3209_v18 }
 0x2a7   : > { %v3264_v30 = vpack.c.bf16 %v3212_v24, %v3208_v22  ;;  %v13238_v31 = vpack.c.bf16 %v3214_v25, %v3210_v23  ;;  %v2690_v32 = vpop.f32.mrb[12].mxu0  ;;  %v3142_v33 = vpop.f32.mrb[12].mxu1  ;;  %3803 = vmatpush1.bf16.msra.mxu0 %v11836_v16  ;;  %v11845_v16 = vld [vmem:[#allocation7 + $0x160] ss:$8 sps:$4 sm:$0xff]  }
 0x2a8   : > { %v10723_v44 = vadd.f32 %v2690_v32, %v13193_v40  ;;  %v10755_v45 = vadd.f32 %v3142_v33, %v13196_v41  ;;  %v2692_v46 = vpop.f32.mrb[13].mxu0  ;;  %v3144_v47 = vpop.f32.mrb[13].mxu1  ;;  %3804 = vmatprep.subr.bf16.mxu0 %v11841_v21  ;;  %v11850_v21 = vld [vmem:[#allocation7 + $0x174] ss:$8 sps:$4 sm:$0xff]  }
 0x2a9   : > { %v10724_v49 = vadd.f32 %v2692_v46, %v13199_v42  ;;  %v10756_v50 = vadd.f32 %v3144_v47, %v13202_v43  ;;  %v2694_v51 = vpop.f32.mrb[14].mxu0  ;;  %v3146_v52 = vpop.f32.mrb[14].mxu1  ;;  %3735 = vmatprep.mubr.bf16.mxu0 %v3264_v30 }
 0x2aa   : > { %v10725_v55 = vadd.f32 %v2694_v51, %v13193_v40  ;;  %v10757_v56 = vadd.f32 %v3146_v52, %v13196_v41  ;;  %v2696_v58 = vpop.f32.mrb[15].mxu0  ;;  %v3148_v59 = vpop.f32.mrb[15].mxu1  ;;  %3736 = vmatmul.mubr.bf16.gmra.mrb[40].mxu0 %v3263_v27  ;;  %v3215_v63 = vmax.f32 %v10723_v44, 0.0  ;;  %v3217_v0 = vmax.f32 %v10755_v45, 0.0 }
 0x2ab   : > { %v10726_v60 = vadd.f32 %v2696_v58, %v13199_v42  ;;  %v10758_v61 = vadd.f32 %v3148_v59, %v13202_v43  ;;  %3805 = vmatpush1.bf16.msra.mxu0 %v11839_v37  ;;  %v3216_v4 = vmax.f32 %v10724_v49, 0.0  ;;  %v3218_v5 = vmax.f32 %v10756_v50, 0.0  ;;  %v11848_v37 = vld [vmem:[#allocation7 + $0x170] ss:$8 sps:$4 sm:$0xff]  }
 0x2ac   : > { %v3219_v1 = vmax.f32 %v10725_v55, 0.0  ;;  %v3221_v2 = vmax.f32 %v10757_v56, 0.0  ;;  %3806 = vmatprep.subr.bf16.mxu0 %v11844_v48  ;;  %v11853_v48 = vld [vmem:[#allocation7 + $0x184] ss:$8 sps:$4 sm:$0xff]  }
 0x2ad   : > { %v3220_v6 = vmax.f32 %v10726_v60, 0.0  ;;  %v3222_v7 = vmax.f32 %v10758_v61, 0.0  ;;  %v11851_v61 = vld [vmem:[#allocation7 + $0x180] ss:$8 sps:$4 sm:$0xff]  }
 0x2ae   : > { %v3267_v8 = vpack.c.bf16 %v3219_v1, %v3215_v63  ;;  %v13248_v10 = vpack.c.bf16 %v3221_v2, %v3217_v0  ;;  %v11856_v2 = vld [vmem:[#allocation7 + $0x194] ss:$8 sps:$4 sm:$0xff]  }
 0x2af   : > { %v3268_v11 = vpack.c.bf16 %v3220_v6, %v3216_v4  ;;  %v13250_v13 = vpack.c.bf16 %v3222_v7, %v3218_v5  ;;  %v2700_v14 = vpop.f32.mrb[16].mxu0  ;;  %v3152_v15 = vpop.f32.mrb[16].mxu1  ;;  %3807 = vmatpush1.bf16.msra.mxu0 %v11842_v62 }
 0x2b0   : > { %v10727_v17 = vadd.f32 %v2700_v14, %v13193_v40  ;;  %v10759_v18 = vadd.f32 %v3152_v15, %v13196_v41  ;;  %v2702_v19 = vpop.f32.mrb[17].mxu0  ;;  %v3154_v20 = vpop.f32.mrb[17].mxu1  ;;  %3808 = vmatprep.subr.bf16.mxu0 %v11847_v3 }
 0x2b1   : > { %v10728_v22 = vadd.f32 %v2702_v19, %v13199_v42  ;;  %v10760_v23 = vadd.f32 %v3154_v20, %v13202_v43  ;;  %v2704_v24 = vpop.f32.mrb[18].mxu0  ;;  %v3156_v25 = vpop.f32.mrb[18].mxu1  ;;  %3745 = vmatprep.mubr.bf16.mxu0 %v3268_v11 }
 0x2b2   : > { %v10729_v26 = vadd.f32 %v2704_v24, %v13193_v40  ;;  %v10761_v27 = vadd.f32 %v3156_v25, %v13196_v41  ;;  %v2706_v29 = vpop.f32.mrb[19].mxu0  ;;  %v3158_v30 = vpop.f32.mrb[19].mxu1  ;;  %3746 = vmatmul.mubr.bf16.gmra.mrb[44].mxu0 %v3267_v8  ;;  %v3223_v44 = vmax.f32 %v10727_v17, 0.0  ;;  %v3225_v45 = vmax.f32 %v10759_v18, 0.0  ;;  %v11854_v17 = vld [vmem:[#allocation7 + $0x190] ss:$8 sps:$4 sm:$0xff]  }
 0x2b3   : > { %v10730_v32 = vadd.f32 %v2706_v29, %v13199_v42  ;;  %v10762_v33 = vadd.f32 %v3158_v30, %v13202_v43  ;;  %3809 = vmatpush1.bf16.msra.mxu0 %v11845_v16  ;;  %v3224_v49 = vmax.f32 %v10728_v22, 0.0  ;;  %v3226_v50 = vmax.f32 %v10760_v23, 0.0  ;;  %v11859_v22 = vld [vmem:[#allocation7 + $0x1a4] ss:$8 sps:$4 sm:$0xff]  }
 0x2b4   : > { %v3227_v46 = vmax.f32 %v10729_v26, 0.0  ;;  %v3229_v47 = vmax.f32 %v10761_v27, 0.0  ;;  %3810 = vmatprep.subr.bf16.mxu0 %v11850_v21 }
 0x2b5   : > { %v3228_v51 = vmax.f32 %v10730_v32, 0.0  ;;  %v3230_v52 = vmax.f32 %v10762_v33, 0.0 }
 0x2b6   : > { %v3271_v53 = vpack.c.bf16 %v3227_v46, %v3223_v44  ;;  %v13260_v55 = vpack.c.bf16 %v3229_v47, %v3225_v45  ;;  %v11857_v44 = vld [vmem:[#allocation7 + $0x1a0] ss:$8 sps:$4 sm:$0xff]  }
 0x2b7   : > { %v3272_v56 = vpack.c.bf16 %v3228_v51, %v3224_v49  ;;  %v13262_v58 = vpack.c.bf16 %v3230_v52, %v3226_v50  ;;  %v2710_v59 = vpop.f32.mrb[20].mxu0  ;;  %v3162_v60 = vpop.f32.mrb[20].mxu1  ;;  %3811 = vmatpush1.bf16.msra.mxu0 %v11848_v37  ;;  %v11862_v49 = vld [vmem:[#allocation7 + $0x1b4] ss:$8 sps:$4 sm:$0xff]  }
 0x2b8   : > { %v10731_v62 = vadd.f32 %v2710_v59, %v13193_v40  ;;  %v10763_v63 = vadd.f32 %v3162_v60, %v13196_v41  ;;  %v2712_v0 = vpop.f32.mrb[21].mxu0  ;;  %v3164_v1 = vpop.f32.mrb[21].mxu1  ;;  %3812 = vmatprep.subr.bf16.mxu0 %v11853_v48 }
 0x2b9   : > { %v10732_v3 = vadd.f32 %v2712_v0, %v13199_v42  ;;  %v10764_v4 = vadd.f32 %v3164_v1, %v13202_v43  ;;  %v2714_v5 = vpop.f32.mrb[22].mxu0  ;;  %v3166_v6 = vpop.f32.mrb[22].mxu1  ;;  %3755 = vmatprep.mubr.bf16.mxu0 %v3272_v56  ;;  %v11860_v0 = vld [vmem:[#allocation7 + $0x1b0] ss:$8 sps:$4 sm:$0xff]  }
 0x2ba   : > { %v10733_v7 = vadd.f32 %v2714_v5, %v13193_v40  ;;  %v10765_v8 = vadd.f32 %v3166_v6, %v13196_v41  ;;  %v2716_v11 = vpop.f32.mrb[23].mxu0  ;;  %v3168_v14 = vpop.f32.mrb[23].mxu1  ;;  %3756 = vmatmul.mubr.bf16.gmra.mrb[48].mxu0 %v3271_v53  ;;  %v3231_v18 = vmax.f32 %v10731_v62, 0.0  ;;  %v3233_v19 = vmax.f32 %v10763_v63, 0.0  ;;  %v11865_v5 = vld [vmem:[#allocation7 + $0x1c4] ss:$8 sps:$4 sm:$0xff]  }
 0x2bb   : > { %v10734_v15 = vadd.f32 %v2716_v11, %v13199_v42  ;;  %v10766_v16 = vadd.f32 %v3168_v14, %v13202_v43  ;;  %3813 = vmatpush1.bf16.msra.mxu0 %v11851_v61  ;;  %v3232_v23 = vmax.f32 %v10732_v3, 0.0  ;;  %v3234_v24 = vmax.f32 %v10764_v4, 0.0 }
 0x2bc   : > { %v3235_v20 = vmax.f32 %v10733_v7, 0.0  ;;  %v3237_v21 = vmax.f32 %v10765_v8, 0.0  ;;  %3814 = vmatprep.subr.bf16.mxu0 %v11856_v2 }
 0x2bd   : > { %v3236_v25 = vmax.f32 %v10734_v15, 0.0  ;;  %v3238_v26 = vmax.f32 %v10766_v16, 0.0 }
 0x2be   : > { %v3275_v27 = vpack.c.bf16 %v3235_v20, %v3231_v18  ;;  %v13272_v29 = vpack.c.bf16 %v3237_v21, %v3233_v19  ;;  %v11863_v20 = vld [vmem:[#allocation7 + $0x1c0] ss:$8 sps:$4 sm:$0xff]  }
 0x2bf   : > { %v3276_v30 = vpack.c.bf16 %v3236_v25, %v3232_v23  ;;  %v13274_v32 = vpack.c.bf16 %v3238_v26, %v3234_v24  ;;  %v2720_v33 = vpop.f32.mrb[24].mxu0  ;;  %v3172_v37 = vpop.f32.mrb[24].mxu1  ;;  %3815 = vmatpush1.bf16.msra.mxu0 %v11854_v17  ;;  %v11868_v25 = vld [vmem:[#allocation7 + $0x1d4] ss:$8 sps:$4 sm:$0xff]  }
 0x2c0   : > { %v10735_v45 = vadd.f32 %v2720_v33, %v13193_v40  ;;  %v10767_v46 = vadd.f32 %v3172_v37, %v13196_v41  ;;  %v2722_v47 = vpop.f32.mrb[25].mxu0  ;;  %v3174_v48 = vpop.f32.mrb[25].mxu1  ;;  %3816 = vmatprep.subr.bf16.mxu0 %v11859_v22 }
 0x2c1   : > { %v10736_v50 = vadd.f32 %v2722_v47, %v13199_v42  ;;  %v10768_v51 = vadd.f32 %v3174_v48, %v13202_v43  ;;  %v2724_v52 = vpop.f32.mrb[26].mxu0  ;;  %v3176_v53 = vpop.f32.mrb[26].mxu1  ;;  %3765 = vmatprep.mubr.bf16.mxu0 %v3276_v30 }
 0x2c2   : > { %v10737_v56 = vadd.f32 %v2724_v52, %v13193_v40  ;;  %v10769_v59 = vadd.f32 %v3176_v53, %v13196_v41  ;;  %v2726_v60 = vpop.f32.mrb[27].mxu0  ;;  %v3178_v61 = vpop.f32.mrb[27].mxu1  ;;  %3766 = vmatmul.mubr.bf16.gmra.mrb[52].mxu0 %v3275_v27  ;;  %v3239_v1 = vmax.f32 %v10735_v45, 0.0  ;;  %v3241_v2 = vmax.f32 %v10767_v46, 0.0 }
 0x2c3   : > { %v10738_v62 = vadd.f32 %v2726_v60, %v13199_v42  ;;  %v10770_v63 = vadd.f32 %v3178_v61, %v13202_v43  ;;  %3817 = vmatpush1.bf16.msra.mxu0 %v11857_v44  ;;  %v3240_v6 = vmax.f32 %v10736_v50, 0.0  ;;  %v3242_v7 = vmax.f32 %v10768_v51, 0.0 }
 0x2c4   : > { %v3243_v3 = vmax.f32 %v10737_v56, 0.0  ;;  %v3245_v4 = vmax.f32 %v10769_v59, 0.0  ;;  %3818 = vmatprep.subr.bf16.mxu0 %v11862_v49  ;;  %v11866_v49 = vld [vmem:[#allocation7 + $0x1d0] ss:$8 sps:$4 sm:$0xff]   ;;  %v11871_v56 = vld [vmem:[#allocation7 + $0x1e4] ss:$8 sps:$4 sm:$0xff]  }
 0x2c5   : > { %v3244_v8 = vmax.f32 %v10738_v62, 0.0  ;;  %v3246_v11 = vmax.f32 %v10770_v63, 0.0 }
 0x2c6   : > { %v3279_v14 = vpack.c.bf16 %v3243_v3, %v3239_v1  ;;  %v13284_v15 = vpack.c.bf16 %v3245_v4, %v3241_v2  ;;  %v11872_v1 = vld [vmem:[#allocation7 + $0x1f0] ss:$8 sps:$4 sm:$0xff]  }
 0x2c7   : > { %v3280_v16 = vpack.c.bf16 %v3244_v8, %v3240_v6  ;;  %v3282_v17 = vpack.c.bf16 %v3246_v11, %v3242_v7  ;;  %v2730_v18 = vpop.f32.mrb[28].mxu0  ;;  %v3182_v19 = vpop.f32.mrb[28].mxu1  ;;  %3819 = vmatpush1.bf16.msra.mxu0 %v11860_v0 }
 0x2c8   : > { %v10739_v21 = vadd.f32 %v2730_v18, %v13193_v40  ;;  %v10771_v22 = vadd.f32 %v3182_v19, %v13196_v41  ;;  %v2732_v23 = vpop.f32.mrb[29].mxu0  ;;  %v3184_v24 = vpop.f32.mrb[29].mxu1  ;;  %3820 = vmatprep.subr.bf16.mxu0 %v11865_v5 }
 0x2c9   : > { %v10740_v26 = vadd.f32 %v2732_v23, %v13199_v42  ;;  %v10772_v27 = vadd.f32 %v3184_v24, %v13202_v43  ;;  %v2734_v30 = vpop.f32.mrb[30].mxu0  ;;  %v3186_v33 = vpop.f32.mrb[30].mxu1  ;;  %3775 = vmatprep.mubr.bf16.mxu0 %v3280_v16 }
 0x2ca   : > { %v10741_v37 = vadd.f32 %v2734_v30, %v13193_v40  ;;  %v10773_v44 = vadd.f32 %v3186_v33, %v13196_v41  ;;  %v2736_v45 = vpop.f32.mrb[31].mxu0  ;;  %v3188_v46 = vpop.f32.mrb[31].mxu1  ;;  %3776 = vmatmul.mubr.bf16.gmra.mrb[56].mxu0 %v3279_v14  ;;  %v3247_v50 = vmax.f32 %v10739_v21, 0.0  ;;  %v3249_v51 = vmax.f32 %v10771_v22, 0.0 }
 0x2cb   : > { %v10742_v47 = vadd.f32 %v2736_v45, %v13199_v42  ;;  %v10774_v48 = vadd.f32 %v3188_v46, %v13202_v43  ;;  %3821 = vmatpush1.bf16.msra.mxu0 %v11863_v20  ;;  %v3248_v59 = vmax.f32 %v10740_v26, 0.0  ;;  %v3250_v60 = vmax.f32 %v10772_v27, 0.0  ;;  %v11869_v42 = vld [vmem:[#allocation7 + $0x1e0] ss:$8 sps:$4 sm:$0xff]   ;;  %v11874_v43 = vld [vmem:[#allocation7 + $0x1f4] ss:$8 sps:$4 sm:$0xff]  }
 0x2cc   : > { %v3251_v52 = vmax.f32 %v10741_v37, 0.0  ;;  %v3253_v53 = vmax.f32 %v10773_v44, 0.0  ;;  %3822 = vmatprep.subr.bf16.mxu0 %v11868_v25  ;;  %v11893_v25 = vld [vmem:[#allocation5 + $0x90] sm:$0xff]   ;;  %v11894_v46 = vld [vmem:[#allocation5 + $0x98] sm:$0xff]  }
 0x2cd   : > { %v3252_v40 = vmax.f32 %v10742_v47, 0.0  ;;  %v3254_v61 = vmax.f32 %v10774_v48, 0.0 }
 0x2ce   : > { %v3283_v41 = vpack.c.bf16 %v3251_v52, %v3247_v50  ;;  %v3285_v62 = vpack.c.bf16 %v3253_v53, %v3249_v51 }
 0x2cf   : > { %v3284_v63 = vpack.c.bf16 %v3252_v40, %v3248_v59  ;;  %v3286_v0 = vpack.c.bf16 %v3254_v61, %v3250_v60  ;;  %3823 = vmatpush1.bf16.msra.mxu0 %v11866_v49 }
 0x2d0   : > { %3824 = vmatprep.subr.bf16.mxu0 %v11871_v56  ;;  %v11895_v56 = vld [vmem:[#allocation5 + $0xa0] sm:$0xff]  }
 0x2d1   : > { %3785 = vmatprep.mubr.bf16.mxu0 %v3284_v63 }
 0x2d2   : > { %3786 = vmatmul.mubr.bf16.gmra.mrb[60].mxu0 %v3283_v41 }
 0x2d3   : > { %3825 = vmatpush1.bf16.msra.mxu0 %v11869_v42  ;;  %3828 = vmatprep.mubr.bf16.mxu0 %v13214_v12  ;;  %v11890_v12 = vld [vmem:[#allocation5 + $0x38] sm:$0xff]  }
 0x2d4   : > { %3826 = vmatprep.subr.bf16.mxu0 %v11874_v43 }
 0x2d7   : > { %3827 = vmatpush1.bf16.msra.mxu0 %v11872_v1 }
 0x2da   : > { %3829 = vmatmul.mubr.bf16.vlgmr.msra.gmra.mrb[32].mxu0 %v13212_v9  ;;  %v11889_v9 = vld [vmem:[#allocation5 + $0x78] sm:$0xff]  }
 0x2db   : > { %3838 = vmatprep.mubr.bf16.mxu0 %v13226_v57  ;;  %10437 = vmatprep.subr.bf16.mxu1 %v11889_v9  ;;  %v3351_v57 = vld [vmem:[#allocation11 + $0x4] sm:$0x3] }
 0x2dc   : > { %10438 = vmatpush3.bf16.msra.mxu1 %v11890_v12 }
 0x2e2   : > { %3839 = vmatmul.mubr.bf16.gmra.mrb[36].mxu0 %v13224_v54  ;;  %v11891_v54 = vld [vmem:[#allocation5 + $0x80] sm:$0xff]  }
 0x2e3   : > { %3848 = vmatprep.mubr.bf16.mxu0 %v13238_v31  ;;  %10551 = vmatprep.subr.bf16.mxu1 %v11891_v54  ;;  %v13311_v31 = vrot.slane %v3351_v57, %v13187_v38 }
 0x2ea   : > { %3849 = vmatmul.mubr.bf16.gmra.mrb[40].mxu0 %v13236_v28  ;;  %v13308_v28 = vrot.slane %v3351_v57, %v13181_v35 }
 0x2eb   : > { %3858 = vmatprep.mubr.bf16.mxu0 %v13250_v13 }
 0x2f2   : > { %3859 = vmatmul.mubr.bf16.gmra.mrb[44].mxu0 %v13248_v10 }
 0x2f3   : > { %3868 = vmatprep.mubr.bf16.mxu0 %v13262_v58 }
 0x2fa   : > { %3869 = vmatmul.mubr.bf16.gmra.mrb[48].mxu0 %v13260_v55 }
 0x2fb   : > { %3878 = vmatprep.mubr.bf16.mxu0 %v13274_v32 }
 0x302   : > { %3879 = vmatmul.mubr.bf16.gmra.mrb[52].mxu0 %v13272_v29 }
 0x303   : > { %3888 = vmatprep.mubr.bf16.mxu0 %v3282_v17  ;;  %v11892_v17 = vld [vmem:[#allocation5 + $0x88] sm:$0xff]  }
 0x30a   : > { %3889 = vmatmul.mubr.bf16.gmra.mrb[56].mxu0 %v13284_v15 }
 0x30b   : > { %3898 = vmatprep.mubr.bf16.mxu0 %v3286_v0  ;;  %v11896_v0 = vld [vmem:[#allocation5 + $0xa8] sm:$0xff]  }
 0x312   : > { %3899 = vmatmul.mubr.bf16.gmra.mrb[60].mxu0 %v3285_v62 }
 0x3ad   : > { %v3830_v10 = vpop.f32.mrb[32].mxu0 }
 0x3ae   : > { %v10775_v13 = vadd.f32 %v3830_v10, %v13308_v28  ;;  %v3832_v55 = vpop.f32.mrb[33].mxu0 }
 0x3af   : > { %v10776_v58 = vadd.f32 %v3832_v55, %v13311_v31  ;;  %v3834_v29 = vpop.f32.mrb[34].mxu0 }
 0x3b0   : > { %v10777_v32 = vadd.f32 %v3834_v29, %v13308_v28  ;;  %v3836_v2 = vpop.f32.mrb[35].mxu0  ;;  %v3909_v4 = vmax.f32 %v10775_v13, 0.0 }
 0x3b1   : > { %v10778_v3 = vadd.f32 %v3836_v2, %v13311_v31  ;;  %v3910_v6 = vmax.f32 %v10776_v58, 0.0 }
 0x3b2   : > { %v3911_v5 = vmax.f32 %v10777_v32, 0.0 }
 0x3b3   : > { %v3912_v7 = vmax.f32 %v10778_v3, 0.0 }
 0x3b4   : > { %v3941_v8 = vpack.c.bf16 %v3911_v5, %v3909_v4 }
 0x3b5   : > { %v3942_v11 = vpack.c.bf16 %v3912_v7, %v3910_v6  ;;  %v3840_v14 = vpop.f32.mrb[36].mxu0 }
 0x3b6   : > { %v10779_v15 = vadd.f32 %v3840_v14, %v13308_v28  ;;  %v3842_v16 = vpop.f32.mrb[37].mxu0 }
 0x3b7   : > { %v10780_v18 = vadd.f32 %v3842_v16, %v13311_v31  ;;  %v3844_v19 = vpop.f32.mrb[38].mxu0  ;;  %4124 = vmatprep.mubr.bf16.mxu1 %v3942_v11 }
 0x3b8   : > { %v10781_v20 = vadd.f32 %v3844_v19, %v13308_v28  ;;  %v3846_v21 = vpop.f32.mrb[39].mxu0  ;;  %4125 = vmatmul.mubr.bf16.vlgmr.msra.gmra.mrb[32].mxu1 %v3941_v8  ;;  %v3913_v23 = vmax.f32 %v10779_v15, 0.0 }
 0x3b9   : > { %v10782_v22 = vadd.f32 %v3846_v21, %v13311_v31  ;;  %10552 = vmatpush3.bf16.msra.mxu1 %v11891_v54  ;;  %v3914_v26 = vmax.f32 %v10780_v18, 0.0 }
 0x3ba   : > { %v3915_v24 = vmax.f32 %v10781_v20, 0.0  ;;  %10553 = vmatprep.subr.bf16.mxu1 %v11892_v17 }
 0x3bb   : > { %v3916_v27 = vmax.f32 %v10782_v22, 0.0 }
 0x3bc   : > { %v3943_v30 = vpack.c.bf16 %v3915_v24, %v3913_v23 }
 0x3bd   : > { %v3944_v33 = vpack.c.bf16 %v3916_v27, %v3914_v26  ;;  %v3850_v37 = vpop.f32.mrb[40].mxu0  ;;  %10554 = vmatpush3.bf16.msra.mxu1 %v11892_v17 }
 0x3be   : > { %v10783_v44 = vadd.f32 %v3850_v37, %v13308_v28  ;;  %v3852_v45 = vpop.f32.mrb[41].mxu0  ;;  %10555 = vmatprep.subr.bf16.mxu1 %v11893_v25 }
 0x3bf   : > { %v10784_v47 = vadd.f32 %v3852_v45, %v13311_v31  ;;  %v3854_v48 = vpop.f32.mrb[42].mxu0  ;;  %4132 = vmatprep.mubr.bf16.mxu1 %v3944_v33 }
 0x3c0   : > { %v10785_v49 = vadd.f32 %v3854_v48, %v13308_v28  ;;  %v3856_v50 = vpop.f32.mrb[43].mxu0  ;;  %4133 = vmatmul.mubr.bf16.gmra.mrb[36].mxu1 %v3943_v30  ;;  %v3917_v52 = vmax.f32 %v10783_v44, 0.0 }
 0x3c1   : > { %v10786_v51 = vadd.f32 %v3856_v50, %v13311_v31  ;;  %10556 = vmatpush3.bf16.msra.mxu1 %v11893_v25  ;;  %v3918_v59 = vmax.f32 %v10784_v47, 0.0 }
 0x3c2   : > { %v3919_v53 = vmax.f32 %v10785_v49, 0.0  ;;  %10557 = vmatprep.subr.bf16.mxu1 %v11894_v46 }
 0x3c3   : > { %v3920_v60 = vmax.f32 %v10786_v51, 0.0 }
 0x3c4   : > { %v3945_v40 = vpack.c.bf16 %v3919_v53, %v3917_v52 }
 0x3c5   : > { %v3946_v61 = vpack.c.bf16 %v3920_v60, %v3918_v59  ;;  %v3860_v41 = vpop.f32.mrb[44].mxu0  ;;  %10558 = vmatpush3.bf16.msra.mxu1 %v11894_v46 }
 0x3c6   : > { %v10787_v62 = vadd.f32 %v3860_v41, %v13308_v28  ;;  %v3862_v63 = vpop.f32.mrb[45].mxu0  ;;  %10559 = vmatprep.subr.bf16.mxu1 %v11895_v56 }
 0x3c7   : > { %v10788_v42 = vadd.f32 %v3862_v63, %v13311_v31  ;;  %v3864_v43 = vpop.f32.mrb[46].mxu0  ;;  %4140 = vmatprep.mubr.bf16.mxu1 %v3946_v61 }
 0x3c8   : > { %v10789_v1 = vadd.f32 %v3864_v43, %v13308_v28  ;;  %v3866_v9 = vpop.f32.mrb[47].mxu0  ;;  %4141 = vmatmul.mubr.bf16.gmra.mrb[40].mxu1 %v3945_v40  ;;  %v3921_v54 = vmax.f32 %v10787_v62, 0.0 }
 0x3c9   : > { %v10790_v12 = vadd.f32 %v3866_v9, %v13311_v31  ;;  %10560 = vmatpush3.bf16.msra.mxu1 %v11895_v56  ;;  %v3922_v10 = vmax.f32 %v10788_v42, 0.0 }
 0x3ca   : > { %v3923_v57 = vmax.f32 %v10789_v1, 0.0  ;;  %10561 = vmatprep.subr.bf16.mxu1 %v11896_v0 }
 0x3cb   : > { %v3924_v13 = vmax.f32 %v10790_v12, 0.0 }
 0x3cc   : > { %v3947_v55 = vpack.c.bf16 %v3923_v57, %v3921_v54 }
 0x3cd   : > { %v3948_v58 = vpack.c.bf16 %v3924_v13, %v3922_v10  ;;  %v3870_v29 = vpop.f32.mrb[48].mxu0  ;;  %10562 = vmatpush3.bf16.msra.mxu1 %v11896_v0 }
 0x3ce   : > { %v10791_v32 = vadd.f32 %v3870_v29, %v13308_v28  ;;  %v3872_v2 = vpop.f32.mrb[49].mxu0  ;;  %v11898_v29 = vld [vmem:[#allocation5 + $0xb8] sm:$0xff]  }
 0x3cf   : > { %v10792_v3 = vadd.f32 %v3872_v2, %v13311_v31  ;;  %v3874_v4 = vpop.f32.mrb[50].mxu0  ;;  %4148 = vmatprep.mubr.bf16.mxu1 %v3948_v58  ;;  %v11897_v58 = vld [vmem:[#allocation5 + $0xb0] sm:$0xff]   ;;  %v13345_v2 = vld [vmem:[#allocation11 + $0x6] ss:$0 sm:$0xff] }
 0x3d0   : > { %v10793_v5 = vadd.f32 %v3874_v4, %v13308_v28  ;;  %v3876_v6 = vpop.f32.mrb[51].mxu0  ;;  %4149 = vmatmul.mubr.bf16.gmra.mrb[44].mxu1 %v3947_v55  ;;  %v3925_v8 = vmax.f32 %v10791_v32, 0.0  ;;  %10563 = vmatprep.subr.bf16.mxu1 %v11897_v58  ;;  %v11899_v32 = vld [vmem:[#allocation5 + $0xc0] sm:$0xff]  }
 0x3d1   : > { %v10794_v7 = vadd.f32 %v3876_v6, %v13311_v31  ;;  %v3926_v14 = vmax.f32 %v10792_v3, 0.0  ;;  %10564 = vmatpush3.bf16.msra.mxu1 %v11897_v58 }
 0x3d2   : > { %v3927_v11 = vmax.f32 %v10793_v5, 0.0  ;;  %10565 = vmatprep.subr.bf16.mxu1 %v11898_v29 }
 0x3d3   : > { %v3928_v15 = vmax.f32 %v10794_v7, 0.0 }
 0x3d4   : > { %v3949_v16 = vpack.c.bf16 %v3927_v11, %v3925_v8 }
 0x3d5   : > { %v3950_v17 = vpack.c.bf16 %v3928_v15, %v3926_v14  ;;  %v3880_v18 = vpop.f32.mrb[52].mxu0  ;;  %10566 = vmatpush3.bf16.msra.mxu1 %v11898_v29 }
 0x3d6   : > { %v10795_v19 = vadd.f32 %v3880_v18, %v13308_v28  ;;  %v3882_v20 = vpop.f32.mrb[53].mxu0  ;;  %10583 = vmatprep.subr.bf16.mxu1 %v11899_v32 }
 0x3d7   : > { %v10796_v21 = vadd.f32 %v3882_v20, %v13311_v31  ;;  %v3884_v22 = vpop.f32.mrb[54].mxu0  ;;  %4156 = vmatprep.mubr.bf16.mxu1 %v3950_v17 }
 0x3d8   : > { %v10797_v23 = vadd.f32 %v3884_v22, %v13308_v28  ;;  %v3886_v24 = vpop.f32.mrb[55].mxu0  ;;  %4157 = vmatmul.mubr.bf16.gmra.mrb[48].mxu1 %v3949_v16  ;;  %v3929_v26 = vmax.f32 %v10795_v19, 0.0 }
 0x3d9   : > { %v10798_v25 = vadd.f32 %v3886_v24, %v13311_v31  ;;  %v3930_v30 = vmax.f32 %v10796_v21, 0.0 }
 0x3da   : > { %v3931_v27 = vmax.f32 %v10797_v23, 0.0 }
 0x3db   : > { %v3932_v33 = vmax.f32 %v10798_v25, 0.0 }
 0x3dc   : > { %v3951_v37 = vpack.c.bf16 %v3931_v27, %v3929_v26 }
 0x3dd   : > { %v3952_v44 = vpack.c.bf16 %v3932_v33, %v3930_v30  ;;  %v3890_v45 = vpop.f32.mrb[56].mxu0 }
 0x3de   : > { %v10799_v46 = vadd.f32 %v3890_v45, %v13308_v28  ;;  %v3892_v47 = vpop.f32.mrb[57].mxu0 }
 0x3df   : > { %v10800_v48 = vadd.f32 %v3892_v47, %v13311_v31  ;;  %v3894_v49 = vpop.f32.mrb[58].mxu0  ;;  %4164 = vmatprep.mubr.bf16.mxu1 %v3952_v44  ;;  %v11900_v44 = vld [vmem:[#allocation5 + $0xc8] sm:$0xff]  }
 0x3e0   : > { %v10801_v50 = vadd.f32 %v3894_v49, %v13308_v28  ;;  %v3896_v51 = vpop.f32.mrb[59].mxu0  ;;  %4165 = vmatmul.mubr.bf16.gmra.mrb[52].mxu1 %v3951_v37  ;;  %v3933_v53 = vmax.f32 %v10799_v46, 0.0  ;;  %v11901_v49 = vld [vmem:[#allocation5 + $0xd0] sm:$0xff]  }
 0x3e1   : > { %v10802_v52 = vadd.f32 %v3896_v51, %v13311_v31  ;;  %v3934_v59 = vmax.f32 %v10800_v48, 0.0 }
 0x3e2   : > { %v3935_v56 = vmax.f32 %v10801_v50, 0.0 }
 0x3e3   : > { %v3936_v60 = vmax.f32 %v10802_v52, 0.0 }
 0x3e4   : > { %v3953_v40 = vpack.c.bf16 %v3935_v56, %v3933_v53 }
 0x3e5   : > { %v3954_v61 = vpack.c.bf16 %v3936_v60, %v3934_v59  ;;  %v3900_v41 = vpop.f32.mrb[60].mxu0 }
 0x3e6   : > { %v10803_v62 = vadd.f32 %v3900_v41, %v13308_v28  ;;  %v3902_v63 = vpop.f32.mrb[61].mxu0 }
 0x3e7   : > { %v10804_v0 = vadd.f32 %v3902_v63, %v13311_v31  ;;  %v3904_v42 = vpop.f32.mrb[62].mxu0  ;;  %4172 = vmatprep.mubr.bf16.mxu1 %v3954_v61 }
 0x3e8   : > { %v10805_v43 = vadd.f32 %v3904_v42, %v13308_v28  ;;  %v3906_v1 = vpop.f32.mrb[63].mxu0  ;;  %4173 = vmatmul.mubr.bf16.gmra.mrb[56].mxu1 %v3953_v40  ;;  %v3937_v12 = vmax.f32 %v10803_v62, 0.0  ;;  %v11902_v40 = vld [vmem:[#allocation5 + $0xd8] sm:$0xff]  }
 0x3e9   : > { %v10806_v9 = vadd.f32 %v3906_v1, %v13311_v31  ;;  %v3938_v57 = vmax.f32 %v10804_v0, 0.0  ;;  %v11903_v0 = vld [vmem:[#allocation5 + $0xe0] sm:$0xff]  }
 0x3ea   : > { %v3939_v54 = vmax.f32 %v10805_v43, 0.0 }
 0x3eb   : > { %v3940_v10 = vmax.f32 %v10806_v9, 0.0 }
 0x3ec   : > { %v3955_v13 = vpack.c.bf16 %v3939_v54, %v3937_v12 }
 0x3ed   : > { %v3956_v55 = vpack.c.bf16 %v3940_v10, %v3938_v57  ;;  %v11904_v10 = vld [vmem:[#allocation5 + $0xe8] sm:$0xff]  }
 0x3ef   : > { %4180 = vmatprep.mubr.bf16.mxu1 %v3956_v55 }
 0x3f0   : > { %4181 = vmatmul.mubr.bf16.gmra.mrb[60].mxu1 %v3955_v13 }
 0x48b   : > { %v10439_v28 = vpop.f32.mrb[32].mxu1 }
 0x48c   : > { %v10440_v31 = vpop.f32.mrb[33].mxu1 }
 0x48d   : > { %v10441_v3 = vadd.f32 %v10440_v31, %v10439_v28  ;;  %v10442_v4 = vpop.f32.mrb[34].mxu1 }
 0x48e   : > { %v10443_v5 = vpop.f32.mrb[35].mxu1 }
 0x48f   : > { %v4127_v6 = vadd.f32 %v10441_v3, %v13345_v2  ;;  %v10444_v7 = vadd.f32 %v10443_v5, %v10442_v4 }
 0x491   : > { %v4130_v8 = vadd.f32 %v10444_v7, %v13345_v2  ;;  %v4189_v11 = vmax.f32 %v4127_v6, 0.0 }
 0x493   : > { %v4190_v14 = vmax.f32 %v4130_v8, 0.0  ;;  %v10445_v15 = vpop.f32.mrb[36].mxu1 }
 0x494   : > { %v10446_v16 = vpop.f32.mrb[37].mxu1 }
 0x495   : > { %v10447_v17 = vadd.f32 %v10446_v16, %v10445_v15  ;;  %v10448_v18 = vpop.f32.mrb[38].mxu1  ;;  %v4205_v19 = vpack.c.bf16 %v4190_v14, %v4189_v11 }
 0x496   : > { %v10449_v20 = vpop.f32.mrb[39].mxu1 }
 0x497   : > { %v4135_v21 = vadd.f32 %v10447_v17, %v13345_v2  ;;  %v10450_v22 = vadd.f32 %v10449_v20, %v10448_v18  ;;  %10567 = vmatprep.mubr.bf16.mxu1 %v4205_v19 }
 0x499   : > { %v4138_v23 = vadd.f32 %v10450_v22, %v13345_v2  ;;  %v4191_v24 = vmax.f32 %v4135_v21, 0.0 }
 0x49b   : > { %v4192_v25 = vmax.f32 %v4138_v23, 0.0  ;;  %v10451_v26 = vpop.f32.mrb[40].mxu1 }
 0x49c   : > { %v10452_v27 = vpop.f32.mrb[41].mxu1 }
 0x49d   : > { %v4206_v30 = vpack.c.bf16 %v4192_v25, %v4191_v24  ;;  %v10453_v33 = vadd.f32 %v10452_v27, %v10451_v26  ;;  %v10454_v37 = vpop.f32.mrb[42].mxu1 }
 0x49e   : > { %v10455_v45 = vpop.f32.mrb[43].mxu1 }
 0x49f   : > { %v4143_v46 = vadd.f32 %v10453_v33, %v13345_v2  ;;  %v10456_v47 = vadd.f32 %v10455_v45, %v10454_v37  ;;  %10568 = vmatmul.mubr.bf16.vlgmr.msra.gmra.mrb[64].mxu1 %v4206_v30 }
 0x4a0   : > { %10584 = vmatpush3.bf16.msra.mxu1 %v11899_v32 }
 0x4a1   : > { %v4146_v48 = vadd.f32 %v10456_v47, %v13345_v2  ;;  %10585 = vmatprep.subr.bf16.mxu1 %v11900_v44  ;;  %v4193_v50 = vmax.f32 %v4143_v46, 0.0 }
 0x4a3   : > { %v4194_v51 = vmax.f32 %v4146_v48, 0.0  ;;  %v10457_v52 = vpop.f32.mrb[44].mxu1 }
 0x4a4   : > { %v10458_v53 = vpop.f32.mrb[45].mxu1  ;;  %10586 = vmatpush3.bf16.msra.mxu1 %v11900_v44 }
 0x4a5   : > { %v10459_v56 = vadd.f32 %v10458_v53, %v10457_v52  ;;  %v10460_v59 = vpop.f32.mrb[46].mxu1  ;;  %v4207_v60 = vpack.c.bf16 %v4194_v51, %v4193_v50  ;;  %10587 = vmatprep.subr.bf16.mxu1 %v11901_v49  ;;  %v11905_v53 = vld [vmem:[#allocation5 + $0xf0] sm:$0xff]  }
 0x4a6   : > { %v10461_v61 = vpop.f32.mrb[47].mxu1 }
 0x4a7   : > { %v4151_v41 = vadd.f32 %v10459_v56, %v13345_v2  ;;  %v10462_v62 = vadd.f32 %v10461_v61, %v10460_v59  ;;  %10571 = vmatprep.mubr.bf16.mxu1 %v4207_v60  ;;  %v11906_v56 = vld [vmem:[#allocation5 + $0xf8] sm:$0xff]   ;;  %v11907_v59 = vld [vmem:[#allocation5 + $0x100] sm:$0xff]   ;;  %v11908_v60 = vld [vmem:[#allocation5 + $0x108] sm:$0xff]  }
 0x4a8   : > { %10588 = vmatpush3.bf16.msra.mxu1 %v11901_v49  ;;  %10615 = vmatprep.subr.bf16.mxu0 %v11907_v59  ;;  %v11910_v61 = vld [vmem:[#allocation5 + $0x118] sm:$0xff]  }
 0x4a9   : > { %v4154_v63 = vadd.f32 %v10462_v62, %v13345_v2  ;;  %10589 = vmatprep.subr.bf16.mxu1 %v11902_v40  ;;  %v4195_v42 = vmax.f32 %v4151_v41, 0.0  ;;  %10616 = vmatpush3.bf16.msra.mxu0 %v11907_v59  ;;  %v11912_v41 = vld [vmem:[#allocation5 + $0x128] sm:$0xff]   ;;  %v11913_v62 = vld [vmem:[#allocation5 + $0x130] sm:$0xff]  }
 0x4aa   : > { %10617 = vmatprep.subr.bf16.mxu0 %v11908_v60 }
 0x4ab   : > { %v4196_v43 = vmax.f32 %v4154_v63, 0.0  ;;  %v10463_v1 = vpop.f32.mrb[48].mxu1  ;;  %v9913_v63 = vld [vmem:[#allocation11 + $0x7] ss:$0 sm:$0xff] }
 0x4ac   : > { %v10464_v9 = vpop.f32.mrb[49].mxu1  ;;  %10590 = vmatpush3.bf16.msra.mxu1 %v11902_v40  ;;  %v11909_v40 = vld [vmem:[#allocation5 + $0x110] sm:$0xff]  }
 0x4ad   : > { %v10465_v12 = vadd.f32 %v10464_v9, %v10463_v1  ;;  %v10466_v54 = vpop.f32.mrb[50].mxu1  ;;  %v4208_v57 = vpack.c.bf16 %v4196_v43, %v4195_v42  ;;  %10591 = vmatprep.subr.bf16.mxu1 %v11903_v0  ;;  %10618 = vmatpush3.bf16.msra.mxu0 %v11908_v60 }
 0x4ae   : > { %v10467_v13 = vpop.f32.mrb[51].mxu1  ;;  %10619 = vmatprep.subr.bf16.mxu0 %v11909_v40 }
 0x4af   : > { %v4159_v55 = vadd.f32 %v10465_v12, %v13345_v2  ;;  %v10468_v58 = vadd.f32 %v10467_v13, %v10466_v54  ;;  %10572 = vmatmul.mubr.bf16.gmra.mrb[68].mxu1 %v4208_v57 }
 0x4b0   : > { %10592 = vmatpush3.bf16.msra.mxu1 %v11903_v0 }
 0x4b1   : > { %v4162_v29 = vadd.f32 %v10468_v58, %v13345_v2  ;;  %10593 = vmatprep.subr.bf16.mxu1 %v11904_v10  ;;  %v4197_v32 = vmax.f32 %v4159_v55, 0.0  ;;  %10620 = vmatpush3.bf16.msra.mxu0 %v11909_v40 }
 0x4b2   : > { %10621 = vmatprep.subr.bf16.mxu0 %v11910_v61 }
 0x4b3   : > { %v4198_v28 = vmax.f32 %v4162_v29, 0.0  ;;  %v10469_v31 = vpop.f32.mrb[52].mxu1 }
 0x4b4   : > { %v10470_v3 = vpop.f32.mrb[53].mxu1  ;;  %10594 = vmatpush3.bf16.msra.mxu1 %v11904_v10 }
 0x4b5   : > { %v10471_v4 = vadd.f32 %v10470_v3, %v10469_v31  ;;  %v10472_v5 = vpop.f32.mrb[54].mxu1  ;;  %v4209_v6 = vpack.c.bf16 %v4198_v28, %v4197_v32  ;;  %10595 = vmatprep.subr.bf16.mxu1 %v11905_v53  ;;  %10622 = vmatpush3.bf16.msra.mxu0 %v11910_v61 }
 0x4b6   : > { %v10473_v7 = vpop.f32.mrb[55].mxu1 }
 0x4b7   : > { %v4167_v8 = vadd.f32 %v10471_v4, %v13345_v2  ;;  %v10474_v11 = vadd.f32 %v10473_v7, %v10472_v5  ;;  %10575 = vmatprep.mubr.bf16.mxu1 %v4209_v6 }
 0x4b8   : > { %10596 = vmatpush3.bf16.msra.mxu1 %v11905_v53 }
 0x4b9   : > { %v4170_v14 = vadd.f32 %v10474_v11, %v13345_v2  ;;  %v4199_v15 = vmax.f32 %v4167_v8, 0.0  ;;  %10597 = vmatprep.subr.bf16.mxu1 %v11906_v56 }
 0x4bb   : > { %v4200_v16 = vmax.f32 %v4170_v14, 0.0  ;;  %v10475_v17 = vpop.f32.mrb[56].mxu1 }
 0x4bc   : > { %v10476_v18 = vpop.f32.mrb[57].mxu1  ;;  %10598 = vmatpush3.bf16.msra.mxu1 %v11906_v56 }
 0x4bd   : > { %v10477_v19 = vadd.f32 %v10476_v18, %v10475_v17  ;;  %v10478_v20 = vpop.f32.mrb[58].mxu1  ;;  %v4210_v21 = vpack.c.bf16 %v4200_v16, %v4199_v15 }
 0x4be   : > { %v10479_v22 = vpop.f32.mrb[59].mxu1 }
 0x4bf   : > { %v4175_v23 = vadd.f32 %v10477_v19, %v13345_v2  ;;  %v10480_v24 = vadd.f32 %v10479_v22, %v10478_v20  ;;  %10576 = vmatmul.mubr.bf16.gmra.mrb[72].mxu1 %v4210_v21 }
 0x4c1   : > { %v4178_v25 = vadd.f32 %v10480_v24, %v13345_v2  ;;  %v4201_v26 = vmax.f32 %v4175_v23, 0.0 }
 0x4c3   : > { %v4202_v27 = vmax.f32 %v4178_v25, 0.0  ;;  %v10481_v30 = vpop.f32.mrb[60].mxu1 }
 0x4c4   : > { %v10482_v33 = vpop.f32.mrb[61].mxu1 }
 0x4c5   : > { %v10483_v37 = vadd.f32 %v10482_v33, %v10481_v30  ;;  %v10484_v44 = vpop.f32.mrb[62].mxu1  ;;  %v4211_v45 = vpack.c.bf16 %v4202_v27, %v4201_v26 }
 0x4c6   : > { %v10485_v46 = vpop.f32.mrb[63].mxu1 }
 0x4c7   : > { %v4183_v47 = vadd.f32 %v10483_v37, %v13345_v2  ;;  %v10486_v48 = vadd.f32 %v10485_v46, %v10484_v44  ;;  %10579 = vmatprep.mubr.bf16.mxu1 %v4211_v45 }
 0x4c9   : > { %v4186_v49 = vadd.f32 %v10486_v48, %v13345_v2  ;;  %v4203_v50 = vmax.f32 %v4183_v47, 0.0  ;;  %v11911_v2 = vld [vmem:[#allocation5 + $0x120] sm:$0xff]  }
 0x4ca   : > { %10623 = vmatprep.subr.bf16.mxu0 %v11911_v2 }
 0x4cb   : > { %v4204_v51 = vmax.f32 %v4186_v49, 0.0  ;;  %10624 = vmatpush3.bf16.msra.mxu0 %v11911_v2 }
 0x4cc   : > { %10625 = vmatprep.subr.bf16.mxu0 %v11912_v41 }
 0x4cd   : > { %v4212_v52 = vpack.c.bf16 %v4204_v51, %v4203_v50 }
 0x4cf   : > { %10580 = vmatmul.mubr.bf16.gmra.mrb[76].mxu1 %v4212_v52  ;;  %10626 = vmatpush3.bf16.msra.mxu0 %v11912_v41  ;;  %v11914_v41 = vld [vmem:[#allocation5 + $0x138] sm:$0xff]  }
 0x4d0   : > { %10627 = vmatprep.subr.bf16.mxu0 %v11913_v62 }
 0x4d3   : > { %10628 = vmatpush3.bf16.msra.mxu0 %v11913_v62  ;;  %v11915_v62 = vld [vmem:[#allocation5 + $0x140] sm:$0xff]  }
 0x4d4   : > { %10629 = vmatprep.subr.bf16.mxu0 %v11914_v41  ;;  %10647 = vmatprep.subr.bf16.mxu1 %v11915_v62 }
 0x4d7   : > { %10630 = vmatpush3.bf16.msra.mxu0 %v11914_v41 }
 0x572   : > { %v10569_v0 = vpop.f32.mrb[64].mxu1 }
 0x573   : > { %v4327_v42 = vadd.f32 %v10569_v0, %v9913_v63  ;;  %v4318_v43 = vpop.f32.mrb[65].mxu1  ;;  %v11916_v0 = vld [vmem:[#allocation5 + $0x148] sm:$0xff]  }
 0x574   : > { %v4319_v1 = vadd.f32 %v9913_v63, %v4318_v43  ;;  %v10570_v9 = vpop.f32.mrb[66].mxu1  ;;  %v11919_v43 = vld [vmem:[#allocation5 + $0x160] sm:$0xff]  }
 0x575   : > { %v4330_v12 = vadd.f32 %v10570_v9, %v9913_v63  ;;  %v4321_v54 = vpop.f32.mrb[67].mxu1  ;;  %v4383_v10 = vmax.f32 %v4327_v42, 0.0  ;;  %v11917_v42 = vld [vmem:[#allocation5 + $0x150] sm:$0xff]   ;;  %v9922_v9 = vld [vmem:[#allocation11 + $0x8] ss:$0 sm:$0xff] }
 0x576   : > { %v4322_v57 = vadd.f32 %v9913_v63, %v4321_v54  ;;  %v4381_v55 = vmax.f32 %v4319_v1, 0.0  ;;  %v11920_v1 = vld [vmem:[#allocation5 + $0x168] sm:$0xff]  }
 0x577   : > { %v4384_v13 = vmax.f32 %v4330_v12, 0.0 }
 0x578   : > { %v4382_v58 = vmax.f32 %v4322_v57, 0.0 }
 0x579   : > { %v4398_v29 = vpack.c.bf16 %v4384_v13, %v4383_v10 }
 0x57a   : > { %v4397_v32 = vpack.c.bf16 %v4382_v58, %v4381_v55 }
 0x57c   : > { %10599 = vmatprep.mubr.bf16.mxu1 %v4397_v32 }
 0x57d   : > { %10600 = vmatmul.mubr.bf16.vlgmr.msra.gmra.mrb[80].mxu1 %v4398_v29 }
 0x57e   : > { %10648 = vmatpush3.bf16.msra.mxu1 %v11915_v62 }
 0x57f   : > { %10649 = vmatprep.subr.bf16.mxu1 %v11916_v0 }
 0x582   : > { %v10573_v28 = vpop.f32.mrb[68].mxu1  ;;  %10650 = vmatpush3.bf16.msra.mxu1 %v11916_v0 }
 0x583   : > { %v4343_v31 = vadd.f32 %v10573_v28, %v9913_v63  ;;  %v4334_v3 = vpop.f32.mrb[69].mxu1  ;;  %10651 = vmatprep.subr.bf16.mxu1 %v11917_v42 }
 0x584   : > { %v4335_v4 = vadd.f32 %v9913_v63, %v4334_v3  ;;  %v10574_v5 = vpop.f32.mrb[70].mxu1 }
 0x585   : > { %v4346_v6 = vadd.f32 %v10574_v5, %v9913_v63  ;;  %v4337_v7 = vpop.f32.mrb[71].mxu1  ;;  %v4387_v11 = vmax.f32 %v4343_v31, 0.0 }
 0x586   : > { %v4338_v8 = vadd.f32 %v9913_v63, %v4337_v7  ;;  %v4385_v15 = vmax.f32 %v4335_v4, 0.0  ;;  %10652 = vmatpush3.bf16.msra.mxu1 %v11917_v42 }
 0x587   : > { %v4388_v14 = vmax.f32 %v4346_v6, 0.0 }
 0x588   : > { %v4386_v16 = vmax.f32 %v4338_v8, 0.0 }
 0x589   : > { %v4400_v17 = vpack.c.bf16 %v4388_v14, %v4387_v11 }
 0x58a   : > { %v4399_v18 = vpack.c.bf16 %v4386_v16, %v4385_v15 }
 0x58c   : > { %10603 = vmatprep.mubr.bf16.mxu1 %v4399_v18 }
 0x58d   : > { %10604 = vmatmul.mubr.bf16.gmra.mrb[84].mxu1 %v4400_v17 }
 0x592   : > { %v10577_v19 = vpop.f32.mrb[72].mxu1 }
 0x593   : > { %v4359_v20 = vadd.f32 %v10577_v19, %v9913_v63  ;;  %v4350_v21 = vpop.f32.mrb[73].mxu1 }
 0x594   : > { %v4351_v22 = vadd.f32 %v9913_v63, %v4350_v21  ;;  %v10578_v23 = vpop.f32.mrb[74].mxu1 }
 0x595   : > { %v4362_v24 = vadd.f32 %v10578_v23, %v9913_v63  ;;  %v4353_v25 = vpop.f32.mrb[75].mxu1  ;;  %v4391_v27 = vmax.f32 %v4359_v20, 0.0 }
 0x596   : > { %v4354_v26 = vadd.f32 %v9913_v63, %v4353_v25  ;;  %v4389_v33 = vmax.f32 %v4351_v22, 0.0 }
 0x597   : > { %v4392_v30 = vmax.f32 %v4362_v24, 0.0 }
 0x598   : > { %v4390_v37 = vmax.f32 %v4354_v26, 0.0 }
 0x599   : > { %v4402_v44 = vpack.c.bf16 %v4392_v30, %v4391_v27 }
 0x59a   : > { %v4401_v45 = vpack.c.bf16 %v4390_v37, %v4389_v33 }
 0x59c   : > { %10607 = vmatprep.mubr.bf16.mxu1 %v4401_v45 }
 0x59d   : > { %10608 = vmatmul.mubr.bf16.gmra.mrb[88].mxu1 %v4402_v44 }
 0x5a2   : > { %v10581_v46 = vpop.f32.mrb[76].mxu1 }
 0x5a3   : > { %v4375_v47 = vadd.f32 %v10581_v46, %v9913_v63  ;;  %v4366_v48 = vpop.f32.mrb[77].mxu1 }
 0x5a4   : > { %v4367_v49 = vadd.f32 %v9913_v63, %v4366_v48  ;;  %v10582_v50 = vpop.f32.mrb[78].mxu1 }
 0x5a5   : > { %v4378_v51 = vadd.f32 %v10582_v50, %v9913_v63  ;;  %v4369_v52 = vpop.f32.mrb[79].mxu1  ;;  %v4395_v56 = vmax.f32 %v4375_v47, 0.0 }
 0x5a6   : > { %v4370_v53 = vadd.f32 %v9913_v63, %v4369_v52  ;;  %v4393_v60 = vmax.f32 %v4367_v49, 0.0  ;;  %v11918_v63 = vld [vmem:[#allocation5 + $0x158] sm:$0xff]  }
 0x5a7   : > { %v4396_v59 = vmax.f32 %v4378_v51, 0.0  ;;  %10653 = vmatprep.subr.bf16.mxu1 %v11918_v63 }
 0x5a8   : > { %v4394_v40 = vmax.f32 %v4370_v53, 0.0  ;;  %10654 = vmatpush3.bf16.msra.mxu1 %v11918_v63 }
 0x5a9   : > { %v4404_v61 = vpack.c.bf16 %v4396_v59, %v4395_v56  ;;  %10655 = vmatprep.subr.bf16.mxu1 %v11919_v43 }
 0x5aa   : > { %v4403_v2 = vpack.c.bf16 %v4394_v40, %v4393_v60 }
 0x5ac   : > { %10611 = vmatprep.mubr.bf16.mxu1 %v4403_v2  ;;  %10656 = vmatpush3.bf16.msra.mxu1 %v11919_v43  ;;  %v11921_v43 = vld [vmem:[#allocation5 + $0x170] sm:$0xff]  }
 0x5ad   : > { %10612 = vmatmul.mubr.bf16.gmra.mrb[92].mxu1 %v4404_v61  ;;  %10657 = vmatprep.subr.bf16.mxu1 %v11920_v1 }
 0x5b0   : > { %10658 = vmatpush3.bf16.msra.mxu1 %v11920_v1  ;;  %v11922_v1 = vld [vmem:[#allocation5 + $0x178] sm:$0xff]  }
 0x5b1   : > { %10659 = vmatprep.subr.bf16.mxu1 %v11921_v43 }
 0x5b4   : > { %10660 = vmatpush3.bf16.msra.mxu1 %v11921_v43 }
 0x5b5   : > { %10661 = vmatprep.subr.bf16.mxu1 %v11922_v1 }
 0x5b8   : > { %10662 = vmatpush3.bf16.msra.mxu1 %v11922_v1 }
 0x650   : > { %v10601_v12 = vpop.f32.mrb[80].mxu1 }
 0x651   : > { %v4519_v54 = vadd.f32 %v10601_v12, %v9922_v9  ;;  %v4510_v57 = vpop.f32.mrb[81].mxu1  ;;  %v11923_v12 = vld [vmem:[#allocation7 + $0x200] ss:$8 sps:$4 sm:$0xff]  }
 0x652   : > { %v4511_v10 = vadd.f32 %v9922_v9, %v4510_v57  ;;  %v10602_v13 = vpop.f32.mrb[82].mxu1  ;;  %v11928_v57 = vld [vmem:[#allocation7 + $0x214] ss:$8 sps:$4 sm:$0xff]  }
 0x653   : > { %v4522_v55 = vadd.f32 %v10602_v13, %v9922_v9  ;;  %v4513_v58 = vpop.f32.mrb[83].mxu1  ;;  %v4575_v32 = vmax.f32 %v4519_v54, 0.0  ;;  %v11925_v54 = vld [vmem:[#allocation7 + $0x204] ss:$8 sps:$4 sm:$0xff]   ;;  %v11929_v13 = vld [vmem:[#allocation7 + $0x220] ss:$8 sps:$4 sm:$0xff]  }
 0x654   : > { %v4514_v29 = vadd.f32 %v9922_v9, %v4513_v58  ;;  %v4573_v31 = vmax.f32 %v4511_v10, 0.0  ;;  %5089 = vmatprep.subr.bf16.mxu0 %v11925_v54  ;;  %v11931_v10 = vld [vmem:[#allocation7 + $0x224] ss:$8 sps:$4 sm:$0xff]   ;;  %v11932_v58 = vld [vmem:[#allocation7 + $0x230] ss:$8 sps:$4 sm:$0xff]  }
 0x655   : > { %v4576_v28 = vmax.f32 %v4522_v55, 0.0  ;;  %v11934_v55 = vld [vmem:[#allocation7 + $0x234] ss:$8 sps:$4 sm:$0xff]  }
 0x656   : > { %v4574_v3 = vmax.f32 %v4514_v29, 0.0  ;;  %v11937_v29 = vld [vmem:[#allocation7 + $0x244] ss:$8 sps:$4 sm:$0xff]  }
 0x657   : > { %v4590_v4 = vpack.c.bf16 %v4576_v28, %v4575_v32  ;;  %v11935_v32 = vld [vmem:[#allocation7 + $0x240] ss:$8 sps:$4 sm:$0xff]   ;;  %v11940_v28 = vld [vmem:[#allocation7 + $0x254] ss:$8 sps:$4 sm:$0xff]  }
 0x658   : > { %v4589_v5 = vpack.c.bf16 %v4574_v3, %v4573_v31  ;;  %v11938_v31 = vld [vmem:[#allocation7 + $0x250] ss:$8 sps:$4 sm:$0xff]   ;;  %v9931_v3 = vld [vmem:[#allocation11 + $0x9] ss:$0 sm:$0xff] }
 0x65a   : > { %10631 = vmatprep.mubr.bf16.mxu0 %v4589_v5 }
 0x65b   : > { %10632 = vmatmul.mubr.bf16.vlgmr.msra.gmra.mrb[64].mxu0 %v4590_v4 }
 0x65c   : > { %5090 = vmatpush1.bf16.msra.mxu0 %v11923_v12 }
 0x65d   : > { %5091 = vmatprep.subr.bf16.mxu0 %v11928_v57 }
 0x660   : > { %v10605_v6 = vpop.f32.mrb[84].mxu1 }
 0x661   : > { %v4535_v7 = vadd.f32 %v10605_v6, %v9922_v9  ;;  %v4526_v8 = vpop.f32.mrb[85].mxu1 }
 0x662   : > { %v4527_v11 = vadd.f32 %v9922_v9, %v4526_v8  ;;  %v10606_v14 = vpop.f32.mrb[86].mxu1 }
 0x663   : > { %v4538_v15 = vadd.f32 %v10606_v14, %v9922_v9  ;;  %v4529_v16 = vpop.f32.mrb[87].mxu1  ;;  %v4579_v18 = vmax.f32 %v4535_v7, 0.0 }
 0x664   : > { %v4530_v17 = vadd.f32 %v9922_v9, %v4529_v16  ;;  %v4577_v20 = vmax.f32 %v4527_v11, 0.0 }
 0x665   : > { %v4580_v19 = vmax.f32 %v4538_v15, 0.0 }
 0x666   : > { %v4578_v21 = vmax.f32 %v4530_v17, 0.0 }
 0x667   : > { %v4592_v22 = vpack.c.bf16 %v4580_v19, %v4579_v18 }
 0x668   : > { %v4591_v23 = vpack.c.bf16 %v4578_v21, %v4577_v20 }
 0x66a   : > { %10635 = vmatprep.mubr.bf16.mxu0 %v4591_v23 }
 0x66b   : > { %10636 = vmatmul.mubr.bf16.gmra.mrb[68].mxu0 %v4592_v22 }
 0x670   : > { %v10609_v24 = vpop.f32.mrb[88].mxu1 }
 0x671   : > { %v4551_v25 = vadd.f32 %v10609_v24, %v9922_v9  ;;  %v4542_v26 = vpop.f32.mrb[89].mxu1 }
 0x672   : > { %v4543_v27 = vadd.f32 %v9922_v9, %v4542_v26  ;;  %v10610_v30 = vpop.f32.mrb[90].mxu1 }
 0x673   : > { %v4554_v33 = vadd.f32 %v10610_v30, %v9922_v9  ;;  %v4545_v37 = vpop.f32.mrb[91].mxu1  ;;  %v4583_v45 = vmax.f32 %v4551_v25, 0.0 }
 0x674   : > { %v4546_v44 = vadd.f32 %v9922_v9, %v4545_v37  ;;  %v4581_v47 = vmax.f32 %v4543_v27, 0.0 }
 0x675   : > { %v4584_v46 = vmax.f32 %v4554_v33, 0.0 }
 0x676   : > { %v4582_v48 = vmax.f32 %v4546_v44, 0.0 }
 0x677   : > { %v4594_v49 = vpack.c.bf16 %v4584_v46, %v4583_v45 }
 0x678   : > { %v4593_v50 = vpack.c.bf16 %v4582_v48, %v4581_v47 }
 0x67a   : > { %10639 = vmatprep.mubr.bf16.mxu0 %v4593_v50 }
 0x67b   : > { %10640 = vmatmul.mubr.bf16.gmra.mrb[72].mxu0 %v4594_v49 }
 0x680   : > { %v10613_v51 = vpop.f32.mrb[92].mxu1 }
 0x681   : > { %v4567_v52 = vadd.f32 %v10613_v51, %v9922_v9  ;;  %v4558_v53 = vpop.f32.mrb[93].mxu1 }
 0x682   : > { %v4559_v56 = vadd.f32 %v9922_v9, %v4558_v53  ;;  %v10614_v59 = vpop.f32.mrb[94].mxu1 }
 0x683   : > { %v4570_v60 = vadd.f32 %v10614_v59, %v9922_v9  ;;  %v4561_v40 = vpop.f32.mrb[95].mxu1  ;;  %v4587_v2 = vmax.f32 %v4567_v52, 0.0 }
 0x684   : > { %v4562_v61 = vadd.f32 %v9922_v9, %v4561_v40  ;;  %v4585_v62 = vmax.f32 %v4559_v56, 0.0  ;;  %v11926_v9 = vld [vmem:[#allocation7 + $0x210] ss:$8 sps:$4 sm:$0xff]  }
 0x685   : > { %v4588_v41 = vmax.f32 %v4570_v60, 0.0  ;;  %5092 = vmatpush1.bf16.msra.mxu0 %v11926_v9 }
 0x686   : > { %v4586_v0 = vmax.f32 %v4562_v61, 0.0  ;;  %5093 = vmatprep.subr.bf16.mxu0 %v11931_v10 }
 0x687   : > { %v4596_v42 = vpack.c.bf16 %v4588_v41, %v4587_v2 }
 0x688   : > { %v4595_v63 = vpack.c.bf16 %v4586_v0, %v4585_v62 }
 0x689   : > { %5094 = vmatpush1.bf16.msra.mxu0 %v11929_v13 }
 0x68a   : > { %10643 = vmatprep.mubr.bf16.mxu0 %v4595_v63  ;;  %5095 = vmatprep.subr.bf16.mxu0 %v11934_v55 }
 0x68b   : > { %10644 = vmatmul.mubr.bf16.gmra.mrb[76].mxu0 %v4596_v42 }
 0x68d   : > { %5096 = vmatpush1.bf16.msra.mxu0 %v11932_v58 }
 0x68e   : > { %5097 = vmatprep.subr.bf16.mxu0 %v11937_v29 }
 0x691   : > { %5098 = vmatpush1.bf16.msra.mxu0 %v11935_v32 }
 0x692   : > { %5099 = vmatprep.subr.bf16.mxu0 %v11940_v28  ;;  %v11943_v28 = vld [vmem:[#allocation7 + $0x264] ss:$8 sps:$4 sm:$0xff]  }
 0x695   : > { %5100 = vmatpush1.bf16.msra.mxu0 %v11938_v31  ;;  %v11941_v31 = vld [vmem:[#allocation7 + $0x260] ss:$8 sps:$4 sm:$0xff]  }
 0x696   : > { %5101 = vmatprep.subr.bf16.mxu0 %v11943_v28 }
 0x699   : > { %5102 = vmatpush1.bf16.msra.mxu0 %v11941_v31 }
 0x72e   : > { %v10633_v4 = vpop.f32.mrb[64].mxu0 }
 0x72f   : > { %v4711_v5 = vadd.f32 %v10633_v4, %v9931_v3  ;;  %v4702_v6 = vpop.f32.mrb[65].mxu0  ;;  %v11946_v4 = vld [vmem:[#allocation7 + $0x274] ss:$8 sps:$4 sm:$0xff]  }
 0x730   : > { %v4703_v7 = vadd.f32 %v9931_v3, %v4702_v6  ;;  %v10634_v8 = vpop.f32.mrb[66].mxu0  ;;  %5103 = vmatprep.subr.bf16.mxu0 %v11946_v4  ;;  %v12820_v6 = vmov 0  }
 0x731   : > { %v4714_v11 = vadd.f32 %v10634_v8, %v9931_v3  ;;  %v4705_v14 = vpop.f32.mrb[67].mxu0  ;;  %v4767_v16 = vmax.f32 %v4711_v5, 0.0  ;;  %v11944_v5 = vld [vmem:[#allocation7 + $0x270] ss:$8 sps:$4 sm:$0xff]   ;;  %5121 = vmatprep.mubr.bf16.mxu0 %v12820_v6  ;;  %v11952_v8 = vld [vmem:[#allocation8 + $0x80c] ss:$16 sps:$4 sm:$0xff]  }
 0x732   : > { %v4706_v15 = vadd.f32 %v9931_v3, %v4705_v14  ;;  %v4765_v18 = vmax.f32 %v4703_v7, 0.0  ;;  %5104 = vmatpush1.bf16.msra.mxu0 %v11944_v5  ;;  %v11949_v7 = vld [vmem:[#allocation8 + $0x804] ss:$16 sps:$4 sm:$0xff]   ;;  %v11953_v14 = vld [vmem:[#allocation8 + $0x820] ss:$16 sps:$4 sm:$0xff]  }
 0x733   : > { %v4768_v17 = vmax.f32 %v4714_v11, 0.0  ;;  %v11955_v11 = vld [vmem:[#allocation8 + $0x824] ss:$16 sps:$4 sm:$0xff]   ;;  %5656 = vmatprep.subr.bf16.mxu1 %v11949_v7  ;;  %5769 = vmatprep.subr.bf16.mxu0 %v11952_v8  ;;  %v11968_v5 = vld [vmem:[#allocation8 + $0x868] ss:$16 sps:$4 sm:$0xff]  }
 0x734   : > { %v4766_v19 = vmax.f32 %v4706_v15, 0.0  ;;  %v11961_v15 = vld [vmem:[#allocation8 + $0x844] ss:$16 sps:$4 sm:$0xff]   ;;  %v11976_v7 = vld [vmem:[#allocation8 + $0x88c] ss:$16 sps:$4 sm:$0xff]  }
 0x735   : > { %v4782_v20 = vpack.c.bf16 %v4768_v17, %v4767_v16  ;;  %v11959_v16 = vld [vmem:[#allocation8 + $0x840] ss:$16 sps:$4 sm:$0xff]   ;;  %v11967_v17 = vld [vmem:[#allocation8 + $0x864] ss:$16 sps:$4 sm:$0xff]  }
 0x736   : > { %v4781_v21 = vpack.c.bf16 %v4766_v19, %v4765_v18  ;;  %v11965_v18 = vld [vmem:[#allocation8 + $0x860] ss:$16 sps:$4 sm:$0xff]   ;;  %v11973_v19 = vld [vmem:[#allocation8 + $0x884] ss:$16 sps:$4 sm:$0xff]  }
 0x738   : > { %10663 = vmatprep.mubr.bf16.mxu1 %v4781_v21  ;;  %v11979_v21 = vld [vmem:[#allocation8 + $0x8a4] ss:$16 sps:$4 sm:$0xff]  }
 0x739   : > { %10664 = vmatmul.mubr.bf16.vlgmr.msra.gmra.mrb[96].mxu1 %v4782_v20  ;;  %v11971_v20 = vld [vmem:[#allocation8 + $0x880] ss:$16 sps:$4 sm:$0xff]  }
 0x73e   : > { %v10637_v22 = vpop.f32.mrb[68].mxu0 }
 0x73f   : > { %v4727_v23 = vadd.f32 %v10637_v22, %v9931_v3  ;;  %v4718_v24 = vpop.f32.mrb[69].mxu0  ;;  %v11977_v22 = vld [vmem:[#allocation8 + $0x8a0] ss:$16 sps:$4 sm:$0xff]  }
 0x740   : > { %v4719_v25 = vadd.f32 %v9931_v3, %v4718_v24  ;;  %v10638_v26 = vpop.f32.mrb[70].mxu0  ;;  %v11983_v24 = vld [vmem:[#allocation8 + $0x8c0] ss:$16 sps:$4 sm:$0xff]  }
 0x741   : > { %v4730_v27 = vadd.f32 %v10638_v26, %v9931_v3  ;;  %v4721_v30 = vpop.f32.mrb[71].mxu0  ;;  %v4771_v37 = vmax.f32 %v4727_v23, 0.0  ;;  %v11985_v23 = vld [vmem:[#allocation8 + $0x8c4] ss:$16 sps:$4 sm:$0xff]   ;;  %v11989_v26 = vld [vmem:[#allocation8 + $0x8e0] ss:$16 sps:$4 sm:$0xff]  }
 0x742   : > { %v4722_v33 = vadd.f32 %v9931_v3, %v4721_v30  ;;  %v4769_v45 = vmax.f32 %v4719_v25, 0.0  ;;  %v11991_v25 = vld [vmem:[#allocation8 + $0x8e4] ss:$16 sps:$4 sm:$0xff]   ;;  %v11995_v30 = vld [vmem:[#allocation8 + $0x900] ss:$16 sps:$4 sm:$0xff]  }
 0x743   : > { %v4772_v44 = vmax.f32 %v4730_v27, 0.0  ;;  %v11997_v27 = vld [vmem:[#allocation8 + $0x904] ss:$16 sps:$4 sm:$0xff]  }
 0x744   : > { %v4770_v46 = vmax.f32 %v4722_v33, 0.0  ;;  %v12003_v33 = vld [vmem:[#allocation8 + $0x924] ss:$16 sps:$4 sm:$0xff]  }
 0x745   : > { %v4784_v47 = vpack.c.bf16 %v4772_v44, %v4771_v37  ;;  %v12001_v37 = vld [vmem:[#allocation8 + $0x920] ss:$16 sps:$4 sm:$0xff]   ;;  %v12009_v44 = vld [vmem:[#allocation8 + $0x944] ss:$16 sps:$4 sm:$0xff]  }
 0x746   : > { %v4783_v48 = vpack.c.bf16 %v4770_v46, %v4769_v45  ;;  %v12007_v45 = vld [vmem:[#allocation8 + $0x940] ss:$16 sps:$4 sm:$0xff]   ;;  %v12015_v46 = vld [vmem:[#allocation8 + $0x964] ss:$16 sps:$4 sm:$0xff]  }
 0x748   : > { %10667 = vmatprep.mubr.bf16.mxu1 %v4783_v48  ;;  %v12021_v48 = vld [vmem:[#allocation8 + $0x984] ss:$16 sps:$4 sm:$0xff]  }
 0x749   : > { %10668 = vmatmul.mubr.bf16.gmra.mrb[100].mxu1 %v4784_v47  ;;  %v12013_v47 = vld [vmem:[#allocation8 + $0x960] ss:$16 sps:$4 sm:$0xff]  }
 0x74e   : > { %v10641_v49 = vpop.f32.mrb[72].mxu0 }
 0x74f   : > { %v4743_v50 = vadd.f32 %v10641_v49, %v9931_v3  ;;  %v4734_v51 = vpop.f32.mrb[73].mxu0  ;;  %v12019_v49 = vld [vmem:[#allocation8 + $0x980] ss:$16 sps:$4 sm:$0xff]  }
 0x750   : > { %v4735_v52 = vadd.f32 %v9931_v3, %v4734_v51  ;;  %v10642_v53 = vpop.f32.mrb[74].mxu0  ;;  %v12025_v51 = vld [vmem:[#allocation8 + $0x9a0] ss:$16 sps:$4 sm:$0xff]  }
 0x751   : > { %v4746_v56 = vadd.f32 %v10642_v53, %v9931_v3  ;;  %v4737_v59 = vpop.f32.mrb[75].mxu0  ;;  %v4775_v40 = vmax.f32 %v4743_v50, 0.0  ;;  %v12027_v50 = vld [vmem:[#allocation8 + $0x9a4] ss:$16 sps:$4 sm:$0xff]  }
 0x752   : > { %v4738_v60 = vadd.f32 %v9931_v3, %v4737_v59  ;;  %v4773_v2 = vmax.f32 %v4735_v52, 0.0  ;;  %v13364_v52 = vld [vmem:[#allocation11 + $0xa] ss:$0 sm:$0xff] }
 0x753   : > { %v4776_v61 = vmax.f32 %v4746_v56, 0.0 }
 0x754   : > { %v4774_v41 = vmax.f32 %v4738_v60, 0.0 }
 0x755   : > { %v4786_v62 = vpack.c.bf16 %v4776_v61, %v4775_v40 }
 0x756   : > { %v4785_v0 = vpack.c.bf16 %v4774_v41, %v4773_v2 }
 0x758   : > { %10671 = vmatprep.mubr.bf16.mxu1 %v4785_v0 }
 0x759   : > { %10672 = vmatmul.mubr.bf16.gmra.mrb[104].mxu1 %v4786_v62 }
 0x75e   : > { %v10645_v42 = vpop.f32.mrb[76].mxu0 }
 0x75f   : > { %v4759_v63 = vadd.f32 %v10645_v42, %v9931_v3  ;;  %v4750_v43 = vpop.f32.mrb[77].mxu0 }
 0x760   : > { %v4751_v1 = vadd.f32 %v9931_v3, %v4750_v43  ;;  %v10646_v12 = vpop.f32.mrb[78].mxu0 }
 0x761   : > { %v4762_v54 = vadd.f32 %v10646_v12, %v9931_v3  ;;  %v4753_v57 = vpop.f32.mrb[79].mxu0  ;;  %v4779_v10 = vmax.f32 %v4759_v63, 0.0 }
 0x762   : > { %v4754_v9 = vadd.f32 %v9931_v3, %v4753_v57  ;;  %v4777_v55 = vmax.f32 %v4751_v1, 0.0  ;;  %v11947_v3 = vld [vmem:[#allocation8 + $0x800] ss:$16 sps:$4 sm:$0xff]   ;;  %v11950_v1 = vld [vmem:[#allocation8 + $0x808] ss:$16 sps:$4 sm:$0xff]  }
 0x763   : > { %v4780_v13 = vmax.f32 %v4762_v54, 0.0  ;;  %5657 = vmatpush1.bf16.msra.mxu1 %v11947_v3  ;;  %v11958_v54 = vld [vmem:[#allocation8 + $0x82c] ss:$16 sps:$4 sm:$0xff]   ;;  %v11956_v57 = vld [vmem:[#allocation8 + $0x828] ss:$16 sps:$4 sm:$0xff]  }
 0x764   : > { %v4778_v58 = vmax.f32 %v4754_v9, 0.0  ;;  %5658 = vmatprep.subr.bf16.mxu1 %v11955_v11  ;;  %v11964_v9 = vld [vmem:[#allocation8 + $0x84c] ss:$16 sps:$4 sm:$0xff]  }
 0x765   : > { %v4788_v29 = vpack.c.bf16 %v4780_v13, %v4779_v10  ;;  %v11962_v10 = vld [vmem:[#allocation8 + $0x848] ss:$16 sps:$4 sm:$0xff]  }
 0x766   : > { %v4787_v32 = vpack.c.bf16 %v4778_v58, %v4777_v55  ;;  %v11970_v55 = vld [vmem:[#allocation8 + $0x86c] ss:$16 sps:$4 sm:$0xff]  }
 0x767   : > { %5659 = vmatpush1.bf16.msra.mxu1 %v11953_v14 }
 0x768   : > { %10675 = vmatprep.mubr.bf16.mxu1 %v4787_v32  ;;  %5660 = vmatprep.subr.bf16.mxu1 %v11961_v15 }
 0x769   : > { %10676 = vmatmul.mubr.bf16.gmra.mrb[108].mxu1 %v4788_v29 }
 0x76b   : > { %5661 = vmatpush1.bf16.msra.mxu1 %v11959_v16 }
 0x76c   : > { %5662 = vmatprep.subr.bf16.mxu1 %v11967_v17  ;;  %v11974_v17 = vld [vmem:[#allocation8 + $0x888] ss:$16 sps:$4 sm:$0xff]  }
 0x76f   : > { %5663 = vmatpush1.bf16.msra.mxu1 %v11965_v18 }
 0x770   : > { %5664 = vmatprep.subr.bf16.mxu1 %v11973_v19  ;;  %v11982_v19 = vld [vmem:[#allocation8 + $0x8ac] ss:$16 sps:$4 sm:$0xff]  }
 0x773   : > { %5665 = vmatpush1.bf16.msra.mxu1 %v11971_v20  ;;  %v11980_v20 = vld [vmem:[#allocation8 + $0x8a8] ss:$16 sps:$4 sm:$0xff]  }
 0x774   : > { %5666 = vmatprep.subr.bf16.mxu1 %v11979_v21  ;;  %v11988_v21 = vld [vmem:[#allocation8 + $0x8cc] ss:$16 sps:$4 sm:$0xff]  }
 0x777   : > { %5667 = vmatpush1.bf16.msra.mxu1 %v11977_v22  ;;  %v11986_v22 = vld [vmem:[#allocation8 + $0x8c8] ss:$16 sps:$4 sm:$0xff]  }
 0x778   : > { %5668 = vmatprep.subr.bf16.mxu1 %v11985_v23 }
 0x77b   : > { %5669 = vmatpush1.bf16.msra.mxu1 %v11983_v24  ;;  %v11994_v24 = vld [vmem:[#allocation8 + $0x8ec] ss:$16 sps:$4 sm:$0xff]  }
 0x77c   : > { %5670 = vmatprep.subr.bf16.mxu1 %v11991_v25 }
 0x77f   : > { %5671 = vmatpush1.bf16.msra.mxu1 %v11989_v26 }
 0x780   : > { %5672 = vmatprep.subr.bf16.mxu1 %v11997_v27 }
 0x783   : > { %5673 = vmatpush1.bf16.msra.mxu1 %v11995_v30 }
 0x784   : > { %5674 = vmatprep.subr.bf16.mxu1 %v12003_v33 }
 0x787   : > { %5675 = vmatpush1.bf16.msra.mxu1 %v12001_v37 }
 0x788   : > { %5676 = vmatprep.subr.bf16.mxu1 %v12009_v44  ;;  %v11992_v44 = vld [vmem:[#allocation8 + $0x8e8] ss:$16 sps:$4 sm:$0xff]  }
 0x78b   : > { %5677 = vmatpush1.bf16.msra.mxu1 %v12007_v45 }
 0x78c   : > { %5678 = vmatprep.subr.bf16.mxu1 %v12015_v46  ;;  %v12000_v46 = vld [vmem:[#allocation8 + $0x90c] ss:$16 sps:$4 sm:$0xff]  }
 0x78f   : > { %5679 = vmatpush1.bf16.msra.mxu1 %v12013_v47 }
 0x790   : > { %5680 = vmatprep.subr.bf16.mxu1 %v12021_v48 }
 0x793   : > { %5681 = vmatpush1.bf16.msra.mxu1 %v12019_v49 }
 0x794   : > { %5682 = vmatprep.subr.bf16.mxu1 %v12027_v50 }
 0x797   : > { %5683 = vmatpush1.bf16.msra.mxu1 %v12025_v51 }
 0x80c   : > { %v10665_v53 = vpop.f32.mrb[96].mxu1 }
 0x80d   : > { %v4903_v56 = vadd.f32 %v10665_v53, %v13364_v52  ;;  %v4894_v59 = vpop.f32.mrb[97].mxu1  ;;  %v11998_v53 = vld [vmem:[#allocation8 + $0x908] ss:$16 sps:$4 sm:$0xff]  }
 0x80e   : > { %v4895_v60 = vadd.f32 %v13364_v52, %v4894_v59  ;;  %v10666_v40 = vpop.f32.mrb[98].mxu1  ;;  %v12006_v59 = vld [vmem:[#allocation8 + $0x92c] ss:$16 sps:$4 sm:$0xff]  }
 0x80f   : > { %v4906_v61 = vadd.f32 %v10666_v40, %v13364_v52  ;;  %v4897_v2 = vpop.f32.mrb[99].mxu1  ;;  %v4959_v62 = vmax.f32 %v4903_v56, 0.0  ;;  %v12012_v40 = vld [vmem:[#allocation8 + $0x94c] ss:$16 sps:$4 sm:$0xff]  }
 0x810   : > { %v4898_v41 = vadd.f32 %v13364_v52, %v4897_v2  ;;  %v4957_v42 = vmax.f32 %v4895_v60, 0.0  ;;  %v12004_v60 = vld [vmem:[#allocation8 + $0x928] ss:$16 sps:$4 sm:$0xff]  }
 0x811   : > { %v4960_v0 = vmax.f32 %v4906_v61, 0.0  ;;  %v12010_v61 = vld [vmem:[#allocation8 + $0x948] ss:$16 sps:$4 sm:$0xff]  }
 0x812   : > { %v4958_v63 = vmax.f32 %v4898_v41, 0.0  ;;  %v12018_v41 = vld [vmem:[#allocation8 + $0x96c] ss:$16 sps:$4 sm:$0xff]  }
 0x813   : > { %v4974_v43 = vpack.c.bf16 %v4960_v0, %v4959_v62 }
 0x814   : > { %v4973_v12 = vpack.c.bf16 %v4958_v63, %v4957_v42 }
 0x816   : > { %5122 = vmatmul.mubr.bf16.vlgmr.msra.gmra.mrb[80].mxu0 %v4973_v12  ;;  %v12016_v12 = vld [vmem:[#allocation8 + $0x968] ss:$16 sps:$4 sm:$0xff]  }
 0x817   : > { %5131 = vmatprep.mubr.bf16.mxu0 %v12820_v6  ;;  %5770 = vmatpush1.bf16.msra.mxu0 %v11950_v1 }
 0x818   : > { %5771 = vmatprep.subr.bf16.mxu0 %v11958_v54 }
 0x81b   : > { %5772 = vmatpush1.bf16.msra.mxu0 %v11956_v57  ;;  %v12024_v57 = vld [vmem:[#allocation8 + $0x98c] ss:$16 sps:$4 sm:$0xff]  }
 0x81c   : > { %v10669_v13 = vpop.f32.mrb[100].mxu1  ;;  %5773 = vmatprep.subr.bf16.mxu0 %v11964_v9 }
 0x81d   : > { %v4919_v58 = vadd.f32 %v10669_v13, %v13364_v52  ;;  %v4910_v29 = vpop.f32.mrb[101].mxu1 }
 0x81e   : > { %v4911_v32 = vadd.f32 %v13364_v52, %v4910_v29  ;;  %v10670_v28 = vpop.f32.mrb[102].mxu1  ;;  %5132 = vmatmul.mubr.bf16.gmra.mrb[84].mxu0 %v4974_v43  ;;  %v12022_v29 = vld [vmem:[#allocation8 + $0x988] ss:$16 sps:$4 sm:$0xff]  }
 0x81f   : > { %v4922_v31 = vadd.f32 %v10670_v28, %v13364_v52  ;;  %v4913_v4 = vpop.f32.mrb[103].mxu1  ;;  %5141 = vmatprep.mubr.bf16.mxu0 %v12820_v6  ;;  %5774 = vmatpush1.bf16.msra.mxu0 %v11962_v10  ;;  %v4963_v8 = vmax.f32 %v4919_v58, 0.0  ;;  %v12030_v28 = vld [vmem:[#allocation8 + $0x9ac] ss:$16 sps:$4 sm:$0xff]  }
 0x820   : > { %v4914_v3 = vadd.f32 %v13364_v52, %v4913_v4  ;;  %5775 = vmatprep.subr.bf16.mxu0 %v11970_v55  ;;  %v4961_v14 = vmax.f32 %v4911_v32, 0.0  ;;  %v12036_v4 = vld [vmem:[#allocation8 + $0x9cc] ss:$16 sps:$4 sm:$0xff]  }
 0x821   : > { %v4964_v11 = vmax.f32 %v4922_v31, 0.0  ;;  %v12028_v31 = vld [vmem:[#allocation8 + $0x9a8] ss:$16 sps:$4 sm:$0xff]  }
 0x822   : > { %v4962_v15 = vmax.f32 %v4914_v3, 0.0  ;;  %v12034_v3 = vld [vmem:[#allocation8 + $0x9c8] ss:$16 sps:$4 sm:$0xff]  }
 0x823   : > { %v4976_v16 = vpack.c.bf16 %v4964_v11, %v4963_v8  ;;  %5776 = vmatpush1.bf16.msra.mxu0 %v11968_v5  ;;  %v12031_v5 = vld [vmem:[#allocation8 + $0x9c0] ss:$16 sps:$4 sm:$0xff]   ;;  %v12042_v8 = vld [vmem:[#allocation8 + $0x9ec] ss:$16 sps:$4 sm:$0xff]  }
 0x824   : > { %v4975_v18 = vpack.c.bf16 %v4962_v15, %v4961_v14  ;;  %5777 = vmatprep.subr.bf16.mxu0 %v11976_v7  ;;  %v12039_v7 = vld [vmem:[#allocation8 + $0x9e4] ss:$16 sps:$4 sm:$0xff]   ;;  %v12037_v11 = vld [vmem:[#allocation8 + $0x9e0] ss:$16 sps:$4 sm:$0xff]   ;;  %v12040_v14 = vld [vmem:[#allocation8 + $0x9e8] ss:$16 sps:$4 sm:$0xff]  }
 0x825   : > { %v5982_v15 = vld [vmem:[#allocation10 + $0x20] sm:$0xff] }
 0x826   : > { %5142 = vmatmul.mubr.bf16.gmra.mrb[88].mxu0 %v4975_v18 }
 0x827   : > { %5151 = vmatprep.mubr.bf16.mxu0 %v12820_v6  ;;  %5778 = vmatpush1.bf16.msra.mxu0 %v11974_v17 }
 0x828   : > { %5779 = vmatprep.subr.bf16.mxu0 %v11982_v19  ;;  %v5983_v19 = vld [vmem:[#allocation10 + $0x28] sm:$0xff] }
 0x82b   : > { %5780 = vmatpush1.bf16.msra.mxu0 %v11980_v20 }
 0x82c   : > { %v10673_v23 = vpop.f32.mrb[104].mxu1  ;;  %5781 = vmatprep.subr.bf16.mxu0 %v11988_v21 }
 0x82d   : > { %v4935_v25 = vadd.f32 %v10673_v23, %v13364_v52  ;;  %v4926_v26 = vpop.f32.mrb[105].mxu1 }
 0x82e   : > { %v4927_v27 = vadd.f32 %v13364_v52, %v4926_v26  ;;  %v10674_v30 = vpop.f32.mrb[106].mxu1  ;;  %5152 = vmatmul.mubr.bf16.gmra.mrb[92].mxu0 %v4976_v16  ;;  %v5979_v16 = vld [vmem:[#allocation10 + $0x8] sm:$0xff] }
 0x82f   : > { %v4938_v33 = vadd.f32 %v10674_v30, %v13364_v52  ;;  %v4929_v37 = vpop.f32.mrb[107].mxu1  ;;  %5161 = vmatprep.mubr.bf16.mxu0 %v12820_v6  ;;  %5782 = vmatpush1.bf16.msra.mxu0 %v11986_v22  ;;  %v4967_v47 = vmax.f32 %v4935_v25, 0.0  ;;  %v10031_v20 = vcombine.low %v5979_v16, %v5983_v19  ;;  %v10032_v21 = vcombine.high %v5979_v16, %v5983_v19  ;;  %v4997_v22 = vld [vmem:[#allocation11 + $0xb] sm:$0x3]  ;;  %v6010_v19 = vld [vmem:[#allocation10 + $0x100] sm:$0xff] }
 0x830   : > { %v4930_v45 = vadd.f32 %v13364_v52, %v4929_v37  ;;  %5783 = vmatprep.subr.bf16.mxu0 %v11994_v24  ;;  %v4965_v49 = vmax.f32 %v4927_v27, 0.0  ;;  %v13390_v23 = vrot.slane %v4997_v22, %v13181_v35  ;;  %v13393_v24 = vrot.slane %v4997_v22, %v13187_v38  ;;  %v6014_v22 = vld [vmem:[#allocation10 + $0x120] sm:$0xff] }
 0x831   : > { %v4968_v48 = vmax.f32 %v4938_v33, 0.0 }
 0x832   : > { %v4966_v50 = vmax.f32 %v4930_v45, 0.0 }
 0x833   : > { %v4978_v51 = vpack.c.bf16 %v4968_v48, %v4967_v47  ;;  %5784 = vmatpush1.bf16.msra.mxu0 %v11992_v44  ;;  %v5986_v48 = vld [vmem:[#allocation10 + $0x40] sm:$0xff] }
 0x834   : > { %v4977_v56 = vpack.c.bf16 %v4966_v50, %v4965_v49  ;;  %5785 = vmatprep.subr.bf16.mxu0 %v12000_v46 }
 0x836   : > { %5162 = vmatmul.mubr.bf16.gmra.mrb[96].mxu0 %v4977_v56  ;;  %v5991_v56 = vld [vmem:[#allocation10 + $0x68] sm:$0xff] }
 0x837   : > { %5171 = vmatprep.mubr.bf16.mxu0 %v12820_v6  ;;  %5786 = vmatpush1.bf16.msra.mxu0 %v11998_v53  ;;  %v5987_v53 = vld [vmem:[#allocation10 + $0x48] sm:$0xff] }
 0x838   : > { %5787 = vmatprep.subr.bf16.mxu0 %v12006_v59 }
 0x83b   : > { %5788 = vmatpush1.bf16.msra.mxu0 %v12004_v60 }
 0x83c   : > { %v10677_v2 = vpop.f32.mrb[108].mxu1  ;;  %5789 = vmatprep.subr.bf16.mxu0 %v12012_v40 }
 0x83d   : > { %v4951_v62 = vadd.f32 %v10677_v2, %v13364_v52  ;;  %v4942_v0 = vpop.f32.mrb[109].mxu1 }
 0x83e   : > { %v4943_v42 = vadd.f32 %v13364_v52, %v4942_v0  ;;  %v10678_v63 = vpop.f32.mrb[110].mxu1  ;;  %5172 = vmatmul.mubr.bf16.gmra.mrb[100].mxu0 %v4978_v51  ;;  %v5990_v51 = vld [vmem:[#allocation10 + $0x60] sm:$0xff] }
 0x83f   : > { %v4954_v43 = vadd.f32 %v10678_v63, %v13364_v52  ;;  %v4945_v1 = vpop.f32.mrb[111].mxu1  ;;  %5181 = vmatprep.mubr.bf16.mxu0 %v12820_v6  ;;  %5790 = vmatpush1.bf16.msra.mxu0 %v12010_v61  ;;  %v4971_v9 = vmax.f32 %v4951_v62, 0.0  ;;  %v10040_v62 = vcombine.high %v5987_v53, %v5991_v56  ;;  %v5994_v0 = vld [vmem:[#allocation10 + $0x80] sm:$0xff] }
 0x840   : > { %v4946_v54 = vadd.f32 %v13364_v52, %v4945_v1  ;;  %5791 = vmatprep.subr.bf16.mxu0 %v12018_v41  ;;  %v4969_v13 = vmax.f32 %v4943_v42, 0.0  ;;  %v12033_v52 = vld [vmem:[#allocation8 + $0x9c4] ss:$16 sps:$4 sm:$0xff]   ;;  %v10038_v41 = vcombine.high %v5986_v48, %v5990_v51  ;;  %v5995_v1 = vld [vmem:[#allocation10 + $0x88] sm:$0xff] }
 0x841   : > { %v4972_v10 = vmax.f32 %v4954_v43, 0.0  ;;  %5684 = vmatprep.subr.bf16.mxu1 %v12033_v52  ;;  %v5998_v43 = vld [vmem:[#allocation10 + $0xa0] sm:$0xff] }
 0x842   : > { %v4970_v55 = vmax.f32 %v4946_v54, 0.0  ;;  %5685 = vmatpush1.bf16.msra.mxu1 %v12031_v5  ;;  %v6003_v5 = vld [vmem:[#allocation10 + $0xc8] sm:$0xff] }
 0x843   : > { %v4980_v58 = vpack.c.bf16 %v4972_v10, %v4971_v9  ;;  %5792 = vmatpush1.bf16.msra.mxu0 %v12016_v12  ;;  %5686 = vmatprep.subr.bf16.mxu1 %v12039_v7  ;;  %v5999_v12 = vld [vmem:[#allocation10 + $0xa8] sm:$0xff]  ;;  %v10037_v10 = vcombine.low %v5986_v48, %v5990_v51 }
 0x844   : > { %v4979_v32 = vpack.c.bf16 %v4970_v55, %v4969_v13  ;;  %5793 = vmatprep.subr.bf16.mxu0 %v12024_v57  ;;  %v10039_v13 = vcombine.low %v5987_v53, %v5991_v56  ;;  %v6022_v53 = vld [vmem:[#allocation10 + $0x160] sm:$0xff]  ;;  %v6019_v56 = vld [vmem:[#allocation10 + $0x148] sm:$0xff] }
 0x846   : > { %5182 = vmatmul.mubr.bf16.gmra.mrb[104].mxu0 %v4979_v32  ;;  %5687 = vmatpush1.bf16.msra.mxu1 %v12037_v11  ;;  %v10048_v32 = vcombine.high %v5995_v1, %v5999_v12 }
 0x847   : > { %5191 = vmatprep.mubr.bf16.mxu0 %v12820_v6  ;;  %5794 = vmatpush1.bf16.msra.mxu0 %v12022_v29  ;;  %v5978_v6 = vld [vmem:[#allocation10] sm:$0xff]  ;;  %v10046_v29 = vcombine.high %v5994_v0, %v5998_v43 }
 0x848   : > { %5795 = vmatprep.subr.bf16.mxu0 %v12030_v28  ;;  %v10029_v17 = vcombine.low %v5978_v6, %v5982_v15  ;;  %v10030_v18 = vcombine.high %v5978_v6, %v5982_v15  ;;  %v6002_v28 = vld [vmem:[#allocation10 + $0xc0] sm:$0xff]  ;;  %v10047_v6 = vcombine.low %v5995_v1, %v5999_v12 }
 0x84a   : > { %7556 = vmatprep.subr.bf16.mxu1 %v10030_v18 }
 0x84b   : > { %5796 = vmatpush1.bf16.msra.mxu0 %v12028_v31 }
 0x84c   : > { %5797 = vmatprep.subr.bf16.mxu0 %v12036_v4  ;;  %v6006_v4 = vld [vmem:[#allocation10 + $0xe0] sm:$0xff] }
 0x84e   : > { %5192 = vmatmul.mubr.bf16.gmra.mrb[108].mxu0 %v4980_v58 }
 0x84f   : > { %5798 = vmatpush1.bf16.msra.mxu0 %v12034_v3  ;;  %v6007_v3 = vld [vmem:[#allocation10 + $0xe8] sm:$0xff] }
 0x850   : > { %5799 = vmatprep.subr.bf16.mxu0 %v12042_v8  ;;  %v10056_v18 = vcombine.high %v6003_v5, %v6007_v3 }
 0x853   : > { %5800 = vmatpush1.bf16.msra.mxu0 %v12040_v14  ;;  %v10045_v14 = vcombine.low %v5994_v0, %v5998_v43  ;;  %v6026_v43 = vld [vmem:[#allocation10 + $0x180] sm:$0xff] }
 0x854   : > { %7782 = vmatprep.subr.bf16.mxu0 %v10032_v21 }
 0x8e9   : > { %v5123_v25 = vpop.f32.mrb[80].mxu0 }
 0x8ea   : > { %v5124_v26 = vadd.f32 %v5123_v25, %v13390_v23  ;;  %v5125_v27 = vpop.f32.mrb[81].mxu0  ;;  %v6011_v25 = vld [vmem:[#allocation10 + $0x108] sm:$0xff] }
 0x8eb   : > { %v5126_v30 = vadd.f32 %v5125_v27, %v13393_v24  ;;  %v5127_v33 = vpop.f32.mrb[82].mxu0 }
 0x8ec   : > { %v5128_v37 = vadd.f32 %v5127_v33, %v13390_v23  ;;  %v5129_v44 = vpop.f32.mrb[83].mxu0  ;;  %v5202_v46 = vmax.f32 %v5124_v26, 0.0  ;;  %v6015_v26 = vld [vmem:[#allocation10 + $0x128] sm:$0xff] }
 0x8ed   : > { %v5130_v45 = vadd.f32 %v5129_v44, %v13393_v24  ;;  %v5203_v49 = vmax.f32 %v5126_v30, 0.0  ;;  %v10055_v44 = vcombine.low %v6003_v5, %v6007_v3  ;;  %v10064_v48 = vcombine.high %v6011_v25, %v6015_v26 }
 0x8ee   : > { %v5204_v47 = vmax.f32 %v5128_v37, 0.0  ;;  %v10053_v37 = vcombine.low %v6002_v28, %v6006_v4 }
 0x8ef   : > { %v5205_v50 = vmax.f32 %v5130_v45, 0.0 }
 0x8f0   : > { %v5234_v59 = vpack.c.bf16 %v5204_v47, %v5202_v46  ;;  %v10062_v47 = vcombine.high %v6010_v19, %v6014_v22 }
 0x8f1   : > { %v5235_v60 = vpack.c.bf16 %v5205_v50, %v5203_v49  ;;  %v5133_v40 = vpop.f32.mrb[84].mxu0  ;;  %v6018_v49 = vld [vmem:[#allocation10 + $0x140] sm:$0xff] }
 0x8f2   : > { %v5134_v61 = vadd.f32 %v5133_v40, %v13390_v23  ;;  %v5135_v2 = vpop.f32.mrb[85].mxu0 }
 0x8f3   : > { %v5136_v42 = vadd.f32 %v5135_v2, %v13393_v24  ;;  %v5137_v63 = vpop.f32.mrb[86].mxu0  ;;  %5688 = vmatprep.mubr.bf16.mxu1 %v5235_v60  ;;  %5801 = vmatprep.mubr.bf16.mxu0 %v5235_v60  ;;  %v10061_v2 = vcombine.low %v6010_v19, %v6014_v22  ;;  %v6042_v22 = vld [vmem:[#allocation10 + $0x200] sm:$0xff] }
 0x8f4   : > { %v5138_v54 = vadd.f32 %v5137_v63, %v13390_v23  ;;  %v5139_v57 = vpop.f32.mrb[87].mxu0  ;;  %5689 = vmatmul.mubr.bf16.vlgmr.msra.gmra.mrb[112].mxu1 %v5234_v59  ;;  %5802 = vmatmul.mubr.bf16.vlgmr.msra.gmra.mrb[112].mxu0 %v5234_v59  ;;  %v5206_v55 = vmax.f32 %v5134_v61, 0.0  ;;  %v6023_v59 = vld [vmem:[#allocation10 + $0x168] sm:$0xff] }
 0x8f5   : > { %v5140_v9 = vadd.f32 %v5139_v57, %v13393_v24  ;;  %7557 = vmatpush1.bf16.msra.mxu1 %v10029_v17  ;;  %7783 = vmatpush1.bf16.msra.mxu0 %v10031_v20  ;;  %v5207_v31 = vmax.f32 %v5136_v42, 0.0  ;;  %v10054_v17 = vcombine.high %v6002_v28, %v6006_v4  ;;  %v10070_v42 = vcombine.high %v6018_v49, %v6022_v53  ;;  %v6027_v57 = vld [vmem:[#allocation10 + $0x188] sm:$0xff]  ;;  %v6034_v4 = vld [vmem:[#allocation10 + $0x1c0] sm:$0xff] }
 0x8f6   : > { %v5208_v58 = vmax.f32 %v5138_v54, 0.0  ;;  %7558 = vmatprep.subr.bf16.mxu1 %v10038_v41  ;;  %7784 = vmatprep.subr.bf16.mxu0 %v10040_v62  ;;  %v10063_v41 = vcombine.low %v6011_v25, %v6015_v26  ;;  %v10072_v63 = vcombine.high %v6019_v56, %v6023_v59  ;;  %v6030_v54 = vld [vmem:[#allocation10 + $0x1a0] sm:$0xff] }
 0x8f7   : > { %v5209_v52 = vmax.f32 %v5140_v9, 0.0  ;;  %v6031_v9 = vld [vmem:[#allocation10 + $0x1a8] sm:$0xff] }
 0x8f8   : > { %v5236_v7 = vpack.c.bf16 %v5208_v58, %v5206_v55  ;;  %v10069_v58 = vcombine.low %v6018_v49, %v6022_v53  ;;  %v6050_v53 = vld [vmem:[#allocation10 + $0x240] sm:$0xff] }
 0x8f9   : > { %v5237_v8 = vpack.c.bf16 %v5209_v52, %v5207_v31  ;;  %v5143_v11 = vpop.f32.mrb[88].mxu0  ;;  %7559 = vmatpush1.bf16.msra.mxu1 %v10037_v10  ;;  %7785 = vmatpush1.bf16.msra.mxu0 %v10039_v13  ;;  %v10078_v31 = vcombine.high %v6026_v43, %v6030_v54  ;;  %v10080_v52 = vcombine.high %v6027_v57, %v6031_v9 }
 0x8fa   : > { %v5144_v15 = vadd.f32 %v5143_v11, %v13390_v23  ;;  %v5145_v16 = vpop.f32.mrb[89].mxu0  ;;  %7560 = vmatprep.subr.bf16.mxu1 %v10046_v29  ;;  %7786 = vmatprep.subr.bf16.mxu0 %v10048_v32  ;;  %v10071_v29 = vcombine.low %v6019_v56, %v6023_v59  ;;  %v6039_v11 = vld [vmem:[#allocation10 + $0x1e8] sm:$0xff] }
 0x8fb   : > { %v5146_v20 = vadd.f32 %v5145_v16, %v13393_v24  ;;  %v5147_v21 = vpop.f32.mrb[90].mxu0  ;;  %5698 = vmatprep.mubr.bf16.mxu1 %v5237_v8  ;;  %5811 = vmatprep.mubr.bf16.mxu0 %v5237_v8  ;;  %v6035_v8 = vld [vmem:[#allocation10 + $0x1c8] sm:$0xff]  ;;  %v10077_v16 = vcombine.low %v6026_v43, %v6030_v54  ;;  %v6058_v54 = vld [vmem:[#allocation10 + $0x280] sm:$0xff] }
 0x8fc   : > { %v5148_v27 = vadd.f32 %v5147_v21, %v13390_v23  ;;  %v5149_v30 = vpop.f32.mrb[91].mxu0  ;;  %5699 = vmatmul.mubr.bf16.gmra.mrb[116].mxu1 %v5236_v7  ;;  %5812 = vmatmul.mubr.bf16.gmra.mrb[116].mxu0 %v5236_v7  ;;  %v5210_v45 = vmax.f32 %v5144_v15, 0.0  ;;  %v6038_v7 = vld [vmem:[#allocation10 + $0x1e0] sm:$0xff]  ;;  %v10088_v21 = vcombine.high %v6035_v8, %v6039_v11 }
 0x8fd   : > { %v5150_v33 = vadd.f32 %v5149_v30, %v13393_v24  ;;  %7561 = vmatpush1.bf16.msra.mxu1 %v10045_v14  ;;  %7787 = vmatpush1.bf16.msra.mxu0 %v10047_v6  ;;  %v5211_v50 = vmax.f32 %v5146_v20, 0.0  ;;  %v10086_v20 = vcombine.high %v6034_v4, %v6038_v7  ;;  %v6043_v30 = vld [vmem:[#allocation10 + $0x208] sm:$0xff] }
 0x8fe   : > { %v5212_v46 = vmax.f32 %v5148_v27, 0.0  ;;  %7562 = vmatprep.subr.bf16.mxu1 %v10054_v17  ;;  %7788 = vmatprep.subr.bf16.mxu0 %v10056_v18  ;;  %v10079_v17 = vcombine.low %v6027_v57, %v6031_v9  ;;  %v6046_v27 = vld [vmem:[#allocation10 + $0x220] sm:$0xff] }
 0x8ff   : > { %v5213_v51 = vmax.f32 %v5150_v33, 0.0  ;;  %v6047_v33 = vld [vmem:[#allocation10 + $0x228] sm:$0xff] }
 0x900   : > { %v5238_v60 = vpack.c.bf16 %v5212_v46, %v5210_v45  ;;  %v10085_v46 = vcombine.low %v6034_v4, %v6038_v7  ;;  %v6066_v7 = vld [vmem:[#allocation10 + $0x2c0] sm:$0xff] }
 0x901   : > { %v5239_v40 = vpack.c.bf16 %v5213_v51, %v5211_v50  ;;  %v5153_v61 = vpop.f32.mrb[92].mxu0  ;;  %7563 = vmatpush1.bf16.msra.mxu1 %v10053_v37  ;;  %7789 = vmatpush1.bf16.msra.mxu0 %v10055_v44  ;;  %v10094_v50 = vcombine.high %v6042_v22, %v6046_v27  ;;  %v10096_v51 = vcombine.high %v6043_v30, %v6047_v33 }
 0x902   : > { %v5154_v62 = vadd.f32 %v5153_v61, %v13390_v23  ;;  %v5155_v0 = vpop.f32.mrb[93].mxu0  ;;  %7564 = vmatprep.subr.bf16.mxu1 %v10062_v47  ;;  %7790 = vmatprep.subr.bf16.mxu0 %v10064_v48  ;;  %v10087_v47 = vcombine.low %v6035_v8, %v6039_v11  ;;  %v6055_v61 = vld [vmem:[#allocation10 + $0x268] sm:$0xff] }
 0x903   : > { %v5156_v1 = vadd.f32 %v5155_v0, %v13393_v24  ;;  %v5157_v12 = vpop.f32.mrb[94].mxu0  ;;  %5708 = vmatprep.mubr.bf16.mxu1 %v5239_v40  ;;  %5821 = vmatprep.mubr.bf16.mxu0 %v5239_v40  ;;  %v6051_v40 = vld [vmem:[#allocation10 + $0x248] sm:$0xff]  ;;  %v10093_v0 = vcombine.low %v6042_v22, %v6046_v27  ;;  %v6074_v27 = vld [vmem:[#allocation10 + $0x300] sm:$0xff] }
 0x904   : > { %v5158_v10 = vadd.f32 %v5157_v12, %v13390_v23  ;;  %v5159_v13 = vpop.f32.mrb[95].mxu0  ;;  %5709 = vmatmul.mubr.bf16.gmra.mrb[120].mxu1 %v5238_v60  ;;  %5822 = vmatmul.mubr.bf16.gmra.mrb[120].mxu0 %v5238_v60  ;;  %v5214_v32 = vmax.f32 %v5154_v62, 0.0  ;;  %v6054_v60 = vld [vmem:[#allocation10 + $0x260] sm:$0xff]  ;;  %v10104_v12 = vcombine.high %v6051_v40, %v6055_v61 }
 0x905   : > { %v5160_v55 = vadd.f32 %v5159_v13, %v13393_v24  ;;  %7565 = vmatpush1.bf16.msra.mxu1 %v10061_v2  ;;  %7791 = vmatpush1.bf16.msra.mxu0 %v10063_v41  ;;  %v5215_v5 = vmax.f32 %v5156_v1, 0.0  ;;  %v10102_v1 = vcombine.high %v6050_v53, %v6054_v60  ;;  %v6059_v13 = vld [vmem:[#allocation10 + $0x288] sm:$0xff] }
 0x906   : > { %v5216_v28 = vmax.f32 %v5158_v10, 0.0  ;;  %7566 = vmatprep.subr.bf16.mxu1 %v10070_v42  ;;  %7792 = vmatprep.subr.bf16.mxu0 %v10072_v63  ;;  %v10095_v42 = vcombine.low %v6043_v30, %v6047_v33  ;;  %v6062_v10 = vld [vmem:[#allocation10 + $0x2a0] sm:$0xff] }
 0x907   : > { %v5217_v3 = vmax.f32 %v5160_v55, 0.0  ;;  %v6063_v55 = vld [vmem:[#allocation10 + $0x2a8] sm:$0xff] }
 0x908   : > { %v5240_v14 = vpack.c.bf16 %v5216_v28, %v5214_v32  ;;  %v10101_v28 = vcombine.low %v6050_v53, %v6054_v60  ;;  %v6082_v60 = vld [vmem:[#allocation10 + $0x340] sm:$0xff] }
 0x909   : > { %v5241_v6 = vpack.c.bf16 %v5217_v3, %v5215_v5  ;;  %v5163_v15 = vpop.f32.mrb[96].mxu0  ;;  %7567 = vmatpush1.bf16.msra.mxu1 %v10069_v58  ;;  %7793 = vmatpush1.bf16.msra.mxu0 %v10071_v29  ;;  %v10110_v5 = vcombine.high %v6058_v54, %v6062_v10  ;;  %v10112_v3 = vcombine.high %v6059_v13, %v6063_v55 }
 0x90a   : > { %v5164_v18 = vadd.f32 %v5163_v15, %v13390_v23  ;;  %v5165_v19 = vpop.f32.mrb[97].mxu0  ;;  %7568 = vmatprep.subr.bf16.mxu1 %v10078_v31  ;;  %7794 = vmatprep.subr.bf16.mxu0 %v10080_v52  ;;  %v10103_v31 = vcombine.low %v6051_v40, %v6055_v61  ;;  %v6071_v15 = vld [vmem:[#allocation10 + $0x2e8] sm:$0xff] }
 0x90b   : > { %v5166_v25 = vadd.f32 %v5165_v19, %v13393_v24  ;;  %v5167_v26 = vpop.f32.mrb[98].mxu0  ;;  %5718 = vmatprep.mubr.bf16.mxu1 %v5241_v6  ;;  %5831 = vmatprep.mubr.bf16.mxu0 %v5241_v6  ;;  %v6067_v6 = vld [vmem:[#allocation10 + $0x2c8] sm:$0xff]  ;;  %v10109_v19 = vcombine.low %v6058_v54, %v6062_v10 }
 0x90c   : > { %v5168_v37 = vadd.f32 %v5167_v26, %v13390_v23  ;;  %v5169_v44 = vpop.f32.mrb[99].mxu0  ;;  %5719 = vmatmul.mubr.bf16.gmra.mrb[124].mxu1 %v5240_v14  ;;  %5832 = vmatmul.mubr.bf16.gmra.mrb[124].mxu0 %v5240_v14  ;;  %v5218_v48 = vmax.f32 %v5164_v18, 0.0  ;;  %v6070_v14 = vld [vmem:[#allocation10 + $0x2e0] sm:$0xff]  ;;  %v10120_v26 = vcombine.high %v6067_v6, %v6071_v15 }
 0x90d   : > { %v5170_v45 = vadd.f32 %v5169_v44, %v13393_v24  ;;  %7569 = vmatpush1.bf16.msra.mxu1 %v10077_v16  ;;  %7795 = vmatpush1.bf16.msra.mxu0 %v10079_v17  ;;  %v5219_v56 = vmax.f32 %v5166_v25, 0.0  ;;  %v10118_v25 = vcombine.high %v6066_v7, %v6070_v14  ;;  %v6075_v44 = vld [vmem:[#allocation10 + $0x308] sm:$0xff] }
 0x90e   : > { %v5220_v49 = vmax.f32 %v5168_v37, 0.0  ;;  %7570 = vmatprep.subr.bf16.mxu1 %v10086_v20  ;;  %7796 = vmatprep.subr.bf16.mxu0 %v10088_v21  ;;  %v10111_v20 = vcombine.low %v6059_v13, %v6063_v55  ;;  %v6078_v37 = vld [vmem:[#allocation10 + $0x320] sm:$0xff] }
 0x90f   : > { %v5221_v59 = vmax.f32 %v5170_v45, 0.0  ;;  %v6079_v45 = vld [vmem:[#allocation10 + $0x328] sm:$0xff] }
 0x910   : > { %v5242_v2 = vpack.c.bf16 %v5220_v49, %v5218_v48  ;;  %v10117_v49 = vcombine.low %v6066_v7, %v6070_v14  ;;  %v6095_v14 = vld [vmem:[#allocation10 + $0x3a8] sm:$0xff] }
 0x911   : > { %v5243_v41 = vpack.c.bf16 %v5221_v59, %v5219_v56  ;;  %v5173_v62 = vpop.f32.mrb[100].mxu0  ;;  %7571 = vmatpush1.bf16.msra.mxu1 %v10085_v46  ;;  %7797 = vmatpush1.bf16.msra.mxu0 %v10087_v47  ;;  %v10126_v56 = vcombine.high %v6074_v27, %v6078_v37  ;;  %v10128_v59 = vcombine.high %v6075_v44, %v6079_v45 }
 0x912   : > { %v5174_v63 = vadd.f32 %v5173_v62, %v13390_v23  ;;  %v5175_v43 = vpop.f32.mrb[101].mxu0  ;;  %7572 = vmatprep.subr.bf16.mxu1 %v10094_v50  ;;  %7798 = vmatprep.subr.bf16.mxu0 %v10096_v51  ;;  %v10119_v50 = vcombine.low %v6067_v6, %v6071_v15  ;;  %v6087_v62 = vld [vmem:[#allocation10 + $0x368] sm:$0xff] }
 0x913   : > { %v5176_v57 = vadd.f32 %v5175_v43, %v13393_v24  ;;  %v5177_v9 = vpop.f32.mrb[102].mxu0  ;;  %5728 = vmatprep.mubr.bf16.mxu1 %v5243_v41  ;;  %5841 = vmatprep.mubr.bf16.mxu0 %v5243_v41  ;;  %v6083_v41 = vld [vmem:[#allocation10 + $0x348] sm:$0xff]  ;;  %v10125_v43 = vcombine.low %v6074_v27, %v6078_v37  ;;  %v13427_v27 = vld [vmem:[#allocation10 + $0x400] sm:$0xff] }
 0x914   : > { %v5178_v58 = vadd.f32 %v5177_v9, %v13390_v23  ;;  %v5179_v29 = vpop.f32.mrb[103].mxu0  ;;  %5729 = vmatmul.mubr.bf16.gmra.mrb[128].mxu1 %v5242_v2  ;;  %5842 = vmatmul.mubr.bf16.gmra.mrb[128].mxu0 %v5242_v2  ;;  %v5222_v52 = vmax.f32 %v5174_v63, 0.0  ;;  %v6086_v2 = vld [vmem:[#allocation10 + $0x360] sm:$0xff]  ;;  %v10136_v9 = vcombine.high %v6083_v41, %v6087_v62 }
 0x915   : > { %v5180_v32 = vadd.f32 %v5179_v29, %v13393_v24  ;;  %7573 = vmatpush1.bf16.msra.mxu1 %v10093_v0  ;;  %7799 = vmatpush1.bf16.msra.mxu0 %v10095_v42  ;;  %v5223_v8 = vmax.f32 %v5176_v57, 0.0  ;;  %v10134_v57 = vcombine.high %v6082_v60, %v6086_v2 }
 0x916   : > { %v5224_v4 = vmax.f32 %v5178_v58, 0.0  ;;  %7574 = vmatprep.subr.bf16.mxu1 %v10102_v1  ;;  %7800 = vmatprep.subr.bf16.mxu0 %v10104_v12  ;;  %v10127_v1 = vcombine.low %v6075_v44, %v6079_v45  ;;  %v13435_v44 = vld [vmem:[#allocation10 + $0x428] sm:$0xff] }
 0x917   : > { %v5225_v11 = vmax.f32 %v5180_v32, 0.0  ;;  %v10133_v32 = vcombine.low %v6082_v60, %v6086_v2  ;;  %v13455_v60 = vld [vmem:[#allocation10 + $0x440] sm:$0xff] }
 0x918   : > { %v5244_v16 = vpack.c.bf16 %v5224_v4, %v5222_v52 }
 0x919   : > { %v5245_v17 = vpack.c.bf16 %v5225_v11, %v5223_v8  ;;  %v5183_v18 = vpop.f32.mrb[104].mxu0  ;;  %7575 = vmatpush1.bf16.msra.mxu1 %v10101_v28  ;;  %7801 = vmatpush1.bf16.msra.mxu0 %v10103_v31  ;;  %v10135_v28 = vcombine.low %v6083_v41, %v6087_v62  ;;  %v6091_v8 = vld [vmem:[#allocation10 + $0x388] sm:$0xff] }
 0x91a   : > { %v5184_v21 = vadd.f32 %v5183_v18, %v13390_v23  ;;  %v5185_v22 = vpop.f32.mrb[105].mxu0  ;;  %7576 = vmatprep.subr.bf16.mxu1 %v10110_v5  ;;  %7802 = vmatprep.subr.bf16.mxu0 %v10112_v3  ;;  %v10143_v15 = vcombine.low %v6091_v8, %v6095_v14  ;;  %v6102_v18 = vld [vmem:[#allocation10 + $0x3e0] sm:$0xff] }
 0x91b   : > { %v5186_v30 = vadd.f32 %v5185_v22, %v13393_v24  ;;  %v5187_v33 = vpop.f32.mrb[106].mxu0  ;;  %5738 = vmatprep.mubr.bf16.mxu1 %v5245_v17  ;;  %5851 = vmatprep.mubr.bf16.mxu0 %v5245_v17  ;;  %v6098_v17 = vld [vmem:[#allocation10 + $0x3c0] sm:$0xff] }
 0x91c   : > { %v5188_v46 = vadd.f32 %v5187_v33, %v13390_v23  ;;  %v5189_v47 = vpop.f32.mrb[107].mxu0  ;;  %5739 = vmatmul.mubr.bf16.gmra.mrb[132].mxu1 %v5244_v16  ;;  %5852 = vmatmul.mubr.bf16.gmra.mrb[132].mxu0 %v5244_v16  ;;  %v5226_v51 = vmax.f32 %v5184_v21, 0.0  ;;  %v10144_v16 = vcombine.high %v6091_v8, %v6095_v14  ;;  %v6103_v21 = vld [vmem:[#allocation10 + $0x3e8] sm:$0xff]  ;;  %v10149_v22 = vcombine.low %v6098_v17, %v6102_v18 }
 0x91d   : > { %v5190_v48 = vadd.f32 %v5189_v47, %v13393_v24  ;;  %7577 = vmatpush1.bf16.msra.mxu1 %v10109_v19  ;;  %7803 = vmatpush1.bf16.msra.mxu0 %v10111_v20  ;;  %v5227_v40 = vmax.f32 %v5186_v30, 0.0  ;;  %v6099_v19 = vld [vmem:[#allocation10 + $0x3c8] sm:$0xff]  ;;  %v10150_v20 = vcombine.high %v6098_v17, %v6102_v18  ;;  %v13429_v30 = vld [vmem:[#allocation10 + $0x420] sm:$0xff] }
 0x91e   : > { %v5228_v53 = vmax.f32 %v5188_v46, 0.0  ;;  %7578 = vmatprep.subr.bf16.mxu1 %v10118_v25  ;;  %7804 = vmatprep.subr.bf16.mxu0 %v10120_v26  ;;  %v10151_v25 = vcombine.low %v6099_v19, %v6103_v21  ;;  %v10152_v26 = vcombine.high %v6099_v19, %v6103_v21  ;;  %v13431_v33 = vld [vmem:[#allocation10 + $0x408] sm:$0xff]  ;;  %v10158_v37 = vcombine.high %v13427_v27, %v13429_v30 }
 0x91f   : > { %v5229_v61 = vmax.f32 %v5190_v48, 0.0  ;;  %v10157_v45 = vcombine.low %v13427_v27, %v13429_v30  ;;  %v10159_v46 = vcombine.low %v13431_v33, %v13435_v44  ;;  %v10160_v47 = vcombine.high %v13431_v33, %v13435_v44  ;;  %v5314_v48 = vld [vmem:[#allocation11 + $0xd] sm:$0xf] }
 0x920   : > { %v5246_v0 = vpack.c.bf16 %v5228_v53, %v5226_v51  ;;  %v13450_v51 = vrot.slane %v5314_v48, %v13187_v38  ;;  %v13453_v53 = vrot.slane %v5314_v48, %v13190_v39  ;;  %v13543_v27 = vld [vmem:[#allocation10 + $0x528] sm:$0xff]  ;;  %v6226_v39 = vld [vmem:[#allocation10 + $0x7c0] sm:$0xff] }
 0x921   : > { %v5247_v42 = vpack.c.bf16 %v5229_v61, %v5227_v40  ;;  %v5193_v63 = vpop.f32.mrb[108].mxu0  ;;  %7579 = vmatpush1.bf16.msra.mxu1 %v10117_v49  ;;  %7805 = vmatpush1.bf16.msra.mxu0 %v10119_v50  ;;  %v13444_v49 = vrot.slane %v5314_v48, %v13181_v35  ;;  %v13447_v50 = vrot.slane %v5314_v48, %v13184_v36  ;;  %v13457_v40 = vld [vmem:[#allocation10 + $0x460] sm:$0xff]  ;;  %v13507_v48 = vld [vmem:[#allocation10 + $0x4e8] sm:$0xff] }
 0x922   : > { %v5194_v12 = vadd.f32 %v5193_v63, %v13390_v23  ;;  %v5195_v54 = vpop.f32.mrb[109].mxu0  ;;  %7580 = vmatprep.subr.bf16.mxu1 %v10126_v56  ;;  %7806 = vmatprep.subr.bf16.mxu0 %v10128_v59 }
 0x923   : > { %v5196_v10 = vadd.f32 %v5195_v54, %v13393_v24  ;;  %v5197_v13 = vpop.f32.mrb[110].mxu0  ;;  %5748 = vmatprep.mubr.bf16.mxu1 %v5247_v42  ;;  %5861 = vmatprep.mubr.bf16.mxu0 %v5247_v42  ;;  %v13463_v42 = vld [vmem:[#allocation10 + $0x468] sm:$0xff] }
 0x924   : > { %v5198_v55 = vadd.f32 %v5197_v13, %v13390_v23  ;;  %v5199_v58 = vpop.f32.mrb[111].mxu0  ;;  %5749 = vmatmul.mubr.bf16.gmra.mrb[136].mxu1 %v5246_v0  ;;  %5862 = vmatmul.mubr.bf16.gmra.mrb[136].mxu0 %v5246_v0  ;;  %v5230_v31 = vmax.f32 %v5194_v12, 0.0  ;;  %v6090_v23 = vld [vmem:[#allocation10 + $0x380] sm:$0xff]  ;;  %v13461_v0 = vld [vmem:[#allocation10 + $0x448] sm:$0xff]  ;;  %v10166_v13 = vcombine.high %v13455_v60, %v13457_v40 }
 0x925   : > { %v5200_v29 = vadd.f32 %v5199_v58, %v13393_v24  ;;  %7581 = vmatpush1.bf16.msra.mxu1 %v10125_v43  ;;  %7807 = vmatpush1.bf16.msra.mxu0 %v10127_v1  ;;  %v5231_v4 = vmax.f32 %v5196_v10, 0.0  ;;  %v6094_v24 = vld [vmem:[#allocation10 + $0x3a0] sm:$0xff]  ;;  %v10168_v18 = vcombine.high %v13461_v0, %v13463_v42 }
 0x926   : > { %v5232_v52 = vmax.f32 %v5198_v55, 0.0  ;;  %7582 = vmatprep.subr.bf16.mxu1 %v10134_v57  ;;  %7808 = vmatprep.subr.bf16.mxu0 %v10136_v9  ;;  %v10142_v11 = vcombine.high %v6090_v23, %v6094_v24  ;;  %v10141_v6 = vcombine.low %v6090_v23, %v6094_v24  ;;  %v13483_v23 = vld [vmem:[#allocation10 + $0x4a8] sm:$0xff] }
 0x927   : > { %v5233_v5 = vmax.f32 %v5200_v29, 0.0  ;;  %v10165_v29 = vcombine.low %v13455_v60, %v13457_v40  ;;  %v13576_v40 = vld [vmem:[#allocation10 + $0x548] sm:$0xff] }
 0x928   : > { %v5248_v3 = vpack.c.bf16 %v5232_v52, %v5230_v31  ;;  %v13479_v31 = vld [vmem:[#allocation10 + $0x4a0] sm:$0xff] }
 0x929   : > { %v5249_v7 = vpack.c.bf16 %v5233_v5, %v5231_v4  ;;  %7583 = vmatpush1.bf16.msra.mxu1 %v10133_v32  ;;  %7809 = vmatpush1.bf16.msra.mxu0 %v10135_v28  ;;  %v10167_v32 = vcombine.low %v13461_v0, %v13463_v42  ;;  %v13477_v28 = vld [vmem:[#allocation10 + $0x480] sm:$0xff]  ;;  %v13578_v0 = vld [vmem:[#allocation10 + $0x568] sm:$0xff] }
 0x92a   : > { %7584 = vmatprep.subr.bf16.mxu1 %v10142_v11  ;;  %7810 = vmatprep.subr.bf16.mxu0 %v10144_v16  ;;  %v10174_v19 = vcombine.high %v13477_v28, %v13479_v31 }
 0x92b   : > { %5758 = vmatprep.mubr.bf16.mxu1 %v5249_v7  ;;  %5871 = vmatprep.mubr.bf16.mxu0 %v5249_v7  ;;  %v13481_v7 = vld [vmem:[#allocation10 + $0x488] sm:$0xff] }
 0x92c   : > { %5759 = vmatmul.mubr.bf16.gmra.mrb[140].mxu1 %v5248_v3  ;;  %5872 = vmatmul.mubr.bf16.gmra.mrb[140].mxu0 %v5248_v3 }
 0x92d   : > { %7585 = vmatpush1.bf16.msra.mxu1 %v10141_v6  ;;  %7811 = vmatpush1.bf16.msra.mxu0 %v10143_v15  ;;  %v13485_v6 = vld [vmem:[#allocation10 + $0x4c0] sm:$0xff] }
 0x92e   : > { %7586 = vmatprep.subr.bf16.mxu1 %v10150_v20  ;;  %7812 = vmatprep.subr.bf16.mxu0 %v10152_v26  ;;  %v13487_v15 = vld [vmem:[#allocation10 + $0x4e0] sm:$0xff]  ;;  %v10173_v26 = vcombine.low %v13477_v28, %v13479_v31 }
 0x931   : > { %7587 = vmatpush1.bf16.msra.mxu1 %v10149_v22  ;;  %7813 = vmatpush1.bf16.msra.mxu0 %v10151_v25 }
 0x932   : > { %7669 = vmatprep.subr.bf16.mxu1 %v10158_v37  ;;  %7895 = vmatprep.subr.bf16.mxu0 %v10160_v47  ;;  %v10175_v37 = vcombine.low %v13481_v7, %v13483_v23  ;;  %v13505_v47 = vld [vmem:[#allocation10 + $0x4c8] sm:$0xff] }
 0x9c7   : > { %v5690_v56 = vpop.f32.mrb[112].mxu1  ;;  %v5803_v59 = vpop.f32.mrb[112].mxu0 }
 0x9c8   : > { %v5691_v61 = vadd.f32 %v5690_v56, %v13444_v49  ;;  %v5804_v2 = vadd.f32 %v5803_v59, %v13447_v50  ;;  %v5692_v41 = vpop.f32.mrb[113].mxu1  ;;  %v5805_v62 = vpop.f32.mrb[113].mxu0 }
 0x9c9   : > { %v5693_v63 = vadd.f32 %v5692_v41, %v13450_v51  ;;  %v5806_v43 = vadd.f32 %v5805_v62, %v13453_v53  ;;  %v5694_v1 = vpop.f32.mrb[114].mxu1  ;;  %v5807_v12 = vpop.f32.mrb[114].mxu0  ;;  %v10176_v41 = vcombine.high %v13481_v7, %v13483_v23  ;;  %v10182_v62 = vcombine.high %v13485_v6, %v13487_v15 }
 0x9ca   : > { %v5695_v54 = vadd.f32 %v5694_v1, %v13444_v49  ;;  %v5808_v57 = vadd.f32 %v5807_v12, %v13447_v50  ;;  %v5696_v9 = vpop.f32.mrb[115].mxu1  ;;  %v5809_v10 = vpop.f32.mrb[115].mxu0  ;;  %v5882_v52 = vmax.f32 %v5691_v61, 0.0  ;;  %v5884_v4 = vmax.f32 %v5804_v2, 0.0 }
 0x9cb   : > { %v5697_v55 = vadd.f32 %v5696_v9, %v13450_v51  ;;  %v5810_v58 = vadd.f32 %v5809_v10, %v13453_v53  ;;  %v5883_v24 = vmax.f32 %v5693_v63, 0.0  ;;  %v5885_v8 = vmax.f32 %v5806_v43, 0.0 }
 0x9cc   : > { %v5886_v5 = vmax.f32 %v5695_v54, 0.0  ;;  %v5888_v3 = vmax.f32 %v5808_v57, 0.0  ;;  %v10181_v54 = vcombine.low %v13485_v6, %v13487_v15 }
 0x9cd   : > { %v5887_v11 = vmax.f32 %v5697_v55, 0.0  ;;  %v5889_v14 = vmax.f32 %v5810_v58, 0.0  ;;  %v10183_v58 = vcombine.low %v13505_v47, %v13507_v48 }
 0x9ce   : > { %v13489_v16 = vpack.c.bf16 %v5886_v5, %v5882_v52  ;;  %v13491_v17 = vpack.c.bf16 %v5888_v3, %v5884_v4  ;;  %v10184_v5 = vcombine.high %v13505_v47, %v13507_v48  ;;  %v13537_v3 = vld [vmem:[#allocation10 + $0x500] sm:$0xff] }
 0x9cf   : > { %v13497_v20 = vpack.c.bf16 %v5887_v11, %v5883_v24  ;;  %v13499_v21 = vpack.c.bf16 %v5889_v14, %v5885_v8  ;;  %v5700_v22 = vpop.f32.mrb[116].mxu1  ;;  %v5813_v25 = vpop.f32.mrb[116].mxu0  ;;  %v13539_v24 = vld [vmem:[#allocation10 + $0x520] sm:$0xff] }
 0x9d0   : > { %v5701_v56 = vadd.f32 %v5700_v22, %v13444_v49  ;;  %v5814_v59 = vadd.f32 %v5813_v25, %v13447_v50  ;;  %v5702_v61 = vpop.f32.mrb[117].mxu1  ;;  %v5815_v2 = vpop.f32.mrb[117].mxu0  ;;  %v13541_v25 = vld [vmem:[#allocation10 + $0x508] sm:$0xff] }
 0x9d1   : > { %v5703_v63 = vadd.f32 %v5702_v61, %v13450_v51  ;;  %v5816_v43 = vadd.f32 %v5815_v2, %v13453_v53  ;;  %v5704_v1 = vpop.f32.mrb[118].mxu1  ;;  %v5817_v12 = vpop.f32.mrb[118].mxu0  ;;  %7588 = vmatprep.mubr.bf16.mxu1 %v13497_v20  ;;  %7814 = vmatprep.mubr.bf16.mxu0 %v13497_v20  ;;  %v10192_v60 = vcombine.high %v13541_v25, %v13543_v27 }
 0x9d2   : > { %v5705_v57 = vadd.f32 %v5704_v1, %v13444_v49  ;;  %v5818_v9 = vadd.f32 %v5817_v12, %v13447_v50  ;;  %v5706_v10 = vpop.f32.mrb[119].mxu1  ;;  %v5819_v55 = vpop.f32.mrb[119].mxu0  ;;  %7589 = vmatmul.mubr.bf16.vlgmr.msra.gmra.mrb[144].mxu1 %v13489_v16  ;;  %7815 = vmatmul.mubr.bf16.vlgmr.msra.gmra.mrb[144].mxu0 %v13489_v16  ;;  %v5890_v8 = vmax.f32 %v5701_v56, 0.0  ;;  %v5892_v11 = vmax.f32 %v5814_v59, 0.0 }
 0x9d3   : > { %v5707_v52 = vadd.f32 %v5706_v10, %v13450_v51  ;;  %v5820_v4 = vadd.f32 %v5819_v55, %v13453_v53  ;;  %7670 = vmatpush1.bf16.msra.mxu1 %v10157_v45  ;;  %7896 = vmatpush1.bf16.msra.mxu0 %v10159_v46  ;;  %v5891_v30 = vmax.f32 %v5703_v63, 0.0  ;;  %v5893_v33 = vmax.f32 %v5816_v43, 0.0 }
 0x9d4   : > { %v5894_v14 = vmax.f32 %v5705_v57, 0.0  ;;  %v5896_v22 = vmax.f32 %v5818_v9, 0.0  ;;  %7671 = vmatprep.subr.bf16.mxu1 %v10166_v13  ;;  %7897 = vmatprep.subr.bf16.mxu0 %v10168_v18  ;;  %v10189_v56 = vcombine.low %v13537_v3, %v13539_v24  ;;  %v10190_v59 = vcombine.high %v13537_v3, %v13539_v24  ;;  %v13553_v13 = vld [vmem:[#allocation10 + $0x540] sm:$0xff] }
 0x9d5   : > { %v5895_v44 = vmax.f32 %v5707_v52, 0.0  ;;  %v5897_v45 = vmax.f32 %v5820_v4, 0.0  ;;  %v13555_v18 = vld [vmem:[#allocation10 + $0x560] sm:$0xff]  ;;  %v10191_v12 = vcombine.low %v13541_v25, %v13543_v27 }
 0x9d6   : > { %v13545_v46 = vpack.c.bf16 %v5894_v14, %v5890_v8  ;;  %v13547_v61 = vpack.c.bf16 %v5896_v22, %v5892_v11  ;;  %v10197_v14 = vcombine.low %v13553_v13, %v13555_v18  ;;  %v13673_v3 = vld [vmem:[#allocation10 + $0x600] sm:$0xff] }
 0x9d7   : > { %v13557_v2 = vpack.c.bf16 %v5895_v44, %v5891_v30  ;;  %v13559_v63 = vpack.c.bf16 %v5897_v45, %v5893_v33  ;;  %v5710_v43 = vpop.f32.mrb[120].mxu1  ;;  %v5823_v1 = vpop.f32.mrb[120].mxu0  ;;  %7672 = vmatpush1.bf16.msra.mxu1 %v10165_v29  ;;  %7898 = vmatpush1.bf16.msra.mxu0 %v10167_v32  ;;  %v10199_v33 = vcombine.low %v13576_v40, %v13578_v0  ;;  %v13602_v44 = vld [vmem:[#allocation10 + $0x580] sm:$0xff] }
 0x9d8   : > { %v5711_v57 = vadd.f32 %v5710_v43, %v13444_v49  ;;  %v5824_v9 = vadd.f32 %v5823_v1, %v13447_v50  ;;  %v5712_v10 = vpop.f32.mrb[121].mxu1  ;;  %v5825_v55 = vpop.f32.mrb[121].mxu0  ;;  %7673 = vmatprep.subr.bf16.mxu1 %v10174_v19  ;;  %7899 = vmatprep.subr.bf16.mxu0 %v10176_v41  ;;  %v10198_v19 = vcombine.high %v13553_v13, %v13555_v18  ;;  %v13604_v45 = vld [vmem:[#allocation10 + $0x5a0] sm:$0xff] }
 0x9d9   : > { %v5713_v42 = vadd.f32 %v5712_v10, %v13450_v51  ;;  %v5826_v29 = vadd.f32 %v5825_v55, %v13453_v53  ;;  %v5714_v32 = vpop.f32.mrb[122].mxu1  ;;  %v5827_v52 = vpop.f32.mrb[122].mxu0  ;;  %7598 = vmatprep.mubr.bf16.mxu1 %v13557_v2  ;;  %7824 = vmatprep.mubr.bf16.mxu0 %v13557_v2  ;;  %v13675_v24 = vld [vmem:[#allocation10 + $0x620] sm:$0xff] }
 0x9da   : > { %v5715_v41 = vadd.f32 %v5714_v32, %v13444_v49  ;;  %v5828_v4 = vadd.f32 %v5827_v52, %v13447_v50  ;;  %v5716_v8 = vpop.f32.mrb[123].mxu1  ;;  %v5829_v11 = vpop.f32.mrb[123].mxu0  ;;  %7599 = vmatmul.mubr.bf16.gmra.mrb[148].mxu1 %v13545_v46  ;;  %7825 = vmatmul.mubr.bf16.gmra.mrb[148].mxu0 %v13545_v46  ;;  %v5898_v43 = vmax.f32 %v5711_v57, 0.0  ;;  %v5900_v1 = vmax.f32 %v5824_v9, 0.0  ;;  %v13708_v18 = vld [vmem:[#allocation10 + $0x640] sm:$0xff] }
 0x9db   : > { %v5717_v22 = vadd.f32 %v5716_v8, %v13450_v51  ;;  %v5830_v30 = vadd.f32 %v5829_v11, %v13453_v53  ;;  %7674 = vmatpush1.bf16.msra.mxu1 %v10173_v26  ;;  %7900 = vmatpush1.bf16.msra.mxu0 %v10175_v37  ;;  %v5899_v28 = vmax.f32 %v5713_v42, 0.0  ;;  %v5901_v31 = vmax.f32 %v5826_v29, 0.0  ;;  %v13609_v26 = vld [vmem:[#allocation10 + $0x588] sm:$0xff]  ;;  %v13635_v8 = vld [vmem:[#allocation10 + $0x5e0] sm:$0xff] }
 0x9dc   : > { %v5902_v10 = vmax.f32 %v5715_v41, 0.0  ;;  %v5904_v55 = vmax.f32 %v5828_v4, 0.0  ;;  %7675 = vmatprep.subr.bf16.mxu1 %v10182_v62  ;;  %7901 = vmatprep.subr.bf16.mxu0 %v10184_v5  ;;  %v13611_v37 = vld [vmem:[#allocation10 + $0x5a8] sm:$0xff]  ;;  %v10200_v57 = vcombine.high %v13576_v40, %v13578_v0  ;;  %v10206_v9 = vcombine.high %v13602_v44, %v13604_v45  ;;  %v13633_v4 = vld [vmem:[#allocation10 + $0x5c0] sm:$0xff] }
 0x9dd   : > { %v5903_v7 = vmax.f32 %v5717_v22, 0.0  ;;  %v5905_v23 = vmax.f32 %v5830_v30, 0.0  ;;  %v10205_v41 = vcombine.low %v13602_v44, %v13604_v45  ;;  %v10207_v6 = vcombine.low %v13609_v26, %v13611_v37  ;;  %v13710_v40 = vld [vmem:[#allocation10 + $0x660] sm:$0xff] }
 0x9de   : > { %v13613_v32 = vpack.c.bf16 %v5902_v10, %v5898_v43  ;;  %v13615_v52 = vpack.c.bf16 %v5904_v55, %v5900_v1  ;;  %v10214_v55 = vcombine.high %v13633_v4, %v13635_v8  ;;  %v10221_v13 = vcombine.low %v13673_v3, %v13675_v24 }
 0x9df   : > { %v13621_v62 = vpack.c.bf16 %v5903_v7, %v5899_v28  ;;  %v13623_v5 = vpack.c.bf16 %v5905_v23, %v5901_v31  ;;  %v5720_v42 = vpop.f32.mrb[124].mxu1  ;;  %v5833_v29 = vpop.f32.mrb[124].mxu0  ;;  %7676 = vmatpush1.bf16.msra.mxu1 %v10181_v54  ;;  %7902 = vmatpush1.bf16.msra.mxu0 %v10183_v58  ;;  %v10208_v58 = vcombine.high %v13609_v26, %v13611_v37  ;;  %v13666_v23 = vld [vmem:[#allocation10 + $0x5c8] sm:$0xff] }
 0x9e0   : > { %v5721_v11 = vadd.f32 %v5720_v42, %v13444_v49  ;;  %v5834_v22 = vadd.f32 %v5833_v29, %v13447_v50  ;;  %v5722_v30 = vpop.f32.mrb[125].mxu1  ;;  %v5835_v43 = vpop.f32.mrb[125].mxu0  ;;  %7677 = vmatprep.subr.bf16.mxu1 %v10190_v59  ;;  %7903 = vmatprep.subr.bf16.mxu0 %v10192_v60  ;;  %v10213_v7 = vcombine.low %v13633_v4, %v13635_v8  ;;  %v13668_v42 = vld [vmem:[#allocation10 + $0x5e8] sm:$0xff] }
 0x9e1   : > { %v5723_v15 = vadd.f32 %v5722_v30, %v13450_v51  ;;  %v5836_v47 = vadd.f32 %v5835_v43, %v13453_v53  ;;  %v5724_v48 = vpop.f32.mrb[126].mxu1  ;;  %v5837_v54 = vpop.f32.mrb[126].mxu0  ;;  %7608 = vmatprep.mubr.bf16.mxu1 %v13621_v62  ;;  %7834 = vmatprep.mubr.bf16.mxu0 %v13621_v62 }
 0x9e2   : > { %v5725_v1 = vadd.f32 %v5724_v48, %v13444_v49  ;;  %v5838_v59 = vadd.f32 %v5837_v54, %v13447_v50  ;;  %v5726_v60 = vpop.f32.mrb[127].mxu1  ;;  %v5839_v10 = vpop.f32.mrb[127].mxu0  ;;  %7609 = vmatmul.mubr.bf16.gmra.mrb[152].mxu1 %v13613_v32  ;;  %7835 = vmatmul.mubr.bf16.gmra.mrb[152].mxu0 %v13613_v32  ;;  %v5906_v29 = vmax.f32 %v5721_v11, 0.0  ;;  %v5908_v30 = vmax.f32 %v5834_v22, 0.0 }
 0x9e3   : > { %v5727_v28 = vadd.f32 %v5726_v60, %v13450_v51  ;;  %v5840_v31 = vadd.f32 %v5839_v10, %v13453_v53  ;;  %7678 = vmatpush1.bf16.msra.mxu1 %v10189_v56  ;;  %7904 = vmatpush1.bf16.msra.mxu0 %v10191_v12  ;;  %v5907_v25 = vmax.f32 %v5723_v15, 0.0  ;;  %v5909_v27 = vmax.f32 %v5836_v47, 0.0 }
 0x9e4   : > { %v5910_v43 = vmax.f32 %v5725_v1, 0.0  ;;  %v5912_v48 = vmax.f32 %v5838_v59, 0.0  ;;  %7679 = vmatprep.subr.bf16.mxu1 %v10198_v19  ;;  %7905 = vmatprep.subr.bf16.mxu0 %v10200_v57  ;;  %v10215_v11 = vcombine.low %v13666_v23, %v13668_v42  ;;  %v10216_v22 = vcombine.high %v13666_v23, %v13668_v42  ;;  %v13685_v19 = vld [vmem:[#allocation10 + $0x608] sm:$0xff] }
 0x9e5   : > { %v5911_v56 = vmax.f32 %v5727_v28, 0.0  ;;  %v5913_v12 = vmax.f32 %v5840_v31, 0.0  ;;  %v13687_v57 = vld [vmem:[#allocation10 + $0x628] sm:$0xff]  ;;  %v10222_v10 = vcombine.high %v13673_v3, %v13675_v24 }
 0x9e6   : > { %v13677_v54 = vpack.c.bf16 %v5910_v43, %v5906_v29  ;;  %v13679_v60 = vpack.c.bf16 %v5912_v48, %v5908_v30  ;;  %v13798_v3 = vld [vmem:[#allocation10 + $0x6e8] sm:$0xff] }
 0x9e7   : > { %v13689_v1 = vpack.c.bf16 %v5911_v56, %v5907_v25  ;;  %v13691_v15 = vpack.c.bf16 %v5913_v12, %v5909_v27  ;;  %v5730_v47 = vpop.f32.mrb[128].mxu1  ;;  %v5843_v59 = vpop.f32.mrb[128].mxu0  ;;  %7680 = vmatpush1.bf16.msra.mxu1 %v10197_v14  ;;  %7906 = vmatpush1.bf16.msra.mxu0 %v10199_v33  ;;  %v10224_v25 = vcombine.high %v13685_v19, %v13687_v57 }
 0x9e8   : > { %v5731_v28 = vadd.f32 %v5730_v47, %v13444_v49  ;;  %v5844_v31 = vadd.f32 %v5843_v59, %v13447_v50  ;;  %v5732_v23 = vpop.f32.mrb[129].mxu1  ;;  %v5845_v42 = vpop.f32.mrb[129].mxu0  ;;  %7681 = vmatprep.subr.bf16.mxu1 %v10206_v9  ;;  %7907 = vmatprep.subr.bf16.mxu0 %v10208_v58  ;;  %v10223_v9 = vcombine.low %v13685_v19, %v13687_v57  ;;  %v13734_v47 = vld [vmem:[#allocation10 + $0x648] sm:$0xff] }
 0x9e9   : > { %v5733_v0 = vadd.f32 %v5732_v23, %v13450_v51  ;;  %v5846_v14 = vadd.f32 %v5845_v42, %v13453_v53  ;;  %v5734_v33 = vpop.f32.mrb[130].mxu1  ;;  %v5847_v29 = vpop.f32.mrb[130].mxu0  ;;  %7618 = vmatprep.mubr.bf16.mxu1 %v13689_v1  ;;  %7844 = vmatprep.mubr.bf16.mxu0 %v13689_v1  ;;  %v10230_v12 = vcombine.high %v13708_v18, %v13710_v40  ;;  %v13736_v59 = vld [vmem:[#allocation10 + $0x668] sm:$0xff] }
 0x9ea   : > { %v5735_v58 = vadd.f32 %v5734_v33, %v13444_v49  ;;  %v5848_v30 = vadd.f32 %v5847_v29, %v13447_v50  ;;  %v5736_v43 = vpop.f32.mrb[131].mxu1  ;;  %v5849_v48 = vpop.f32.mrb[131].mxu0  ;;  %7619 = vmatmul.mubr.bf16.gmra.mrb[156].mxu1 %v13677_v54  ;;  %7845 = vmatmul.mubr.bf16.gmra.mrb[156].mxu0 %v13677_v54  ;;  %v5914_v23 = vmax.f32 %v5731_v28, 0.0  ;;  %v5916_v42 = vmax.f32 %v5844_v31, 0.0 }
 0x9eb   : > { %v5737_v27 = vadd.f32 %v5736_v43, %v13450_v51  ;;  %v5850_v56 = vadd.f32 %v5849_v48, %v13453_v53  ;;  %7682 = vmatpush1.bf16.msra.mxu1 %v10205_v41  ;;  %7908 = vmatpush1.bf16.msra.mxu0 %v10207_v6  ;;  %v5915_v44 = vmax.f32 %v5733_v0, 0.0  ;;  %v5917_v45 = vmax.f32 %v5846_v14, 0.0  ;;  %v13741_v41 = vld [vmem:[#allocation10 + $0x680] sm:$0xff] }
 0x9ec   : > { %v5918_v33 = vmax.f32 %v5735_v58, 0.0  ;;  %v5920_v29 = vmax.f32 %v5848_v30, 0.0  ;;  %7683 = vmatprep.subr.bf16.mxu1 %v10214_v55  ;;  %7909 = vmatprep.subr.bf16.mxu0 %v10216_v22  ;;  %v13743_v6 = vld [vmem:[#allocation10 + $0x6a0] sm:$0xff]  ;;  %v10229_v28 = vcombine.low %v13708_v18, %v13710_v40  ;;  %v10231_v31 = vcombine.low %v13734_v47, %v13736_v59  ;;  %v13762_v30 = vld [vmem:[#allocation10 + $0x688] sm:$0xff] }
 0x9ed   : > { %v5919_v26 = vmax.f32 %v5737_v27, 0.0  ;;  %v5921_v37 = vmax.f32 %v5850_v56, 0.0  ;;  %v10232_v58 = vcombine.high %v13734_v47, %v13736_v59  ;;  %v13764_v18 = vld [vmem:[#allocation10 + $0x6a8] sm:$0xff]  ;;  %v10238_v4 = vcombine.high %v13741_v41, %v13743_v6 }
 0x9ee   : > { %v13745_v43 = vpack.c.bf16 %v5918_v33, %v5914_v23  ;;  %v13747_v48 = vpack.c.bf16 %v5920_v29, %v5916_v42  ;;  %v10237_v59 = vcombine.low %v13741_v41, %v13743_v6  ;;  %v10239_v29 = vcombine.low %v13762_v30, %v13764_v18  ;;  %v6211_v41 = vld [vmem:[#allocation10 + $0x748] sm:$0xff] }
 0x9ef   : > { %v13753_v55 = vpack.c.bf16 %v5919_v26, %v5915_v44  ;;  %v13755_v22 = vpack.c.bf16 %v5921_v37, %v5917_v45  ;;  %v5740_v0 = vpop.f32.mrb[132].mxu1  ;;  %v5853_v14 = vpop.f32.mrb[132].mxu0  ;;  %7684 = vmatpush1.bf16.msra.mxu1 %v10213_v7  ;;  %7910 = vmatpush1.bf16.msra.mxu0 %v10215_v11  ;;  %v10240_v26 = vcombine.high %v13762_v30, %v13764_v18  ;;  %v13792_v37 = vld [vmem:[#allocation10 + $0x6c0] sm:$0xff]  ;;  %v6215_v6 = vld [vmem:[#allocation10 + $0x768] sm:$0xff] }
 0x9f0   : > { %v5741_v40 = vadd.f32 %v5740_v0, %v13444_v49  ;;  %v5854_v27 = vadd.f32 %v5853_v14, %v13447_v50  ;;  %v5742_v56 = vpop.f32.mrb[133].mxu1  ;;  %v5855_v23 = vpop.f32.mrb[133].mxu0  ;;  %7685 = vmatprep.subr.bf16.mxu1 %v10222_v10  ;;  %7911 = vmatprep.subr.bf16.mxu0 %v10224_v25  ;;  %v13794_v0 = vld [vmem:[#allocation10 + $0x6e0] sm:$0xff] }
 0x9f1   : > { %v5743_v8 = vadd.f32 %v5742_v56, %v13450_v51  ;;  %v5856_v7 = vadd.f32 %v5855_v23, %v13453_v53  ;;  %v5744_v11 = vpop.f32.mrb[134].mxu1  ;;  %v5857_v47 = vpop.f32.mrb[134].mxu0  ;;  %7628 = vmatprep.mubr.bf16.mxu1 %v13753_v55  ;;  %7854 = vmatprep.mubr.bf16.mxu0 %v13753_v55  ;;  %v10245_v18 = vcombine.low %v13792_v37, %v13794_v0 }
 0x9f2   : > { %v5745_v42 = vadd.f32 %v5744_v11, %v13444_v49  ;;  %v5858_v10 = vadd.f32 %v5857_v47, %v13447_v50  ;;  %v5746_v25 = vpop.f32.mrb[135].mxu1  ;;  %v5859_v33 = vpop.f32.mrb[135].mxu0  ;;  %7629 = vmatmul.mubr.bf16.gmra.mrb[160].mxu1 %v13745_v43  ;;  %7855 = vmatmul.mubr.bf16.gmra.mrb[160].mxu0 %v13745_v43  ;;  %v5922_v14 = vmax.f32 %v5741_v40, 0.0  ;;  %v5924_v56 = vmax.f32 %v5854_v27, 0.0  ;;  %v13796_v47 = vld [vmem:[#allocation10 + $0x6c8] sm:$0xff] }
 0x9f3   : > { %v5747_v44 = vadd.f32 %v5746_v25, %v13450_v51  ;;  %v5860_v45 = vadd.f32 %v5859_v33, %v13453_v53  ;;  %7686 = vmatpush1.bf16.msra.mxu1 %v10221_v13  ;;  %7912 = vmatpush1.bf16.msra.mxu0 %v10223_v9  ;;  %v5923_v24 = vmax.f32 %v5743_v8, 0.0  ;;  %v5925_v19 = vmax.f32 %v5856_v7, 0.0 }
 0x9f4   : > { %v5926_v23 = vmax.f32 %v5745_v42, 0.0  ;;  %v5928_v11 = vmax.f32 %v5858_v10, 0.0  ;;  %7687 = vmatprep.subr.bf16.mxu1 %v10230_v12  ;;  %7913 = vmatprep.subr.bf16.mxu0 %v10232_v58  ;;  %v10246_v40 = vcombine.high %v13792_v37, %v13794_v0  ;;  %v13808_v12 = vld [vmem:[#allocation10 + $0x700] sm:$0xff]  ;;  %v10247_v10 = vcombine.low %v13796_v47, %v13798_v3  ;;  %v13822_v0 = vld [vmem:[#allocation10 + $0x708] sm:$0xff] }
 0x9f5   : > { %v5927_v57 = vmax.f32 %v5747_v44, 0.0  ;;  %v5929_v13 = vmax.f32 %v5860_v45, 0.0  ;;  %v13810_v58 = vld [vmem:[#allocation10 + $0x720] sm:$0xff]  ;;  %v10248_v37 = vcombine.high %v13796_v47, %v13798_v3 }
 0x9f6   : > { %v13800_v9 = vpack.c.bf16 %v5926_v23, %v5922_v14  ;;  %v13802_v30 = vpack.c.bf16 %v5928_v11, %v5924_v56  ;;  %v13824_v14 = vld [vmem:[#allocation10 + $0x728] sm:$0xff] }
 0x9f7   : > { %v13812_v27 = vpack.c.bf16 %v5927_v57, %v5923_v24  ;;  %v13814_v8 = vpack.c.bf16 %v5929_v13, %v5925_v19  ;;  %v5750_v7 = vpop.f32.mrb[136].mxu1  ;;  %v5863_v42 = vpop.f32.mrb[136].mxu0  ;;  %7688 = vmatpush1.bf16.msra.mxu1 %v10229_v28  ;;  %7914 = vmatpush1.bf16.msra.mxu0 %v10231_v31  ;;  %v10253_v24 = vcombine.low %v13808_v12, %v13810_v58 }
 0x9f8   : > { %v5751_v25 = vadd.f32 %v5750_v7, %v13444_v49  ;;  %v5864_v33 = vadd.f32 %v5863_v42, %v13447_v50  ;;  %v5752_v44 = vpop.f32.mrb[137].mxu1  ;;  %v5865_v45 = vpop.f32.mrb[137].mxu0  ;;  %7689 = vmatprep.subr.bf16.mxu1 %v10238_v4  ;;  %7915 = vmatprep.subr.bf16.mxu0 %v10240_v26  ;;  %v10254_v4 = vcombine.high %v13808_v12, %v13810_v58  ;;  %v13845_v7 = vld [vmem:[#allocation10 + $0x740] sm:$0xff] }
 0x9f9   : > { %v5753_v28 = vadd.f32 %v5752_v44, %v13450_v51  ;;  %v5866_v31 = vadd.f32 %v5865_v45, %v13453_v53  ;;  %v5754_v56 = vpop.f32.mrb[138].mxu1  ;;  %v5867_v23 = vpop.f32.mrb[138].mxu0  ;;  %7638 = vmatprep.mubr.bf16.mxu1 %v13812_v27  ;;  %7864 = vmatprep.mubr.bf16.mxu0 %v13812_v27  ;;  %v10256_v13 = vcombine.high %v13822_v0, %v13824_v14  ;;  %v13847_v42 = vld [vmem:[#allocation10 + $0x760] sm:$0xff] }
 0x9fa   : > { %v5755_v26 = vadd.f32 %v5754_v56, %v13444_v49  ;;  %v5868_v11 = vadd.f32 %v5867_v23, %v13447_v50  ;;  %v5756_v47 = vpop.f32.mrb[139].mxu1  ;;  %v5869_v3 = vpop.f32.mrb[139].mxu0  ;;  %7639 = vmatmul.mubr.bf16.gmra.mrb[164].mxu1 %v13800_v9  ;;  %7865 = vmatmul.mubr.bf16.gmra.mrb[164].mxu0 %v13800_v9  ;;  %v5930_v44 = vmax.f32 %v5751_v25, 0.0  ;;  %v5932_v45 = vmax.f32 %v5864_v33, 0.0 }
 0x9fb   : > { %v5757_v19 = vadd.f32 %v5756_v47, %v13450_v51  ;;  %v5870_v57 = vadd.f32 %v5869_v3, %v13453_v53  ;;  %7690 = vmatpush1.bf16.msra.mxu1 %v10237_v59  ;;  %7916 = vmatpush1.bf16.msra.mxu0 %v10239_v29  ;;  %v5931_v58 = vmax.f32 %v5753_v28, 0.0  ;;  %v5933_v23 = vmax.f32 %v5866_v31, 0.0 }
 0x9fc   : > { %v5934_v56 = vmax.f32 %v5755_v26, 0.0  ;;  %v5936_v12 = vmax.f32 %v5868_v11, 0.0  ;;  %7691 = vmatprep.subr.bf16.mxu1 %v10246_v40  ;;  %7917 = vmatprep.subr.bf16.mxu0 %v10248_v37  ;;  %v10255_v34 = vcombine.low %v13822_v0, %v13824_v14  ;;  %v10262_v25 = vcombine.high %v13845_v7, %v13847_v42  ;;  %v13863_v26 = vld [vmem:[#allocation10 + $0x780] sm:$0xff] }
 0x9fd   : > { %v5935_v47 = vmax.f32 %v5757_v19, 0.0  ;;  %v5937_v3 = vmax.f32 %v5870_v57, 0.0  ;;  %v10261_v31 = vcombine.low %v13845_v7, %v13847_v42  ;;  %v13865_v11 = vld [vmem:[#allocation10 + $0x7a0] sm:$0xff] }
 0x9fe   : > { %v13849_v59 = vpack.c.bf16 %v5934_v56, %v5930_v44  ;;  %v13851_v29 = vpack.c.bf16 %v5936_v12, %v5932_v45  ;;  %v10264_v44 = vcombine.high %v6211_v41, %v6215_v6  ;;  %v6219_v45 = vld [vmem:[#allocation10 + $0x788] sm:$0xff]  ;;  %v10263_v12 = vcombine.low %v6211_v41, %v6215_v6 }
 0x9ff   : > { %v13857_v33 = vpack.c.bf16 %v5935_v47, %v5931_v58  ;;  %v13859_v40 = vpack.c.bf16 %v5937_v3, %v5933_v23  ;;  %v5760_v37 = vpop.f32.mrb[140].mxu1  ;;  %v5873_v28 = vpop.f32.mrb[140].mxu0  ;;  %7692 = vmatpush1.bf16.msra.mxu1 %v10245_v18  ;;  %7918 = vmatpush1.bf16.msra.mxu0 %v10247_v10  ;;  %v6223_v56 = vld [vmem:[#allocation10 + $0x7a8] sm:$0xff]  ;;  %v10270_v47 = vcombine.high %v13863_v26, %v13865_v11 }
 0xa00   : > { %v5761_v0 = vadd.f32 %v5760_v37, %v13444_v49  ;;  %v5874_v14 = vadd.f32 %v5873_v28, %v13447_v50  ;;  %v5762_v19 = vpop.f32.mrb[141].mxu1  ;;  %v5875_v57 = vpop.f32.mrb[141].mxu0  ;;  %7693 = vmatprep.subr.bf16.mxu1 %v10254_v4  ;;  %7919 = vmatprep.subr.bf16.mxu0 %v10256_v13  ;;  %v10272_v41 = vcombine.high %v6219_v45, %v6223_v56 }
 0xa01   : > { %v5763_v18 = vadd.f32 %v5762_v19, %v13450_v51  ;;  %v5876_v10 = vadd.f32 %v5875_v57, %v13453_v53  ;;  %v5764_v7 = vpop.f32.mrb[142].mxu1  ;;  %v5877_v42 = vpop.f32.mrb[142].mxu0  ;;  %7648 = vmatprep.mubr.bf16.mxu1 %v13857_v33  ;;  %7874 = vmatprep.mubr.bf16.mxu0 %v13857_v33 }
 0xa02   : > { %v5765_v58 = vadd.f32 %v5764_v7, %v13444_v49  ;;  %v5878_v23 = vadd.f32 %v5877_v42, %v13447_v50  ;;  %v5766_v4 = vpop.f32.mrb[143].mxu1  ;;  %v5879_v13 = vpop.f32.mrb[143].mxu0  ;;  %7649 = vmatmul.mubr.bf16.gmra.mrb[168].mxu1 %v13849_v59  ;;  %7875 = vmatmul.mubr.bf16.gmra.mrb[168].mxu0 %v13849_v59  ;;  %v5938_v6 = vmax.f32 %v5761_v0, 0.0  ;;  %v5940_v49 = vmax.f32 %v5874_v14, 0.0 }
 0xa03   : > { %v5767_v3 = vadd.f32 %v5766_v4, %v13450_v51  ;;  %v5880_v37 = vadd.f32 %v5879_v13, %v13453_v53  ;;  %7694 = vmatpush1.bf16.msra.mxu1 %v10253_v24  ;;  %7920 = vmatpush1.bf16.msra.mxu0 %v10255_v34  ;;  %v5939_v19 = vmax.f32 %v5763_v18, 0.0  ;;  %v5941_v57 = vmax.f32 %v5876_v10, 0.0  ;;  %v6230_v51 = vld [vmem:[#allocation10 + $0x7e0] sm:$0xff]  ;;  %v6227_v53 = vld [vmem:[#allocation10 + $0x7c8] sm:$0xff]  ;;  %v5980_v10 = vld [vmem:[#allocation10 + $0x10] sm:$0xff] }
 0xa04   : > { %v5942_v28 = vmax.f32 %v5765_v58, 0.0  ;;  %v5944_v50 = vmax.f32 %v5878_v23, 0.0  ;;  %7695 = vmatprep.subr.bf16.mxu1 %v10262_v25  ;;  %7921 = vmatprep.subr.bf16.mxu0 %v10264_v44  ;;  %v6231_v24 = vld [vmem:[#allocation10 + $0x7e8] sm:$0xff]  ;;  %v10269_v25 = vcombine.low %v13863_v26, %v13865_v11  ;;  %v10271_v14 = vcombine.low %v6219_v45, %v6223_v56  ;;  %v5984_v58 = vld [vmem:[#allocation10 + $0x30] sm:$0xff]  ;;  %v5989_v13 = vld [vmem:[#allocation10 + $0x58] sm:$0xff] }
 0xa05   : > { %v5943_v7 = vmax.f32 %v5767_v3, 0.0  ;;  %v5945_v42 = vmax.f32 %v5880_v37, 0.0  ;;  %v10278_v44 = vcombine.high %v6226_v39, %v6230_v51  ;;  %v10280_v18 = vcombine.high %v6227_v53, %v6231_v24  ;;  %v5988_v23 = vld [vmem:[#allocation10 + $0x50] sm:$0xff] }
 0xa06   : > { %v13881_v38 = vpack.c.bf16 %v5942_v28, %v5938_v6  ;;  %v13883_v36 = vpack.c.bf16 %v5944_v50, %v5940_v49  ;;  %v10277_v26 = vcombine.low %v6226_v39, %v6230_v51  ;;  %v10279_v11 = vcombine.low %v6227_v53, %v6231_v24  ;;  %v5992_v4 = vld [vmem:[#allocation10 + $0x70] sm:$0xff]  ;;  %v5997_v28 = vld [vmem:[#allocation10 + $0x98] sm:$0xff] }
 0xa07   : > { %v13885_v34 = vpack.c.bf16 %v5943_v7, %v5939_v19  ;;  %v13887_v0 = vpack.c.bf16 %v5945_v42, %v5941_v57  ;;  %7696 = vmatpush1.bf16.msra.mxu1 %v10261_v31  ;;  %7922 = vmatpush1.bf16.msra.mxu0 %v10263_v12  ;;  %v5981_v31 = vld [vmem:[#allocation10 + $0x18] sm:$0xff]  ;;  %v10034_v45 = vcombine.high %v5980_v10, %v5984_v58  ;;  %v5996_v6 = vld [vmem:[#allocation10 + $0x90] sm:$0xff] }
 0xa08   : > { %7697 = vmatprep.subr.bf16.mxu1 %v10270_v47  ;;  %7923 = vmatprep.subr.bf16.mxu0 %v10272_v41  ;;  %v5985_v12 = vld [vmem:[#allocation10 + $0x38] sm:$0xff]  ;;  %v10033_v3 = vcombine.low %v5980_v10, %v5984_v58  ;;  %v10042_v41 = vcombine.high %v5988_v23, %v5992_v4  ;;  %v6000_v49 = vld [vmem:[#allocation10 + $0xb0] sm:$0xff]  ;;  %v10041_v19 = vcombine.low %v5988_v23, %v5992_v4 }
 0xa09   : > { %7658 = vmatprep.mubr.bf16.mxu1 %v13885_v34  ;;  %7884 = vmatprep.mubr.bf16.mxu0 %v13885_v34  ;;  %v10036_v56 = vcombine.high %v5981_v31, %v5985_v12  ;;  %v5993_v47 = vld [vmem:[#allocation10 + $0x78] sm:$0xff]  ;;  %v10035_v37 = vcombine.low %v5981_v31, %v5985_v12  ;;  %v10050_v7 = vcombine.high %v5996_v6, %v6000_v49  ;;  %v6004_v51 = vld [vmem:[#allocation10 + $0xd0] sm:$0xff] }
 0xa0a   : > { %7659 = vmatmul.mubr.bf16.gmra.mrb[172].mxu1 %v13881_v38  ;;  %7885 = vmatmul.mubr.bf16.gmra.mrb[172].mxu0 %v13881_v38  ;;  %v10044_v39 = vcombine.high %v5989_v13, %v5993_v47  ;;  %v6001_v50 = vld [vmem:[#allocation10 + $0xb8] sm:$0xff]  ;;  %v10043_v57 = vcombine.low %v5989_v13, %v5993_v47  ;;  %v6008_v53 = vld [vmem:[#allocation10 + $0xf0] sm:$0xff] }
 0xa0b   : > { %7698 = vmatpush1.bf16.msra.mxu1 %v10269_v25  ;;  %7701 = vmatprep.mubr.bf16.mxu1 %v13499_v21  ;;  %v10052_v42 = vcombine.high %v5997_v28, %v6001_v50  ;;  %v6005_v24 = vld [vmem:[#allocation10 + $0xd8] sm:$0xff]  ;;  %v6012_v58 = vld [vmem:[#allocation10 + $0x110] sm:$0xff] }
 0xa0c   : > { %7924 = vmatpush1.bf16.msra.mxu0 %v10271_v14  ;;  %7927 = vmatprep.mubr.bf16.mxu0 %v13499_v21  ;;  %v6009_v25 = vld [vmem:[#allocation10 + $0xf8] sm:$0xff]  ;;  %v10049_v14 = vcombine.low %v5996_v6, %v6000_v49  ;;  %v6016_v31 = vld [vmem:[#allocation10 + $0x130] sm:$0xff] }
 0xa0d   : > { %7699 = vmatprep.subr.bf16.mxu1 %v10278_v44  ;;  %7925 = vmatprep.subr.bf16.mxu0 %v10280_v18  ;;  %v10051_v44 = vcombine.low %v5997_v28, %v6001_v50  ;;  %v10058_v18 = vcombine.high %v6004_v51, %v6008_v53  ;;  %v10060_v10 = vcombine.high %v6005_v24, %v6009_v25  ;;  %v6013_v12 = vld [vmem:[#allocation10 + $0x118] sm:$0xff]  ;;  %v6020_v4 = vld [vmem:[#allocation10 + $0x150] sm:$0xff] }
 0xa0e   : > { %v6024_v13 = vld [vmem:[#allocation10 + $0x170] sm:$0xff]  ;;  %v6021_v47 = vld [vmem:[#allocation10 + $0x158] sm:$0xff] }
 0xa0f   : > { %7700 = vmatpush1.bf16.msra.mxu1 %v10277_v26  ;;  %v6017_v26 = vld [vmem:[#allocation10 + $0x138] sm:$0xff]  ;;  %v6028_v49 = vld [vmem:[#allocation10 + $0x190] sm:$0xff] }
 0xa10   : > { %7926 = vmatpush1.bf16.msra.mxu0 %v10279_v11  ;;  %8008 = vmatprep.subr.bf16.mxu1 %v10034_v45  ;;  %v10057_v11 = vcombine.low %v6004_v51, %v6008_v53  ;;  %v10059_v45 = vcombine.low %v6005_v24, %v6009_v25  ;;  %v10068_v23 = vcombine.high %v6013_v12, %v6017_v26  ;;  %v6032_v28 = vld [vmem:[#allocation10 + $0x1b0] sm:$0xff]  ;;  %v6029_v50 = vld [vmem:[#allocation10 + $0x198] sm:$0xff] }
 0xa11   : > { %8234 = vmatprep.subr.bf16.mxu0 %v10036_v56  ;;  %v10066_v56 = vcombine.high %v6012_v58, %v6016_v31  ;;  %v6036_v53 = vld [vmem:[#allocation10 + $0x1d0] sm:$0xff]  ;;  %v6037_v25 = vld [vmem:[#allocation10 + $0x1d8] sm:$0xff] }
 0xa12   : > { %7702 = vmatmul.mubr.bf16.vlgmr.msra.gmra.mrb[144].mxu1 %v13491_v17  ;;  %v6040_v24 = vld [vmem:[#allocation10 + $0x1f0] sm:$0xff] }
 0xa13   : > { %7928 = vmatmul.mubr.bf16.vlgmr.msra.gmra.mrb[144].mxu0 %v13491_v17  ;;  %7711 = vmatprep.mubr.bf16.mxu1 %v13559_v63 }
 0xa14   : > { %7937 = vmatprep.mubr.bf16.mxu0 %v13559_v63  ;;  %8009 = vmatpush1.bf16.msra.mxu1 %v10033_v3  ;;  %v6025_v3 = vld [vmem:[#allocation10 + $0x178] sm:$0xff] }
 0xa15   : > { %8235 = vmatpush1.bf16.msra.mxu0 %v10035_v37  ;;  %8010 = vmatprep.subr.bf16.mxu1 %v10042_v41  ;;  %v10065_v37 = vcombine.low %v6012_v58, %v6016_v31  ;;  %v10067_v41 = vcombine.low %v6013_v12, %v6017_v26  ;;  %v10076_v6 = vcombine.high %v6021_v47, %v6025_v3  ;;  %v6044_v31 = vld [vmem:[#allocation10 + $0x210] sm:$0xff]  ;;  %v6045_v26 = vld [vmem:[#allocation10 + $0x218] sm:$0xff] }
 0xa16   : > { %8236 = vmatprep.subr.bf16.mxu0 %v10044_v39  ;;  %v10074_v39 = vcombine.high %v6020_v4, %v6024_v13  ;;  %v6048_v12 = vld [vmem:[#allocation10 + $0x230] sm:$0xff] }
 0xa18   : > { %8011 = vmatpush1.bf16.msra.mxu1 %v10041_v19  ;;  %v6033_v19 = vld [vmem:[#allocation10 + $0x1b8] sm:$0xff] }
 0xa19   : > { %8237 = vmatpush1.bf16.msra.mxu0 %v10043_v57  ;;  %8012 = vmatprep.subr.bf16.mxu1 %v10050_v7  ;;  %v10073_v57 = vcombine.low %v6020_v4, %v6024_v13  ;;  %v10075_v7 = vcombine.low %v6021_v47, %v6025_v3  ;;  %v10084_v51 = vcombine.high %v6029_v50, %v6033_v19  ;;  %v6052_v13 = vld [vmem:[#allocation10 + $0x250] sm:$0xff]  ;;  %v6053_v3 = vld [vmem:[#allocation10 + $0x258] sm:$0xff] }
 0xa1a   : > { %7712 = vmatmul.mubr.bf16.gmra.mrb[148].mxu1 %v13547_v61  ;;  %8238 = vmatprep.subr.bf16.mxu0 %v10052_v42  ;;  %v10082_v42 = vcombine.high %v6028_v49, %v6032_v28  ;;  %v6056_v47 = vld [vmem:[#allocation10 + $0x270] sm:$0xff] }
 0xa1b   : > { %7938 = vmatmul.mubr.bf16.gmra.mrb[148].mxu0 %v13547_v61  ;;  %7721 = vmatprep.mubr.bf16.mxu1 %v13623_v5 }
 0xa1c   : > { %7947 = vmatprep.mubr.bf16.mxu0 %v13623_v5  ;;  %8013 = vmatpush1.bf16.msra.mxu1 %v10049_v14  ;;  %v6041_v14 = vld [vmem:[#allocation10 + $0x1f8] sm:$0xff] }
 0xa1d   : > { %8239 = vmatpush1.bf16.msra.mxu0 %v10051_v44  ;;  %8014 = vmatprep.subr.bf16.mxu1 %v10058_v18  ;;  %v10081_v44 = vcombine.low %v6028_v49, %v6032_v28  ;;  %v10083_v18 = vcombine.low %v6029_v50, %v6033_v19  ;;  %v10092_v58 = vcombine.high %v6037_v25, %v6041_v14  ;;  %v6060_v28 = vld [vmem:[#allocation10 + $0x290] sm:$0xff]  ;;  %v6061_v19 = vld [vmem:[#allocation10 + $0x298] sm:$0xff] }
 0xa1e   : > { %8240 = vmatprep.subr.bf16.mxu0 %v10060_v10  ;;  %v10090_v10 = vcombine.high %v6036_v53, %v6040_v24  ;;  %v6064_v50 = vld [vmem:[#allocation10 + $0x2b0] sm:$0xff] }
 0xa20   : > { %8015 = vmatpush1.bf16.msra.mxu1 %v10057_v11  ;;  %v6049_v11 = vld [vmem:[#allocation10 + $0x238] sm:$0xff] }
 0xa21   : > { %8241 = vmatpush1.bf16.msra.mxu0 %v10059_v45  ;;  %8016 = vmatprep.subr.bf16.mxu1 %v10066_v56  ;;  %v10089_v45 = vcombine.low %v6036_v53, %v6040_v24  ;;  %v10091_v56 = vcombine.low %v6037_v25, %v6041_v14  ;;  %v10100_v4 = vcombine.high %v6045_v26, %v6049_v11  ;;  %v6068_v24 = vld [vmem:[#allocation10 + $0x2d0] sm:$0xff]  ;;  %v6069_v14 = vld [vmem:[#allocation10 + $0x2d8] sm:$0xff] }
 0xa22   : > { %7722 = vmatmul.mubr.bf16.gmra.mrb[152].mxu1 %v13615_v52  ;;  %8242 = vmatprep.subr.bf16.mxu0 %v10068_v23  ;;  %v10098_v23 = vcombine.high %v6044_v31, %v6048_v12  ;;  %v6072_v25 = vld [vmem:[#allocation10 + $0x2f0] sm:$0xff] }
 0xa23   : > { %7948 = vmatmul.mubr.bf16.gmra.mrb[152].mxu0 %v13615_v52  ;;  %7731 = vmatprep.mubr.bf16.mxu1 %v13691_v15 }
 0xa24   : > { %7957 = vmatprep.mubr.bf16.mxu0 %v13691_v15  ;;  %8017 = vmatpush1.bf16.msra.mxu1 %v10065_v37  ;;  %v6057_v37 = vld [vmem:[#allocation10 + $0x278] sm:$0xff] }
 0xa25   : > { %8243 = vmatpush1.bf16.msra.mxu0 %v10067_v41  ;;  %8018 = vmatprep.subr.bf16.mxu1 %v10074_v39  ;;  %v10097_v41 = vcombine.low %v6044_v31, %v6048_v12  ;;  %v10099_v39 = vcombine.low %v6045_v26, %v6049_v11  ;;  %v10108_v49 = vcombine.high %v6053_v3, %v6057_v37  ;;  %v6076_v12 = vld [vmem:[#allocation10 + $0x310] sm:$0xff]  ;;  %v6077_v11 = vld [vmem:[#allocation10 + $0x318] sm:$0xff] }
 0xa26   : > { %8244 = vmatprep.subr.bf16.mxu0 %v10076_v6  ;;  %v10106_v6 = vcombine.high %v6052_v13, %v6056_v47  ;;  %v6080_v26 = vld [vmem:[#allocation10 + $0x330] sm:$0xff] }
 0xa28   : > { %8019 = vmatpush1.bf16.msra.mxu1 %v10073_v57  ;;  %v6065_v57 = vld [vmem:[#allocation10 + $0x2b8] sm:$0xff] }
 0xa29   : > { %8245 = vmatpush1.bf16.msra.mxu0 %v10075_v7  ;;  %8020 = vmatprep.subr.bf16.mxu1 %v10082_v42  ;;  %v10105_v7 = vcombine.low %v6052_v13, %v6056_v47  ;;  %v10107_v42 = vcombine.low %v6053_v3, %v6057_v37  ;;  %v10116_v53 = vcombine.high %v6061_v19, %v6065_v57  ;;  %v6084_v47 = vld [vmem:[#allocation10 + $0x350] sm:$0xff]  ;;  %v6085_v37 = vld [vmem:[#allocation10 + $0x358] sm:$0xff] }
 0xa2a   : > { %7732 = vmatmul.mubr.bf16.gmra.mrb[156].mxu1 %v13679_v60  ;;  %8246 = vmatprep.subr.bf16.mxu0 %v10084_v51  ;;  %v10114_v51 = vcombine.high %v6060_v28, %v6064_v50  ;;  %v6088_v3 = vld [vmem:[#allocation10 + $0x370] sm:$0xff] }
 0xa2b   : > { %7958 = vmatmul.mubr.bf16.gmra.mrb[156].mxu0 %v13679_v60  ;;  %7741 = vmatprep.mubr.bf16.mxu1 %v13755_v22 }
 0xa2c   : > { %7967 = vmatprep.mubr.bf16.mxu0 %v13755_v22  ;;  %8021 = vmatpush1.bf16.msra.mxu1 %v10081_v44  ;;  %v6073_v44 = vld [vmem:[#allocation10 + $0x2f8] sm:$0xff] }
 0xa2d   : > { %8247 = vmatpush1.bf16.msra.mxu0 %v10083_v18  ;;  %8022 = vmatprep.subr.bf16.mxu1 %v10090_v10  ;;  %v10113_v18 = vcombine.low %v6060_v28, %v6064_v50  ;;  %v10115_v10 = vcombine.low %v6061_v19, %v6065_v57  ;;  %v10124_v31 = vcombine.high %v6069_v14, %v6073_v44  ;;  %v6092_v50 = vld [vmem:[#allocation10 + $0x390] sm:$0xff]  ;;  %v6093_v57 = vld [vmem:[#allocation10 + $0x398] sm:$0xff] }
 0xa2e   : > { %8248 = vmatprep.subr.bf16.mxu0 %v10092_v58  ;;  %v10122_v58 = vcombine.high %v6068_v24, %v6072_v25  ;;  %v6096_v19 = vld [vmem:[#allocation10 + $0x3b0] sm:$0xff] }
 0xa30   : > { %8023 = vmatpush1.bf16.msra.mxu1 %v10089_v45  ;;  %v6081_v45 = vld [vmem:[#allocation10 + $0x338] sm:$0xff] }
 0xa31   : > { %8249 = vmatpush1.bf16.msra.mxu0 %v10091_v56  ;;  %8024 = vmatprep.subr.bf16.mxu1 %v10098_v23  ;;  %v10121_v56 = vcombine.low %v6068_v24, %v6072_v25  ;;  %v10123_v23 = vcombine.low %v6069_v14, %v6073_v44  ;;  %v10132_v13 = vcombine.high %v6077_v11, %v6081_v45  ;;  %v6100_v25 = vld [vmem:[#allocation10 + $0x3d0] sm:$0xff]  ;;  %v6101_v44 = vld [vmem:[#allocation10 + $0x3d8] sm:$0xff] }
 0xa32   : > { %7742 = vmatmul.mubr.bf16.gmra.mrb[160].mxu1 %v13747_v48  ;;  %8250 = vmatprep.subr.bf16.mxu0 %v10100_v4  ;;  %v10130_v4 = vcombine.high %v6076_v12, %v6080_v26  ;;  %v6104_v14 = vld [vmem:[#allocation10 + $0x3f0] sm:$0xff] }
 0xa33   : > { %7968 = vmatmul.mubr.bf16.gmra.mrb[160].mxu0 %v13747_v48  ;;  %7751 = vmatprep.mubr.bf16.mxu1 %v13814_v8 }
 0xa34   : > { %7977 = vmatprep.mubr.bf16.mxu0 %v13814_v8  ;;  %8025 = vmatpush1.bf16.msra.mxu1 %v10097_v41  ;;  %v6089_v41 = vld [vmem:[#allocation10 + $0x378] sm:$0xff] }
 0xa35   : > { %8251 = vmatpush1.bf16.msra.mxu0 %v10099_v39  ;;  %8026 = vmatprep.subr.bf16.mxu1 %v10106_v6  ;;  %v10129_v39 = vcombine.low %v6076_v12, %v6080_v26  ;;  %v10131_v6 = vcombine.low %v6077_v11, %v6081_v45  ;;  %v10140_v28 = vcombine.high %v6085_v37, %v6089_v41  ;;  %v6108_v26 = vld [vmem:[#allocation10 + $0x410] sm:$0xff]  ;;  %v6109_v45 = vld [vmem:[#allocation10 + $0x418] sm:$0xff] }
 0xa36   : > { %8252 = vmatprep.subr.bf16.mxu0 %v10108_v49  ;;  %v10138_v49 = vcombine.high %v6084_v47, %v6088_v3  ;;  %v6112_v11 = vld [vmem:[#allocation10 + $0x430] sm:$0xff] }
 0xa38   : > { %8027 = vmatpush1.bf16.msra.mxu1 %v10105_v7  ;;  %v6097_v7 = vld [vmem:[#allocation10 + $0x3b8] sm:$0xff] }
 0xa39   : > { %8253 = vmatpush1.bf16.msra.mxu0 %v10107_v42  ;;  %8028 = vmatprep.subr.bf16.mxu1 %v10114_v51  ;;  %v10137_v42 = vcombine.low %v6084_v47, %v6088_v3  ;;  %v10139_v51 = vcombine.low %v6085_v37, %v6089_v41  ;;  %v10148_v24 = vcombine.high %v6093_v57, %v6097_v7  ;;  %v6116_v3 = vld [vmem:[#allocation10 + $0x450] sm:$0xff]  ;;  %v6117_v41 = vld [vmem:[#allocation10 + $0x458] sm:$0xff] }
 0xa3a   : > { %7752 = vmatmul.mubr.bf16.gmra.mrb[164].mxu1 %v13802_v30  ;;  %8254 = vmatprep.subr.bf16.mxu0 %v10116_v53  ;;  %v10146_v53 = vcombine.high %v6092_v50, %v6096_v19  ;;  %v6120_v37 = vld [vmem:[#allocation10 + $0x470] sm:$0xff] }
 0xa3b   : > { %7978 = vmatmul.mubr.bf16.gmra.mrb[164].mxu0 %v13802_v30  ;;  %7761 = vmatprep.mubr.bf16.mxu1 %v13859_v40 }
 0xa3c   : > { %7987 = vmatprep.mubr.bf16.mxu0 %v13859_v40  ;;  %8029 = vmatpush1.bf16.msra.mxu1 %v10113_v18  ;;  %v6105_v18 = vld [vmem:[#allocation10 + $0x3f8] sm:$0xff] }
 0xa3d   : > { %8255 = vmatpush1.bf16.msra.mxu0 %v10115_v10  ;;  %8030 = vmatprep.subr.bf16.mxu1 %v10122_v58  ;;  %v10145_v10 = vcombine.low %v6092_v50, %v6096_v19  ;;  %v10147_v58 = vcombine.low %v6093_v57, %v6097_v7  ;;  %v10156_v12 = vcombine.high %v6101_v44, %v6105_v18  ;;  %v6124_v50 = vld [vmem:[#allocation10 + $0x490] sm:$0xff]  ;;  %v6125_v57 = vld [vmem:[#allocation10 + $0x498] sm:$0xff] }
 0xa3e   : > { %8256 = vmatprep.subr.bf16.mxu0 %v10124_v31  ;;  %v10154_v31 = vcombine.high %v6100_v25, %v6104_v14  ;;  %v6128_v19 = vld [vmem:[#allocation10 + $0x4b0] sm:$0xff]  ;;  %v6129_v7 = vld [vmem:[#allocation10 + $0x4b8] sm:$0xff] }
 0xa40   : > { %8031 = vmatpush1.bf16.msra.mxu1 %v10121_v56  ;;  %v6113_v56 = vld [vmem:[#allocation10 + $0x438] sm:$0xff] }
 0xa41   : > { %8257 = vmatpush1.bf16.msra.mxu0 %v10123_v23  ;;  %8032 = vmatprep.subr.bf16.mxu1 %v10130_v4  ;;  %v10153_v23 = vcombine.low %v6100_v25, %v6104_v14  ;;  %v10155_v4 = vcombine.low %v6101_v44, %v6105_v18  ;;  %v13929_v47 = vcombine.high %v6109_v45, %v6113_v56  ;;  %v6132_v25 = vld [vmem:[#allocation10 + $0x4d0] sm:$0xff]  ;;  %v6133_v14 = vld [vmem:[#allocation10 + $0x4d8] sm:$0xff] }
 0xa42   : > { %7762 = vmatmul.mubr.bf16.gmra.mrb[168].mxu1 %v13851_v29  ;;  %8258 = vmatprep.subr.bf16.mxu0 %v10132_v13  ;;  %v10162_v13 = vcombine.high %v6108_v26, %v6112_v11  ;;  %v6137_v44 = vld [vmem:[#allocation10 + $0x4f8] sm:$0xff]  ;;  %v10177_v18 = vcombine.low %v6124_v50, %v6128_v19 }
 0xa43   : > { %7988 = vmatmul.mubr.bf16.gmra.mrb[168].mxu0 %v13851_v29  ;;  %7771 = vmatprep.mubr.bf16.mxu1 %v13887_v0 }
 0xa44   : > { %7997 = vmatprep.mubr.bf16.mxu0 %v13887_v0  ;;  %8033 = vmatpush1.bf16.msra.mxu1 %v10129_v39  ;;  %v6121_v39 = vld [vmem:[#allocation10 + $0x478] sm:$0xff] }
 0xa45   : > { %8259 = vmatpush1.bf16.msra.mxu0 %v10131_v6  ;;  %8034 = vmatprep.subr.bf16.mxu1 %v10138_v49  ;;  %v10161_v6 = vcombine.low %v6108_v26, %v6112_v11  ;;  %v13931_v49 = vcombine.low %v6109_v45, %v6113_v56  ;;  %v6141_v26 = vld [vmem:[#allocation10 + $0x518] sm:$0xff]  ;;  %v13957_v56 = vcombine.low %v6133_v14, %v6137_v44 }
 0xa46   : > { %8260 = vmatprep.subr.bf16.mxu0 %v10140_v28  ;;  %v13935_v28 = vcombine.high %v6117_v41, %v6121_v39  ;;  %v6145_v11 = vld [vmem:[#allocation10 + $0x538] sm:$0xff] }
 0xa48   : > { %8035 = vmatpush1.bf16.msra.mxu1 %v10137_v42  ;;  %v10169_v42 = vcombine.low %v6116_v3, %v6120_v37 }
 0xa49   : > { %8261 = vmatpush1.bf16.msra.mxu0 %v10139_v51  ;;  %8036 = vmatprep.subr.bf16.mxu1 %v10146_v53  ;;  %v13941_v51 = vcombine.low %v6117_v41, %v6121_v39  ;;  %v10178_v53 = vcombine.high %v6124_v50, %v6128_v19  ;;  %v6160_v50 = vld [vmem:[#allocation10 + $0x5b0] sm:$0xff]  ;;  %v6157_v19 = vld [vmem:[#allocation10 + $0x598] sm:$0xff] }
 0xa4a   : > { %7772 = vmatmul.mubr.bf16.gmra.mrb[172].mxu1 %v13883_v36  ;;  %8262 = vmatprep.subr.bf16.mxu0 %v10148_v24  ;;  %v13944_v24 = vcombine.high %v6125_v57, %v6129_v7 }
 0xa4b   : > { %7998 = vmatmul.mubr.bf16.gmra.mrb[172].mxu0 %v13883_v36  ;;  %8040 = vmatprep.mubr.bf16.mxu1 %v13497_v20 }
 0xa4c   : > { %8037 = vmatpush1.bf16.msra.mxu1 %v10145_v10  ;;  %8266 = vmatprep.mubr.bf16.mxu0 %v13497_v20  ;;  %v10170_v20 = vcombine.high %v6116_v3, %v6120_v37  ;;  %v6149_v3 = vld [vmem:[#allocation10 + $0x558] sm:$0xff] }
 0xa4d   : > { %8263 = vmatpush1.bf16.msra.mxu0 %v10147_v58  ;;  %8038 = vmatprep.subr.bf16.mxu1 %v10154_v31  ;;  %v13951_v58 = vcombine.high %v6133_v14, %v6137_v44  ;;  %v6140_v31 = vld [vmem:[#allocation10 + $0x510] sm:$0xff]  ;;  %v6153_v37 = vld [vmem:[#allocation10 + $0x578] sm:$0xff] }
 0xa4e   : > { %8264 = vmatprep.subr.bf16.mxu0 %v10156_v12  ;;  %v6144_v12 = vld [vmem:[#allocation10 + $0x530] sm:$0xff]  ;;  %v6165_v14 = vld [vmem:[#allocation10 + $0x5d8] sm:$0xff] }
 0xa4f   : > { %v10193_v41 = vcombine.low %v6140_v31, %v6144_v12  ;;  %v6169_v44 = vld [vmem:[#allocation10 + $0x5f8] sm:$0xff] }
 0xa50   : > { %8039 = vmatpush1.bf16.msra.mxu1 %v10153_v23  ;;  %v10194_v23 = vcombine.high %v6140_v31, %v6144_v12  ;;  %v13983_v31 = vcombine.high %v6165_v14, %v6169_v44  ;;  %v6172_v12 = vld [vmem:[#allocation10 + $0x610] sm:$0xff] }
 0xa51   : > { %8265 = vmatpush1.bf16.msra.mxu0 %v10155_v4  ;;  %8121 = vmatprep.subr.bf16.mxu1 %v10162_v13  ;;  %v13960_v4 = vcombine.high %v6141_v26, %v6145_v11  ;;  %v6148_v13 = vld [vmem:[#allocation10 + $0x550] sm:$0xff] }
 0xa52   : > { %8347 = vmatprep.subr.bf16.mxu0 %v13929_v47 }
 0xa53   : > { %8041 = vmatmul.mubr.bf16.vlgmr.msra.gmra.mrb[176].mxu1 %v13489_v16 }
 0xa54   : > { %8267 = vmatmul.mubr.bf16.vlgmr.msra.gmra.mrb[176].mxu0 %v13489_v16  ;;  %8050 = vmatprep.mubr.bf16.mxu1 %v13557_v2  ;;  %v6136_v16 = vld [vmem:[#allocation10 + $0x4f0] sm:$0xff] }
 0xa55   : > { %8122 = vmatpush1.bf16.msra.mxu1 %v10161_v6  ;;  %8276 = vmatprep.mubr.bf16.mxu0 %v13557_v2  ;;  %v13947_v2 = vcombine.low %v6125_v57, %v6129_v7  ;;  %v10186_v10 = vcombine.high %v6132_v25, %v6136_v16  ;;  %v10185_v45 = vcombine.low %v6132_v25, %v6136_v16  ;;  %v6161_v57 = vld [vmem:[#allocation10 + $0x5b8] sm:$0xff]  ;;  %v6164_v16 = vld [vmem:[#allocation10 + $0x5d0] sm:$0xff] }
 0xa56   : > { %8348 = vmatpush1.bf16.msra.mxu0 %v13931_v49  ;;  %8123 = vmatprep.subr.bf16.mxu1 %v10170_v20  ;;  %v13967_v6 = vcombine.high %v6149_v3, %v6153_v37  ;;  %v6156_v20 = vld [vmem:[#allocation10 + $0x590] sm:$0xff]  ;;  %v13976_v25 = vcombine.high %v6157_v19, %v6161_v57 }
 0xa57   : > { %8349 = vmatprep.subr.bf16.mxu0 %v13935_v28 }
 0xa59   : > { %8124 = vmatpush1.bf16.msra.mxu1 %v10169_v42  ;;  %v13973_v42 = vcombine.low %v6149_v3, %v6153_v37  ;;  %v6180_v37 = vld [vmem:[#allocation10 + $0x650] sm:$0xff] }
 0xa5a   : > { %8350 = vmatpush1.bf16.msra.mxu0 %v13941_v51  ;;  %8125 = vmatprep.subr.bf16.mxu1 %v10178_v53  ;;  %v10210_v53 = vcombine.high %v6156_v20, %v6160_v50 }
 0xa5b   : > { %8051 = vmatmul.mubr.bf16.gmra.mrb[180].mxu1 %v13545_v46  ;;  %8351 = vmatprep.subr.bf16.mxu0 %v13944_v24 }
 0xa5c   : > { %8277 = vmatmul.mubr.bf16.gmra.mrb[180].mxu0 %v13545_v46  ;;  %8060 = vmatprep.mubr.bf16.mxu1 %v13621_v62  ;;  %v6152_v46 = vld [vmem:[#allocation10 + $0x570] sm:$0xff] }
 0xa5d   : > { %8126 = vmatpush1.bf16.msra.mxu1 %v10177_v18  ;;  %8286 = vmatprep.mubr.bf16.mxu0 %v13621_v62  ;;  %v13963_v62 = vcombine.low %v6141_v26, %v6145_v11  ;;  %v10202_v39 = vcombine.high %v6148_v13, %v6152_v46  ;;  %v10201_v7 = vcombine.low %v6148_v13, %v6152_v46  ;;  %v6176_v26 = vld [vmem:[#allocation10 + $0x630] sm:$0xff]  ;;  %v6173_v11 = vld [vmem:[#allocation10 + $0x618] sm:$0xff] }
 0xa5e   : > { %8352 = vmatpush1.bf16.msra.mxu0 %v13947_v2  ;;  %8127 = vmatprep.subr.bf16.mxu1 %v10186_v10  ;;  %v10209_v18 = vcombine.low %v6156_v20, %v6160_v50  ;;  %v13989_v13 = vcombine.low %v6165_v14, %v6169_v44  ;;  %v10226_v46 = vcombine.high %v6172_v12, %v6176_v26 }
 0xa5f   : > { %8353 = vmatprep.subr.bf16.mxu0 %v13951_v58  ;;  %v10225_v20 = vcombine.low %v6172_v12, %v6176_v26  ;;  %v6197_v12 = vld [vmem:[#allocation10 + $0x6d8] sm:$0xff] }
 0xa60   : > { %v6201_v26 = vld [vmem:[#allocation10 + $0x6f8] sm:$0xff] }
 0xa61   : > { %8128 = vmatpush1.bf16.msra.mxu1 %v10185_v45  ;;  %v6177_v45 = vld [vmem:[#allocation10 + $0x638] sm:$0xff] }
 0xa62   : > { %8354 = vmatpush1.bf16.msra.mxu0 %v13957_v56  ;;  %8129 = vmatprep.subr.bf16.mxu1 %v10194_v23  ;;  %v13992_v3 = vcombine.high %v6173_v11, %v6177_v45 }
 0xa63   : > { %8061 = vmatmul.mubr.bf16.gmra.mrb[184].mxu1 %v13613_v32  ;;  %8355 = vmatprep.subr.bf16.mxu0 %v13960_v4 }
 0xa64   : > { %8287 = vmatmul.mubr.bf16.gmra.mrb[184].mxu0 %v13613_v32  ;;  %8070 = vmatprep.mubr.bf16.mxu1 %v13689_v1  ;;  %v6168_v32 = vld [vmem:[#allocation10 + $0x5f0] sm:$0xff] }
 0xa65   : > { %8130 = vmatpush1.bf16.msra.mxu1 %v10193_v41  ;;  %8296 = vmatprep.mubr.bf16.mxu0 %v13689_v1  ;;  %v13979_v1 = vcombine.low %v6157_v19, %v6161_v57  ;;  %v10218_v10 = vcombine.high %v6164_v16, %v6168_v32  ;;  %v10217_v23 = vcombine.low %v6164_v16, %v6168_v32  ;;  %v6181_v41 = vld [vmem:[#allocation10 + $0x658] sm:$0xff]  ;;  %v6188_v57 = vld [vmem:[#allocation10 + $0x690] sm:$0xff] }
 0xa66   : > { %8356 = vmatpush1.bf16.msra.mxu0 %v13963_v62  ;;  %8131 = vmatprep.subr.bf16.mxu1 %v10202_v39  ;;  %v6185_v39 = vld [vmem:[#allocation10 + $0x678] sm:$0xff] }
 0xa67   : > { %8357 = vmatprep.subr.bf16.mxu0 %v13967_v6  ;;  %v13999_v19 = vcombine.high %v6181_v41, %v6185_v39  ;;  %v6193_v16 = vld [vmem:[#allocation10 + $0x6b8] sm:$0xff]  ;;  %v14005_v14 = vcombine.low %v6181_v41, %v6185_v39 }
 0xa68   : > { %v6209_v41 = vld [vmem:[#allocation10 + $0x738] sm:$0xff] }
 0xa69   : > { %8132 = vmatpush1.bf16.msra.mxu1 %v10201_v7  ;;  %v6192_v7 = vld [vmem:[#allocation10 + $0x6b0] sm:$0xff] }
 0xa6a   : > { %8358 = vmatpush1.bf16.msra.mxu0 %v13973_v42  ;;  %8133 = vmatprep.subr.bf16.mxu1 %v10210_v53  ;;  %v6189_v53 = vld [vmem:[#allocation10 + $0x698] sm:$0xff]  ;;  %v10242_v44 = vcombine.high %v6188_v57, %v6192_v7 }
 0xa6b   : > { %8071 = vmatmul.mubr.bf16.gmra.mrb[188].mxu1 %v13677_v54  ;;  %8359 = vmatprep.subr.bf16.mxu0 %v13976_v25 }
 0xa6c   : > { %8297 = vmatmul.mubr.bf16.gmra.mrb[188].mxu0 %v13677_v54  ;;  %8080 = vmatprep.mubr.bf16.mxu1 %v13753_v55  ;;  %v6184_v54 = vld [vmem:[#allocation10 + $0x670] sm:$0xff] }
 0xa6d   : > { %8134 = vmatpush1.bf16.msra.mxu1 %v10209_v18  ;;  %8306 = vmatprep.mubr.bf16.mxu0 %v13753_v55  ;;  %v13995_v55 = vcombine.low %v6173_v11, %v6177_v45  ;;  %v10234_v50 = vcombine.high %v6180_v37, %v6184_v54  ;;  %v10233_v32 = vcombine.low %v6180_v37, %v6184_v54  ;;  %v6208_v37 = vld [vmem:[#allocation10 + $0x730] sm:$0xff]  ;;  %v6205_v54 = vld [vmem:[#allocation10 + $0x718] sm:$0xff] }
 0xa6e   : > { %8360 = vmatpush1.bf16.msra.mxu0 %v13979_v1  ;;  %8135 = vmatprep.subr.bf16.mxu1 %v10218_v10  ;;  %v14008_v18 = vcombine.high %v6189_v53, %v6193_v16  ;;  %v6196_v10 = vld [vmem:[#allocation10 + $0x6d0] sm:$0xff]  ;;  %v10241_v11 = vcombine.low %v6188_v57, %v6192_v7  ;;  %v14024_v57 = vcombine.high %v6205_v54, %v6209_v41 }
 0xa6f   : > { %8361 = vmatprep.subr.bf16.mxu0 %v13983_v31  ;;  %v6212_v7 = vld [vmem:[#allocation10 + $0x750] sm:$0xff] }
 0xa71   : > { %8136 = vmatpush1.bf16.msra.mxu1 %v10217_v23  ;;  %v14015_v23 = vcombine.high %v6197_v12, %v6201_v26 }
 0xa72   : > { %8362 = vmatpush1.bf16.msra.mxu0 %v13989_v13  ;;  %8137 = vmatprep.subr.bf16.mxu1 %v10226_v46  ;;  %v6204_v46 = vld [vmem:[#allocation10 + $0x710] sm:$0xff] }
 0xa73   : > { %8081 = vmatmul.mubr.bf16.gmra.mrb[192].mxu1 %v13745_v43  ;;  %8363 = vmatprep.subr.bf16.mxu0 %v13992_v3 }
 0xa74   : > { %8307 = vmatmul.mubr.bf16.gmra.mrb[192].mxu0 %v13745_v43  ;;  %8090 = vmatprep.mubr.bf16.mxu1 %v13812_v27  ;;  %v6200_v43 = vld [vmem:[#allocation10 + $0x6f0] sm:$0xff] }
 0xa75   : > { %8138 = vmatpush1.bf16.msra.mxu1 %v10225_v20  ;;  %8316 = vmatprep.mubr.bf16.mxu0 %v13812_v27  ;;  %v14011_v27 = vcombine.low %v6189_v53, %v6193_v16  ;;  %v10250_v45 = vcombine.high %v6196_v10, %v6200_v43  ;;  %v10249_v39 = vcombine.low %v6196_v10, %v6200_v43  ;;  %v6213_v53 = vld [vmem:[#allocation10 + $0x758] sm:$0xff]  ;;  %v6220_v43 = vld [vmem:[#allocation10 + $0x790] sm:$0xff] }
 0xa76   : > { %8364 = vmatpush1.bf16.msra.mxu0 %v13995_v55  ;;  %8139 = vmatprep.subr.bf16.mxu1 %v10234_v50  ;;  %v14021_v20 = vcombine.low %v6197_v12, %v6201_v26  ;;  %v10258_v50 = vcombine.high %v6204_v46, %v6208_v37  ;;  %v6217_v16 = vld [vmem:[#allocation10 + $0x778] sm:$0xff]  ;;  %v6224_v12 = vld [vmem:[#allocation10 + $0x7b0] sm:$0xff] }
 0xa77   : > { %8365 = vmatprep.subr.bf16.mxu0 %v13999_v19  ;;  %v14031_v10 = vcombine.high %v6213_v53, %v6217_v16  ;;  %v6221_v26 = vld [vmem:[#allocation10 + $0x798] sm:$0xff]  ;;  %v10273_v35 = vcombine.low %v6220_v43, %v6224_v12 }
 0xa79   : > { %8140 = vmatpush1.bf16.msra.mxu1 %v10233_v32  ;;  %v10257_v32 = vcombine.low %v6204_v46, %v6208_v37  ;;  %v14037_v46 = vcombine.low %v6213_v53, %v6217_v16  ;;  %v10274_v37 = vcombine.high %v6220_v43, %v6224_v12 }
 0xa7a   : > { %8366 = vmatpush1.bf16.msra.mxu0 %v14005_v14  ;;  %8141 = vmatprep.subr.bf16.mxu1 %v10242_v44 }
 0xa7b   : > { %8091 = vmatmul.mubr.bf16.gmra.mrb[196].mxu1 %v13800_v9  ;;  %8367 = vmatprep.subr.bf16.mxu0 %v14008_v18 }
 0xa7c   : > { %8317 = vmatmul.mubr.bf16.gmra.mrb[196].mxu0 %v13800_v9  ;;  %8100 = vmatprep.mubr.bf16.mxu1 %v13857_v33  ;;  %v6216_v9 = vld [vmem:[#allocation10 + $0x770] sm:$0xff] }
 0xa7d   : > { %8142 = vmatpush1.bf16.msra.mxu1 %v10241_v11  ;;  %8326 = vmatprep.mubr.bf16.mxu0 %v13857_v33  ;;  %v14027_v33 = vcombine.low %v6205_v54, %v6209_v41  ;;  %v10266_v44 = vcombine.high %v6212_v7, %v6216_v9  ;;  %v6225_v11 = vld [vmem:[#allocation10 + $0x7b8] sm:$0xff]  ;;  %v6228_v41 = vld [vmem:[#allocation10 + $0x7d0] sm:$0xff] }
 0xa7e   : > { %8368 = vmatpush1.bf16.msra.mxu0 %v14011_v27  ;;  %8143 = vmatprep.subr.bf16.mxu1 %v10250_v45  ;;  %v10265_v45 = vcombine.low %v6212_v7, %v6216_v9  ;;  %v14040_v54 = vcombine.high %v6221_v26, %v6225_v11 }
 0xa7f   : > { %8369 = vmatprep.subr.bf16.mxu0 %v14015_v23 }
 0xa81   : > { %8144 = vmatpush1.bf16.msra.mxu1 %v10249_v39  ;;  %v6229_v39 = vld [vmem:[#allocation10 + $0x7d8] sm:$0xff] }
 0xa82   : > { %8370 = vmatpush1.bf16.msra.mxu0 %v14021_v20  ;;  %8145 = vmatprep.subr.bf16.mxu1 %v10258_v50  ;;  %v6233_v50 = vld [vmem:[#allocation10 + $0x7f8] sm:$0xff] }
 0xa83   : > { %8101 = vmatmul.mubr.bf16.gmra.mrb[200].mxu1 %v13849_v59  ;;  %8371 = vmatprep.subr.bf16.mxu0 %v14024_v57  ;;  %v14047_v9 = vcombine.high %v6229_v39, %v6233_v50  ;;  %v10283_v16 = vcombine.low %v6229_v39, %v6233_v50 }
 0xa84   : > { %8327 = vmatmul.mubr.bf16.gmra.mrb[200].mxu0 %v13849_v59  ;;  %8110 = vmatprep.mubr.bf16.mxu1 %v13885_v34  ;;  %v6232_v59 = vld [vmem:[#allocation10 + $0x7f0] sm:$0xff] }
 0xa85   : > { %8146 = vmatpush1.bf16.msra.mxu1 %v10257_v32  ;;  %8336 = vmatprep.mubr.bf16.mxu0 %v13885_v34  ;;  %v14043_v34 = vcombine.low %v6221_v26, %v6225_v11  ;;  %v10282_v7 = vcombine.high %v6228_v41, %v6232_v59  ;;  %v10281_v53 = vcombine.low %v6228_v41, %v6232_v59 }
 0xa86   : > { %8372 = vmatpush1.bf16.msra.mxu0 %v14027_v33  ;;  %8147 = vmatprep.subr.bf16.mxu1 %v10266_v44 }
 0xa87   : > { %8373 = vmatprep.subr.bf16.mxu0 %v14031_v10 }
 0xa89   : > { %8148 = vmatpush1.bf16.msra.mxu1 %v10265_v45 }
 0xa8a   : > { %8374 = vmatpush1.bf16.msra.mxu0 %v14037_v46  ;;  %8149 = vmatprep.subr.bf16.mxu1 %v10274_v37 }
 0xa8b   : > { %8111 = vmatmul.mubr.bf16.gmra.mrb[204].mxu1 %v13881_v38  ;;  %8375 = vmatprep.subr.bf16.mxu0 %v14040_v54 }
 0xa8c   : > { %8337 = vmatmul.mubr.bf16.gmra.mrb[204].mxu0 %v13881_v38  ;;  %8153 = vmatprep.mubr.bf16.mxu1 %v13499_v21  ;;  %v14759_v38 = vld [vmem:[#allocation20_spill] sm:$0xff] }
 0xa8d   : > { %8150 = vmatpush1.bf16.msra.mxu1 %v10273_v35  ;;  %8379 = vmatprep.mubr.bf16.mxu0 %v13499_v21  ;;  %v14115_v35 = vld [vmem:[#allocation11 + $0x11] sm:$0xff] }
 0xa8e   : > { %8376 = vmatpush1.bf16.msra.mxu0 %v14043_v34  ;;  %8151 = vmatprep.subr.bf16.mxu1 %v10282_v7  ;;  %v14760_v21 = vld [vmem:[#allocation21_spill] sm:$0xff] }
 0xa8f   : > { %8377 = vmatprep.subr.bf16.mxu0 %v14047_v9 }
 0xa91   : > { %8152 = vmatpush1.bf16.msra.mxu1 %v10281_v53 }
 0xa92   : > { %8378 = vmatpush1.bf16.msra.mxu0 %v10283_v16  ;;  %10679 = vmatprep.subr.bf16.mxu1 %v13929_v47 }
 0xa94   : > { %8154 = vmatmul.mubr.bf16.vlgmr.msra.gmra.mrb[176].mxu1 %v13491_v17 }
 0xa95   : > { %8380 = vmatmul.mubr.bf16.vlgmr.msra.gmra.mrb[176].mxu0 %v13491_v17  ;;  %8163 = vmatprep.mubr.bf16.mxu1 %v13559_v63  ;;  %v14119_v17 = vrot.slane %v14115_v35, %v14759_v38 }
 0xa96   : > { %10695 = vmatpush1.bf16.msra.mxu1 %v13931_v49  ;;  %8389 = vmatprep.mubr.bf16.mxu0 %v13559_v63  ;;  %v14761_v63 = vld [vmem:[#allocation22_spill] sm:$0xff] }
 0xa97   : > { %10680 = vmatprep.subr.bf16.mxu1 %v13935_v28 }
 0xa9a   : > { %10696 = vmatpush1.bf16.msra.mxu1 %v13941_v51 }
 0xa9b   : > { %10681 = vmatprep.subr.bf16.mxu1 %v13944_v24 }
 0xa9c   : > { %8164 = vmatmul.mubr.bf16.gmra.mrb[180].mxu1 %v13547_v61 }
 0xa9d   : > { %8390 = vmatmul.mubr.bf16.gmra.mrb[180].mxu0 %v13547_v61  ;;  %8173 = vmatprep.mubr.bf16.mxu1 %v13623_v5  ;;  %v14123_v61 = vrot.slane %v14115_v35, %v14760_v21 }
 0xa9e   : > { %10697 = vmatpush1.bf16.msra.mxu1 %v13947_v2  ;;  %8399 = vmatprep.mubr.bf16.mxu0 %v13623_v5  ;;  %v14762_v5 = vld [vmem:[#allocation23_spill] sm:$0xff] }
 0xa9f   : > { %10682 = vmatprep.subr.bf16.mxu1 %v13951_v58 }
 0xaa2   : > { %10698 = vmatpush1.bf16.msra.mxu1 %v13957_v56 }
 0xaa3   : > { %10683 = vmatprep.subr.bf16.mxu1 %v13960_v4 }
 0xaa4   : > { %8174 = vmatmul.mubr.bf16.gmra.mrb[184].mxu1 %v13615_v52 }
 0xaa5   : > { %8400 = vmatmul.mubr.bf16.gmra.mrb[184].mxu0 %v13615_v52  ;;  %8183 = vmatprep.mubr.bf16.mxu1 %v13691_v15  ;;  %v14127_v52 = vrot.slane %v14115_v35, %v14761_v63 }
 0xaa6   : > { %10699 = vmatpush1.bf16.msra.mxu1 %v13963_v62  ;;  %8409 = vmatprep.mubr.bf16.mxu0 %v13691_v15 }
 0xaa7   : > { %10684 = vmatprep.subr.bf16.mxu1 %v13967_v6 }
 0xaaa   : > { %10700 = vmatpush1.bf16.msra.mxu1 %v13973_v42 }
 0xaab   : > { %10685 = vmatprep.subr.bf16.mxu1 %v13976_v25 }
 0xaac   : > { %8184 = vmatmul.mubr.bf16.gmra.mrb[188].mxu1 %v13679_v60 }
 0xaad   : > { %8410 = vmatmul.mubr.bf16.gmra.mrb[188].mxu0 %v13679_v60  ;;  %8193 = vmatprep.mubr.bf16.mxu1 %v13755_v22  ;;  %v14131_v60 = vrot.slane %v14115_v35, %v14762_v5 }
 0xaae   : > { %10701 = vmatpush1.bf16.msra.mxu1 %v13979_v1  ;;  %8419 = vmatprep.mubr.bf16.mxu0 %v13755_v22 }
 0xaaf   : > { %10686 = vmatprep.subr.bf16.mxu1 %v13983_v31 }
 0xab2   : > { %10702 = vmatpush1.bf16.msra.mxu1 %v13989_v13 }
 0xab3   : > { %10687 = vmatprep.subr.bf16.mxu1 %v13992_v3 }
 0xab4   : > { %8194 = vmatmul.mubr.bf16.gmra.mrb[192].mxu1 %v13747_v48 }
 0xab5   : > { %8420 = vmatmul.mubr.bf16.gmra.mrb[192].mxu0 %v13747_v48  ;;  %8203 = vmatprep.mubr.bf16.mxu1 %v13814_v8 }
 0xab6   : > { %10703 = vmatpush1.bf16.msra.mxu1 %v13995_v55  ;;  %8429 = vmatprep.mubr.bf16.mxu0 %v13814_v8 }
 0xab7   : > { %10688 = vmatprep.subr.bf16.mxu1 %v13999_v19 }
 0xaba   : > { %10704 = vmatpush1.bf16.msra.mxu1 %v14005_v14 }
 0xabb   : > { %10689 = vmatprep.subr.bf16.mxu1 %v14008_v18 }
 0xabc   : > { %8204 = vmatmul.mubr.bf16.gmra.mrb[196].mxu1 %v13802_v30 }
 0xabd   : > { %8430 = vmatmul.mubr.bf16.gmra.mrb[196].mxu0 %v13802_v30  ;;  %8213 = vmatprep.mubr.bf16.mxu1 %v13859_v40 }
 0xabe   : > { %10705 = vmatpush1.bf16.msra.mxu1 %v14011_v27 }
 0xabf   : > { %10690 = vmatprep.subr.bf16.mxu1 %v14015_v23 }
 0xac2   : > { %10706 = vmatpush1.bf16.msra.mxu1 %v14021_v20 }
 0xac3   : > { %10691 = vmatprep.subr.bf16.mxu1 %v14024_v57 }
 0xac4   : > { %8214 = vmatmul.mubr.bf16.gmra.mrb[200].mxu1 %v13851_v29 }
 0xac5   : > { %8223 = vmatprep.mubr.bf16.mxu1 %v13887_v0 }
 0xac6   : > { %10707 = vmatpush1.bf16.msra.mxu1 %v14027_v33 }
 0xac7   : > { %10692 = vmatprep.subr.bf16.mxu1 %v14031_v10 }
 0xaca   : > { %10708 = vmatpush1.bf16.msra.mxu1 %v14037_v46 }
 0xacb   : > { %10693 = vmatprep.subr.bf16.mxu1 %v14040_v54 }
 0xacc   : > { %8224 = vmatmul.mubr.bf16.gmra.mrb[204].mxu1 %v13883_v36 }
 0xacd   : > { %8439 = vmatprep.mubr.bf16.mxu1 %v13859_v40 }
 0xace   : > { %10709 = vmatpush1.bf16.msra.mxu1 %v14043_v34 }
 0xacf   : > { %10694 = vmatprep.subr.bf16.mxu1 %v14047_v9 }
 0xad2   : > { %10710 = vmatpush1.bf16.msra.mxu1 %v10283_v16 }
 0xad5   : > { %8440 = vmatmul.mubr.bf16.vlgmr.msra.gmra.mrb[208].mxu1 %v13851_v29 }
 0xad6   : > { %8449 = vmatprep.mubr.bf16.mxu1 %v13887_v0 }
 0xadd   : > { %8450 = vmatmul.mubr.bf16.gmra.mrb[212].mxu1 %v13883_v36 }
 0xae5   : > { %v7703_v15 = vpop.f32.mrb[144].mxu1 }
 0xae6   : > { %v10807_v36 = vadd.f32 %v7703_v15, %v14119_v17  ;;  %v7929_v48 = vpop.f32.mrb[144].mxu0  ;;  %v7705_v22 = vpop.f32.mrb[145].mxu1 }
 0xae7   : > { %v10839_v30 = vadd.f32 %v7929_v48, %v14123_v61  ;;  %v10808_v8 = vadd.f32 %v7705_v22, %v14127_v52  ;;  %v7931_v29 = vpop.f32.mrb[145].mxu0  ;;  %v7707_v40 = vpop.f32.mrb[146].mxu1 }
 0xae8   : > { %v10285_v0 = vmul.f32 -1.442695, %v10807_v36  ;;  %v10840_v47 = vadd.f32 %v7931_v29, %v14131_v60  ;;  %v10809_v49 = vadd.f32 %v7707_v40, %v14119_v17  ;;  %v7933_v28 = vpop.f32.mrb[146].mxu0  ;;  %v7709_v51 = vpop.f32.mrb[147].mxu1 }
 0xae9   : > { %v10287_v24 = vmul.f32 -1.442695, %v10839_v30  ;;  %v10286_v2 = vmul.f32 -1.442695, %v10808_v8  ;;  %v10841_v58 = vadd.f32 %v7933_v28, %v14123_v61  ;;  %v10810_v56 = vadd.f32 %v7709_v51, %v14127_v52  ;;  %v7935_v4 = vpop.f32.mrb[147].mxu0 }
 0xaea   : > { %12043 = vpow2.f32 %v10285_v0  ;;  %v10288_v62 = vmul.f32 -1.442695, %v10840_v47  ;;  %v10293_v6 = vmul.f32 -1.442695, %v10809_v49  ;;  %v10842_v42 = vadd.f32 %v7935_v4, %v14131_v60 }
 0xaeb   : > { %12045 = vpow2.f32 %v10287_v24  ;;  %v10295_v25 = vmul.f32 -1.442695, %v10841_v58  ;;  %v10294_v1 = vmul.f32 -1.442695, %v10810_v56 }
 0xaec   : > { %12047 = vpow2.f32 %v10286_v2  ;;  %v10296_v31 = vmul.f32 -1.442695, %v10842_v42 }
 0xaed   : > { %12049 = vpow2.f32 %v10288_v62  ;;  %v7713_v13 = vpop.f32.mrb[148].mxu1 }
 0xaee   : > { %12051 = vpow2.f32 %v10293_v6  ;;  %v10811_v3 = vadd.f32 %v7713_v13, %v14119_v17  ;;  %v7939_v55 = vpop.f32.mrb[148].mxu0  ;;  %v7715_v19 = vpop.f32.mrb[149].mxu1 }
 0xaef   : > { %12053 = vpow2.f32 %v10295_v25  ;;  %v10843_v14 = vadd.f32 %v7939_v55, %v14123_v61  ;;  %v10812_v18 = vadd.f32 %v7715_v19, %v14127_v52  ;;  %v7941_v27 = vpop.f32.mrb[149].mxu0  ;;  %v7717_v23 = vpop.f32.mrb[150].mxu1 }
 0xaf0   : > { %12055 = vpow2.f32 %v10294_v1  ;;  %v10301_v20 = vmul.f32 -1.442695, %v10811_v3  ;;  %v10844_v57 = vadd.f32 %v7941_v27, %v14131_v60  ;;  %v10813_v32 = vadd.f32 %v7717_v23, %v14119_v17  ;;  %v7943_v33 = vpop.f32.mrb[150].mxu0  ;;  %v7719_v44 = vpop.f32.mrb[151].mxu1 }
 0xaf1   : > { %12057 = vpow2.f32 %v10296_v31  ;;  %v10303_v10 = vmul.f32 -1.442695, %v10843_v14  ;;  %v10302_v43 = vmul.f32 -1.442695, %v10812_v18  ;;  %v7945_v12 = vpop.f32.mrb[151].mxu0  ;;  %v10845_v0 = vadd.f32 %v7943_v33, %v14123_v61 }
 0xaf2   : > { %12059 = vpow2.f32 %v10301_v20  ;;  %v10304_v26 = vmul.f32 -1.442695, %v10844_v57  ;;  %v10309_v11 = vmul.f32 -1.442695, %v10813_v32  ;;  %v10814_v28 = vadd.f32 %v7719_v44, %v14127_v52 }
 0xaf3   : > { %12061 = vpow2.f32 %v10303_v10  ;;  %v10846_v58 = vadd.f32 %v7945_v12, %v14131_v60  ;;  %v10311_v3 = vmul.f32 -1.442695, %v10845_v0 }
 0xaf4   : > { %v12044_v45 = vpop.eup %12043  ;;  %12063 = vpow2.f32 %v10302_v43  ;;  %v10310_v23 = vmul.f32 -1.442695, %v10814_v28 }
 0xaf5   : > { %v12046_v46 = vpop.eup %12045  ;;  %v8844_v37 = vadd.f32 1.0, %v12044_v45  ;;  %12065 = vpow2.f32 %v10304_v26  ;;  %v7723_v54 = vpop.f32.mrb[152].mxu1  ;;  %v10312_v33 = vmul.f32 -1.442695, %v10846_v58 }
 0xaf6   : > { %v12048_v41 = vpop.eup %12047  ;;  %v8846_v59 = vadd.f32 1.0, %v12046_v46  ;;  %12067 = vpow2.f32 %v10309_v11  ;;  %v7949_v39 = vpop.f32.mrb[152].mxu0  ;;  %v10815_v42 = vadd.f32 %v7723_v54, %v14119_v17 }
 0xaf7   : > { %v7725_v50 = vpop.f32.mrb[153].mxu1  ;;  %v12050_v34 = vpop.eup %12049  ;;  %12069 = vrcp.f32 %v8844_v37  ;;  %v8845_v7 = vadd.f32 1.0, %v12048_v41  ;;  %v10847_v55 = vadd.f32 %v7949_v39, %v14123_v61 }
 0xaf8   : > { %v7951_v9 = vpop.f32.mrb[153].mxu0  ;;  %v7727_v53 = vpop.f32.mrb[154].mxu1  ;;  %12071 = vrcp.f32 %v8846_v59  ;;  %v8847_v38 = vadd.f32 1.0, %v12050_v34  ;;  %v10816_v20 = vadd.f32 %v7725_v50, %v14127_v52  ;;  %v10317_v43 = vmul.f32 -1.442695, %v10815_v42 }
 0xaf9   : > { %v12052_v16 = vpop.eup %12051  ;;  %v7953_v21 = vpop.f32.mrb[154].mxu0  ;;  %12073 = vrcp.f32 %v8845_v7  ;;  %v10848_v44 = vadd.f32 %v7951_v9, %v14131_v60  ;;  %v10817_v12 = vadd.f32 %v7727_v53, %v14119_v17  ;;  %v10319_v11 = vmul.f32 -1.442695, %v10847_v55 }
 0xafa   : > { %v14146_v63 = vpop.f32.mrb[155].mxu1  ;;  %v12054_v5 = vpop.eup %12053  ;;  %v8852_v15 = vadd.f32 1.0, %v12052_v16  ;;  %12075 = vrcp.f32 %v8847_v38  ;;  %v10849_v45 = vadd.f32 %v7953_v21, %v14123_v61  ;;  %v10318_v37 = vmul.f32 -1.442695, %v10816_v20 }
 0xafb   : > { %v14148_v36 = vpop.f32.mrb[155].mxu0  ;;  %v12056_v48 = vpop.eup %12055  ;;  %v8854_v22 = vadd.f32 1.0, %v12054_v5  ;;  %v10818_v54 = vadd.f32 %v14146_v63, %v14127_v52  ;;  %v10320_v39 = vmul.f32 -1.442695, %v10848_v44  ;;  %v10325_v53 = vmul.f32 -1.442695, %v10817_v12 }
 0xafc   : > { %v12058_v30 = vpop.eup %12057  ;;  %12077 = vrcp.f32 %v8852_v15  ;;  %v8853_v8 = vadd.f32 1.0, %v12056_v48  ;;  %v10850_v50 = vadd.f32 %v14148_v36, %v14131_v60  ;;  %v10327_v5 = vmul.f32 -1.442695, %v10849_v45 }
 0xafd   : > { %v12060_v29 = vpop.eup %12059  ;;  %12079 = vrcp.f32 %v8854_v22  ;;  %v8855_v40 = vadd.f32 1.0, %v12058_v30  ;;  %v7733_v51 = vpop.f32.mrb[156].mxu1  ;;  %v10326_v30 = vmul.f32 -1.442695, %v10818_v54 }
 0xafe   : > { %v12062_v47 = vpop.eup %12061  ;;  %12081 = vrcp.f32 %v8853_v8  ;;  %v8860_v49 = vadd.f32 1.0, %v12060_v29  ;;  %v7959_v56 = vpop.f32.mrb[156].mxu0  ;;  %v10819_v16 = vadd.f32 %v7733_v51, %v14119_v17 }
 0xaff   : > { %v12064_v24 = vpop.eup %12063  ;;  %12083 = vrcp.f32 %v8855_v40  ;;  %v8862_v2 = vadd.f32 1.0, %v12062_v47  ;;  %v14154_v4 = vpop.f32.mrb[157].mxu1  ;;  %v10851_v15 = vadd.f32 %v7959_v56, %v14123_v61  ;;  %v10328_v40 = vmul.f32 -1.442695, %v10850_v50 }
 0xb00   : > { %v12066_v62 = vpop.eup %12065  ;;  %12085 = vrcp.f32 %v8860_v49  ;;  %v8861_v6 = vadd.f32 1.0, %v12064_v24  ;;  %v14157_v25 = vpop.f32.mrb[157].mxu0  ;;  %v10333_v47 = vmul.f32 -1.442695, %v10819_v16 }
 0xb01   : > { %v14159_v1 = vpop.f32.mrb[158].mxu1  ;;  %v12068_v31 = vpop.eup %12067  ;;  %12087 = vrcp.f32 %v8862_v2  ;;  %v8863_v13 = vadd.f32 1.0, %v12066_v62  ;;  %v10335_v51 = vmul.f32 -1.442695, %v10851_v15  ;;  %v10852_v12 = vadd.f32 %v14157_v25, %v14131_v60 }
 0xb02   : > { %v14162_v19 = vpop.f32.mrb[158].mxu0  ;;  %v14164_v14 = vpop.f32.mrb[159].mxu1  ;;  %12089 = vrcp.f32 %v8861_v6  ;;  %v8868_v27 = vadd.f32 1.0, %v12068_v31 }
 0xb03   : > { %v12070_v18 = vpop.eup %12069  ;;  %v14167_v57 = vpop.f32.mrb[159].mxu0  ;;  %12091 = vrcp.f32 %v8863_v13 }
 0xb04   : > { %v12072_v32 = vpop.eup %12071  ;;  %9228 = vst [vmem:[%s14171_s13] sm:$0xff] %v12070_v18  ;;  %12093 = vrcp.f32 %v8868_v27 }
 0xb05   : > { %v12074_v10 = vpop.eup %12073  ;;  %9230 = vst [vmem:[%s14171_s13 + $0x10] sm:$0xff] %v12072_v32  ;;  %12095 = vpow2.f32 %v10311_v3  ;;  %v14182_v41 = vpop.f32.mrb[160].mxu1 }
 0xb06   : > { %v12076_v26 = vpop.eup %12075  ;;  %9229 = vst [vmem:[%s14171_s13 + $0x8] sm:$0xff] %v12074_v10  ;;  %12097 = vpow2.f32 %v10310_v23  ;;  %v14187_v34 = vpop.f32.mrb[160].mxu0 }
 0xb07   : > { %v12078_v46 = vpop.eup %12077  ;;  %9231 = vst [vmem:[%s14171_s13 + $0x18] sm:$0xff] %v12076_v26  ;;  %12099 = vpow2.f32 %v10312_v33  ;;  %v14189_v7 = vpop.f32.mrb[161].mxu1 }
 0xb08   : > { %v12080_v59 = vpop.eup %12079  ;;  %9236 = vst [vmem:[%s14171_s13 + $0x40] sm:$0xff] %v12078_v46  ;;  %12101 = vpow2.f32 %v10317_v43  ;;  %v14193_v38 = vpop.f32.mrb[161].mxu0  ;;  %v10820_v43 = vadd.f32 %v14154_v4, %v14127_v52 }
 0xb09   : > { %v12082_v9 = vpop.eup %12081  ;;  %9238 = vst [vmem:[%s14171_s13 + $0x50] sm:$0xff] %v12080_v59  ;;  %v14195_v21 = vpop.f32.mrb[162].mxu1  ;;  %12103 = vpow2.f32 %v10319_v11 }
 0xb0a   : > { %v12084_v63 = vpop.eup %12083  ;;  %9237 = vst [vmem:[%s14171_s13 + $0x48] sm:$0xff] %v12082_v9  ;;  %v14199_v36 = vpop.f32.mrb[162].mxu0  ;;  %12105 = vpow2.f32 %v10318_v37  ;;  %v10334_v16 = vmul.f32 -1.442695, %v10820_v43 }
 0xb0b   : > { %v14201_v48 = vpop.f32.mrb[163].mxu1  ;;  %v12086_v22 = vpop.eup %12085  ;;  %9239 = vst [vmem:[%s14171_s13 + $0x58] sm:$0xff] %v12084_v63  ;;  %12107 = vpow2.f32 %v10320_v39  ;;  %v10336_v63 = vmul.f32 -1.442695, %v10852_v12 }
 0xb0c   : > { %v7975_v8 = vpop.f32.mrb[163].mxu0  ;;  %v12088_v29 = vpop.eup %12087  ;;  %9244 = vst [vmem:[%s14171_s13 + $0x80] sm:$0xff] %v12086_v22  ;;  %12109 = vpow2.f32 %v10325_v53 }
 0xb0d   : > { %v12090_v0 = vpop.eup %12089  ;;  %9246 = vst [vmem:[%s14171_s13 + $0x90] sm:$0xff] %v12088_v29  ;;  %v14207_v49 = vadd.f32 %v7975_v8, %v14131_v60  ;;  %12111 = vpow2.f32 %v10327_v5  ;;  %v7753_v2 = vpop.f32.mrb[164].mxu1 }
 0xb0e   : > { %v12092_v28 = vpop.eup %12091  ;;  %9245 = vst [vmem:[%s14171_s13 + $0x88] sm:$0xff] %v12090_v0  ;;  %12113 = vpow2.f32 %v10326_v30  ;;  %v14213_v56 = vadd.f32 %v7753_v2, %v14119_v17  ;;  %v7979_v62 = vpop.f32.mrb[164].mxu0  ;;  %v10821_v30 = vadd.f32 %v14159_v1, %v14119_v17  ;;  %v10853_v1 = vadd.f32 %v14162_v19, %v14123_v61 }
 0xb0f   : > { %v12094_v24 = vpop.eup %12093  ;;  %9247 = vst [vmem:[%s14171_s13 + $0x98] sm:$0xff] %v12092_v28  ;;  %12115 = vpow2.f32 %v10328_v40  ;;  %v7755_v6 = vpop.f32.mrb[165].mxu1  ;;  %v14216_v13 = vadd.f32 %v7979_v62, %v14123_v61 }
 0xb10   : > { %v12096_v58 = vpop.eup %12095  ;;  %9252 = vst [vmem:[%s14171_s13 + $0xc0] sm:$0xff] %v12094_v24  ;;  %12117 = vpow2.f32 %v10333_v47  ;;  %v14219_v3 = vadd.f32 %v7755_v6, %v14127_v52  ;;  %v7981_v55 = vpop.f32.mrb[165].mxu0 }
 0xb11   : > { %v12098_v42 = vpop.eup %12097  ;;  %v8870_v31 = vadd.f32 1.0, %v12096_v58  ;;  %v7757_v18 = vpop.f32.mrb[166].mxu1  ;;  %12119 = vpow2.f32 %v10335_v51  ;;  %v14222_v20 = vadd.f32 %v7981_v55, %v14131_v60 }
 0xb12   : > { %v12100_v27 = vpop.eup %12099  ;;  %v8869_v23 = vadd.f32 1.0, %v12098_v42  ;;  %v7983_v32 = vpop.f32.mrb[166].mxu0  ;;  %v14229_v46 = vadd.f32 %v7757_v18, %v14119_v17 }
 0xb13   : > { %v7759_v33 = vpop.f32.mrb[167].mxu1  ;;  %v12102_v44 = vpop.eup %12101  ;;  %12121 = vrcp.f32 %v8870_v31  ;;  %v8871_v10 = vadd.f32 1.0, %v12100_v27  ;;  %v14232_v59 = vadd.f32 %v7983_v32, %v14123_v61  ;;  %v10822_v27 = vadd.f32 %v14164_v14, %v14127_v52 }
 0xb14   : > { %v7985_v26 = vpop.f32.mrb[167].mxu0  ;;  %v12104_v11 = vpop.eup %12103  ;;  %12123 = vrcp.f32 %v8869_v23  ;;  %v8876_v45 = vadd.f32 1.0, %v12102_v44  ;;  %v14235_v39 = vadd.f32 %v7759_v33, %v14127_v52  ;;  %v10854_v23 = vadd.f32 %v14167_v57, %v14131_v60 }
 0xb15   : > { %v12106_v37 = vpop.eup %12105  ;;  %12125 = vrcp.f32 %v8871_v10  ;;  %v8878_v54 = vadd.f32 1.0, %v12104_v11  ;;  %v14238_v25 = vadd.f32 %v7985_v26, %v14131_v60  ;;  %v7763_v5 = vpop.f32.mrb[168].mxu1  ;;  %v10823_v44 = vadd.f32 %v14182_v41, %v14119_v17 }
 0xb16   : > { %v12108_v4 = vpop.eup %12107  ;;  %12127 = vrcp.f32 %v8876_v45  ;;  %v8877_v50 = vadd.f32 1.0, %v12106_v37  ;;  %v14243_v8 = vadd.f32 %v7763_v5, %v14119_v17  ;;  %v7989_v29 = vpop.f32.mrb[168].mxu0  ;;  %v10341_v11 = vmul.f32 -1.442695, %v10821_v30 }
 0xb17   : > { %v12110_v9 = vpop.eup %12109  ;;  %12129 = vrcp.f32 %v8878_v54  ;;  %v8879_v53 = vadd.f32 1.0, %v12108_v4  ;;  %v7765_v40 = vpop.f32.mrb[169].mxu1  ;;  %v14246_v28 = vadd.f32 %v7989_v29, %v14123_v61  ;;  %v10343_v45 = vmul.f32 -1.442695, %v10853_v1 }
 0xb18   : > { %v12112_v15 = vpop.eup %12111  ;;  %12131 = vrcp.f32 %v8877_v50  ;;  %v8884_v22 = vadd.f32 1.0, %v12110_v9  ;;  %v14249_v51 = vadd.f32 %v7765_v40, %v14127_v52  ;;  %v7991_v24 = vpop.f32.mrb[169].mxu0  ;;  %v10342_v54 = vmul.f32 -1.442695, %v10822_v27 }
 0xb19   : > { %v12114_v0 = vpop.eup %12113  ;;  %12133 = vrcp.f32 %v8879_v53  ;;  %v8886_v47 = vadd.f32 1.0, %v12112_v15  ;;  %v7767_v2 = vpop.f32.mrb[170].mxu1  ;;  %v14254_v6 = vadd.f32 %v7991_v24, %v14131_v60  ;;  %v10344_v4 = vmul.f32 -1.442695, %v10854_v23 }
 0xb1a   : > { %v12116_v58 = vpop.eup %12115  ;;  %12135 = vrcp.f32 %v8884_v22  ;;  %v8885_v62 = vadd.f32 1.0, %v12114_v0  ;;  %v7993_v42 = vpop.f32.mrb[170].mxu0  ;;  %v14263_v10 = vadd.f32 %v7767_v2, %v14119_v17  ;;  %v10855_v50 = vadd.f32 %v14187_v34, %v14123_v61 }
 0xb1b   : > { %v7769_v31 = vpop.f32.mrb[171].mxu1  ;;  %v12118_v55 = vpop.eup %12117  ;;  %12137 = vrcp.f32 %v8886_v47  ;;  %v8887_v18 = vadd.f32 1.0, %v12116_v58  ;;  %v14266_v26 = vadd.f32 %v7993_v42, %v14123_v61  ;;  %v10349_v5 = vmul.f32 -1.442695, %v10823_v44 }
 0xb1c   : > { %v7995_v32 = vpop.f32.mrb[171].mxu0  ;;  %v12120_v33 = vpop.eup %12119  ;;  %12139 = vrcp.f32 %v8885_v62  ;;  %v8892_v19 = vadd.f32 1.0, %v12118_v55  ;;  %v14269_v14 = vadd.f32 %v7769_v31, %v14127_v52  ;;  %v10824_v15 = vadd.f32 %v14189_v7, %v14127_v52 }
 0xb1d   : > { %v12122_v43 = vpop.eup %12121  ;;  %12141 = vrcp.f32 %v8887_v18  ;;  %v8894_v12 = vadd.f32 1.0, %v12120_v33  ;;  %v14273_v41 = vadd.f32 %v7995_v32, %v14131_v60  ;;  %v7773_v9 = vpop.f32.mrb[172].mxu1  ;;  %v10856_v34 = vadd.f32 %v14193_v38, %v14131_v60 }
 0xb1e   : > { %v12124_v57 = vpop.eup %12123  ;;  %9254 = vst [vmem:[%s14171_s13 + $0xd0] sm:$0xff] %v12122_v43  ;;  %12143 = vrcp.f32 %v8892_v19  ;;  %v14282_v22 = vadd.f32 %v7773_v9, %v14119_v17  ;;  %v7999_v30 = vpop.f32.mrb[172].mxu0  ;;  %v10825_v2 = vadd.f32 %v14195_v21, %v14119_v17  ;;  %v10351_v42 = vmul.f32 -1.442695, %v10855_v50 }
 0xb1f   : > { %v12126_v37 = vpop.eup %12125  ;;  %9253 = vst [vmem:[%s14171_s13 + $0xc8] sm:$0xff] %v12124_v57  ;;  %12145 = vrcp.f32 %v8894_v12  ;;  %v7775_v29 = vpop.f32.mrb[173].mxu1  ;;  %v14288_v0 = vadd.f32 %v7999_v30, %v14123_v61  ;;  %v10857_v31 = vadd.f32 %v14199_v36, %v14123_v61  ;;  %v10826_v27 = vadd.f32 %v14201_v48, %v14127_v52 }
 0xb20   : > { %v12128_v53 = vpop.eup %12127  ;;  %9255 = vst [vmem:[%s14171_s13 + $0xd8] sm:$0xff] %v12126_v37  ;;  %12147 = vpow2.f32 %v10334_v16  ;;  %v14291_v16 = vadd.f32 %v7775_v29, %v14127_v52  ;;  %v8001_v47 = vpop.f32.mrb[173].mxu0  ;;  %v10352_v36 = vmul.f32 -1.442695, %v10856_v34  ;;  %v10357_v19 = vmul.f32 -1.442695, %v10825_v2 }
 0xb21   : > { %v12130_v40 = vpop.eup %12129  ;;  %9260 = vst [vmem:[%s14171_s13 + $0x100] sm:$0xff] %v12128_v53  ;;  %12149 = vpow2.f32 %v10336_v63  ;;  %v7777_v7 = vpop.f32.mrb[174].mxu1  ;;  %v14297_v63 = vadd.f32 %v8001_v47, %v14131_v60  ;;  %v10359_v48 = vmul.f32 -1.442695, %v10857_v31 }
 0xb22   : > { %v12132_v24 = vpop.eup %12131  ;;  %9262 = vst [vmem:[%s14171_s13 + $0x110] sm:$0xff] %v12130_v40  ;;  %12151 = vpow2.f32 %v10341_v11  ;;  %v14300_v38 = vadd.f32 %v7777_v7, %v14119_v17  ;;  %v8003_v58 = vpop.f32.mrb[174].mxu0  ;;  %v10350_v17 = vmul.f32 -1.442695, %v10824_v15 }
 0xb23   : > { %v7779_v62 = vpop.f32.mrb[175].mxu1  ;;  %v12134_v1 = vpop.eup %12133  ;;  %9261 = vst [vmem:[%s14171_s13 + $0x108] sm:$0xff] %v12132_v24  ;;  %12153 = vpow2.f32 %v10343_v45  ;;  %v14306_v55 = vadd.f32 %v8003_v58, %v14123_v61 }
 0xb24   : > { %v8005_v21 = vpop.f32.mrb[175].mxu0  ;;  %v12136_v18 = vpop.eup %12135  ;;  %9263 = vst [vmem:[%s14171_s13 + $0x118] sm:$0xff] %v12134_v1  ;;  %12155 = vpow2.f32 %v10342_v54  ;;  %v14312_v23 = vadd.f32 %v7779_v62, %v14127_v52  ;;  %v10358_v52 = vmul.f32 -1.442695, %v10826_v27  ;;  %v10365_v27 = vmul.f32 -1.442695, %v14213_v56 }
 0xb25   : > { %v12138_v32 = vpop.eup %12137  ;;  %9268 = vst [vmem:[%s14171_s13 + $0x140] sm:$0xff] %v12136_v18  ;;  %12157 = vpow2.f32 %v10344_v4  ;;  %v14316_v61 = vadd.f32 %v8005_v21, %v14131_v60  ;;  %v10360_v21 = vmul.f32 -1.442695, %v14207_v49  ;;  %v10368_v49 = vmul.f32 -1.442695, %v14222_v20 }
 0xb26   : > { %v12140_v33 = vpop.eup %12139  ;;  %9270 = vst [vmem:[%s14171_s13 + $0x150] sm:$0xff] %v12138_v32  ;;  %12159 = vpow2.f32 %v10349_v5  ;;  %v10373_v56 = vmul.f32 -1.442695, %v14229_v46  ;;  %v10376_v20 = vmul.f32 -1.442695, %v14238_v25 }
 0xb27   : > { %v12142_v44 = vpop.eup %12141  ;;  %9269 = vst [vmem:[%s14171_s13 + $0x148] sm:$0xff] %v12140_v33  ;;  %12161 = vpow2.f32 %v10351_v42  ;;  %v10381_v46 = vmul.f32 -1.442695, %v14243_v8  ;;  %v10384_v25 = vmul.f32 -1.442695, %v14254_v6 }
 0xb28   : > { %v12144_v43 = vpop.eup %12143  ;;  %9271 = vst [vmem:[%s14171_s13 + $0x158] sm:$0xff] %v12142_v44  ;;  %12163 = vpow2.f32 %v10350_v17 }
 0xb29   : > { %v12146_v12 = vpop.eup %12145  ;;  %9276 = vst [vmem:[%s14171_s13 + $0x180] sm:$0xff] %v12144_v43  ;;  %12165 = vpow2.f32 %v10352_v36  ;;  %v10367_v36 = vmul.f32 -1.442695, %v14216_v13  ;;  %v10375_v13 = vmul.f32 -1.442695, %v14232_v59 }
 0xb2a   : > { %v12148_v57 = vpop.eup %12147  ;;  %9278 = vst [vmem:[%s14171_s13 + $0x190] sm:$0xff] %v12146_v12  ;;  %12167 = vpow2.f32 %v10357_v19  ;;  %v10366_v19 = vmul.f32 -1.442695, %v14219_v3  ;;  %v10374_v3 = vmul.f32 -1.442695, %v14235_v39 }
 0xb2b   : > { %v12150_v60 = vpop.eup %12149  ;;  %v8893_v11 = vadd.f32 1.0, %v12148_v57  ;;  %12169 = vpow2.f32 %v10359_v48  ;;  %v10383_v59 = vmul.f32 -1.442695, %v14246_v28  ;;  %v10382_v39 = vmul.f32 -1.442695, %v14249_v51 }
 0xb2c   : > { %v12152_v45 = vpop.eup %12151  ;;  %v8895_v37 = vadd.f32 1.0, %v12150_v60  ;;  %12171 = vpow2.f32 %v10358_v52 }
 0xb2d   : > { %v12154_v54 = vpop.eup %12153  ;;  %12173 = vrcp.f32 %v8893_v11  ;;  %v8900_v4 = vadd.f32 1.0, %v12152_v45 }
 0xb2e   : > { %v12156_v50 = vpop.eup %12155  ;;  %12175 = vrcp.f32 %v8895_v37  ;;  %v8902_v9 = vadd.f32 1.0, %v12154_v54 }
 0xb2f   : > { %v12158_v53 = vpop.eup %12157  ;;  %12177 = vrcp.f32 %v8900_v4  ;;  %v8901_v5 = vadd.f32 1.0, %v12156_v50 }
 0xb30   : > { %v12160_v15 = vpop.eup %12159  ;;  %12179 = vrcp.f32 %v8902_v9  ;;  %v8903_v30 = vadd.f32 1.0, %v12158_v53 }
 0xb31   : > { %v12162_v29 = vpop.eup %12161  ;;  %12181 = vrcp.f32 %v8901_v5  ;;  %v8908_v40 = vadd.f32 1.0, %v12160_v15 }
 0xb32   : > { %v12164_v34 = vpop.eup %12163  ;;  %12183 = vrcp.f32 %v8903_v30  ;;  %v8910_v47 = vadd.f32 1.0, %v12162_v29 }
 0xb33   : > { %v12166_v7 = vpop.eup %12165  ;;  %12185 = vrcp.f32 %v8908_v40  ;;  %v8909_v24 = vadd.f32 1.0, %v12164_v34 }
 0xb34   : > { %v12168_v2 = vpop.eup %12167  ;;  %12187 = vrcp.f32 %v8910_v47  ;;  %v8911_v58 = vadd.f32 1.0, %v12166_v7 }
 0xb35   : > { %v12170_v62 = vpop.eup %12169  ;;  %12189 = vrcp.f32 %v8909_v24  ;;  %v8916_v1 = vadd.f32 1.0, %v12168_v2 }
 0xb36   : > { %v12172_v42 = vpop.eup %12171  ;;  %12191 = vrcp.f32 %v8911_v58  ;;  %v8918_v31 = vadd.f32 1.0, %v12170_v62 }
 0xb37   : > { %v12174_v18 = vpop.eup %12173  ;;  %12193 = vrcp.f32 %v8916_v1  ;;  %v8917_v17 = vadd.f32 1.0, %v12172_v42 }
 0xb38   : > { %v12176_v32 = vpop.eup %12175  ;;  %9277 = vst [vmem:[%s14171_s13 + $0x188] sm:$0xff] %v12174_v18  ;;  %12195 = vrcp.f32 %v8918_v31  ;;  %v10389_v18 = vmul.f32 -1.442695, %v14263_v10  ;;  %v10392_v10 = vmul.f32 -1.442695, %v14273_v41 }
 0xb39   : > { %v12178_v33 = vpop.eup %12177  ;;  %9279 = vst [vmem:[%s14171_s13 + $0x198] sm:$0xff] %v12176_v32  ;;  %12197 = vrcp.f32 %v8917_v17  ;;  %v10391_v32 = vmul.f32 -1.442695, %v14266_v26  ;;  %v10397_v26 = vmul.f32 -1.442695, %v14282_v22 }
 0xb3a   : > { %v12180_v44 = vpop.eup %12179  ;;  %9284 = vst [vmem:[%s14171_s13 + $0x1c0] sm:$0xff] %v12178_v33  ;;  %12199 = vpow2.f32 %v10360_v21  ;;  %v10390_v33 = vmul.f32 -1.442695, %v14269_v14  ;;  %v10399_v14 = vmul.f32 -1.442695, %v14288_v0 }
 0xb3b   : > { %v12182_v48 = vpop.eup %12181  ;;  %9286 = vst [vmem:[%s14171_s13 + $0x1d0] sm:$0xff] %v12180_v44  ;;  %12201 = vpow2.f32 %v10365_v27  ;;  %v10398_v41 = vmul.f32 -1.442695, %v14291_v16  ;;  %v10400_v22 = vmul.f32 -1.442695, %v14297_v63 }
 0xb3c   : > { %v12184_v43 = vpop.eup %12183  ;;  %9285 = vst [vmem:[%s14171_s13 + $0x1c8] sm:$0xff] %v12182_v48  ;;  %12203 = vpow2.f32 %v10367_v36  ;;  %v10405_v0 = vmul.f32 -1.442695, %v14300_v38  ;;  %v10407_v16 = vmul.f32 -1.442695, %v14306_v55 }
 0xb3d   : > { %v12186_v52 = vpop.eup %12185  ;;  %9287 = vst [vmem:[%s14171_s13 + $0x1d8] sm:$0xff] %v12184_v43  ;;  %12205 = vpow2.f32 %v10366_v19  ;;  %v14763_v19 = vld [vmem:[#allocation19_spill] sm:$0xff]  ;;  %v10408_v38 = vmul.f32 -1.442695, %v14316_v61 }
 0xb3e   : > { %v12188_v12 = vpop.eup %12187  ;;  %9292 = vst [vmem:[%s14171_s13 + $0x200] sm:$0xff] %v12186_v52  ;;  %12207 = vpow2.f32 %v10368_v49  ;;  %v6262_v44 = vsub.s32 6, %v14763_v19  ;;  %v6266_v48 = vsub.s32 7, %v14763_v19 }
 0xb3f   : > { %v12190_v57 = vpop.eup %12189  ;;  %9294 = vst [vmem:[%s14171_s13 + $0x210] sm:$0xff] %v12188_v12  ;;  %12209 = vpow2.f32 %v10373_v56 }
 0xb40   : > { %v12192_v60 = vpop.eup %12191  ;;  %9293 = vst [vmem:[%s14171_s13 + $0x208] sm:$0xff] %v12190_v57  ;;  %12211 = vpow2.f32 %v10375_v13  ;;  %v14364_v52 = vrot.slane %v14115_v35, %v6262_v44  ;;  %v14369_v12 = vrot.slane %v14115_v35, %v6266_v48  ;;  %v10406_v35 = vmul.f32 -1.442695, %v14312_v23 }
 0xb41   : > { %v12194_v11 = vpop.eup %12193  ;;  %9295 = vst [vmem:[%s14171_s13 + $0x218] sm:$0xff] %v12192_v60  ;;  %12213 = vpow2.f32 %v10374_v3 }
 0xb42   : > { %v12196_v45 = vpop.eup %12195  ;;  %9300 = vst [vmem:[%s14171_s13 + $0x240] sm:$0xff] %v12194_v11  ;;  %12215 = vpow2.f32 %v10376_v20 }
 0xb43   : > { %v12198_v37 = vpop.eup %12197  ;;  %9302 = vst [vmem:[%s14171_s13 + $0x250] sm:$0xff] %v12196_v45  ;;  %12217 = vpow2.f32 %v10381_v46 }
 0xb44   : > { %v12200_v8 = vpop.eup %12199  ;;  %9301 = vst [vmem:[%s14171_s13 + $0x248] sm:$0xff] %v12198_v37  ;;  %12219 = vpow2.f32 %v10383_v59 }
 0xb45   : > { %v12202_v54 = vpop.eup %12201  ;;  %v8919_v4 = vadd.f32 1.0, %v12200_v8  ;;  %12221 = vpow2.f32 %v10382_v39 }
 0xb46   : > { %v12204_v28 = vpop.eup %12203  ;;  %v8924_v50 = vadd.f32 1.0, %v12202_v54  ;;  %12223 = vpow2.f32 %v10384_v25 }
 0xb47   : > { %v12206_v9 = vpop.eup %12205  ;;  %12225 = vrcp.f32 %v8919_v4  ;;  %v8926_v51 = vadd.f32 1.0, %v12204_v28 }
 0xb48   : > { %v12208_v53 = vpop.eup %12207  ;;  %12227 = vrcp.f32 %v8924_v50  ;;  %v8925_v5 = vadd.f32 1.0, %v12206_v9 }
 0xb49   : > { %v12210_v15 = vpop.eup %12209  ;;  %12229 = vrcp.f32 %v8926_v51  ;;  %v8927_v6 = vadd.f32 1.0, %v12208_v53 }
 0xb4a   : > { %v12212_v30 = vpop.eup %12211  ;;  %12231 = vrcp.f32 %v8925_v5  ;;  %v8932_v29 = vadd.f32 1.0, %v12210_v15 }
 0xb4b   : > { %v12214_v40 = vpop.eup %12213  ;;  %12233 = vrcp.f32 %v8927_v6  ;;  %v8934_v34 = vadd.f32 1.0, %v12212_v30 }
 0xb4c   : > { %v12216_v47 = vpop.eup %12215  ;;  %12235 = vrcp.f32 %v8932_v29  ;;  %v8933_v7 = vadd.f32 1.0, %v12214_v40  ;;  %v6254_v29 = vsub.s32 4, %v14763_v19 }
 0xb4d   : > { %v12218_v24 = vpop.eup %12217  ;;  %12237 = vrcp.f32 %v8934_v34  ;;  %v8935_v2 = vadd.f32 1.0, %v12216_v47 }
 0xb4e   : > { %v12220_v58 = vpop.eup %12219  ;;  %12239 = vrcp.f32 %v8933_v7  ;;  %v8940_v62 = vadd.f32 1.0, %v12218_v24  ;;  %v6258_v24 = vsub.s32 5, %v14763_v19 }
 0xb4f   : > { %v12222_v1 = vpop.eup %12221  ;;  %12241 = vrcp.f32 %v8935_v2  ;;  %v8942_v42 = vadd.f32 1.0, %v12220_v58 }
 0xb50   : > { %v12224_v31 = vpop.eup %12223  ;;  %12243 = vrcp.f32 %v8940_v62  ;;  %v8941_v21 = vadd.f32 1.0, %v12222_v1 }
 0xb51   : > { %v12226_v17 = vpop.eup %12225  ;;  %12245 = vrcp.f32 %v8942_v42  ;;  %v8943_v27 = vadd.f32 1.0, %v12224_v31 }
 0xb52   : > { %v12228_v36 = vpop.eup %12227  ;;  %9303 = vst [vmem:[%s14171_s13 + $0x258] sm:$0xff] %v12226_v17  ;;  %12247 = vrcp.f32 %v8941_v21 }
 0xb53   : > { %v12230_v49 = vpop.eup %12229  ;;  %9308 = vst [vmem:[%s14171_s13 + $0x280] sm:$0xff] %v12228_v36  ;;  %12249 = vrcp.f32 %v8943_v27  ;;  %v12555_v27 = vld [vmem:[#allocation11 + $0x11] sm:$0xff] }
 0xb54   : > { %v12232_v56 = vpop.eup %12231  ;;  %9310 = vst [vmem:[%s14171_s13 + $0x290] sm:$0xff] %v12230_v49  ;;  %12251 = vpow2.f32 %v10389_v18  ;;  %v14410_v19 = vrot.slane %v12555_v27, %v6258_v24 }
 0xb55   : > { %v12234_v43 = vpop.eup %12233  ;;  %9309 = vst [vmem:[%s14171_s13 + $0x288] sm:$0xff] %v12232_v56  ;;  %12253 = vpow2.f32 %v10391_v32  ;;  %v14408_v32 = vrot.slane %v12555_v27, %v6254_v29 }
 0xb56   : > { %v12236_v13 = vpop.eup %12235  ;;  %9311 = vst [vmem:[%s14171_s13 + $0x298] sm:$0xff] %v12234_v43  ;;  %12255 = vpow2.f32 %v10390_v33 }
 0xb57   : > { %v12238_v3 = vpop.eup %12237  ;;  %9316 = vst [vmem:[%s14171_s13 + $0x2c0] sm:$0xff] %v12236_v13  ;;  %12257 = vpow2.f32 %v10392_v10  ;;  %v8328_v46 = vpop.f32.mrb[200].mxu0 }
 0xb58   : > { %v12240_v20 = vpop.eup %12239  ;;  %9318 = vst [vmem:[%s14171_s13 + $0x2d0] sm:$0xff] %v12238_v3  ;;  %12259 = vpow2.f32 %v10397_v26  ;;  %v14378_v63 = vadd.f32 %v8328_v46, %v14364_v52  ;;  %v8330_v59 = vpop.f32.mrb[201].mxu0 }
 0xb59   : > { %v12242_v57 = vpop.eup %12241  ;;  %9317 = vst [vmem:[%s14171_s13 + $0x2c8] sm:$0xff] %v12240_v20  ;;  %12261 = vpow2.f32 %v10399_v14  ;;  %v14383_v39 = vadd.f32 %v8330_v59, %v14369_v12  ;;  %v8332_v55 = vpop.f32.mrb[202].mxu0 }
 0xb5a   : > { %v12244_v60 = vpop.eup %12243  ;;  %9319 = vst [vmem:[%s14171_s13 + $0x2d8] sm:$0xff] %v12242_v57  ;;  %12263 = vpow2.f32 %v10398_v41  ;;  %v14387_v25 = vadd.f32 %v8332_v55, %v14364_v52  ;;  %v8334_v23 = vpop.f32.mrb[203].mxu0 }
 0xb5b   : > { %v12246_v11 = vpop.eup %12245  ;;  %9324 = vst [vmem:[%s14171_s13 + $0x300] sm:$0xff] %v12244_v60  ;;  %12265 = vpow2.f32 %v10400_v22  ;;  %v14391_v8 = vadd.f32 %v8334_v23, %v14369_v12 }
 0xb5c   : > { %v12248_v45 = vpop.eup %12247  ;;  %9326 = vst [vmem:[%s14171_s13 + $0x310] sm:$0xff] %v12246_v11  ;;  %12267 = vpow2.f32 %v10405_v0 }
 0xb5d   : > { %v12250_v37 = vpop.eup %12249  ;;  %9325 = vst [vmem:[%s14171_s13 + $0x308] sm:$0xff] %v12248_v45  ;;  %12269 = vpow2.f32 %v10407_v16 }
 0xb5e   : > { %v12252_v54 = vpop.eup %12251  ;;  %9327 = vst [vmem:[%s14171_s13 + $0x318] sm:$0xff] %v12250_v37  ;;  %12271 = vpow2.f32 %v10406_v35 }
 0xb5f   : > { %v12254_v61 = vpop.eup %12253  ;;  %v8948_v4 = vadd.f32 1.0, %v12252_v54  ;;  %12273 = vpow2.f32 %v10408_v38  ;;  %v8338_v53 = vpop.f32.mrb[204].mxu0 }
 0xb60   : > { %v12256_v28 = vpop.eup %12255  ;;  %v8950_v50 = vadd.f32 1.0, %v12254_v61  ;;  %v14395_v6 = vadd.f32 %v8338_v53, %v14364_v52  ;;  %v8340_v30 = vpop.f32.mrb[205].mxu0 }
 0xb61   : > { %v12258_v9 = vpop.eup %12257  ;;  %12275 = vrcp.f32 %v8948_v4  ;;  %v8949_v51 = vadd.f32 1.0, %v12256_v28  ;;  %v14399_v47 = vadd.f32 %v8340_v30, %v14369_v12  ;;  %v8342_v7 = vpop.f32.mrb[206].mxu0 }
 0xb62   : > { %v12260_v5 = vpop.eup %12259  ;;  %12277 = vrcp.f32 %v8950_v50  ;;  %v8951_v15 = vadd.f32 1.0, %v12258_v9  ;;  %v14403_v62 = vadd.f32 %v8342_v7, %v14364_v52  ;;  %v8344_v1 = vpop.f32.mrb[207].mxu0 }
 0xb63   : > { %v12262_v40 = vpop.eup %12261  ;;  %12279 = vrcp.f32 %v8949_v51  ;;  %v8956_v34 = vadd.f32 1.0, %v12260_v5  ;;  %v14406_v21 = vadd.f32 %v8344_v1, %v14369_v12 }
 0xb64   : > { %v12264_v2 = vpop.eup %12263  ;;  %12281 = vrcp.f32 %v8951_v15  ;;  %v8958_v58 = vadd.f32 1.0, %v12262_v40 }
 0xb65   : > { %v12266_v42 = vpop.eup %12265  ;;  %12283 = vrcp.f32 %v8956_v34  ;;  %v8957_v31 = vadd.f32 1.0, %v12264_v2 }
 0xb66   : > { %v12268_v18 = vpop.eup %12267  ;;  %12285 = vrcp.f32 %v8958_v58  ;;  %v8959_v17 = vadd.f32 1.0, %v12266_v42 }
 0xb67   : > { %v12270_v36 = vpop.eup %12269  ;;  %12287 = vrcp.f32 %v8957_v31  ;;  %v8964_v33 = vadd.f32 1.0, %v12268_v18  ;;  %v8155_v56 = vpop.f32.mrb[176].mxu1 }
 0xb68   : > { %v12272_v44 = vpop.eup %12271  ;;  %12289 = vrcp.f32 %v8959_v17  ;;  %v8966_v49 = vadd.f32 1.0, %v12270_v36  ;;  %v10871_v43 = vadd.f32 %v8155_v56, %v14408_v32  ;;  %v8381_v14 = vpop.f32.mrb[176].mxu0 }
 0xb69   : > { %v12274_v10 = vpop.eup %12273  ;;  %12291 = vrcp.f32 %v8964_v33  ;;  %v8965_v48 = vadd.f32 1.0, %v12272_v44  ;;  %v8157_v13 = vpop.f32.mrb[177].mxu1  ;;  %v10903_v3 = vadd.f32 %v8381_v14, %v14364_v52 }
 0xb6a   : > { %12293 = vrcp.f32 %v8966_v49  ;;  %v8967_v26 = vadd.f32 1.0, %v12274_v10  ;;  %v10872_v22 = vadd.f32 %v8157_v13, %v14410_v19  ;;  %v8383_v20 = vpop.f32.mrb[177].mxu0  ;;  %v8159_v0 = vpop.f32.mrb[178].mxu1  ;;  %v10289_v16 = vmul.f32 -1.442695, %v10871_v43 }
 0xb6b   : > { %v12276_v41 = vpop.eup %12275  ;;  %12295 = vrcp.f32 %v8965_v48  ;;  %v10904_v46 = vadd.f32 %v8383_v20, %v14369_v12  ;;  %v10873_v60 = vadd.f32 %v8159_v0, %v14408_v32  ;;  %v8385_v35 = vpop.f32.mrb[178].mxu0  ;;  %v10291_v38 = vmul.f32 -1.442695, %v10903_v3 }
 0xb6c   : > { %v12278_v57 = vpop.eup %12277  ;;  %9332 = vst [vmem:[%s14171_s13 + $0x340] sm:$0xff] %v12276_v41  ;;  %12297 = vrcp.f32 %v8967_v26  ;;  %v8161_v59 = vpop.f32.mrb[179].mxu1  ;;  %v10290_v55 = vmul.f32 -1.442695, %v10872_v22  ;;  %v10905_v45 = vadd.f32 %v8385_v35, %v14364_v52 }
 0xb6d   : > { %v12280_v11 = vpop.eup %12279  ;;  %9334 = vst [vmem:[%s14171_s13 + $0x350] sm:$0xff] %v12278_v57  ;;  %v10874_v23 = vadd.f32 %v8161_v59, %v14410_v19  ;;  %v8387_v37 = vpop.f32.mrb[179].mxu0  ;;  %12299 = vpow2.f32 %v10289_v16  ;;  %v10292_v61 = vmul.f32 -1.442695, %v10904_v46  ;;  %v10297_v4 = vmul.f32 -1.442695, %v10873_v60 }
 0xb6e   : > { %v12282_v54 = vpop.eup %12281  ;;  %9333 = vst [vmem:[%s14171_s13 + $0x348] sm:$0xff] %v12280_v11  ;;  %v10906_v28 = vadd.f32 %v8387_v37, %v14369_v12  ;;  %12301 = vpow2.f32 %v10291_v38  ;;  %v10299_v9 = vmul.f32 -1.442695, %v10905_v45 }
 0xb6f   : > { %v12284_v50 = vpop.eup %12283  ;;  %9335 = vst [vmem:[%s14171_s13 + $0x358] sm:$0xff] %v12282_v54  ;;  %12303 = vpow2.f32 %v10290_v55  ;;  %v10298_v53 = vmul.f32 -1.442695, %v10874_v23  ;;  %v8165_v30 = vpop.f32.mrb[180].mxu1 }
 0xb70   : > { %v12286_v51 = vpop.eup %12285  ;;  %9340 = vst [vmem:[%s14171_s13 + $0x380] sm:$0xff] %v12284_v50  ;;  %12305 = vpow2.f32 %v10292_v61  ;;  %v10300_v15 = vmul.f32 -1.442695, %v10906_v28  ;;  %v10875_v40 = vadd.f32 %v8165_v30, %v14408_v32  ;;  %v8391_v34 = vpop.f32.mrb[180].mxu0 }
 0xb71   : > { %v12288_v5 = vpop.eup %12287  ;;  %9342 = vst [vmem:[%s14171_s13 + $0x390] sm:$0xff] %v12286_v51  ;;  %12307 = vpow2.f32 %v10297_v4  ;;  %v8167_v7 = vpop.f32.mrb[181].mxu1  ;;  %v10907_v2 = vadd.f32 %v8391_v34, %v14364_v52 }
 0xb72   : > { %v12290_v29 = vpop.eup %12289  ;;  %9341 = vst [vmem:[%s14171_s13 + $0x388] sm:$0xff] %v12288_v5  ;;  %12309 = vpow2.f32 %v10299_v9  ;;  %v10876_v58 = vadd.f32 %v8167_v7, %v14410_v19  ;;  %v8393_v1 = vpop.f32.mrb[181].mxu0  ;;  %v10305_v18 = vmul.f32 -1.442695, %v10875_v40 }
 0xb73   : > { %v12292_v24 = vpop.eup %12291  ;;  %9343 = vst [vmem:[%s14171_s13 + $0x398] sm:$0xff] %v12290_v29  ;;  %v8169_v42 = vpop.f32.mrb[182].mxu1  ;;  %12311 = vpow2.f32 %v10298_v53  ;;  %v10908_v17 = vadd.f32 %v8393_v1, %v14369_v12  ;;  %v10307_v49 = vmul.f32 -1.442695, %v10907_v2 }
 0xb74   : > { %v12294_v31 = vpop.eup %12293  ;;  %9348 = vst [vmem:[%s14171_s13 + $0x3c0] sm:$0xff] %v12292_v24  ;;  %v10877_v27 = vadd.f32 %v8169_v42, %v14408_v32  ;;  %v8395_v36 = vpop.f32.mrb[182].mxu0  ;;  %12313 = vpow2.f32 %v10300_v15  ;;  %v10306_v10 = vmul.f32 -1.442695, %v10876_v58 }
 0xb75   : > { %v8171_v33 = vpop.f32.mrb[183].mxu1  ;;  %v12296_v44 = vpop.eup %12295  ;;  %9350 = vst [vmem:[%s14171_s13 + $0x3d0] sm:$0xff] %v12294_v31  ;;  %12315 = vpow2.f32 %v10305_v18  ;;  %v10308_v26 = vmul.f32 -1.442695, %v10908_v17  ;;  %v10909_v51 = vadd.f32 %v8395_v36, %v14364_v52 }
 0xb76   : > { %v8397_v48 = vpop.f32.mrb[183].mxu0  ;;  %v12298_v56 = vpop.eup %12297  ;;  %9349 = vst [vmem:[%s14171_s13 + $0x3c8] sm:$0xff] %v12296_v44  ;;  %v10313_v43 = vmul.f32 -1.442695, %v10877_v27  ;;  %12317 = vpow2.f32 %v10307_v49  ;;  %v10878_v15 = vadd.f32 %v8171_v33, %v14410_v19 }
 0xb77   : > { %9351 = vst [vmem:[%s14171_s13 + $0x3d8] sm:$0xff] %v12298_v56  ;;  %v12300_v14 = vpop.eup %12299  ;;  %12319 = vpow2.f32 %v10306_v10  ;;  %v8175_v3 = vpop.f32.mrb[184].mxu1  ;;  %v10910_v34 = vadd.f32 %v8397_v48, %v14369_v12  ;;  %v10315_v27 = vmul.f32 -1.442695, %v10909_v51 }
 0xb78   : > { %v12302_v13 = vpop.eup %12301  ;;  %v8848_v41 = vadd.f32 1.0, %v12300_v14  ;;  %12321 = vpow2.f32 %v10308_v26  ;;  %v8401_v0 = vpop.f32.mrb[184].mxu0  ;;  %v10879_v1 = vadd.f32 %v8175_v3, %v14408_v32  ;;  %v10314_v48 = vmul.f32 -1.442695, %v10878_v15 }
 0xb79   : > { %v12304_v22 = vpop.eup %12303  ;;  %v8850_v20 = vadd.f32 1.0, %v12302_v13  ;;  %12323 = vpow2.f32 %v10313_v43  ;;  %v8177_v57 = vpop.f32.mrb[185].mxu1  ;;  %v10911_v36 = vadd.f32 %v8401_v0, %v14364_v52  ;;  %v10316_v14 = vmul.f32 -1.442695, %v10910_v34 }
 0xb7a   : > { %v12306_v16 = vpop.eup %12305  ;;  %12325 = vrcp.f32 %v8848_v41  ;;  %v8849_v46 = vadd.f32 1.0, %v12304_v22  ;;  %v8403_v60 = vpop.f32.mrb[185].mxu0  ;;  %v10880_v56 = vadd.f32 %v8177_v57, %v14410_v19  ;;  %v10321_v3 = vmul.f32 -1.442695, %v10879_v1 }
 0xb7b   : > { %v8179_v35 = vpop.f32.mrb[186].mxu1  ;;  %v12308_v59 = vpop.eup %12307  ;;  %12327 = vrcp.f32 %v8850_v20  ;;  %v8851_v11 = vadd.f32 1.0, %v12306_v16  ;;  %v10912_v13 = vadd.f32 %v8403_v60, %v14369_v12  ;;  %v10323_v0 = vmul.f32 -1.442695, %v10911_v36 }
 0xb7c   : > { %v8405_v38 = vpop.f32.mrb[186].mxu0  ;;  %v14437_v55 = vpop.f32.mrb[187].mxu1  ;;  %12329 = vrcp.f32 %v8849_v46  ;;  %v8856_v23 = vadd.f32 1.0, %v12308_v59  ;;  %v10881_v22 = vadd.f32 %v8179_v35, %v14408_v32  ;;  %v10322_v46 = vmul.f32 -1.442695, %v10880_v56 }
 0xb7d   : > { %v12310_v45 = vpop.eup %12309  ;;  %v14439_v37 = vpop.f32.mrb[187].mxu0  ;;  %12331 = vrcp.f32 %v8851_v11  ;;  %v10913_v57 = vadd.f32 %v8405_v38, %v14364_v52  ;;  %v10882_v60 = vadd.f32 %v14437_v55, %v14410_v19  ;;  %v10324_v35 = vmul.f32 -1.442695, %v10912_v13 }
 0xb7e   : > { %v12312_v54 = vpop.eup %12311  ;;  %v8858_v61 = vadd.f32 1.0, %v12310_v45  ;;  %12333 = vrcp.f32 %v8856_v23  ;;  %v10914_v45 = vadd.f32 %v14439_v37, %v14369_v12 }
 0xb7f   : > { %v12314_v4 = vpop.eup %12313  ;;  %v8857_v28 = vadd.f32 1.0, %v12312_v54  ;;  %v8185_v30 = vpop.f32.mrb[188].mxu1  ;;  %v10331_v37 = vmul.f32 -1.442695, %v10913_v57  ;;  %v10330_v15 = vmul.f32 -1.442695, %v10882_v60 }
 0xb80   : > { %v12316_v50 = vpop.eup %12315  ;;  %12335 = vrcp.f32 %v8858_v61  ;;  %v8859_v9 = vadd.f32 1.0, %v12314_v4  ;;  %v8411_v7 = vpop.f32.mrb[188].mxu0  ;;  %v10329_v61 = vmul.f32 -1.442695, %v10881_v22  ;;  %v10883_v55 = vadd.f32 %v8185_v30, %v14408_v32 }
 0xb81   : > { %v12318_v53 = vpop.eup %12317  ;;  %12337 = vrcp.f32 %v8857_v28  ;;  %v8864_v5 = vadd.f32 1.0, %v12316_v50  ;;  %v14444_v24 = vpop.f32.mrb[189].mxu1 }
 0xb82   : > { %v12320_v29 = vpop.eup %12319  ;;  %12339 = vrcp.f32 %v8859_v9  ;;  %v8866_v40 = vadd.f32 1.0, %v12318_v53  ;;  %v14447_v42 = vpop.f32.mrb[189].mxu0  ;;  %v10915_v9 = vadd.f32 %v8411_v7, %v14364_v52  ;;  %v10337_v7 = vmul.f32 -1.442695, %v10883_v55 }
 0xb83   : > { %v12322_v2 = vpop.eup %12321  ;;  %12341 = vrcp.f32 %v8864_v5  ;;  %v8865_v58 = vadd.f32 1.0, %v12320_v29  ;;  %v14449_v31 = vpop.f32.mrb[190].mxu1 }
 0xb84   : > { %v12324_v18 = vpop.eup %12323  ;;  %12343 = vrcp.f32 %v8866_v40  ;;  %v8867_v17 = vadd.f32 1.0, %v12322_v2  ;;  %v14452_v33 = vpop.f32.mrb[190].mxu0  ;;  %v10332_v40 = vmul.f32 -1.442695, %v10914_v45  ;;  %v10339_v1 = vmul.f32 -1.442695, %v10915_v9 }
 0xb85   : > { %v14454_v44 = vpop.f32.mrb[191].mxu1  ;;  %v12326_v49 = vpop.eup %12325  ;;  %12345 = vrcp.f32 %v8865_v58  ;;  %v8872_v10 = vadd.f32 1.0, %v12324_v18 }
 0xb86   : > { %v14457_v26 = vpop.f32.mrb[191].mxu0  ;;  %v12328_v43 = vpop.eup %12327  ;;  %9232 = vst [vmem:[%s14171_s13 + $0x20] sm:$0xff] %v12326_v49  ;;  %12347 = vrcp.f32 %v8867_v17 }
 0xb87   : > { %v12330_v41 = vpop.eup %12329  ;;  %9234 = vst [vmem:[%s14171_s13 + $0x30] sm:$0xff] %v12328_v43  ;;  %12349 = vrcp.f32 %v8872_v10  ;;  %v14468_v59 = vpop.f32.mrb[192].mxu1 }
 0xb88   : > { %v12332_v20 = vpop.eup %12331  ;;  %9233 = vst [vmem:[%s14171_s13 + $0x28] sm:$0xff] %v12330_v41  ;;  %12351 = vpow2.f32 %v10315_v27  ;;  %v14473_v23 = vpop.f32.mrb[192].mxu0 }
 0xb89   : > { %v12334_v16 = vpop.eup %12333  ;;  %9235 = vst [vmem:[%s14171_s13 + $0x38] sm:$0xff] %v12332_v20  ;;  %12353 = vpow2.f32 %v10314_v48  ;;  %v14475_v38 = vpop.f32.mrb[193].mxu1 }
 0xb8a   : > { %v12336_v11 = vpop.eup %12335  ;;  %9240 = vst [vmem:[%s14171_s13 + $0x60] sm:$0xff] %v12334_v16  ;;  %12355 = vpow2.f32 %v10316_v14  ;;  %v14479_v4 = vpop.f32.mrb[193].mxu0 }
 0xb8b   : > { %v12338_v54 = vpop.eup %12337  ;;  %9242 = vst [vmem:[%s14171_s13 + $0x70] sm:$0xff] %v12336_v11  ;;  %12357 = vpow2.f32 %v10321_v3  ;;  %v14481_v28 = vpop.f32.mrb[194].mxu1 }
 0xb8c   : > { %v12340_v50 = vpop.eup %12339  ;;  %9241 = vst [vmem:[%s14171_s13 + $0x68] sm:$0xff] %v12338_v54  ;;  %12359 = vpow2.f32 %v10323_v0  ;;  %v14485_v51 = vpop.f32.mrb[194].mxu0 }
 0xb8d   : > { %v14487_v53 = vpop.f32.mrb[195].mxu1  ;;  %v12342_v5 = vpop.eup %12341  ;;  %9243 = vst [vmem:[%s14171_s13 + $0x78] sm:$0xff] %v12340_v50  ;;  %12361 = vpow2.f32 %v10322_v46 }
 0xb8e   : > { %v8427_v30 = vpop.f32.mrb[195].mxu0  ;;  %v12344_v29 = vpop.eup %12343  ;;  %9248 = vst [vmem:[%s14171_s13 + $0xa0] sm:$0xff] %v12342_v5  ;;  %12363 = vpow2.f32 %v10324_v35 }
 0xb8f   : > { %v12346_v34 = vpop.eup %12345  ;;  %9250 = vst [vmem:[%s14171_s13 + $0xb0] sm:$0xff] %v12344_v29  ;;  %12365 = vpow2.f32 %v10329_v61  ;;  %v14493_v2 = vadd.f32 %v8427_v30, %v14369_v12  ;;  %v8205_v17 = vpop.f32.mrb[196].mxu1 }
 0xb90   : > { %v12348_v58 = vpop.eup %12347  ;;  %9249 = vst [vmem:[%s14171_s13 + $0xa8] sm:$0xff] %v12346_v34  ;;  %12367 = vpow2.f32 %v10331_v37  ;;  %v14499_v36 = vadd.f32 %v8205_v17, %v14408_v32  ;;  %v8431_v49 = vpop.f32.mrb[196].mxu0 }
 0xb91   : > { %v12350_v18 = vpop.eup %12349  ;;  %9251 = vst [vmem:[%s14171_s13 + $0xb8] sm:$0xff] %v12348_v58  ;;  %12369 = vpow2.f32 %v10330_v15  ;;  %v8207_v10 = vpop.f32.mrb[197].mxu1  ;;  %v14502_v43 = vadd.f32 %v8431_v49, %v14364_v52 }
 0xb92   : > { %v12352_v27 = vpop.eup %12351  ;;  %9256 = vst [vmem:[%s14171_s13 + $0xe0] sm:$0xff] %v12350_v18  ;;  %12371 = vpow2.f32 %v10332_v40  ;;  %v14505_v14 = vadd.f32 %v8207_v10, %v14410_v19  ;;  %v8433_v13 = vpop.f32.mrb[197].mxu0 }
 0xb93   : > { %v12354_v48 = vpop.eup %12353  ;;  %v8874_v56 = vadd.f32 1.0, %v12352_v27  ;;  %12373 = vpow2.f32 %v10337_v7  ;;  %v8209_v41 = vpop.f32.mrb[198].mxu1  ;;  %v14508_v20 = vadd.f32 %v8433_v13, %v14369_v12  ;;  %v10884_v7 = vadd.f32 %v14444_v24, %v14410_v19 }
 0xb94   : > { %v12356_v3 = vpop.eup %12355  ;;  %v8873_v22 = vadd.f32 1.0, %v12354_v48  ;;  %12375 = vpow2.f32 %v10339_v1  ;;  %v8435_v0 = vpop.f32.mrb[198].mxu0  ;;  %v14511_v45 = vadd.f32 %v8209_v41, %v14408_v32  ;;  %v10916_v27 = vadd.f32 %v14447_v42, %v14369_v12 }
 0xb95   : > { %v8211_v57 = vpop.f32.mrb[199].mxu1  ;;  %v12358_v16 = vpop.eup %12357  ;;  %12377 = vrcp.f32 %v8874_v56  ;;  %v8875_v46 = vadd.f32 1.0, %v12356_v3  ;;  %v14514_v55 = vadd.f32 %v8435_v0, %v14364_v52  ;;  %v10885_v24 = vadd.f32 %v14449_v31, %v14408_v32 }
 0xb96   : > { %v8437_v60 = vpop.f32.mrb[199].mxu0  ;;  %v12360_v11 = vpop.eup %12359  ;;  %12379 = vrcp.f32 %v8873_v22  ;;  %v8880_v35 = vadd.f32 1.0, %v12358_v16  ;;  %v14517_v50 = vadd.f32 %v8211_v57, %v14410_v19  ;;  %v10917_v42 = vadd.f32 %v14452_v33, %v14364_v52 }
 0xb97   : > { %v12362_v54 = vpop.eup %12361  ;;  %12381 = vrcp.f32 %v8875_v46  ;;  %v8882_v61 = vadd.f32 1.0, %v12360_v11  ;;  %v14520_v5 = vadd.f32 %v8437_v60, %v14369_v12  ;;  %v8215_v29 = vpop.f32.mrb[200].mxu1  ;;  %v10338_v46 = vmul.f32 -1.442695, %v10884_v7 }
 0xb98   : > { %v12364_v37 = vpop.eup %12363  ;;  %12383 = vrcp.f32 %v8880_v35  ;;  %v8881_v9 = vadd.f32 1.0, %v12362_v54  ;;  %v14525_v58 = vadd.f32 %v8215_v29, %v14408_v32  ;;  %v8217_v1 = vpop.f32.mrb[201].mxu1  ;;  %v10886_v31 = vadd.f32 %v14454_v44, %v14410_v19 }
 0xb99   : > { %v12366_v15 = vpop.eup %12365  ;;  %12385 = vrcp.f32 %v8882_v61  ;;  %v8883_v30 = vadd.f32 1.0, %v12364_v37  ;;  %v14530_v49 = vadd.f32 %v8217_v1, %v14410_v19  ;;  %v8219_v10 = vpop.f32.mrb[202].mxu1  ;;  %v10340_v35 = vmul.f32 -1.442695, %v10916_v27 }
 0xb9a   : > { %v12368_v40 = vpop.eup %12367  ;;  %12387 = vrcp.f32 %v8881_v9  ;;  %v8888_v34 = vadd.f32 1.0, %v12366_v15  ;;  %v14535_v13 = vadd.f32 %v8219_v10, %v14408_v32  ;;  %v8221_v41 = vpop.f32.mrb[203].mxu1  ;;  %v10918_v54 = vadd.f32 %v14457_v26, %v14369_v12 }
 0xb9b   : > { %v12370_v18 = vpop.eup %12369  ;;  %12389 = vrcp.f32 %v8883_v30  ;;  %v8890_v17 = vadd.f32 1.0, %v12368_v40  ;;  %v14540_v0 = vadd.f32 %v8221_v41, %v14410_v19  ;;  %v10345_v61 = vmul.f32 -1.442695, %v10885_v24 }
 0xb9c   : > { %v12372_v48 = vpop.eup %12371  ;;  %12391 = vrcp.f32 %v8888_v34  ;;  %v8889_v56 = vadd.f32 1.0, %v12370_v18  ;;  %v10887_v37 = vadd.f32 %v14468_v59, %v14408_v32  ;;  %v10347_v44 = vmul.f32 -1.442695, %v10917_v42 }
 0xb9d   : > { %v12374_v3 = vpop.eup %12373  ;;  %12393 = vrcp.f32 %v8890_v17  ;;  %v8891_v22 = vadd.f32 1.0, %v12372_v48  ;;  %v10919_v15 = vadd.f32 %v14473_v23, %v14364_v52  ;;  %v10346_v26 = vmul.f32 -1.442695, %v10886_v31 }
 0xb9e   : > { %v12376_v57 = vpop.eup %12375  ;;  %12395 = vrcp.f32 %v8889_v56  ;;  %v8896_v16 = vadd.f32 1.0, %v12374_v3  ;;  %v10888_v40 = vadd.f32 %v14475_v38, %v14410_v19  ;;  %v10348_v1 = vmul.f32 -1.442695, %v10918_v54 }
 0xb9f   : > { %v12378_v60 = vpop.eup %12377  ;;  %12397 = vrcp.f32 %v8891_v22  ;;  %v8898_v11 = vadd.f32 1.0, %v12376_v57  ;;  %v8225_v30 = vpop.f32.mrb[204].mxu1  ;;  %v10920_v23 = vadd.f32 %v14479_v4, %v14369_v12  ;;  %v10353_v38 = vmul.f32 -1.442695, %v10887_v37 }
 0xba0   : > { %v12380_v33 = vpop.eup %12379  ;;  %9258 = vst [vmem:[%s14171_s13 + $0xf0] sm:$0xff] %v12378_v60  ;;  %12399 = vrcp.f32 %v8896_v16  ;;  %v14556_v34 = vadd.f32 %v8225_v30, %v14408_v32  ;;  %v8227_v59 = vpop.f32.mrb[205].mxu1  ;;  %v10889_v10 = vadd.f32 %v14481_v28, %v14408_v32  ;;  %v10355_v12 = vmul.f32 -1.442695, %v10919_v15 }
 0xba1   : > { %v12382_v9 = vpop.eup %12381  ;;  %9257 = vst [vmem:[%s14171_s13 + $0xe8] sm:$0xff] %v12380_v33  ;;  %12401 = vrcp.f32 %v8898_v11  ;;  %v14562_v18 = vadd.f32 %v8227_v59, %v14410_v19  ;;  %v8229_v17 = vpop.f32.mrb[206].mxu1  ;;  %v10921_v4 = vadd.f32 %v14485_v51, %v14364_v52  ;;  %v10354_v28 = vmul.f32 -1.442695, %v10888_v40 }
 0xba2   : > { %v12384_v29 = vpop.eup %12383  ;;  %9259 = vst [vmem:[%s14171_s13 + $0xf8] sm:$0xff] %v12382_v9  ;;  %12403 = vpow2.f32 %v10338_v46  ;;  %v14568_v48 = vadd.f32 %v8229_v17, %v14408_v32  ;;  %v8231_v56 = vpop.f32.mrb[207].mxu1  ;;  %v10890_v32 = vadd.f32 %v14487_v53, %v14410_v19  ;;  %v10356_v42 = vmul.f32 -1.442695, %v10920_v23 }
 0xba3   : > { %v12386_v7 = vpop.eup %12385  ;;  %9264 = vst [vmem:[%s14171_s13 + $0x120] sm:$0xff] %v12384_v29  ;;  %12405 = vpow2.f32 %v10340_v35  ;;  %v14574_v41 = vadd.f32 %v8231_v56, %v14410_v19  ;;  %v10361_v52 = vmul.f32 -1.442695, %v10889_v10  ;;  %v10363_v16 = vmul.f32 -1.442695, %v10921_v4 }
 0xba4   : > { %v12388_v27 = vpop.eup %12387  ;;  %9266 = vst [vmem:[%s14171_s13 + $0x130] sm:$0xff] %v12386_v7  ;;  %12407 = vpow2.f32 %v10345_v61  ;;  %v10362_v31 = vmul.f32 -1.442695, %v10890_v32 }
 0xba5   : > { %v12390_v24 = vpop.eup %12389  ;;  %9265 = vst [vmem:[%s14171_s13 + $0x128] sm:$0xff] %v12388_v27  ;;  %12409 = vpow2.f32 %v10347_v44 }
 0xba6   : > { %v12392_v3 = vpop.eup %12391  ;;  %9267 = vst [vmem:[%s14171_s13 + $0x138] sm:$0xff] %v12390_v24  ;;  %12411 = vpow2.f32 %v10346_v26 }
 0xba7   : > { %v12394_v22 = vpop.eup %12393  ;;  %9272 = vst [vmem:[%s14171_s13 + $0x160] sm:$0xff] %v12392_v3  ;;  %12413 = vpow2.f32 %v10348_v1 }
 0xba8   : > { %v12396_v57 = vpop.eup %12395  ;;  %9274 = vst [vmem:[%s14171_s13 + $0x170] sm:$0xff] %v12394_v22  ;;  %12415 = vpow2.f32 %v10353_v38  ;;  %v8441_v60 = vpop.f32.mrb[208].mxu1 }
 0xba9   : > { %v12398_v51 = vpop.eup %12397  ;;  %9273 = vst [vmem:[%s14171_s13 + $0x168] sm:$0xff] %v12396_v57  ;;  %12417 = vpow2.f32 %v10355_v12  ;;  %v14585_v53 = vadd.f32 %v8441_v60, %v14378_v63  ;;  %v8443_v11 = vpop.f32.mrb[209].mxu1 }
 0xbaa   : > { %v12400_v46 = vpop.eup %12399  ;;  %9275 = vst [vmem:[%s14171_s13 + $0x178] sm:$0xff] %v12398_v51  ;;  %12419 = vpow2.f32 %v10354_v28  ;;  %v14589_v54 = vadd.f32 %v8443_v11, %v14383_v39  ;;  %v8445_v33 = vpop.f32.mrb[210].mxu1  ;;  %v10370_v11 = vmul.f32 -1.442695, %v14505_v14  ;;  %v10378_v14 = vmul.f32 -1.442695, %v14517_v50 }
 0xbab   : > { %v12402_v19 = vpop.eup %12401  ;;  %9280 = vst [vmem:[%s14171_s13 + $0x1a0] sm:$0xff] %v12400_v46  ;;  %12421 = vpow2.f32 %v10356_v42  ;;  %v14592_v9 = vadd.f32 %v8445_v33, %v14387_v25  ;;  %v8447_v44 = vpop.f32.mrb[211].mxu1  ;;  %v10393_v50 = vmul.f32 -1.442695, %v14535_v13 }
 0xbac   : > { %v12404_v35 = vpop.eup %12403  ;;  %9282 = vst [vmem:[%s14171_s13 + $0x1b0] sm:$0xff] %v12402_v19  ;;  %12423 = vpow2.f32 %v10361_v52  ;;  %v14595_v63 = vadd.f32 %v8447_v44, %v14391_v8 }
 0xbad   : > { %v12406_v61 = vpop.eup %12405  ;;  %v8897_v37 = vadd.f32 1.0, %v12404_v35  ;;  %12425 = vpow2.f32 %v10363_v16  ;;  %v10364_v16 = vmul.f32 -1.442695, %v14493_v2  ;;  %v10372_v2 = vmul.f32 -1.442695, %v14508_v20 }
 0xbae   : > { %v12408_v15 = vpop.eup %12407  ;;  %v8899_v30 = vadd.f32 1.0, %v12406_v61  ;;  %12427 = vpow2.f32 %v10362_v31  ;;  %v10369_v31 = vmul.f32 -1.442695, %v14499_v36  ;;  %v10377_v36 = vmul.f32 -1.442695, %v14511_v45 }
 0xbaf   : > { %v12410_v29 = vpop.eup %12409  ;;  %12429 = vrcp.f32 %v8897_v37  ;;  %v8904_v26 = vadd.f32 1.0, %v12408_v15  ;;  %v10380_v20 = vmul.f32 -1.442695, %v14520_v5  ;;  %v10385_v45 = vmul.f32 -1.442695, %v14525_v58 }
 0xbb0   : > { %v12412_v40 = vpop.eup %12411  ;;  %12431 = vrcp.f32 %v8899_v30  ;;  %v8906_v39 = vadd.f32 1.0, %v12410_v29  ;;  %v8451_v23 = vpop.f32.mrb[212].mxu1  ;;  %v10394_v5 = vmul.f32 -1.442695, %v14540_v0 }
 0xbb1   : > { %v12414_v59 = vpop.eup %12413  ;;  %12433 = vrcp.f32 %v8904_v26  ;;  %v8905_v7 = vadd.f32 1.0, %v12412_v40  ;;  %v14598_v38 = vadd.f32 %v8451_v23, %v14395_v6  ;;  %v8453_v8 = vpop.f32.mrb[213].mxu1 }
 0xbb2   : > { %v12416_v1 = vpop.eup %12415  ;;  %12435 = vrcp.f32 %v8906_v39  ;;  %v8907_v25 = vadd.f32 1.0, %v12414_v59  ;;  %v14601_v24 = vadd.f32 %v8453_v8, %v14399_v47  ;;  %v8455_v12 = vpop.f32.mrb[214].mxu1 }
 0xbb3   : > { %v12418_v17 = vpop.eup %12417  ;;  %12437 = vrcp.f32 %v8905_v7  ;;  %v8912_v27 = vadd.f32 1.0, %v12416_v1  ;;  %v14604_v28 = vadd.f32 %v8455_v12, %v14403_v62  ;;  %v8457_v32 = vpop.f32.mrb[215].mxu1 }
 0xbb4   : > { %v12420_v10 = vpop.eup %12419  ;;  %12439 = vrcp.f32 %v8907_v25  ;;  %v8914_v56 = vadd.f32 1.0, %v12418_v17  ;;  %v14607_v42 = vadd.f32 %v8457_v32, %v14406_v21  ;;  %v10371_v21 = vmul.f32 -1.442695, %v14502_v43 }
 0xbb5   : > { %v12422_v4 = vpop.eup %12421  ;;  %12441 = vrcp.f32 %v8912_v27  ;;  %v8913_v3 = vadd.f32 1.0, %v12420_v10  ;;  %v10379_v43 = vmul.f32 -1.442695, %v14514_v55  ;;  %v10386_v55 = vmul.f32 -1.442695, %v14530_v49 }
 0xbb6   : > { %v12424_v22 = vpop.eup %12423  ;;  %12443 = vrcp.f32 %v8914_v56  ;;  %v8915_v6 = vadd.f32 1.0, %v12422_v4 }
 0xbb7   : > { %v12426_v57 = vpop.eup %12425  ;;  %12445 = vrcp.f32 %v8913_v3  ;;  %v8920_v47 = vadd.f32 1.0, %v12424_v22 }
 0xbb8   : > { %v12428_v52 = vpop.eup %12427  ;;  %12447 = vrcp.f32 %v8915_v6  ;;  %v8922_v51 = vadd.f32 1.0, %v12426_v57 }
 0xbb9   : > { %v12430_v62 = vpop.eup %12429  ;;  %12449 = vrcp.f32 %v8920_v47  ;;  %v8921_v46 = vadd.f32 1.0, %v12428_v52 }
 0xbba   : > { %v12432_v60 = vpop.eup %12431  ;;  %9281 = vst [vmem:[%s14171_s13 + $0x1a8] sm:$0xff] %v12430_v62  ;;  %12451 = vrcp.f32 %v8922_v51 }
 0xbbb   : > { %v12434_v19 = vpop.eup %12433  ;;  %9283 = vst [vmem:[%s14171_s13 + $0x1b8] sm:$0xff] %v12432_v60  ;;  %12453 = vrcp.f32 %v8921_v46 }
 0xbbc   : > { %v12436_v35 = vpop.eup %12435  ;;  %9288 = vst [vmem:[%s14171_s13 + $0x1e0] sm:$0xff] %v12434_v19  ;;  %12455 = vpow2.f32 %v10364_v16  ;;  %v10401_v16 = vmul.f32 -1.442695, %v14556_v34  ;;  %v10387_v34 = vmul.f32 -1.442695, %v14585_v53 }
 0xbbd   : > { %v12438_v33 = vpop.eup %12437  ;;  %9290 = vst [vmem:[%s14171_s13 + $0x1f0] sm:$0xff] %v12436_v35  ;;  %12457 = vpow2.f32 %v10369_v31  ;;  %v10402_v31 = vmul.f32 -1.442695, %v14562_v18  ;;  %v10388_v18 = vmul.f32 -1.442695, %v14589_v54 }
 0xbbe   : > { %v12440_v61 = vpop.eup %12439  ;;  %9289 = vst [vmem:[%s14171_s13 + $0x1e8] sm:$0xff] %v12438_v33  ;;  %12459 = vpow2.f32 %v10371_v21  ;;  %v10409_v21 = vmul.f32 -1.442695, %v14568_v48  ;;  %v10395_v48 = vmul.f32 -1.442695, %v14592_v9 }
 0xbbf   : > { %v12442_v37 = vpop.eup %12441  ;;  %9291 = vst [vmem:[%s14171_s13 + $0x1f8] sm:$0xff] %v12440_v61  ;;  %12461 = vpow2.f32 %v10370_v11  ;;  %v10410_v11 = vmul.f32 -1.442695, %v14574_v41  ;;  %v10396_v41 = vmul.f32 -1.442695, %v14595_v63 }
 0xbc0   : > { %v12444_v44 = vpop.eup %12443  ;;  %9296 = vst [vmem:[%s14171_s13 + $0x220] sm:$0xff] %v12442_v37  ;;  %12463 = vpow2.f32 %v10372_v2  ;;  %v10403_v53 = vmul.f32 -1.442695, %v14598_v38  ;;  %v10404_v54 = vmul.f32 -1.442695, %v14601_v24 }
 0xbc1   : > { %v12446_v15 = vpop.eup %12445  ;;  %9298 = vst [vmem:[%s14171_s13 + $0x230] sm:$0xff] %v12444_v44  ;;  %12465 = vpow2.f32 %v10377_v36  ;;  %v10411_v37 = vmul.f32 -1.442695, %v14604_v28  ;;  %v10412_v63 = vmul.f32 -1.442695, %v14607_v42 }
 0xbc2   : > { %v12448_v30 = vpop.eup %12447  ;;  %9297 = vst [vmem:[%s14171_s13 + $0x228] sm:$0xff] %v12446_v15  ;;  %12467 = vpow2.f32 %v10379_v43 }
 0xbc3   : > { %v12450_v29 = vpop.eup %12449  ;;  %9299 = vst [vmem:[%s14171_s13 + $0x238] sm:$0xff] %v12448_v30  ;;  %12469 = vpow2.f32 %v10378_v14 }
 0xbc4   : > { %v12452_v26 = vpop.eup %12451  ;;  %9304 = vst [vmem:[%s14171_s13 + $0x260] sm:$0xff] %v12450_v29  ;;  %12471 = vpow2.f32 %v10380_v20 }
 0xbc5   : > { %v12454_v40 = vpop.eup %12453  ;;  %9306 = vst [vmem:[%s14171_s13 + $0x270] sm:$0xff] %v12452_v26  ;;  %12473 = vpow2.f32 %v10385_v45 }
 0xbc6   : > { %v12456_v58 = vpop.eup %12455  ;;  %9305 = vst [vmem:[%s14171_s13 + $0x268] sm:$0xff] %v12454_v40  ;;  %12475 = vpow2.f32 %v10386_v55 }
 0xbc7   : > { %v12458_v39 = vpop.eup %12457  ;;  %v8923_v59 = vadd.f32 1.0, %v12456_v58  ;;  %12477 = vpow2.f32 %v10393_v50 }
 0xbc8   : > { %v12460_v49 = vpop.eup %12459  ;;  %v8928_v7 = vadd.f32 1.0, %v12458_v39  ;;  %12479 = vpow2.f32 %v10394_v5 }
 0xbc9   : > { %v12462_v1 = vpop.eup %12461  ;;  %12481 = vrcp.f32 %v8923_v59  ;;  %v8930_v13 = vadd.f32 1.0, %v12460_v49 }
 0xbca   : > { %v12464_v25 = vpop.eup %12463  ;;  %12483 = vrcp.f32 %v8928_v7  ;;  %v8929_v23 = vadd.f32 1.0, %v12462_v1 }
 0xbcb   : > { %v12466_v17 = vpop.eup %12465  ;;  %12485 = vrcp.f32 %v8930_v13  ;;  %v8931_v0 = vadd.f32 1.0, %v12464_v25 }
 0xbcc   : > { %v12468_v27 = vpop.eup %12467  ;;  %12487 = vrcp.f32 %v8929_v23  ;;  %v8936_v8 = vadd.f32 1.0, %v12466_v17 }
 0xbcd   : > { %v12470_v10 = vpop.eup %12469  ;;  %12489 = vrcp.f32 %v8931_v0  ;;  %v8938_v56 = vadd.f32 1.0, %v12468_v27 }
 0xbce   : > { %v12472_v12 = vpop.eup %12471  ;;  %12491 = vrcp.f32 %v8936_v8  ;;  %v8937_v4 = vadd.f32 1.0, %v12470_v10 }
 0xbcf   : > { %v12474_v3 = vpop.eup %12473  ;;  %12493 = vrcp.f32 %v8938_v56  ;;  %v8939_v32 = vadd.f32 1.0, %v12472_v12 }
 0xbd0   : > { %v12476_v22 = vpop.eup %12475  ;;  %12495 = vrcp.f32 %v8937_v4  ;;  %v8944_v6 = vadd.f32 1.0, %v12474_v3 }
 0xbd1   : > { %v12478_v57 = vpop.eup %12477  ;;  %12497 = vrcp.f32 %v8939_v32  ;;  %v8945_v47 = vadd.f32 1.0, %v12476_v22 }
 0xbd2   : > { %v12480_v52 = vpop.eup %12479  ;;  %12499 = vrcp.f32 %v8944_v6  ;;  %v8952_v51 = vadd.f32 1.0, %v12478_v57 }
 0xbd3   : > { %v12482_v62 = vpop.eup %12481  ;;  %12501 = vrcp.f32 %v8945_v47  ;;  %v8953_v46 = vadd.f32 1.0, %v12480_v52 }
 0xbd4   : > { %v12484_v60 = vpop.eup %12483  ;;  %9307 = vst [vmem:[%s14171_s13 + $0x278] sm:$0xff] %v12482_v62  ;;  %12503 = vrcp.f32 %v8952_v51 }
 0xbd5   : > { %v12486_v19 = vpop.eup %12485  ;;  %9312 = vst [vmem:[%s14171_s13 + $0x2a0] sm:$0xff] %v12484_v60  ;;  %12505 = vrcp.f32 %v8953_v46 }
 0xbd6   : > { %v12488_v35 = vpop.eup %12487  ;;  %9314 = vst [vmem:[%s14171_s13 + $0x2b0] sm:$0xff] %v12486_v19  ;;  %12507 = vpow2.f32 %v10401_v16 }
 0xbd7   : > { %v12490_v2 = vpop.eup %12489  ;;  %9313 = vst [vmem:[%s14171_s13 + $0x2a8] sm:$0xff] %v12488_v35  ;;  %12509 = vpow2.f32 %v10402_v31 }
 0xbd8   : > { %v12492_v33 = vpop.eup %12491  ;;  %9315 = vst [vmem:[%s14171_s13 + $0x2b8] sm:$0xff] %v12490_v2  ;;  %12511 = vpow2.f32 %v10409_v21 }
 0xbd9   : > { %v12494_v36 = vpop.eup %12493  ;;  %9320 = vst [vmem:[%s14171_s13 + $0x2e0] sm:$0xff] %v12492_v33  ;;  %12513 = vpow2.f32 %v10410_v11 }
 0xbda   : > { %v12496_v61 = vpop.eup %12495  ;;  %9322 = vst [vmem:[%s14171_s13 + $0x2f0] sm:$0xff] %v12494_v36  ;;  %12515 = vpow2.f32 %v10387_v34 }
 0xbdb   : > { %v12498_v43 = vpop.eup %12497  ;;  %9321 = vst [vmem:[%s14171_s13 + $0x2e8] sm:$0xff] %v12496_v61  ;;  %12517 = vpow2.f32 %v10388_v18 }
 0xbdc   : > { %v12500_v9 = vpop.eup %12499  ;;  %9323 = vst [vmem:[%s14171_s13 + $0x2f8] sm:$0xff] %v12498_v43  ;;  %12519 = vpow2.f32 %v10395_v48 }
 0xbdd   : > { %v12502_v14 = vpop.eup %12501  ;;  %9328 = vst [vmem:[%s14171_s13 + $0x320] sm:$0xff] %v12500_v9  ;;  %12521 = vpow2.f32 %v10396_v41 }
 0xbde   : > { %v12504_v44 = vpop.eup %12503  ;;  %9329 = vst [vmem:[%s14171_s13 + $0x328] sm:$0xff] %v12502_v14  ;;  %12523 = vpow2.f32 %v10403_v53 }
 0xbdf   : > { %v12506_v38 = vpop.eup %12505  ;;  %9336 = vst [vmem:[%s14171_s13 + $0x360] sm:$0xff] %v12504_v44  ;;  %12525 = vpow2.f32 %v10404_v54 }
 0xbe0   : > { %v12508_v20 = vpop.eup %12507  ;;  %9337 = vst [vmem:[%s14171_s13 + $0x368] sm:$0xff] %v12506_v38  ;;  %12527 = vpow2.f32 %v10411_v37 }
 0xbe1   : > { %v12510_v24 = vpop.eup %12509  ;;  %v8960_v15 = vadd.f32 1.0, %v12508_v20  ;;  %12529 = vpow2.f32 %v10412_v63 }
 0xbe2   : > { %v12512_v45 = vpop.eup %12511  ;;  %v8961_v30 = vadd.f32 1.0, %v12510_v24 }
 0xbe3   : > { %v12514_v28 = vpop.eup %12513  ;;  %12531 = vrcp.f32 %v8960_v15  ;;  %v8968_v55 = vadd.f32 1.0, %v12512_v45 }
 0xbe4   : > { %v12516_v29 = vpop.eup %12515  ;;  %12533 = vrcp.f32 %v8961_v30  ;;  %v8969_v42 = vadd.f32 1.0, %v12514_v28 }
 0xbe5   : > { %v12518_v50 = vpop.eup %12517  ;;  %12535 = vrcp.f32 %v8968_v55  ;;  %v8946_v26 = vadd.f32 1.0, %v12516_v29 }
 0xbe6   : > { %v12520_v5 = vpop.eup %12519  ;;  %12537 = vrcp.f32 %v8969_v42  ;;  %v8947_v40 = vadd.f32 1.0, %v12518_v50 }
 0xbe7   : > { %v12522_v58 = vpop.eup %12521  ;;  %12539 = vrcp.f32 %v8946_v26  ;;  %v8954_v39 = vadd.f32 1.0, %v12520_v5 }
 0xbe8   : > { %v12524_v59 = vpop.eup %12523  ;;  %12541 = vrcp.f32 %v8947_v40  ;;  %v8955_v49 = vadd.f32 1.0, %v12522_v58 }
 0xbe9   : > { %v12526_v7 = vpop.eup %12525  ;;  %12543 = vrcp.f32 %v8954_v39  ;;  %v8962_v1 = vadd.f32 1.0, %v12524_v59 }
 0xbea   : > { %v12528_v13 = vpop.eup %12527  ;;  %12545 = vrcp.f32 %v8955_v49  ;;  %v8963_v25 = vadd.f32 1.0, %v12526_v7 }
 0xbeb   : > { %v12530_v23 = vpop.eup %12529  ;;  %12547 = vrcp.f32 %v8962_v1  ;;  %v8970_v17 = vadd.f32 1.0, %v12528_v13 }
 0xbec   : > { %12549 = vrcp.f32 %v8963_v25  ;;  %v8971_v0 = vadd.f32 1.0, %v12530_v23 }
 0xbed   : > { %v12532_v27 = vpop.eup %12531  ;;  %12551 = vrcp.f32 %v8970_v17 }
 0xbee   : > { %v12534_v8 = vpop.eup %12533  ;;  %9344 = vst [vmem:[%s14171_s13 + $0x3a0] sm:$0xff] %v12532_v27  ;;  %12553 = vrcp.f32 %v8971_v0 }
 0xbef   : > { %v12536_v10 = vpop.eup %12535  ;;  %9345 = vst [vmem:[%s14171_s13 + $0x3a8] sm:$0xff] %v12534_v8 }
 0xbf0   : > { %v12538_v56 = vpop.eup %12537  ;;  %9352 = vst [vmem:[%s14171_s13 + $0x3e0] sm:$0xff] %v12536_v10 }
 0xbf1   : > { %v12540_v12 = vpop.eup %12539  ;;  %9353 = vst [vmem:[%s14171_s13 + $0x3e8] sm:$0xff] %v12538_v56 }
 0xbf2   : > { %v12542_v4 = vpop.eup %12541  ;;  %9330 = vst [vmem:[%s14171_s13 + $0x330] sm:$0xff] %v12540_v12 }
 0xbf3   : > { %v12544_v3 = vpop.eup %12543  ;;  %9331 = vst [vmem:[%s14171_s13 + $0x338] sm:$0xff] %v12542_v4 }
 0xbf4   : > { %v12546_v32 = vpop.eup %12545  ;;  %9338 = vst [vmem:[%s14171_s13 + $0x370] sm:$0xff] %v12544_v3 }
 0xbf5   : > { %v12548_v22 = vpop.eup %12547  ;;  %9339 = vst [vmem:[%s14171_s13 + $0x378] sm:$0xff] %v12546_v32 }
 0xbf6   : > { %v12550_v6 = vpop.eup %12549  ;;  %9346 = vst [vmem:[%s14171_s13 + $0x3b0] sm:$0xff] %v12548_v22 }
 0xbf7   : > { %v12552_v57 = vpop.eup %12551  ;;  %9347 = vst [vmem:[%s14171_s13 + $0x3b8] sm:$0xff] %v12550_v6 }
 0xbf8   : > { %v12554_v47 = vpop.eup %12553  ;;  %9354 = vst [vmem:[%s14171_s13 + $0x3f0] sm:$0xff] %v12552_v57 }
 0xbf9   : > { %9355 = vst [vmem:[%s14171_s13 + $0x3f8] sm:$0xff] %v12554_v47 }
 0xbfa   : > { %12739 = shalt.err (!%p12736_p8)
}
 0xbfb   : > { %s12740_s11 = scalar_lea.hbm %s14674_s15, 16384  ;;  %s12744_s28 = scalar_lea.hbm %s14729_s6, 32768 }
 0xbfc   : > { %p12741_p6 = scmp.ne.s32.totalorder %s14674_s15, %s12740_s11  ;;  %p12745_p3 = scmp.lt.u32.totalorder %s14674_s15, %s14729_s6 }
 0xbfd   : > { %p12746_p0 = scmp.lt.u32.totalorder %s12744_s28, %s12740_s11  ;;  %p12748_p2 = scmp.lt.u32.totalorder %s12740_s11, %s14674_s15 }
 0xbfe   : > { %p12742_p9 = pnand %p12741_p6, %p14764_p7 }
 0xbff   : > { %p12747_p5 = por %p12746_p0, %p12745_p3 }
 0xc00   : > { %p12743_p4 = pneg %p12742_p9 }
 0xc01   : > { %p12749_p10 = por %p12748_p2, %p12747_p5 }
 0xc03   : > { %p12750_p1 = pnand %p12749_p10, %p12743_p4 }
 0xc05   : > { %12753 = shalt.err (!%p12750_p1)
}
 0xc06   : > { %s12822_s12 = smov 1024   ;;  %s12823_s30 = smov 64  }
 0xc07   : > { %11309 = dma.vmem_to_hbm [thread:$0]  (%p14764_p7), %s14676_s20, 16384, %s14674_s15, %s9357_s27, %s12822_s12, %s12822_s12, %s12823_s30  }
 0xc08 PF: > { %s9386_s16 = sand.u32 1, %s12792_s21   ;;  %p14765_p11 = scmp.ne.s32.totalorder %s14745_s29, 0 }
 0xc09   : > { %p14766_p12 = scmp.ge.s32.totalorder %s12804_s24, 2  ;;  %s9387_s8 = scalar_lea.sflag [#allocation4], %s9386_s16 }
 0xc0b   : > { %p11332_p13 = pnand %p14766_p12, %p14765_p11 }
 0xc0d   : > { %12787 = dma.done.wait (!%p11332_p13), %s9387_s8, 16384  }
 0xc0e   : > { %12789 = vsyncadd (!%p11332_p13), %s9387_s8, 4294950912  ;;  %p22_p8 = scmp.ge.s32.totalorder %s13016_s7, 4   ;;  %s14767_s21 = smov %s12796_s22 }
 0xc0f   : > { %s14768_s22 = smov %s12800_s23  ;;  %s14769_s23 = smov %s13028_s18 }
 0xc10   : > { %s14770_s24 = smov %s13016_s7  ;;  %24 = sbr.rel (!%p22_p8) target bundleno = 8 (0x8), region = 109 }
 0xc17   :  { %9392 = vsyncpa [#allocation3], 1 }
 0xc18   :  { %9394 = vsyncpa [#allocation3 + $0x1], 1 }
 0xc19   :  { %9395 = vsyncpa [#allocation6], 1 }
 0xc1a   :  { %9396 = vsyncpa [#allocation9], 1 }
 0xc1b   :  { %9397 = vsyncpa [#allocation12], 1 }
 0xc1c   :  { %9398 = vsyncpa [#allocation4], 1 }
 0xc1d   :  { %9400 = vsyncpa [#allocation4 + $0x1], 1 }

</bundles_post_ra>
